<compile_context>
chip_gen: v5e
topology: v5e:2x2
jax: 0.10.0
libtpu: 0.0.40
codegen_flags: <defaults>
</compile_context>

<pallas_src>
import numpy as np

import jax
import jax.numpy as jnp
from jax.experimental import pallas as pl
from jax.experimental.pallas import tpu as pltpu


LATENT_DIM = 32
CHANNELS = 1
BN_EPS = 1e-5

_S2_ROWS = 88    # flat (9x9 padded 7x7 grid = 81 rows) + tail, layer-2 input
_S3_ROWS = 264   # flat (16x16 padded 14x14 grid = 256 rows) + tail, layer-3/4


# =============================================================================
# Stage 1 kernel: layer 1 (dense) + layer 2 (sub-pixel ConvT), one image/step.
# =============================================================================
def _stage1_kernel(z_ref, w1_ref, sh1_ref, w2_ref, sh2_ref, y2_ref, flat_buf):
    # ---- Layer 1: ConvTranspose2d(k=7,s=1,p=0) on a 1x1 latent == matmul ----
    zrow = z_ref[0].astype(jnp.bfloat16)                               # (1, 32)
    x1 = jnp.dot(zrow, w1_ref[...], preferred_element_type=jnp.float32)
    x1 = jnp.maximum(x1 + sh1_ref[...], 0.0).astype(jnp.bfloat16)      # (1, 6272)

    # Scatter the 7x7x128 map into the zero-bordered flat-row scratch
    # (row = (1+y)*9 + (1+x), lanes = 128 channels).
    flat_buf[...] = jnp.zeros((_S2_ROWS, 128), jnp.bfloat16)
    for iy in range(7):
        for ix in range(7):
            p = iy * 7 + ix
            row = (iy + 1) * 9 + (ix + 1)
            flat_buf[row:row + 1, :] = x1[:, p * 128:(p + 1) * 128]

    # ---- Layer 2: ConvT(k=5,s=2,p=2,op=1) via 9 row-shifted matmuls ----
    # Output row r = qy*9+qx (valid for qy,qx<7); channels = 4 phases x 64.
    acc = jnp.zeros((64, 256), jnp.float32)
    for dy in range(3):
        for dx in range(3):
            sh = dy * 9 + dx
            acc = acc + jnp.dot(flat_buf[sh:sh + 64, :],
                                w2_ref[dy * 3 + dx],
                                preferred_element_type=jnp.float32)
    y2 = jnp.maximum(acc + sh2_ref[...], 0.0)
    y2_ref[0] = y2.astype(jnp.bfloat16)


def _stage1_call(z2, prep):
    B = z2.shape[0]
    z3 = z2.reshape(B, 1, LATENT_DIM)
    return pl.pallas_call(
        _stage1_kernel,
        out_shape=jax.ShapeDtypeStruct((B, 64, 256), jnp.bfloat16),
        grid_spec=pltpu.PrefetchScalarGridSpec(
            num_scalar_prefetch=0,
            grid=(B,),
            in_specs=[
                pl.BlockSpec((1, 1, LATENT_DIM), lambda b: (b, 0, 0)),
                pl.BlockSpec((LATENT_DIM, 6272), lambda b: (0, 0)),
                pl.BlockSpec((1, 6272), lambda b: (0, 0)),
                pl.BlockSpec((9, 128, 256), lambda b: (0, 0, 0)),
                pl.BlockSpec((1, 256), lambda b: (0, 0)),
            ],
            out_specs=pl.BlockSpec((1, 64, 256), lambda b: (b, 0, 0)),
            scratch_shapes=[pltpu.VMEM((_S2_ROWS, 128), jnp.bfloat16)],
        ),
        compiler_params=pltpu.CompilerParams(
            dimension_semantics=("parallel",)),
    )(z3, prep["w1"], prep["sh1"], prep["w2"], prep["sh2"])


# =============================================================================
# Stage 2 kernel: layer 3 (sub-pixel ConvT) + layer 4 (k=5,s=1 ConvT + tanh)
# with the 14x14 -> 28x28 depth-to-space composed into the layer-4 weights.
# =============================================================================
def _stage2_kernel(x3_ref, w3_ref, sh3_ref, w4_ref, b4_ref, o_ref, flat_buf):
    # ---- Layer 3: 9 row-shifted matmuls over the padded flat 16x16 grid ----
    acc3 = jnp.zeros((224, 128), jnp.float32)
    for dy in range(3):
        for dx in range(3):
            sh = dy * 16 + dx
            acc3 = acc3 + jnp.dot(x3_ref[0, sh:sh + 224, :],
                                  w3_ref[dy * 3 + dx],
                                  preferred_element_type=jnp.float32)
    y3 = jnp.maximum(acc3 + sh3_ref[...], 0.0)                     # (224, 128)

    # Zero the 2 junk x-columns of the 16-wide flat grid (x = 14, 15); they act
    # as the zero padding layer 4 needs at the image border.
    col = jax.lax.broadcasted_iota(jnp.int32, (224, 1), 0) % 16
    y3 = jnp.where(col < 14, y3, 0.0)

    # Park y3 with a 17-row zero border so layer-4 taps can read shifts 0..34.
    flat_buf[...] = jnp.zeros((_S3_ROWS, 128), jnp.bfloat16)
    flat_buf[17:241, :] = y3.astype(jnp.bfloat16)

    # ---- Layer 4: ConvT(k=5,s=1,p=2,Cout=1)+bias+tanh composed with the 2x
    # depth-to-space: 9 taps, K = 4 phases x 32 ch, N = 4 output parity classes.
    acc4 = jnp.zeros((224, 4), jnp.float32)
    for dy in range(3):
        for dx in range(3):
            sh = dy * 16 + dx
            acc4 = acc4 + jnp.dot(flat_buf[sh:sh + 224, :],
                                  w4_ref[dy * 3 + dx],
                                  preferred_element_type=jnp.float32)
    o_ref[0] = jnp.tanh(acc4 + b4_ref[...])


def _stage2_call(x3, prep):
    B = x3.shape[0]
    return pl.pallas_call(
        _stage2_kernel,
        out_shape=jax.ShapeDtypeStruct((B, 224, 4), jnp.float32),
        grid_spec=pltpu.PrefetchScalarGridSpec(
            num_scalar_prefetch=0,
            grid=(B,),
            in_specs=[
                pl.BlockSpec((1, _S3_ROWS, 64), lambda b: (b, 0, 0)),
                pl.BlockSpec((9, 64, 128), lambda b: (0, 0, 0)),
                pl.BlockSpec((1, 128), lambda b: (0, 0)),
                pl.BlockSpec((9, 128, 4), lambda b: (0, 0, 0)),
                pl.BlockSpec((1, 4), lambda b: (0, 0)),
            ],
            out_specs=pl.BlockSpec((1, 224, 4), lambda b: (b, 0, 0)),
            scratch_shapes=[pltpu.VMEM((_S3_ROWS, 128), jnp.bfloat16)],
        ),
        compiler_params=pltpu.CompilerParams(
            dimension_semantics=("parallel",)),
    )(x3, prep["w3"], prep["sh3"], prep["w4"], prep["b4"])


# =============================================================================
# Tiny XLA glue (tens of KB per image): depth-to-space between stages + output.
# =============================================================================
def _l2_to_l3_glue(y2):
    """(B,64,256) phase output of layer 2 -> padded flat (B,264,64) layer-3 input."""
    B = y2.shape[0]
    v = y2[:, :63, :].reshape(B, 7, 9, 2, 2, 64)[:, :, :7]       # (b,qy,qx,py,px,c)
    v = jnp.transpose(v, (0, 1, 3, 2, 4, 5)).reshape(B, 14, 14, 64)
    v = jnp.pad(v, ((0, 0), (1, 1), (1, 1), (0, 0)))             # (B,16,16,64)
    v = v.reshape(B, 256, 64)
    return jnp.pad(v, ((0, 0), (0, _S3_ROWS - 256), (0, 0)))     # (B,264,64)


def _assemble_image(o4):
    """(B,224,4) parity-class output of layer 4 -> (B,1,28,28) image."""
    B = o4.shape[0]
    v = o4.reshape(B, 14, 16, 2, 2)[:, :, :14]                   # (b,Y,X,ry,rx)
    v = jnp.transpose(v, (0, 1, 3, 2, 4)).reshape(B, 28, 28)
    return v[:, None, :, :]


def generator_forward(z_nchw, prep):
    """z_nchw: [B, LATENT_DIM, 1, 1] -> images [B, CHANNELS, 28, 28] (NCHW)."""
    B = z_nchw.shape[0]
    z2 = z_nchw.reshape(B, LATENT_DIM)
    y2 = _stage1_call(z2, prep)          # layers 1+2   (B, 64, 256)  bf16
    x3 = _l2_to_l3_glue(y2)              # ~33 KB/img   (B, 264, 64)  bf16
    o4 = _stage2_call(x3, prep)          # layers 3+4   (B, 224, 4)   f32
    return _assemble_image(o4)


# =============================================================================
# Parameters (PyTorch layout) + one-time prep (BN folding, weight re-layout).
# =============================================================================
def init_params(key):
    ks = jax.random.split(key, 16)
    p = {}
    p["w1"] = 0.05 * jax.random.normal(ks[0], (LATENT_DIM, 128, 7, 7), jnp.float32)
    p["w2"] = 0.05 * jax.random.normal(ks[1], (128, 64, 5, 5), jnp.float32)
    p["w3"] = 0.05 * jax.random.normal(ks[2], (64, 32, 5, 5), jnp.float32)
    p["w4"] = 0.05 * jax.random.normal(ks[3], (32, CHANNELS, 5, 5), jnp.float32)
    p["b4"] = 0.01 * jax.random.normal(ks[4], (CHANNELS,), jnp.float32)
    for i, (kk, c) in enumerate(zip(ks[5:8], (128, 64, 32)), start=1):
        k_g, k_b, k_m, k_v = jax.random.split(kk, 4)
        p[f"bn{i}_gamma"] = 1.0 + 0.1 * jax.random.normal(k_g, (c,), jnp.float32)
        p[f"bn{i}_beta"] = 0.1 * jax.random.normal(k_b, (c,), jnp.float32)
        p[f"bn{i}_mean"] = 0.1 * jax.random.normal(k_m, (c,), jnp.float32)
        p[f"bn{i}_var"] = 1.0 + 0.5 * jax.random.uniform(k_v, (c,), jnp.float32)
    return p


def _bn_fold_np(gamma, beta, mean, var):
    scale = gamma / np.sqrt(var + BN_EPS)
    return scale, beta - mean * scale


def _phase_weight_np(w, scale):
    """ConvT(k=5,s=2,p=2,op=1) weight (Cin,Cout,5,5) -> sub-pixel taps
    (9, Cin, 4*Cout) with the BN scale folded in.  Phase order = (py, px, co)."""
    cin, cout = w.shape[0], w.shape[1]
    ws = w * scale[None, :, None, None]
    out = np.zeros((3, 3, cin, 2, 2, cout), np.float32)
    for dy in range(3):
        for dx in range(3):
            for py in range(2):
                ky = 4 + py - 2 * dy
                if not 0 <= ky <= 4:
                    continue
                for px in range(2):
                    kx = 4 + px - 2 * dx
                    if not 0 <= kx <= 4:
                        continue
                    out[dy, dx, :, py, px, :] = ws[:, :, ky, kx]
    return out.reshape(9, cin, 4 * cout)


def _final_weight_np(w4):
    """ConvT(k=5,s=1,p=2,Cout=1) composed with the preceding 2x depth-to-space.
    Returns (9 taps, 4 phases * 32 ch, 4 output parity classes)."""
    w4f = np.transpose(np.asarray(w4)[:, 0, ::-1, ::-1], (1, 2, 0))  # (ay, ax, ci)
    out = np.zeros((3, 3, 4, 32, 4), np.float32)
    for ry in range(2):
        for rx in range(2):
            for ay in range(5):
                for ax in range(5):
                    ey, ex = ry + ay - 2, rx + ax - 2
                    out[ey // 2 + 1, ex // 2 + 1,
                        (ey % 2) * 2 + (ex % 2), :, ry * 2 + rx] += w4f[ay, ax]
    return out.reshape(9, 128, 4)


def prepare_generator_params(p):
    """One-time (per parameter set) weight prep; keep OUT of the jitted forward."""
    g = lambda a: np.asarray(jax.device_get(a), np.float32)
    s1, b1 = _bn_fold_np(g(p["bn1_gamma"]), g(p["bn1_beta"]),
                         g(p["bn1_mean"]), g(p["bn1_var"]))
    s2, b2 = _bn_fold_np(g(p["bn2_gamma"]), g(p["bn2_beta"]),
                         g(p["bn2_mean"]), g(p["bn2_var"]))
    s3, b3 = _bn_fold_np(g(p["bn3_gamma"]), g(p["bn3_beta"]),
                         g(p["bn3_mean"]), g(p["bn3_var"]))
    w1 = g(p["w1"]) * s1[None, :, None, None]
    w1mat = np.transpose(w1, (0, 2, 3, 1)).reshape(LATENT_DIM, 49 * 128)
    return {
        "w1": jnp.asarray(w1mat, jnp.bfloat16),                           # (32, 6272)
        "sh1": jnp.asarray(np.tile(b1, 49)[None, :], jnp.float32),        # (1, 6272)
        "w2": jnp.asarray(_phase_weight_np(g(p["w2"]), s2), jnp.bfloat16),  # (9,128,256)
        "sh2": jnp.asarray(np.tile(b2, 4)[None, :], jnp.float32),         # (1, 256)
        "w3": jnp.asarray(_phase_weight_np(g(p["w3"]), s3), jnp.bfloat16),  # (9,64,128)
        "sh3": jnp.asarray(np.tile(b3, 4)[None, :], jnp.float32),         # (1, 128)
        "w4": jnp.asarray(_final_weight_np(g(p["w4"])), jnp.bfloat16),    # (9,128,4)
        "b4": jnp.asarray(np.full((1, 4), g(p["b4"])[0], np.float32)),    # (1, 4)
    }


# =============================================================================
# Pure-jnp reference (zero-insertion + im2col) with matching bf16 rounding.
# =============================================================================
def _bn_fold(gamma, beta, mean, var):
    scale = gamma * jax.lax.rsqrt(var + BN_EPS)
    shift = beta - mean * scale
    return scale, shift


def _reference_forward(z_nchw, p):
    def convT(x, w, scale, shift, k, stride, pad, out_pad, act):
        B, H, W, Cin = x.shape
        Cout = w.shape[1]
        if stride > 1:
            xu = jnp.zeros((B, (H - 1) * stride + 1, (W - 1) * stride + 1, Cin), x.dtype)
            xu = xu.at[:, ::stride, ::stride, :].set(x)
        else:
            xu = x
        pp = k - 1 - pad
        xp = jnp.pad(xu, ((0, 0), (pp, pp + out_pad), (pp, pp + out_pad), (0, 0)))
        Ho, Wo = xp.shape[1] - k + 1, xp.shape[2] - k + 1
        cols = [xp[:, i:i + Ho, j:j + Wo, :] for i in range(k) for j in range(k)]
        patches = jnp.concatenate(cols, axis=-1).reshape(B * Ho * Wo, k * k * Cin)
        wc = jnp.transpose(w[:, :, ::-1, ::-1], (2, 3, 0, 1)).reshape(k * k * Cin, Cout)
        wc = wc * scale[None, :]
        y = jnp.dot(patches.astype(jnp.bfloat16).astype(jnp.float32),
                    wc.astype(jnp.bfloat16).astype(jnp.float32),
                    precision=jax.lax.Precision.HIGHEST) + shift[None, :]
        if act == "relu":
            y = jnp.maximum(y, 0.0)
        elif act == "tanh":
            y = jnp.tanh(y)
        return y.reshape(B, Ho, Wo, Cout)

    x = jnp.transpose(z_nchw, (0, 2, 3, 1))
    s1, b1 = _bn_fold(p["bn1_gamma"], p["bn1_beta"], p["bn1_mean"], p["bn1_var"])
    x = convT(x, p["w1"], s1, b1, 7, 1, 0, 0, "relu")
    x = x.astype(jnp.bfloat16).astype(jnp.float32)
    s2, b2 = _bn_fold(p["bn2_gamma"], p["bn2_beta"], p["bn2_mean"], p["bn2_var"])
    x = convT(x, p["w2"], s2, b2, 5, 2, 2, 1, "relu")
    x = x.astype(jnp.bfloat16).astype(jnp.float32)
    s3, b3 = _bn_fold(p["bn3_gamma"], p["bn3_beta"], p["bn3_mean"], p["bn3_var"])
    x = convT(x, p["w3"], s3, b3, 5, 2, 2, 1, "relu")
    x = x.astype(jnp.bfloat16).astype(jnp.float32)
    x = convT(x, p["w4"], jnp.ones((CHANNELS,), jnp.float32), p["b4"], 5, 1, 2, 0, "tanh")
    return jnp.transpose(x, (0, 3, 1, 2))


if __name__ == "__main__":
    key = jax.random.PRNGKey(0)
    k_param, k_z = jax.random.split(key)
    params = init_params(k_param)
    prep = prepare_generator_params(params)   # hoisted: runs once, not per forward

    batch = 2
    z = jax.random.normal(k_z, (batch, LATENT_DIM, 1, 1), jnp.float32)

    fwd = jax.jit(generator_forward)
    img = jax.block_until_ready(fwd(z, prep))

    assert img.shape == (batch, CHANNELS, 28, 28), img.shape
    assert img.dtype == jnp.float32
    assert bool(jnp.all(jnp.isfinite(img)))
    assert bool(jnp.all(jnp.abs(img) <= 1.0 + 1e-6))  # tanh range

    ref = jax.block_until_ready(jax.jit(_reference_forward)(z, params))
    err = float(jnp.max(jnp.abs(img - ref)))
    assert err < 2e-2, f"mismatch vs reference: {err}"

    print("KERNEL_OK")
</pallas_src>

<mosaic_0001>
module attributes {stable_mosaic.version = 11 : i64} {
  func.func @_stage1_kernel(%arg0: i32, %arg1: memref<1x1x32xf32, #tpu.memory_space<vmem>>, %arg2: memref<32x6272xbf16, #tpu.memory_space<vmem>>, %arg3: memref<1x6272xf32, #tpu.memory_space<vmem>>, %arg4: memref<9x128x256xbf16, #tpu.memory_space<vmem>>, %arg5: memref<1x256xf32, #tpu.memory_space<vmem>>, %arg6: memref<1x64x256xbf16, #tpu.memory_space<vmem>>, %arg7: memref<88x128xbf16, #tpu.memory_space<vmem>>) attributes {dimension_semantics = [#tpu.dimension_semantics<parallel>], iteration_bounds = array<i64: 2>, scalar_prefetch = 0 : i64, scratch_operands = 1 : i64, tpu.core_type = #tpu.core_type<tc>, window_params = [{transform_indices = @transform_0, window_bounds = array<i64: 1, 1, 32>}, {pipeline_mode = #tpu.pipeline_mode<synchronous>, transform_indices = @transform_1, window_bounds = array<i64: 32, 6272>}, {pipeline_mode = #tpu.pipeline_mode<synchronous>, transform_indices = @transform_2, window_bounds = array<i64: 1, 6272>}, {pipeline_mode = #tpu.pipeline_mode<synchronous>, transform_indices = @transform_3, window_bounds = array<i64: 9, 128, 256>}, {pipeline_mode = #tpu.pipeline_mode<synchronous>, transform_indices = @transform_4, window_bounds = array<i64: 1, 256>}, {transform_indices = @transform_5, window_bounds = array<i64: 1, 64, 256>}]} {
    %c0 = arith.constant 0 : index
    %c0_0 = arith.constant 0 : index
    %c0_1 = arith.constant 0 : index
    %0 = vector.load %arg1[%c0, %c0_0, %c0_1] : memref<1x1x32xf32, #tpu.memory_space<vmem>>, vector<1x1x32xf32>
    %1 = vector.shape_cast %0 : vector<1x1x32xf32> to vector<1x32xf32>
    %2 = arith.truncf %1 : vector<1x32xf32> to vector<1x32xbf16>
    %c0_2 = arith.constant 0 : index
    %c0_3 = arith.constant 0 : index
    %3 = vector.load %arg2[%c0_2, %c0_3] : memref<32x6272xbf16, #tpu.memory_space<vmem>>, vector<32x6272xbf16>
    %cst = arith.constant dense<0.000000e+00> : vector<1x6272xf32>
    %4 = tpu.matmul %2, %3, %cst {dimension_numbers = #tpu.dot_dimension_numbers<[1], [0], [0], [1], [0, 0, 1, 1], [], []>} : vector<1x32xbf16>, vector<32x6272xbf16>, vector<1x6272xf32> -> vector<1x6272xf32>
    %c0_4 = arith.constant 0 : index
    %c0_5 = arith.constant 0 : index
    %5 = vector.load %arg3[%c0_4, %c0_5] : memref<1x6272xf32, #tpu.memory_space<vmem>>, vector<1x6272xf32>
    %6 = arith.addf %4, %5 : vector<1x6272xf32>
    %cst_6 = arith.constant 0.000000e+00 : f32
    %7 = vector.broadcast %cst_6 : f32 to vector<1x6272xf32>
    %8 = arith.maximumf %6, %7 : vector<1x6272xf32>
    %9 = arith.truncf %8 : vector<1x6272xf32> to vector<1x6272xbf16>
    %cst_7 = arith.constant 0.000000e+00 : bf16
    %10 = vector.broadcast %cst_7 : bf16 to vector<88x128xbf16>
    %c0_8 = arith.constant 0 : index
    %c0_9 = arith.constant 0 : index
    %11 = vector.load %arg7[%c0_8, %c0_9] : memref<88x128xbf16, #tpu.memory_space<vmem>>, vector<88x128xbf16>
    tpu.vector_store %arg7[%c0_8, %c0_9], %10 {strides = array<i32>} : memref<88x128xbf16, #tpu.memory_space<vmem>>, vector<88x128xbf16>,
    %12 = vector.extract_strided_slice %9 {offsets = [0, 0], sizes = [1, 128], strides = [1, 1]} : vector<1x6272xbf16> to vector<1x128xbf16>
    %c10 = arith.constant 10 : index
    %c0_10 = arith.constant 0 : index
    %13 = vector.load %arg7[%c10, %c0_10] : memref<88x128xbf16, #tpu.memory_space<vmem>>, vector<1x128xbf16>
    tpu.vector_store %arg7[%c10, %c0_10], %12 {strides = array<i32>} : memref<88x128xbf16, #tpu.memory_space<vmem>>, vector<1x128xbf16>,
    %14 = vector.extract_strided_slice %9 {offsets = [0, 128], sizes = [1, 128], strides = [1, 1]} : vector<1x6272xbf16> to vector<1x128xbf16>
    %c11 = arith.constant 11 : index
    %c0_11 = arith.constant 0 : index
    %15 = vector.load %arg7[%c11, %c0_11] : memref<88x128xbf16, #tpu.memory_space<vmem>>, vector<1x128xbf16>
    tpu.vector_store %arg7[%c11, %c0_11], %14 {strides = array<i32>} : memref<88x128xbf16, #tpu.memory_space<vmem>>, vector<1x128xbf16>,
    %16 = vector.extract_strided_slice %9 {offsets = [0, 256], sizes = [1, 128], strides = [1, 1]} : vector<1x6272xbf16> to vector<1x128xbf16>
    %c12 = arith.constant 12 : index
    %c0_12 = arith.constant 0 : index
    %17 = vector.load %arg7[%c12, %c0_12] : memref<88x128xbf16, #tpu.memory_space<vmem>>, vector<1x128xbf16>
    tpu.vector_store %arg7[%c12, %c0_12], %16 {strides = array<i32>} : memref<88x128xbf16, #tpu.memory_space<vmem>>, vector<1x128xbf16>,
    %18 = vector.extract_strided_slice %9 {offsets = [0, 384], sizes = [1, 128], strides = [1, 1]} : vector<1x6272xbf16> to vector<1x128xbf16>
    %c13 = arith.constant 13 : index
    %c0_13 = arith.constant 0 : index
    %19 = vector.load %arg7[%c13, %c0_13] : memref<88x128xbf16, #tpu.memory_space<vmem>>, vector<1x128xbf16>
    tpu.vector_store %arg7[%c13, %c0_13], %18 {strides = array<i32>} : memref<88x128xbf16, #tpu.memory_space<vmem>>, vector<1x128xbf16>,
    %20 = vector.extract_strided_slice %9 {offsets = [0, 512], sizes = [1, 128], strides = [1, 1]} : vector<1x6272xbf16> to vector<1x128xbf16>
    %c14 = arith.constant 14 : index
    %c0_14 = arith.constant 0 : index
    %21 = vector.load %arg7[%c14, %c0_14] : memref<88x128xbf16, #tpu.memory_space<vmem>>, vector<1x128xbf16>
    tpu.vector_store %arg7[%c14, %c0_14], %20 {strides = array<i32>} : memref<88x128xbf16, #tpu.memory_space<vmem>>, vector<1x128xbf16>,
    %22 = vector.extract_strided_slice %9 {offsets = [0, 640], sizes = [1, 128], strides = [1, 1]} : vector<1x6272xbf16> to vector<1x128xbf16>
    %c15 = arith.constant 15 : index
    %c0_15 = arith.constant 0 : index
    %23 = vector.load %arg7[%c15, %c0_15] : memref<88x128xbf16, #tpu.memory_space<vmem>>, vector<1x128xbf16>
    tpu.vector_store %arg7[%c15, %c0_15], %22 {strides = array<i32>} : memref<88x128xbf16, #tpu.memory_space<vmem>>, vector<1x128xbf16>,
    %24 = vector.extract_strided_slice %9 {offsets = [0, 768], sizes = [1, 128], strides = [1, 1]} : vector<1x6272xbf16> to vector<1x128xbf16>
    %c16 = arith.constant 16 : index
    %c0_16 = arith.constant 0 : index
    %25 = vector.load %arg7[%c16, %c0_16] : memref<88x128xbf16, #tpu.memory_space<vmem>>, vector<1x128xbf16>
    tpu.vector_store %arg7[%c16, %c0_16], %24 {strides = array<i32>} : memref<88x128xbf16, #tpu.memory_space<vmem>>, vector<1x128xbf16>,
    %26 = vector.extract_strided_slice %9 {offsets = [0, 896], sizes = [1, 128], strides = [1, 1]} : vector<1x6272xbf16> to vector<1x128xbf16>
    %c19 = arith.constant 19 : index
    %c0_17 = arith.constant 0 : index
    %27 = vector.load %arg7[%c19, %c0_17] : memref<88x128xbf16, #tpu.memory_space<vmem>>, vector<1x128xbf16>
    tpu.vector_store %arg7[%c19, %c0_17], %26 {strides = array<i32>} : memref<88x128xbf16, #tpu.memory_space<vmem>>, vector<1x128xbf16>,
    %28 = vector.extract_strided_slice %9 {offsets = [0, 1024], sizes = [1, 128], strides = [1, 1]} : vector<1x6272xbf16> to vector<1x128xbf16>
    %c20 = arith.constant 20 : index
    %c0_18 = arith.constant 0 : index
    %29 = vector.load %arg7[%c20, %c0_18] : memref<88x128xbf16, #tpu.memory_space<vmem>>, vector<1x128xbf16>
    tpu.vector_store %arg7[%c20, %c0_18], %28 {strides = array<i32>} : memref<88x128xbf16, #tpu.memory_space<vmem>>, vector<1x128xbf16>,
    %30 = vector.extract_strided_slice %9 {offsets = [0, 1152], sizes = [1, 128], strides = [1, 1]} : vector<1x6272xbf16> to vector<1x128xbf16>
    %c21 = arith.constant 21 : index
    %c0_19 = arith.constant 0 : index
    %31 = vector.load %arg7[%c21, %c0_19] : memref<88x128xbf16, #tpu.memory_space<vmem>>, vector<1x128xbf16>
    tpu.vector_store %arg7[%c21, %c0_19], %30 {strides = array<i32>} : memref<88x128xbf16, #tpu.memory_space<vmem>>, vector<1x128xbf16>,
    %32 = vector.extract_strided_slice %9 {offsets = [0, 1280], sizes = [1, 128], strides = [1, 1]} : vector<1x6272xbf16> to vector<1x128xbf16>
    %c22 = arith.constant 22 : index
    %c0_20 = arith.constant 0 : index
    %33 = vector.load %arg7[%c22, %c0_20] : memref<88x128xbf16, #tpu.memory_space<vmem>>, vector<1x128xbf16>
    tpu.vector_store %arg7[%c22, %c0_20], %32 {strides = array<i32>} : memref<88x128xbf16, #tpu.memory_space<vmem>>, vector<1x128xbf16>,
    %34 = vector.extract_strided_slice %9 {offsets = [0, 1408], sizes = [1, 128], strides = [1, 1]} : vector<1x6272xbf16> to vector<1x128xbf16>
    %c23 = arith.constant 23 : index
    %c0_21 = arith.constant 0 : index
    %35 = vector.load %arg7[%c23, %c0_21] : memref<88x128xbf16, #tpu.memory_space<vmem>>, vector<1x128xbf16>
    tpu.vector_store %arg7[%c23, %c0_21], %34 {strides = array<i32>} : memref<88x128xbf16, #tpu.memory_space<vmem>>, vector<1x128xbf16>,
    %36 = vector.extract_strided_slice %9 {offsets = [0, 1536], sizes = [1, 128], strides = [1, 1]} : vector<1x6272xbf16> to vector<1x128xbf16>
    %c24 = arith.constant 24 : index
    %c0_22 = arith.constant 0 : index
    %37 = vector.load %arg7[%c24, %c0_22] : memref<88x128xbf16, #tpu.memory_space<vmem>>, vector<1x128xbf16>
    tpu.vector_store %arg7[%c24, %c0_22], %36 {strides = array<i32>} : memref<88x128xbf16, #tpu.memory_space<vmem>>, vector<1x128xbf16>,
    %38 = vector.extract_strided_slice %9 {offsets = [0, 1664], sizes = [1, 128], strides = [1, 1]} : vector<1x6272xbf16> to vector<1x128xbf16>
    %c25 = arith.constant 25 : index
    %c0_23 = arith.constant 0 : index
    %39 = vector.load %arg7[%c25, %c0_23] : memref<88x128xbf16, #tpu.memory_space<vmem>>, vector<1x128xbf16>
    tpu.vector_store %arg7[%c25, %c0_23], %38 {strides = array<i32>} : memref<88x128xbf16, #tpu.memory_space<vmem>>, vector<1x128xbf16>,
    %40 = vector.extract_strided_slice %9 {offsets = [0, 1792], sizes = [1, 128], strides = [1, 1]} : vector<1x6272xbf16> to vector<1x128xbf16>
    %c28 = arith.constant 28 : index
    %c0_24 = arith.constant 0 : index
    %41 = vector.load %arg7[%c28, %c0_24] : memref<88x128xbf16, #tpu.memory_space<vmem>>, vector<1x128xbf16>
    tpu.vector_store %arg7[%c28, %c0_24], %40 {strides = array<i32>} : memref<88x128xbf16, #tpu.memory_space<vmem>>, vector<1x128xbf16>,
    %42 = vector.extract_strided_slice %9 {offsets = [0, 1920], sizes = [1, 128], strides = [1, 1]} : vector<1x6272xbf16> to vector<1x128xbf16>
    %c29 = arith.constant 29 : index
    %c0_25 = arith.constant 0 : index
    %43 = vector.load %arg7[%c29, %c0_25] : memref<88x128xbf16, #tpu.memory_space<vmem>>, vector<1x128xbf16>
    tpu.vector_store %arg7[%c29, %c0_25], %42 {strides = array<i32>} : memref<88x128xbf16, #tpu.memory_space<vmem>>, vector<1x128xbf16>,
    %44 = vector.extract_strided_slice %9 {offsets = [0, 2048], sizes = [1, 128], strides = [1, 1]} : vector<1x6272xbf16> to vector<1x128xbf16>
    %c30 = arith.constant 30 : index
    %c0_26 = arith.constant 0 : index
    %45 = vector.load %arg7[%c30, %c0_26] : memref<88x128xbf16, #tpu.memory_space<vmem>>, vector<1x128xbf16>
    tpu.vector_store %arg7[%c30, %c0_26], %44 {strides = array<i32>} : memref<88x128xbf16, #tpu.memory_space<vmem>>, vector<1x128xbf16>,
    %46 = vector.extract_strided_slice %9 {offsets = [0, 2176], sizes = [1, 128], strides = [1, 1]} : vector<1x6272xbf16> to vector<1x128xbf16>
    %c31 = arith.constant 31 : index
    %c0_27 = arith.constant 0 : index
    %47 = vector.load %arg7[%c31, %c0_27] : memref<88x128xbf16, #tpu.memory_space<vmem>>, vector<1x128xbf16>
    tpu.vector_store %arg7[%c31, %c0_27], %46 {strides = array<i32>} : memref<88x128xbf16, #tpu.memory_space<vmem>>, vector<1x128xbf16>,
    %48 = vector.extract_strided_slice %9 {offsets = [0, 2304], sizes = [1, 128], strides = [1, 1]} : vector<1x6272xbf16> to vector<1x128xbf16>
    %c32 = arith.constant 32 : index
    %c0_28 = arith.constant 0 : index
    %49 = vector.load %arg7[%c32, %c0_28] : memref<88x128xbf16, #tpu.memory_space<vmem>>, vector<1x128xbf16>
    tpu.vector_store %arg7[%c32, %c0_28], %48 {strides = array<i32>} : memref<88x128xbf16, #tpu.memory_space<vmem>>, vector<1x128xbf16>,
    %50 = vector.extract_strided_slice %9 {offsets = [0, 2432], sizes = [1, 128], strides = [1, 1]} : vector<1x6272xbf16> to vector<1x128xbf16>
    %c33 = arith.constant 33 : index
    %c0_29 = arith.constant 0 : index
    %51 = vector.load %arg7[%c33, %c0_29] : memref<88x128xbf16, #tpu.memory_space<vmem>>, vector<1x128xbf16>
    tpu.vector_store %arg7[%c33, %c0_29], %50 {strides = array<i32>} : memref<88x128xbf16, #tpu.memory_space<vmem>>, vector<1x128xbf16>,
    %52 = vector.extract_strided_slice %9 {offsets = [0, 2560], sizes = [1, 128], strides = [1, 1]} : vector<1x6272xbf16> to vector<1x128xbf16>
    %c34 = arith.constant 34 : index
    %c0_30 = arith.constant 0 : index
    %53 = vector.load %arg7[%c34, %c0_30] : memref<88x128xbf16, #tpu.memory_space<vmem>>, vector<1x128xbf16>
    tpu.vector_store %arg7[%c34, %c0_30], %52 {strides = array<i32>} : memref<88x128xbf16, #tpu.memory_space<vmem>>, vector<1x128xbf16>,
    %54 = vector.extract_strided_slice %9 {offsets = [0, 2688], sizes = [1, 128], strides = [1, 1]} : vector<1x6272xbf16> to vector<1x128xbf16>
    %c37 = arith.constant 37 : index
    %c0_31 = arith.constant 0 : index
    %55 = vector.load %arg7[%c37, %c0_31] : memref<88x128xbf16, #tpu.memory_space<vmem>>, vector<1x128xbf16>
    tpu.vector_store %arg7[%c37, %c0_31], %54 {strides = array<i32>} : memref<88x128xbf16, #tpu.memory_space<vmem>>, vector<1x128xbf16>,
    %56 = vector.extract_strided_slice %9 {offsets = [0, 2816], sizes = [1, 128], strides = [1, 1]} : vector<1x6272xbf16> to vector<1x128xbf16>
    %c38 = arith.constant 38 : index
    %c0_32 = arith.constant 0 : index
    %57 = vector.load %arg7[%c38, %c0_32] : memref<88x128xbf16, #tpu.memory_space<vmem>>, vector<1x128xbf16>
    tpu.vector_store %arg7[%c38, %c0_32], %56 {strides = array<i32>} : memref<88x128xbf16, #tpu.memory_space<vmem>>, vector<1x128xbf16>,
    %58 = vector.extract_strided_slice %9 {offsets = [0, 2944], sizes = [1, 128], strides = [1, 1]} : vector<1x6272xbf16> to vector<1x128xbf16>
    %c39 = arith.constant 39 : index
    %c0_33 = arith.constant 0 : index
    %59 = vector.load %arg7[%c39, %c0_33] : memref<88x128xbf16, #tpu.memory_space<vmem>>, vector<1x128xbf16>
    tpu.vector_store %arg7[%c39, %c0_33], %58 {strides = array<i32>} : memref<88x128xbf16, #tpu.memory_space<vmem>>, vector<1x128xbf16>,
    %60 = vector.extract_strided_slice %9 {offsets = [0, 3072], sizes = [1, 128], strides = [1, 1]} : vector<1x6272xbf16> to vector<1x128xbf16>
    %c40 = arith.constant 40 : index
    %c0_34 = arith.constant 0 : index
    %61 = vector.load %arg7[%c40, %c0_34] : memref<88x128xbf16, #tpu.memory_space<vmem>>, vector<1x128xbf16>
    tpu.vector_store %arg7[%c40, %c0_34], %60 {strides = array<i32>} : memref<88x128xbf16, #tpu.memory_space<vmem>>, vector<1x128xbf16>,
    %62 = vector.extract_strided_slice %9 {offsets = [0, 3200], sizes = [1, 128], strides = [1, 1]} : vector<1x6272xbf16> to vector<1x128xbf16>
    %c41 = arith.constant 41 : index
    %c0_35 = arith.constant 0 : index
    %63 = vector.load %arg7[%c41, %c0_35] : memref<88x128xbf16, #tpu.memory_space<vmem>>, vector<1x128xbf16>
    tpu.vector_store %arg7[%c41, %c0_35], %62 {strides = array<i32>} : memref<88x128xbf16, #tpu.memory_space<vmem>>, vector<1x128xbf16>,
    %64 = vector.extract_strided_slice %9 {offsets = [0, 3328], sizes = [1, 128], strides = [1, 1]} : vector<1x6272xbf16> to vector<1x128xbf16>
    %c42 = arith.constant 42 : index
    %c0_36 = arith.constant 0 : index
    %65 = vector.load %arg7[%c42, %c0_36] : memref<88x128xbf16, #tpu.memory_space<vmem>>, vector<1x128xbf16>
    tpu.vector_store %arg7[%c42, %c0_36], %64 {strides = array<i32>} : memref<88x128xbf16, #tpu.memory_space<vmem>>, vector<1x128xbf16>,
    %66 = vector.extract_strided_slice %9 {offsets = [0, 3456], sizes = [1, 128], strides = [1, 1]} : vector<1x6272xbf16> to vector<1x128xbf16>
    %c43 = arith.constant 43 : index
    %c0_37 = arith.constant 0 : index
    %67 = vector.load %arg7[%c43, %c0_37] : memref<88x128xbf16, #tpu.memory_space<vmem>>, vector<1x128xbf16>
    tpu.vector_store %arg7[%c43, %c0_37], %66 {strides = array<i32>} : memref<88x128xbf16, #tpu.memory_space<vmem>>, vector<1x128xbf16>,
    %68 = vector.extract_strided_slice %9 {offsets = [0, 3584], sizes = [1, 128], strides = [1, 1]} : vector<1x6272xbf16> to vector<1x128xbf16>
    %c46 = arith.constant 46 : index
    %c0_38 = arith.constant 0 : index
    %69 = vector.load %arg7[%c46, %c0_38] : memref<88x128xbf16, #tpu.memory_space<vmem>>, vector<1x128xbf16>
    tpu.vector_store %arg7[%c46, %c0_38], %68 {strides = array<i32>} : memref<88x128xbf16, #tpu.memory_space<vmem>>, vector<1x128xbf16>,
    %70 = vector.extract_strided_slice %9 {offsets = [0, 3712], sizes = [1, 128], strides = [1, 1]} : vector<1x6272xbf16> to vector<1x128xbf16>
    %c47 = arith.constant 47 : index
    %c0_39 = arith.constant 0 : index
    %71 = vector.load %arg7[%c47, %c0_39] : memref<88x128xbf16, #tpu.memory_space<vmem>>, vector<1x128xbf16>
    tpu.vector_store %arg7[%c47, %c0_39], %70 {strides = array<i32>} : memref<88x128xbf16, #tpu.memory_space<vmem>>, vector<1x128xbf16>,
    %72 = vector.extract_strided_slice %9 {offsets = [0, 3840], sizes = [1, 128], strides = [1, 1]} : vector<1x6272xbf16> to vector<1x128xbf16>
    %c48 = arith.constant 48 : index
    %c0_40 = arith.constant 0 : index
    %73 = vector.load %arg7[%c48, %c0_40] : memref<88x128xbf16, #tpu.memory_space<vmem>>, vector<1x128xbf16>
    tpu.vector_store %arg7[%c48, %c0_40], %72 {strides = array<i32>} : memref<88x128xbf16, #tpu.memory_space<vmem>>, vector<1x128xbf16>,
    %74 = vector.extract_strided_slice %9 {offsets = [0, 3968], sizes = [1, 128], strides = [1, 1]} : vector<1x6272xbf16> to vector<1x128xbf16>
    %c49 = arith.constant 49 : index
    %c0_41 = arith.constant 0 : index
    %75 = vector.load %arg7[%c49, %c0_41] : memref<88x128xbf16, #tpu.memory_space<vmem>>, vector<1x128xbf16>
    tpu.vector_store %arg7[%c49, %c0_41], %74 {strides = array<i32>} : memref<88x128xbf16, #tpu.memory_space<vmem>>, vector<1x128xbf16>,
    %76 = vector.extract_strided_slice %9 {offsets = [0, 4096], sizes = [1, 128], strides = [1, 1]} : vector<1x6272xbf16> to vector<1x128xbf16>
    %c50 = arith.constant 50 : index
    %c0_42 = arith.constant 0 : index
    %77 = vector.load %arg7[%c50, %c0_42] : memref<88x128xbf16, #tpu.memory_space<vmem>>, vector<1x128xbf16>
    tpu.vector_store %arg7[%c50, %c0_42], %76 {strides = array<i32>} : memref<88x128xbf16, #tpu.memory_space<vmem>>, vector<1x128xbf16>,
    %78 = vector.extract_strided_slice %9 {offsets = [0, 4224], sizes = [1, 128], strides = [1, 1]} : vector<1x6272xbf16> to vector<1x128xbf16>
    %c51 = arith.constant 51 : index
    %c0_43 = arith.constant 0 : index
    %79 = vector.load %arg7[%c51, %c0_43] : memref<88x128xbf16, #tpu.memory_space<vmem>>, vector<1x128xbf16>
    tpu.vector_store %arg7[%c51, %c0_43], %78 {strides = array<i32>} : memref<88x128xbf16, #tpu.memory_space<vmem>>, vector<1x128xbf16>,
    %80 = vector.extract_strided_slice %9 {offsets = [0, 4352], sizes = [1, 128], strides = [1, 1]} : vector<1x6272xbf16> to vector<1x128xbf16>
    %c52 = arith.constant 52 : index
    %c0_44 = arith.constant 0 : index
    %81 = vector.load %arg7[%c52, %c0_44] : memref<88x128xbf16, #tpu.memory_space<vmem>>, vector<1x128xbf16>
    tpu.vector_store %arg7[%c52, %c0_44], %80 {strides = array<i32>} : memref<88x128xbf16, #tpu.memory_space<vmem>>, vector<1x128xbf16>,
    %82 = vector.extract_strided_slice %9 {offsets = [0, 4480], sizes = [1, 128], strides = [1, 1]} : vector<1x6272xbf16> to vector<1x128xbf16>
    %c55 = arith.constant 55 : index
    %c0_45 = arith.constant 0 : index
    %83 = vector.load %arg7[%c55, %c0_45] : memref<88x128xbf16, #tpu.memory_space<vmem>>, vector<1x128xbf16>
    tpu.vector_store %arg7[%c55, %c0_45], %82 {strides = array<i32>} : memref<88x128xbf16, #tpu.memory_space<vmem>>, vector<1x128xbf16>,
    %84 = vector.extract_strided_slice %9 {offsets = [0, 4608], sizes = [1, 128], strides = [1, 1]} : vector<1x6272xbf16> to vector<1x128xbf16>
    %c56 = arith.constant 56 : index
    %c0_46 = arith.constant 0 : index
    %85 = vector.load %arg7[%c56, %c0_46] : memref<88x128xbf16, #tpu.memory_space<vmem>>, vector<1x128xbf16>
    tpu.vector_store %arg7[%c56, %c0_46], %84 {strides = array<i32>} : memref<88x128xbf16, #tpu.memory_space<vmem>>, vector<1x128xbf16>,
    %86 = vector.extract_strided_slice %9 {offsets = [0, 4736], sizes = [1, 128], strides = [1, 1]} : vector<1x6272xbf16> to vector<1x128xbf16>
    %c57 = arith.constant 57 : index
    %c0_47 = arith.constant 0 : index
    %87 = vector.load %arg7[%c57, %c0_47] : memref<88x128xbf16, #tpu.memory_space<vmem>>, vector<1x128xbf16>
    tpu.vector_store %arg7[%c57, %c0_47], %86 {strides = array<i32>} : memref<88x128xbf16, #tpu.memory_space<vmem>>, vector<1x128xbf16>,
    %88 = vector.extract_strided_slice %9 {offsets = [0, 4864], sizes = [1, 128], strides = [1, 1]} : vector<1x6272xbf16> to vector<1x128xbf16>
    %c58 = arith.constant 58 : index
    %c0_48 = arith.constant 0 : index
    %89 = vector.load %arg7[%c58, %c0_48] : memref<88x128xbf16, #tpu.memory_space<vmem>>, vector<1x128xbf16>
    tpu.vector_store %arg7[%c58, %c0_48], %88 {strides = array<i32>} : memref<88x128xbf16, #tpu.memory_space<vmem>>, vector<1x128xbf16>,
    %90 = vector.extract_strided_slice %9 {offsets = [0, 4992], sizes = [1, 128], strides = [1, 1]} : vector<1x6272xbf16> to vector<1x128xbf16>
    %c59 = arith.constant 59 : index
    %c0_49 = arith.constant 0 : index
    %91 = vector.load %arg7[%c59, %c0_49] : memref<88x128xbf16, #tpu.memory_space<vmem>>, vector<1x128xbf16>
    tpu.vector_store %arg7[%c59, %c0_49], %90 {strides = array<i32>} : memref<88x128xbf16, #tpu.memory_space<vmem>>, vector<1x128xbf16>,
    %92 = vector.extract_strided_slice %9 {offsets = [0, 5120], sizes = [1, 128], strides = [1, 1]} : vector<1x6272xbf16> to vector<1x128xbf16>
    %c60 = arith.constant 60 : index
    %c0_50 = arith.constant 0 : index
    %93 = vector.load %arg7[%c60, %c0_50] : memref<88x128xbf16, #tpu.memory_space<vmem>>, vector<1x128xbf16>
    tpu.vector_store %arg7[%c60, %c0_50], %92 {strides = array<i32>} : memref<88x128xbf16, #tpu.memory_space<vmem>>, vector<1x128xbf16>,
    %94 = vector.extract_strided_slice %9 {offsets = [0, 5248], sizes = [1, 128], strides = [1, 1]} : vector<1x6272xbf16> to vector<1x128xbf16>
    %c61 = arith.constant 61 : index
    %c0_51 = arith.constant 0 : index
    %95 = vector.load %arg7[%c61, %c0_51] : memref<88x128xbf16, #tpu.memory_space<vmem>>, vector<1x128xbf16>
    tpu.vector_store %arg7[%c61, %c0_51], %94 {strides = array<i32>} : memref<88x128xbf16, #tpu.memory_space<vmem>>, vector<1x128xbf16>,
    %96 = vector.extract_strided_slice %9 {offsets = [0, 5376], sizes = [1, 128], strides = [1, 1]} : vector<1x6272xbf16> to vector<1x128xbf16>
    %c64 = arith.constant 64 : index
    %c0_52 = arith.constant 0 : index
    %97 = vector.load %arg7[%c64, %c0_52] : memref<88x128xbf16, #tpu.memory_space<vmem>>, vector<1x128xbf16>
    tpu.vector_store %arg7[%c64, %c0_52], %96 {strides = array<i32>} : memref<88x128xbf16, #tpu.memory_space<vmem>>, vector<1x128xbf16>,
    %98 = vector.extract_strided_slice %9 {offsets = [0, 5504], sizes = [1, 128], strides = [1, 1]} : vector<1x6272xbf16> to vector<1x128xbf16>
    %c65 = arith.constant 65 : index
    %c0_53 = arith.constant 0 : index
    %99 = vector.load %arg7[%c65, %c0_53] : memref<88x128xbf16, #tpu.memory_space<vmem>>, vector<1x128xbf16>
    tpu.vector_store %arg7[%c65, %c0_53], %98 {strides = array<i32>} : memref<88x128xbf16, #tpu.memory_space<vmem>>, vector<1x128xbf16>,
    %100 = vector.extract_strided_slice %9 {offsets = [0, 5632], sizes = [1, 128], strides = [1, 1]} : vector<1x6272xbf16> to vector<1x128xbf16>
    %c66 = arith.constant 66 : index
    %c0_54 = arith.constant 0 : index
    %101 = vector.load %arg7[%c66, %c0_54] : memref<88x128xbf16, #tpu.memory_space<vmem>>, vector<1x128xbf16>
    tpu.vector_store %arg7[%c66, %c0_54], %100 {strides = array<i32>} : memref<88x128xbf16, #tpu.memory_space<vmem>>, vector<1x128xbf16>,
    %102 = vector.extract_strided_slice %9 {offsets = [0, 5760], sizes = [1, 128], strides = [1, 1]} : vector<1x6272xbf16> to vector<1x128xbf16>
    %c67 = arith.constant 67 : index
    %c0_55 = arith.constant 0 : index
    %103 = vector.load %arg7[%c67, %c0_55] : memref<88x128xbf16, #tpu.memory_space<vmem>>, vector<1x128xbf16>
    tpu.vector_store %arg7[%c67, %c0_55], %102 {strides = array<i32>} : memref<88x128xbf16, #tpu.memory_space<vmem>>, vector<1x128xbf16>,
    %104 = vector.extract_strided_slice %9 {offsets = [0, 5888], sizes = [1, 128], strides = [1, 1]} : vector<1x6272xbf16> to vector<1x128xbf16>
    %c68 = arith.constant 68 : index
    %c0_56 = arith.constant 0 : index
    %105 = vector.load %arg7[%c68, %c0_56] : memref<88x128xbf16, #tpu.memory_space<vmem>>, vector<1x128xbf16>
    tpu.vector_store %arg7[%c68, %c0_56], %104 {strides = array<i32>} : memref<88x128xbf16, #tpu.memory_space<vmem>>, vector<1x128xbf16>,
    %106 = vector.extract_strided_slice %9 {offsets = [0, 6016], sizes = [1, 128], strides = [1, 1]} : vector<1x6272xbf16> to vector<1x128xbf16>
    %c69 = arith.constant 69 : index
    %c0_57 = arith.constant 0 : index
    %107 = vector.load %arg7[%c69, %c0_57] : memref<88x128xbf16, #tpu.memory_space<vmem>>, vector<1x128xbf16>
    tpu.vector_store %arg7[%c69, %c0_57], %106 {strides = array<i32>} : memref<88x128xbf16, #tpu.memory_space<vmem>>, vector<1x128xbf16>,
    %108 = vector.extract_strided_slice %9 {offsets = [0, 6144], sizes = [1, 128], strides = [1, 1]} : vector<1x6272xbf16> to vector<1x128xbf16>
    %c70 = arith.constant 70 : index
    %c0_58 = arith.constant 0 : index
    %109 = vector.load %arg7[%c70, %c0_58] : memref<88x128xbf16, #tpu.memory_space<vmem>>, vector<1x128xbf16>
    tpu.vector_store %arg7[%c70, %c0_58], %108 {strides = array<i32>} : memref<88x128xbf16, #tpu.memory_space<vmem>>, vector<1x128xbf16>,
    %cst_59 = arith.constant 0.000000e+00 : f32
    %110 = vector.broadcast %cst_59 : f32 to vector<64x256xf32>
    %c0_60 = arith.constant 0 : index
    %c0_61 = arith.constant 0 : index
    %111 = vector.load %arg7[%c0_60, %c0_61] : memref<88x128xbf16, #tpu.memory_space<vmem>>, vector<64x128xbf16>
    %c0_62 = arith.constant 0 : index
    %c0_63 = arith.constant 0 : index
    %c0_64 = arith.constant 0 : index
    %112 = vector.load %arg4[%c0_62, %c0_63, %c0_64] : memref<9x128x256xbf16, #tpu.memory_space<vmem>>, vector<1x128x256xbf16>
    %113 = vector.shape_cast %112 : vector<1x128x256xbf16> to vector<128x256xbf16>
    %cst_65 = arith.constant dense<0.000000e+00> : vector<64x256xf32>
    %114 = tpu.matmul %111, %113, %cst_65 {dimension_numbers = #tpu.dot_dimension_numbers<[1], [0], [0], [1], [0, 0, 1, 1], [], []>} : vector<64x128xbf16>, vector<128x256xbf16>, vector<64x256xf32> -> vector<64x256xf32>
    %115 = arith.addf %110, %114 : vector<64x256xf32>
    %c1 = arith.constant 1 : index
    %c0_66 = arith.constant 0 : index
    %116 = vector.load %arg7[%c1, %c0_66] : memref<88x128xbf16, #tpu.memory_space<vmem>>, vector<64x128xbf16>
    %c1_67 = arith.constant 1 : index
    %c0_68 = arith.constant 0 : index
    %c0_69 = arith.constant 0 : index
    %117 = vector.load %arg4[%c1_67, %c0_68, %c0_69] : memref<9x128x256xbf16, #tpu.memory_space<vmem>>, vector<1x128x256xbf16>
    %118 = vector.shape_cast %117 : vector<1x128x256xbf16> to vector<128x256xbf16>
    %cst_70 = arith.constant dense<0.000000e+00> : vector<64x256xf32>
    %119 = tpu.matmul %116, %118, %cst_70 {dimension_numbers = #tpu.dot_dimension_numbers<[1], [0], [0], [1], [0, 0, 1, 1], [], []>} : vector<64x128xbf16>, vector<128x256xbf16>, vector<64x256xf32> -> vector<64x256xf32>
    %120 = arith.addf %115, %119 : vector<64x256xf32>
    %c2 = arith.constant 2 : index
    %c0_71 = arith.constant 0 : index
    %121 = vector.load %arg7[%c2, %c0_71] : memref<88x128xbf16, #tpu.memory_space<vmem>>, vector<64x128xbf16>
    %c2_72 = arith.constant 2 : index
    %c0_73 = arith.constant 0 : index
    %c0_74 = arith.constant 0 : index
    %122 = vector.load %arg4[%c2_72, %c0_73, %c0_74] : memref<9x128x256xbf16, #tpu.memory_space<vmem>>, vector<1x128x256xbf16>
    %123 = vector.shape_cast %122 : vector<1x128x256xbf16> to vector<128x256xbf16>
    %cst_75 = arith.constant dense<0.000000e+00> : vector<64x256xf32>
    %124 = tpu.matmul %121, %123, %cst_75 {dimension_numbers = #tpu.dot_dimension_numbers<[1], [0], [0], [1], [0, 0, 1, 1], [], []>} : vector<64x128xbf16>, vector<128x256xbf16>, vector<64x256xf32> -> vector<64x256xf32>
    %125 = arith.addf %120, %124 : vector<64x256xf32>
    %c9 = arith.constant 9 : index
    %c0_76 = arith.constant 0 : index
    %126 = vector.load %arg7[%c9, %c0_76] : memref<88x128xbf16, #tpu.memory_space<vmem>>, vector<64x128xbf16>
    %c3 = arith.constant 3 : index
    %c0_77 = arith.constant 0 : index
    %c0_78 = arith.constant 0 : index
    %127 = vector.load %arg4[%c3, %c0_77, %c0_78] : memref<9x128x256xbf16, #tpu.memory_space<vmem>>, vector<1x128x256xbf16>
    %128 = vector.shape_cast %127 : vector<1x128x256xbf16> to vector<128x256xbf16>
    %cst_79 = arith.constant dense<0.000000e+00> : vector<64x256xf32>
    %129 = tpu.matmul %126, %128, %cst_79 {dimension_numbers = #tpu.dot_dimension_numbers<[1], [0], [0], [1], [0, 0, 1, 1], [], []>} : vector<64x128xbf16>, vector<128x256xbf16>, vector<64x256xf32> -> vector<64x256xf32>
    %130 = arith.addf %125, %129 : vector<64x256xf32>
    %c10_80 = arith.constant 10 : index
    %c0_81 = arith.constant 0 : index
    %131 = vector.load %arg7[%c10_80, %c0_81] : memref<88x128xbf16, #tpu.memory_space<vmem>>, vector<64x128xbf16>
    %c4 = arith.constant 4 : index
    %c0_82 = arith.constant 0 : index
    %c0_83 = arith.constant 0 : index
    %132 = vector.load %arg4[%c4, %c0_82, %c0_83] : memref<9x128x256xbf16, #tpu.memory_space<vmem>>, vector<1x128x256xbf16>
    %133 = vector.shape_cast %132 : vector<1x128x256xbf16> to vector<128x256xbf16>
    %cst_84 = arith.constant dense<0.000000e+00> : vector<64x256xf32>
    %134 = tpu.matmul %131, %133, %cst_84 {dimension_numbers = #tpu.dot_dimension_numbers<[1], [0], [0], [1], [0, 0, 1, 1], [], []>} : vector<64x128xbf16>, vector<128x256xbf16>, vector<64x256xf32> -> vector<64x256xf32>
    %135 = arith.addf %130, %134 : vector<64x256xf32>
    %c11_85 = arith.constant 11 : index
    %c0_86 = arith.constant 0 : index
    %136 = vector.load %arg7[%c11_85, %c0_86] : memref<88x128xbf16, #tpu.memory_space<vmem>>, vector<64x128xbf16>
    %c5 = arith.constant 5 : index
    %c0_87 = arith.constant 0 : index
    %c0_88 = arith.constant 0 : index
    %137 = vector.load %arg4[%c5, %c0_87, %c0_88] : memref<9x128x256xbf16, #tpu.memory_space<vmem>>, vector<1x128x256xbf16>
    %138 = vector.shape_cast %137 : vector<1x128x256xbf16> to vector<128x256xbf16>
    %cst_89 = arith.constant dense<0.000000e+00> : vector<64x256xf32>
    %139 = tpu.matmul %136, %138, %cst_89 {dimension_numbers = #tpu.dot_dimension_numbers<[1], [0], [0], [1], [0, 0, 1, 1], [], []>} : vector<64x128xbf16>, vector<128x256xbf16>, vector<64x256xf32> -> vector<64x256xf32>
    %140 = arith.addf %135, %139 : vector<64x256xf32>
    %c18 = arith.constant 18 : index
    %c0_90 = arith.constant 0 : index
    %141 = vector.load %arg7[%c18, %c0_90] : memref<88x128xbf16, #tpu.memory_space<vmem>>, vector<64x128xbf16>
    %c6 = arith.constant 6 : index
    %c0_91 = arith.constant 0 : index
    %c0_92 = arith.constant 0 : index
    %142 = vector.load %arg4[%c6, %c0_91, %c0_92] : memref<9x128x256xbf16, #tpu.memory_space<vmem>>, vector<1x128x256xbf16>
    %143 = vector.shape_cast %142 : vector<1x128x256xbf16> to vector<128x256xbf16>
    %cst_93 = arith.constant dense<0.000000e+00> : vector<64x256xf32>
    %144 = tpu.matmul %141, %143, %cst_93 {dimension_numbers = #tpu.dot_dimension_numbers<[1], [0], [0], [1], [0, 0, 1, 1], [], []>} : vector<64x128xbf16>, vector<128x256xbf16>, vector<64x256xf32> -> vector<64x256xf32>
    %145 = arith.addf %140, %144 : vector<64x256xf32>
    %c19_94 = arith.constant 19 : index
    %c0_95 = arith.constant 0 : index
    %146 = vector.load %arg7[%c19_94, %c0_95] : memref<88x128xbf16, #tpu.memory_space<vmem>>, vector<64x128xbf16>
    %c7 = arith.constant 7 : index
    %c0_96 = arith.constant 0 : index
    %c0_97 = arith.constant 0 : index
    %147 = vector.load %arg4[%c7, %c0_96, %c0_97] : memref<9x128x256xbf16, #tpu.memory_space<vmem>>, vector<1x128x256xbf16>
    %148 = vector.shape_cast %147 : vector<1x128x256xbf16> to vector<128x256xbf16>
    %cst_98 = arith.constant dense<0.000000e+00> : vector<64x256xf32>
    %149 = tpu.matmul %146, %148, %cst_98 {dimension_numbers = #tpu.dot_dimension_numbers<[1], [0], [0], [1], [0, 0, 1, 1], [], []>} : vector<64x128xbf16>, vector<128x256xbf16>, vector<64x256xf32> -> vector<64x256xf32>
    %150 = arith.addf %145, %149 : vector<64x256xf32>
    %c20_99 = arith.constant 20 : index
    %c0_100 = arith.constant 0 : index
    %151 = vector.load %arg7[%c20_99, %c0_100] : memref<88x128xbf16, #tpu.memory_space<vmem>>, vector<64x128xbf16>
    %c8 = arith.constant 8 : index
    %c0_101 = arith.constant 0 : index
    %c0_102 = arith.constant 0 : index
    %152 = vector.load %arg4[%c8, %c0_101, %c0_102] : memref<9x128x256xbf16, #tpu.memory_space<vmem>>, vector<1x128x256xbf16>
    %153 = vector.shape_cast %152 : vector<1x128x256xbf16> to vector<128x256xbf16>
    %cst_103 = arith.constant dense<0.000000e+00> : vector<64x256xf32>
    %154 = tpu.matmul %151, %153, %cst_103 {dimension_numbers = #tpu.dot_dimension_numbers<[1], [0], [0], [1], [0, 0, 1, 1], [], []>} : vector<64x128xbf16>, vector<128x256xbf16>, vector<64x256xf32> -> vector<64x256xf32>
    %155 = arith.addf %150, %154 : vector<64x256xf32>
    %c0_104 = arith.constant 0 : index
    %c0_105 = arith.constant 0 : index
    %156 = vector.load %arg5[%c0_104, %c0_105] : memref<1x256xf32, #tpu.memory_space<vmem>>, vector<1x256xf32>
    %157 = vector.broadcast %156 : vector<1x256xf32> to vector<64x256xf32>
    %158 = arith.addf %155, %157 : vector<64x256xf32>
    %cst_106 = arith.constant 0.000000e+00 : f32
    %159 = vector.broadcast %cst_106 : f32 to vector<64x256xf32>
    %160 = arith.maximumf %158, %159 : vector<64x256xf32>
    %161 = arith.truncf %160 : vector<64x256xf32> to vector<64x256xbf16>
    %c0_107 = arith.constant 0 : index
    %c0_108 = arith.constant 0 : index
    %c0_109 = arith.constant 0 : index
    %162 = vector.load %arg6[%c0_107, %c0_108, %c0_109] : memref<1x64x256xbf16, #tpu.memory_space<vmem>>, vector<1x64x256xbf16>
    %163 = vector.shape_cast %162 : vector<1x64x256xbf16> to vector<64x256xbf16>
    %164 = vector.shape_cast %161 : vector<64x256xbf16> to vector<1x64x256xbf16>
    tpu.vector_store %arg6[%c0_107, %c0_108, %c0_109], %164 {strides = array<i32>} : memref<1x64x256xbf16, #tpu.memory_space<vmem>>, vector<1x64x256xbf16>,
    return
  }
  func.func @transform_0(%arg0: i32) -> (i32, i32, i32) {
    %c0_i32 = arith.constant 0 : i32
    %c0_i32_0 = arith.constant 0 : i32
    %c0_i32_1 = arith.constant 0 : i32
    return %arg0, %c0_i32, %c0_i32_0 : i32, i32, i32
  }
  func.func @transform_1(%arg0: i32) -> (i32, i32) {
    %c0_i32 = arith.constant 0 : i32
    %c0_i32_0 = arith.constant 0 : i32
    %c0_i32_1 = arith.constant 0 : i32
    return %c0_i32, %c0_i32_0 : i32, i32
  }
  func.func @transform_2(%arg0: i32) -> (i32, i32) {
    %c0_i32 = arith.constant 0 : i32
    %c0_i32_0 = arith.constant 0 : i32
    %c0_i32_1 = arith.constant 0 : i32
    return %c0_i32, %c0_i32_0 : i32, i32
  }
  func.func @transform_3(%arg0: i32) -> (i32, i32, i32) {
    %c0_i32 = arith.constant 0 : i32
    %c0_i32_0 = arith.constant 0 : i32
    %c0_i32_1 = arith.constant 0 : i32
    %c0_i32_2 = arith.constant 0 : i32
    return %c0_i32, %c0_i32_0, %c0_i32_1 : i32, i32, i32
  }
  func.func @transform_4(%arg0: i32) -> (i32, i32) {
    %c0_i32 = arith.constant 0 : i32
    %c0_i32_0 = arith.constant 0 : i32
    %c0_i32_1 = arith.constant 0 : i32
    return %c0_i32, %c0_i32_0 : i32, i32
  }
  func.func @transform_5(%arg0: i32) -> (i32, i32, i32) {
    %c0_i32 = arith.constant 0 : i32
    %c0_i32_0 = arith.constant 0 : i32
    %c0_i32_1 = arith.constant 0 : i32
    return %arg0, %c0_i32, %c0_i32_0 : i32, i32, i32
  }
}

module attributes {stable_mosaic.version = 11 : i64} {
  func.func @_stage2_kernel(%arg0: i32, %arg1: memref<1x264x64xbf16, #tpu.memory_space<vmem>>, %arg2: memref<9x64x128xbf16, #tpu.memory_space<vmem>>, %arg3: memref<1x128xf32, #tpu.memory_space<vmem>>, %arg4: memref<9x128x4xbf16, #tpu.memory_space<vmem>>, %arg5: memref<1x4xf32, #tpu.memory_space<vmem>>, %arg6: memref<1x224x4xf32, #tpu.memory_space<vmem>>, %arg7: memref<264x128xbf16, #tpu.memory_space<vmem>>) attributes {dimension_semantics = [#tpu.dimension_semantics<parallel>], iteration_bounds = array<i64: 2>, scalar_prefetch = 0 : i64, scratch_operands = 1 : i64, tpu.core_type = #tpu.core_type<tc>, window_params = [{transform_indices = @transform_0, window_bounds = array<i64: 1, 264, 64>}, {pipeline_mode = #tpu.pipeline_mode<synchronous>, transform_indices = @transform_1, window_bounds = array<i64: 9, 64, 128>}, {pipeline_mode = #tpu.pipeline_mode<synchronous>, transform_indices = @transform_2, window_bounds = array<i64: 1, 128>}, {pipeline_mode = #tpu.pipeline_mode<synchronous>, transform_indices = @transform_3, window_bounds = array<i64: 9, 128, 4>}, {pipeline_mode = #tpu.pipeline_mode<synchronous>, transform_indices = @transform_4, window_bounds = array<i64: 1, 4>}, {transform_indices = @transform_5, window_bounds = array<i64: 1, 224, 4>}]} {
    %cst = arith.constant 0.000000e+00 : f32
    %0 = vector.broadcast %cst : f32 to vector<224x128xf32>
    %c0 = arith.constant 0 : index
    %c0_0 = arith.constant 0 : index
    %c0_1 = arith.constant 0 : index
    %1 = vector.load %arg1[%c0, %c0_0, %c0_1] : memref<1x264x64xbf16, #tpu.memory_space<vmem>>, vector<1x224x64xbf16>
    %2 = vector.shape_cast %1 : vector<1x224x64xbf16> to vector<224x64xbf16>
    %c0_2 = arith.constant 0 : index
    %c0_3 = arith.constant 0 : index
    %c0_4 = arith.constant 0 : index
    %3 = vector.load %arg2[%c0_2, %c0_3, %c0_4] : memref<9x64x128xbf16, #tpu.memory_space<vmem>>, vector<1x64x128xbf16>
    %4 = vector.shape_cast %3 : vector<1x64x128xbf16> to vector<64x128xbf16>
    %cst_5 = arith.constant dense<0.000000e+00> : vector<224x128xf32>
    %5 = tpu.matmul %2, %4, %cst_5 {dimension_numbers = #tpu.dot_dimension_numbers<[1], [0], [0], [1], [0, 0, 1, 1], [], []>} : vector<224x64xbf16>, vector<64x128xbf16>, vector<224x128xf32> -> vector<224x128xf32>
    %6 = arith.addf %0, %5 : vector<224x128xf32>
    %c0_6 = arith.constant 0 : index
    %c1 = arith.constant 1 : index
    %c0_7 = arith.constant 0 : index
    %7 = vector.load %arg1[%c0_6, %c1, %c0_7] : memref<1x264x64xbf16, #tpu.memory_space<vmem>>, vector<1x224x64xbf16>
    %8 = vector.shape_cast %7 : vector<1x224x64xbf16> to vector<224x64xbf16>
    %c1_8 = arith.constant 1 : index
    %c0_9 = arith.constant 0 : index
    %c0_10 = arith.constant 0 : index
    %9 = vector.load %arg2[%c1_8, %c0_9, %c0_10] : memref<9x64x128xbf16, #tpu.memory_space<vmem>>, vector<1x64x128xbf16>
    %10 = vector.shape_cast %9 : vector<1x64x128xbf16> to vector<64x128xbf16>
    %cst_11 = arith.constant dense<0.000000e+00> : vector<224x128xf32>
    %11 = tpu.matmul %8, %10, %cst_11 {dimension_numbers = #tpu.dot_dimension_numbers<[1], [0], [0], [1], [0, 0, 1, 1], [], []>} : vector<224x64xbf16>, vector<64x128xbf16>, vector<224x128xf32> -> vector<224x128xf32>
    %12 = arith.addf %6, %11 : vector<224x128xf32>
    %c0_12 = arith.constant 0 : index
    %c2 = arith.constant 2 : index
    %c0_13 = arith.constant 0 : index
    %13 = vector.load %arg1[%c0_12, %c2, %c0_13] : memref<1x264x64xbf16, #tpu.memory_space<vmem>>, vector<1x224x64xbf16>
    %14 = vector.shape_cast %13 : vector<1x224x64xbf16> to vector<224x64xbf16>
    %c2_14 = arith.constant 2 : index
    %c0_15 = arith.constant 0 : index
    %c0_16 = arith.constant 0 : index
    %15 = vector.load %arg2[%c2_14, %c0_15, %c0_16] : memref<9x64x128xbf16, #tpu.memory_space<vmem>>, vector<1x64x128xbf16>
    %16 = vector.shape_cast %15 : vector<1x64x128xbf16> to vector<64x128xbf16>
    %cst_17 = arith.constant dense<0.000000e+00> : vector<224x128xf32>
    %17 = tpu.matmul %14, %16, %cst_17 {dimension_numbers = #tpu.dot_dimension_numbers<[1], [0], [0], [1], [0, 0, 1, 1], [], []>} : vector<224x64xbf16>, vector<64x128xbf16>, vector<224x128xf32> -> vector<224x128xf32>
    %18 = arith.addf %12, %17 : vector<224x128xf32>
    %c0_18 = arith.constant 0 : index
    %c16 = arith.constant 16 : index
    %c0_19 = arith.constant 0 : index
    %19 = vector.load %arg1[%c0_18, %c16, %c0_19] : memref<1x264x64xbf16, #tpu.memory_space<vmem>>, vector<1x224x64xbf16>
    %20 = vector.shape_cast %19 : vector<1x224x64xbf16> to vector<224x64xbf16>
    %c3 = arith.constant 3 : index
    %c0_20 = arith.constant 0 : index
    %c0_21 = arith.constant 0 : index
    %21 = vector.load %arg2[%c3, %c0_20, %c0_21] : memref<9x64x128xbf16, #tpu.memory_space<vmem>>, vector<1x64x128xbf16>
    %22 = vector.shape_cast %21 : vector<1x64x128xbf16> to vector<64x128xbf16>
    %cst_22 = arith.constant dense<0.000000e+00> : vector<224x128xf32>
    %23 = tpu.matmul %20, %22, %cst_22 {dimension_numbers = #tpu.dot_dimension_numbers<[1], [0], [0], [1], [0, 0, 1, 1], [], []>} : vector<224x64xbf16>, vector<64x128xbf16>, vector<224x128xf32> -> vector<224x128xf32>
    %24 = arith.addf %18, %23 : vector<224x128xf32>
    %c0_23 = arith.constant 0 : index
    %c17 = arith.constant 17 : index
    %c0_24 = arith.constant 0 : index
    %25 = vector.load %arg1[%c0_23, %c17, %c0_24] : memref<1x264x64xbf16, #tpu.memory_space<vmem>>, vector<1x224x64xbf16>
    %26 = vector.shape_cast %25 : vector<1x224x64xbf16> to vector<224x64xbf16>
    %c4 = arith.constant 4 : index
    %c0_25 = arith.constant 0 : index
    %c0_26 = arith.constant 0 : index
    %27 = vector.load %arg2[%c4, %c0_25, %c0_26] : memref<9x64x128xbf16, #tpu.memory_space<vmem>>, vector<1x64x128xbf16>
    %28 = vector.shape_cast %27 : vector<1x64x128xbf16> to vector<64x128xbf16>
    %cst_27 = arith.constant dense<0.000000e+00> : vector<224x128xf32>
    %29 = tpu.matmul %26, %28, %cst_27 {dimension_numbers = #tpu.dot_dimension_numbers<[1], [0], [0], [1], [0, 0, 1, 1], [], []>} : vector<224x64xbf16>, vector<64x128xbf16>, vector<224x128xf32> -> vector<224x128xf32>
    %30 = arith.addf %24, %29 : vector<224x128xf32>
    %c0_28 = arith.constant 0 : index
    %c18 = arith.constant 18 : index
    %c0_29 = arith.constant 0 : index
    %31 = vector.load %arg1[%c0_28, %c18, %c0_29] : memref<1x264x64xbf16, #tpu.memory_space<vmem>>, vector<1x224x64xbf16>
    %32 = vector.shape_cast %31 : vector<1x224x64xbf16> to vector<224x64xbf16>
    %c5 = arith.constant 5 : index
    %c0_30 = arith.constant 0 : index
    %c0_31 = arith.constant 0 : index
    %33 = vector.load %arg2[%c5, %c0_30, %c0_31] : memref<9x64x128xbf16, #tpu.memory_space<vmem>>, vector<1x64x128xbf16>
    %34 = vector.shape_cast %33 : vector<1x64x128xbf16> to vector<64x128xbf16>
    %cst_32 = arith.constant dense<0.000000e+00> : vector<224x128xf32>
    %35 = tpu.matmul %32, %34, %cst_32 {dimension_numbers = #tpu.dot_dimension_numbers<[1], [0], [0], [1], [0, 0, 1, 1], [], []>} : vector<224x64xbf16>, vector<64x128xbf16>, vector<224x128xf32> -> vector<224x128xf32>
    %36 = arith.addf %30, %35 : vector<224x128xf32>
    %c0_33 = arith.constant 0 : index
    %c32 = arith.constant 32 : index
    %c0_34 = arith.constant 0 : index
    %37 = vector.load %arg1[%c0_33, %c32, %c0_34] : memref<1x264x64xbf16, #tpu.memory_space<vmem>>, vector<1x224x64xbf16>
    %38 = vector.shape_cast %37 : vector<1x224x64xbf16> to vector<224x64xbf16>
    %c6 = arith.constant 6 : index
    %c0_35 = arith.constant 0 : index
    %c0_36 = arith.constant 0 : index
    %39 = vector.load %arg2[%c6, %c0_35, %c0_36] : memref<9x64x128xbf16, #tpu.memory_space<vmem>>, vector<1x64x128xbf16>
    %40 = vector.shape_cast %39 : vector<1x64x128xbf16> to vector<64x128xbf16>
    %cst_37 = arith.constant dense<0.000000e+00> : vector<224x128xf32>
    %41 = tpu.matmul %38, %40, %cst_37 {dimension_numbers = #tpu.dot_dimension_numbers<[1], [0], [0], [1], [0, 0, 1, 1], [], []>} : vector<224x64xbf16>, vector<64x128xbf16>, vector<224x128xf32> -> vector<224x128xf32>
    %42 = arith.addf %36, %41 : vector<224x128xf32>
    %c0_38 = arith.constant 0 : index
    %c33 = arith.constant 33 : index
    %c0_39 = arith.constant 0 : index
    %43 = vector.load %arg1[%c0_38, %c33, %c0_39] : memref<1x264x64xbf16, #tpu.memory_space<vmem>>, vector<1x224x64xbf16>
    %44 = vector.shape_cast %43 : vector<1x224x64xbf16> to vector<224x64xbf16>
    %c7 = arith.constant 7 : index
    %c0_40 = arith.constant 0 : index
    %c0_41 = arith.constant 0 : index
    %45 = vector.load %arg2[%c7, %c0_40, %c0_41] : memref<9x64x128xbf16, #tpu.memory_space<vmem>>, vector<1x64x128xbf16>
    %46 = vector.shape_cast %45 : vector<1x64x128xbf16> to vector<64x128xbf16>
    %cst_42 = arith.constant dense<0.000000e+00> : vector<224x128xf32>
    %47 = tpu.matmul %44, %46, %cst_42 {dimension_numbers = #tpu.dot_dimension_numbers<[1], [0], [0], [1], [0, 0, 1, 1], [], []>} : vector<224x64xbf16>, vector<64x128xbf16>, vector<224x128xf32> -> vector<224x128xf32>
    %48 = arith.addf %42, %47 : vector<224x128xf32>
    %c0_43 = arith.constant 0 : index
    %c34 = arith.constant 34 : index
    %c0_44 = arith.constant 0 : index
    %49 = vector.load %arg1[%c0_43, %c34, %c0_44] : memref<1x264x64xbf16, #tpu.memory_space<vmem>>, vector<1x224x64xbf16>
    %50 = vector.shape_cast %49 : vector<1x224x64xbf16> to vector<224x64xbf16>
    %c8 = arith.constant 8 : index
    %c0_45 = arith.constant 0 : index
    %c0_46 = arith.constant 0 : index
    %51 = vector.load %arg2[%c8, %c0_45, %c0_46] : memref<9x64x128xbf16, #tpu.memory_space<vmem>>, vector<1x64x128xbf16>
    %52 = vector.shape_cast %51 : vector<1x64x128xbf16> to vector<64x128xbf16>
    %cst_47 = arith.constant dense<0.000000e+00> : vector<224x128xf32>
    %53 = tpu.matmul %50, %52, %cst_47 {dimension_numbers = #tpu.dot_dimension_numbers<[1], [0], [0], [1], [0, 0, 1, 1], [], []>} : vector<224x64xbf16>, vector<64x128xbf16>, vector<224x128xf32> -> vector<224x128xf32>
    %54 = arith.addf %48, %53 : vector<224x128xf32>
    %c0_48 = arith.constant 0 : index
    %c0_49 = arith.constant 0 : index
    %55 = vector.load %arg3[%c0_48, %c0_49] : memref<1x128xf32, #tpu.memory_space<vmem>>, vector<1x128xf32>
    %56 = vector.broadcast %55 : vector<1x128xf32> to vector<224x128xf32>
    %57 = arith.addf %54, %56 : vector<224x128xf32>
    %cst_50 = arith.constant 0.000000e+00 : f32
    %58 = vector.broadcast %cst_50 : f32 to vector<224x128xf32>
    %59 = arith.maximumf %57, %58 : vector<224x128xf32>
    %60 = tpu.iota {dimensions = array<i32: 0>} : vector<224x1xi32>
    %c16_i32 = arith.constant 16 : i32
    %c0_i32 = arith.constant 0 : i32
    %61 = arith.cmpi eq, %c16_i32, %c0_i32 : i32
    %c1_i32 = arith.constant 1 : i32
    %62 = arith.select %61, %c1_i32, %c16_i32 : i32
    %63 = vector.broadcast %62 : i32 to vector<224x1xi32>
    %64 = arith.remsi %60, %63 : vector<224x1xi32>
    %c0_i32_51 = arith.constant 0 : i32
    %65 = vector.broadcast %c0_i32_51 : i32 to vector<224x1xi32>
    %66 = arith.cmpi ne, %64, %65 : vector<224x1xi32>
    %c0_i32_52 = arith.constant 0 : i32
    %67 = vector.broadcast %c0_i32_52 : i32 to vector<224x1xi32>
    %68 = arith.cmpi slt, %64, %67 : vector<224x1xi32>
    %c0_i32_53 = arith.constant 0 : i32
    %69 = arith.cmpi slt, %62, %c0_i32_53 : i32
    %70 = vector.broadcast %69 : i1 to vector<224x1xi1>
    %71 = vector.broadcast %70 : vector<224x1xi1> to vector<224x1xi1>
    %72 = arith.xori %68, %71 : vector<224x1xi1>
    %73 = arith.andi %72, %66 : vector<224x1xi1>
    %74 = vector.broadcast %62 : i32 to vector<224x1xi32>
    %75 = arith.addi %64, %74 : vector<224x1xi32>
    %76 = arith.select %73, %75, %64 : vector<224x1xi1>, vector<224x1xi32>
    %c14_i32 = arith.constant 14 : i32
    %77 = vector.broadcast %c14_i32 : i32 to vector<224x1xi32>
    %78 = arith.cmpi slt, %76, %77 : vector<224x1xi32>
    %cst_54 = arith.constant 0.000000e+00 : f32
    %79 = vector.shape_cast %78 : vector<224x1xi1> to vector<224x1xi1>
    %80 = vector.broadcast %79 : vector<224x1xi1> to vector<224x128xi1>
    %81 = vector.broadcast %cst_54 : f32 to vector<224x128xf32>
    %82 = arith.select %80, %59, %81 : vector<224x128xi1>, vector<224x128xf32>
    %cst_55 = arith.constant 0.000000e+00 : bf16
    %83 = vector.broadcast %cst_55 : bf16 to vector<264x128xbf16>
    %c0_56 = arith.constant 0 : index
    %c0_57 = arith.constant 0 : index
    %84 = vector.load %arg7[%c0_56, %c0_57] : memref<264x128xbf16, #tpu.memory_space<vmem>>, vector<264x128xbf16>
    tpu.vector_store %arg7[%c0_56, %c0_57], %83 {strides = array<i32>} : memref<264x128xbf16, #tpu.memory_space<vmem>>, vector<264x128xbf16>,
    %85 = arith.truncf %82 : vector<224x128xf32> to vector<224x128xbf16>
    %c17_58 = arith.constant 17 : index
    %c0_59 = arith.constant 0 : index
    %86 = vector.load %arg7[%c17_58, %c0_59] : memref<264x128xbf16, #tpu.memory_space<vmem>>, vector<224x128xbf16>
    tpu.vector_store %arg7[%c17_58, %c0_59], %85 {strides = array<i32>} : memref<264x128xbf16, #tpu.memory_space<vmem>>, vector<224x128xbf16>,
    %cst_60 = arith.constant 0.000000e+00 : f32
    %87 = vector.broadcast %cst_60 : f32 to vector<224x4xf32>
    %c0_61 = arith.constant 0 : index
    %c0_62 = arith.constant 0 : index
    %88 = vector.load %arg7[%c0_61, %c0_62] : memref<264x128xbf16, #tpu.memory_space<vmem>>, vector<224x128xbf16>
    %c0_63 = arith.constant 0 : index
    %c0_64 = arith.constant 0 : index
    %c0_65 = arith.constant 0 : index
    %89 = vector.load %arg4[%c0_63, %c0_64, %c0_65] : memref<9x128x4xbf16, #tpu.memory_space<vmem>>, vector<1x128x4xbf16>
    %90 = vector.shape_cast %89 : vector<1x128x4xbf16> to vector<128x4xbf16>
    %cst_66 = arith.constant dense<0.000000e+00> : vector<224x4xf32>
    %91 = tpu.matmul %88, %90, %cst_66 {dimension_numbers = #tpu.dot_dimension_numbers<[1], [0], [0], [1], [0, 0, 1, 1], [], []>} : vector<224x128xbf16>, vector<128x4xbf16>, vector<224x4xf32> -> vector<224x4xf32>
    %92 = arith.addf %87, %91 : vector<224x4xf32>
    %c1_67 = arith.constant 1 : index
    %c0_68 = arith.constant 0 : index
    %93 = vector.load %arg7[%c1_67, %c0_68] : memref<264x128xbf16, #tpu.memory_space<vmem>>, vector<224x128xbf16>
    %c1_69 = arith.constant 1 : index
    %c0_70 = arith.constant 0 : index
    %c0_71 = arith.constant 0 : index
    %94 = vector.load %arg4[%c1_69, %c0_70, %c0_71] : memref<9x128x4xbf16, #tpu.memory_space<vmem>>, vector<1x128x4xbf16>
    %95 = vector.shape_cast %94 : vector<1x128x4xbf16> to vector<128x4xbf16>
    %cst_72 = arith.constant dense<0.000000e+00> : vector<224x4xf32>
    %96 = tpu.matmul %93, %95, %cst_72 {dimension_numbers = #tpu.dot_dimension_numbers<[1], [0], [0], [1], [0, 0, 1, 1], [], []>} : vector<224x128xbf16>, vector<128x4xbf16>, vector<224x4xf32> -> vector<224x4xf32>
    %97 = arith.addf %92, %96 : vector<224x4xf32>
    %c2_73 = arith.constant 2 : index
    %c0_74 = arith.constant 0 : index
    %98 = vector.load %arg7[%c2_73, %c0_74] : memref<264x128xbf16, #tpu.memory_space<vmem>>, vector<224x128xbf16>
    %c2_75 = arith.constant 2 : index
    %c0_76 = arith.constant 0 : index
    %c0_77 = arith.constant 0 : index
    %99 = vector.load %arg4[%c2_75, %c0_76, %c0_77] : memref<9x128x4xbf16, #tpu.memory_space<vmem>>, vector<1x128x4xbf16>
    %100 = vector.shape_cast %99 : vector<1x128x4xbf16> to vector<128x4xbf16>
    %cst_78 = arith.constant dense<0.000000e+00> : vector<224x4xf32>
    %101 = tpu.matmul %98, %100, %cst_78 {dimension_numbers = #tpu.dot_dimension_numbers<[1], [0], [0], [1], [0, 0, 1, 1], [], []>} : vector<224x128xbf16>, vector<128x4xbf16>, vector<224x4xf32> -> vector<224x4xf32>
    %102 = arith.addf %97, %101 : vector<224x4xf32>
    %c16_79 = arith.constant 16 : index
    %c0_80 = arith.constant 0 : index
    %103 = vector.load %arg7[%c16_79, %c0_80] : memref<264x128xbf16, #tpu.memory_space<vmem>>, vector<224x128xbf16>
    %c3_81 = arith.constant 3 : index
    %c0_82 = arith.constant 0 : index
    %c0_83 = arith.constant 0 : index
    %104 = vector.load %arg4[%c3_81, %c0_82, %c0_83] : memref<9x128x4xbf16, #tpu.memory_space<vmem>>, vector<1x128x4xbf16>
    %105 = vector.shape_cast %104 : vector<1x128x4xbf16> to vector<128x4xbf16>
    %cst_84 = arith.constant dense<0.000000e+00> : vector<224x4xf32>
    %106 = tpu.matmul %103, %105, %cst_84 {dimension_numbers = #tpu.dot_dimension_numbers<[1], [0], [0], [1], [0, 0, 1, 1], [], []>} : vector<224x128xbf16>, vector<128x4xbf16>, vector<224x4xf32> -> vector<224x4xf32>
    %107 = arith.addf %102, %106 : vector<224x4xf32>
    %c17_85 = arith.constant 17 : index
    %c0_86 = arith.constant 0 : index
    %108 = vector.load %arg7[%c17_85, %c0_86] : memref<264x128xbf16, #tpu.memory_space<vmem>>, vector<224x128xbf16>
    %c4_87 = arith.constant 4 : index
    %c0_88 = arith.constant 0 : index
    %c0_89 = arith.constant 0 : index
    %109 = vector.load %arg4[%c4_87, %c0_88, %c0_89] : memref<9x128x4xbf16, #tpu.memory_space<vmem>>, vector<1x128x4xbf16>
    %110 = vector.shape_cast %109 : vector<1x128x4xbf16> to vector<128x4xbf16>
    %cst_90 = arith.constant dense<0.000000e+00> : vector<224x4xf32>
    %111 = tpu.matmul %108, %110, %cst_90 {dimension_numbers = #tpu.dot_dimension_numbers<[1], [0], [0], [1], [0, 0, 1, 1], [], []>} : vector<224x128xbf16>, vector<128x4xbf16>, vector<224x4xf32> -> vector<224x4xf32>
    %112 = arith.addf %107, %111 : vector<224x4xf32>
    %c18_91 = arith.constant 18 : index
    %c0_92 = arith.constant 0 : index
    %113 = vector.load %arg7[%c18_91, %c0_92] : memref<264x128xbf16, #tpu.memory_space<vmem>>, vector<224x128xbf16>
    %c5_93 = arith.constant 5 : index
    %c0_94 = arith.constant 0 : index
    %c0_95 = arith.constant 0 : index
    %114 = vector.load %arg4[%c5_93, %c0_94, %c0_95] : memref<9x128x4xbf16, #tpu.memory_space<vmem>>, vector<1x128x4xbf16>
    %115 = vector.shape_cast %114 : vector<1x128x4xbf16> to vector<128x4xbf16>
    %cst_96 = arith.constant dense<0.000000e+00> : vector<224x4xf32>
    %116 = tpu.matmul %113, %115, %cst_96 {dimension_numbers = #tpu.dot_dimension_numbers<[1], [0], [0], [1], [0, 0, 1, 1], [], []>} : vector<224x128xbf16>, vector<128x4xbf16>, vector<224x4xf32> -> vector<224x4xf32>
    %117 = arith.addf %112, %116 : vector<224x4xf32>
    %c32_97 = arith.constant 32 : index
    %c0_98 = arith.constant 0 : index
    %118 = vector.load %arg7[%c32_97, %c0_98] : memref<264x128xbf16, #tpu.memory_space<vmem>>, vector<224x128xbf16>
    %c6_99 = arith.constant 6 : index
    %c0_100 = arith.constant 0 : index
    %c0_101 = arith.constant 0 : index
    %119 = vector.load %arg4[%c6_99, %c0_100, %c0_101] : memref<9x128x4xbf16, #tpu.memory_space<vmem>>, vector<1x128x4xbf16>
    %120 = vector.shape_cast %119 : vector<1x128x4xbf16> to vector<128x4xbf16>
    %cst_102 = arith.constant dense<0.000000e+00> : vector<224x4xf32>
    %121 = tpu.matmul %118, %120, %cst_102 {dimension_numbers = #tpu.dot_dimension_numbers<[1], [0], [0], [1], [0, 0, 1, 1], [], []>} : vector<224x128xbf16>, vector<128x4xbf16>, vector<224x4xf32> -> vector<224x4xf32>
    %122 = arith.addf %117, %121 : vector<224x4xf32>
    %c33_103 = arith.constant 33 : index
    %c0_104 = arith.constant 0 : index
    %123 = vector.load %arg7[%c33_103, %c0_104] : memref<264x128xbf16, #tpu.memory_space<vmem>>, vector<224x128xbf16>
    %c7_105 = arith.constant 7 : index
    %c0_106 = arith.constant 0 : index
    %c0_107 = arith.constant 0 : index
    %124 = vector.load %arg4[%c7_105, %c0_106, %c0_107] : memref<9x128x4xbf16, #tpu.memory_space<vmem>>, vector<1x128x4xbf16>
    %125 = vector.shape_cast %124 : vector<1x128x4xbf16> to vector<128x4xbf16>
    %cst_108 = arith.constant dense<0.000000e+00> : vector<224x4xf32>
    %126 = tpu.matmul %123, %125, %cst_108 {dimension_numbers = #tpu.dot_dimension_numbers<[1], [0], [0], [1], [0, 0, 1, 1], [], []>} : vector<224x128xbf16>, vector<128x4xbf16>, vector<224x4xf32> -> vector<224x4xf32>
    %127 = arith.addf %122, %126 : vector<224x4xf32>
    %c34_109 = arith.constant 34 : index
    %c0_110 = arith.constant 0 : index
    %128 = vector.load %arg7[%c34_109, %c0_110] : memref<264x128xbf16, #tpu.memory_space<vmem>>, vector<224x128xbf16>
    %c8_111 = arith.constant 8 : index
    %c0_112 = arith.constant 0 : index
    %c0_113 = arith.constant 0 : index
    %129 = vector.load %arg4[%c8_111, %c0_112, %c0_113] : memref<9x128x4xbf16, #tpu.memory_space<vmem>>, vector<1x128x4xbf16>
    %130 = vector.shape_cast %129 : vector<1x128x4xbf16> to vector<128x4xbf16>
    %cst_114 = arith.constant dense<0.000000e+00> : vector<224x4xf32>
    %131 = tpu.matmul %128, %130, %cst_114 {dimension_numbers = #tpu.dot_dimension_numbers<[1], [0], [0], [1], [0, 0, 1, 1], [], []>} : vector<224x128xbf16>, vector<128x4xbf16>, vector<224x4xf32> -> vector<224x4xf32>
    %132 = arith.addf %127, %131 : vector<224x4xf32>
    %c0_115 = arith.constant 0 : index
    %c0_116 = arith.constant 0 : index
    %133 = vector.load %arg5[%c0_115, %c0_116] : memref<1x4xf32, #tpu.memory_space<vmem>>, vector<1x4xf32>
    %134 = vector.broadcast %133 : vector<1x4xf32> to vector<224x4xf32>
    %135 = arith.addf %132, %134 : vector<224x4xf32>
    %136 = math.tanh %135 : vector<224x4xf32>
    %c0_117 = arith.constant 0 : index
    %c0_118 = arith.constant 0 : index
    %c0_119 = arith.constant 0 : index
    %137 = vector.load %arg6[%c0_117, %c0_118, %c0_119] : memref<1x224x4xf32, #tpu.memory_space<vmem>>, vector<1x224x4xf32>
    %138 = vector.shape_cast %137 : vector<1x224x4xf32> to vector<224x4xf32>
    %139 = vector.shape_cast %136 : vector<224x4xf32> to vector<1x224x4xf32>
    tpu.vector_store %arg6[%c0_117, %c0_118, %c0_119], %139 {strides = array<i32>} : memref<1x224x4xf32, #tpu.memory_space<vmem>>, vector<1x224x4xf32>,
    return
  }
  func.func @transform_0(%arg0: i32) -> (i32, i32, i32) {
    %c0_i32 = arith.constant 0 : i32
    %c0_i32_0 = arith.constant 0 : i32
    %c0_i32_1 = arith.constant 0 : i32
    return %arg0, %c0_i32, %c0_i32_0 : i32, i32, i32
  }
  func.func @transform_1(%arg0: i32) -> (i32, i32, i32) {
    %c0_i32 = arith.constant 0 : i32
    %c0_i32_0 = arith.constant 0 : i32
    %c0_i32_1 = arith.constant 0 : i32
    %c0_i32_2 = arith.constant 0 : i32
    return %c0_i32, %c0_i32_0, %c0_i32_1 : i32, i32, i32
  }
  func.func @transform_2(%arg0: i32) -> (i32, i32) {
    %c0_i32 = arith.constant 0 : i32
    %c0_i32_0 = arith.constant 0 : i32
    %c0_i32_1 = arith.constant 0 : i32
    return %c0_i32, %c0_i32_0 : i32, i32
  }
  func.func @transform_3(%arg0: i32) -> (i32, i32, i32) {
    %c0_i32 = arith.constant 0 : i32
    %c0_i32_0 = arith.constant 0 : i32
    %c0_i32_1 = arith.constant 0 : i32
    %c0_i32_2 = arith.constant 0 : i32
    return %c0_i32, %c0_i32_0, %c0_i32_1 : i32, i32, i32
  }
  func.func @transform_4(%arg0: i32) -> (i32, i32) {
    %c0_i32 = arith.constant 0 : i32
    %c0_i32_0 = arith.constant 0 : i32
    %c0_i32_1 = arith.constant 0 : i32
    return %c0_i32, %c0_i32_0 : i32, i32
  }
  func.func @transform_5(%arg0: i32) -> (i32, i32, i32) {
    %c0_i32 = arith.constant 0 : i32
    %c0_i32_0 = arith.constant 0 : i32
    %c0_i32_1 = arith.constant 0 : i32
    return %arg0, %c0_i32, %c0_i32_0 : i32, i32, i32
  }
}

</mosaic_0001>

<bundles_post_ra>
// kernel: generator_forward.2
= control target key start
LH: loop header
LB: loop body
LE: loop exit
PB: predicated region body
PF: predicated region fallthrough
CT: control target
= control target key end

     0   :  { %10 = vsyncpa [#allocation4], 0  ;;  %s6722_s0 = inlined_call_operand.hbm [shape: f32[2,1,32], index: 0, kind: input, shape index: {}]   ;;  %s6723_s1 = inlined_call_operand.hbm [shape: bf16[32,6272], index: 1, kind: input, shape index: {}]   ;;  %s6724_s2 = inlined_call_operand.hbm [shape: f32[1,6272], index: 2, kind: input, shape index: {}]   ;;  %s6725_s3 = inlined_call_operand.hbm [shape: bf16[9,128,256], index: 3, kind: input, shape index: {}]   ;;  %s6726_s4 = inlined_call_operand.vmem [shape: f32[1,256], index: 4, kind: input, shape index: {}]   ;;  %s6727_s5 = inlined_call_operand.vmem [shape: bf16[2,64,256], index: 5, kind: output, shape index: {}]  }
   0x1   :  { %12 = vsyncpa [#allocation4 + $0x1], 0 }
   0x2   :  { %13 = vsyncpa [#allocation6], 0 }
   0x3   :  { %14 = vsyncpa [#allocation9], 0  ;;  %s5705_s18 = smov 0   ;;  %s5707_s19 = smov 0  }
   0x4   :  { %s5709_s20 = smov 0   ;;  %s5711_s21 = smov 0  }
   0x5 LB: > { %s172_s24 = sshll.u32 %s6723_s1, 4  ;;  %s5729_s25 = sadd.s32 4294967295, %s5665_s21   ;;  %s5665_s21 = sphi %s5711_s21, %s6751_s21   ;;  %s5661_s20 = sphi %s5709_s20, %s6750_s20   ;;  %s5657_s19 = sphi %s5707_s19, %s6749_s19   ;;  %s5653_s18 = sphi %s5705_s18, %s6748_s18   ;;  %s173_s24 = int_to_ptr.hbm [resolvable:$true] %s172_s24 }
   0x6   : > { %p4070_p0 = scmp.ge.s32.totalorder %s5665_s21, 1  ;;  %p41_p1 = scmp.eq.s32.totalorder %s5729_s25, 0 }
   0x7   : > { %p161_p2 = scmp.lt.s32.totalorder %s5665_s21, 3  ;;  %s5667_s27 = smov [#allocation5]  }
   0x8   : > { %s174_s28 = sshll.u32 %s5667_s27, 4  ;;  %s187_s6 = sshll.u32 %s6724_s2, 4  ;;  %s175_s28 = int_to_ptr.vmem [resolvable:$true] %s174_s28  ;;  %s188_s6 = int_to_ptr.hbm [resolvable:$true] %s187_s6 }
   0x9   : > { %p5734_p3 = pnand %p4070_p0, %p161_p2  ;;  %s198_s10 = sshll.u32 %s6725_s3, 4  ;;  %s199_s10 = int_to_ptr.hbm [resolvable:$true] %s198_s10 }
   0xa   : > { %s5668_s11 = smov [#allocation7]   ;;  %s5669_s13 = smov 3136  }
   0xb   : > { %p5435_p4 = pneg %p5734_p3  ;;  %s189_s12 = sshll.u32 %s5668_s11, 4  ;;  %s190_s12 = int_to_ptr.vmem [resolvable:$true] %s189_s12 }
   0xc   : > { %s5670_s14 = smov 196   ;;  %s5671_s15 = smov [#allocation8]  }
   0xd   : > { %p5745_p5 = pnand %p5435_p4, %p41_p1  ;;  %s200_s16 = sshll.u32 %s5671_s15, 4  ;;  %s201_s16 = int_to_ptr.vmem [resolvable:$true] %s200_s16 }
   0xe   : > { %s5672_s17 = smov 128   ;;  %s5673_s22 = smov 8  }
   0xf   : > { %5438 = dma.hbm_to_vmem [thread:$0]  (!%p5745_p5), %s173_s24, 12544, %s175_s28, [#allocation6], %s5669_s13, %s5669_s13, %s5670_s14  }
  0x10   : > { %5441 = dma.hbm_to_vmem [thread:$0]  (!%p5745_p5), %s188_s6, 784, %s190_s12, [#allocation6]  }
  0x11   : > { %5444 = dma.hbm_to_vmem [thread:$0]  (!%p5745_p5), %s199_s10, 18432, %s201_s16, [#allocation9], %s5672_s17, %s5672_s17, %s5673_s22  }
  0x12   : > { %s5759_s23 = sadd.s32 1, %s5665_s21   ;;  %s27_s27 = sadd.s32 1, %s5661_s20 }
  0x13   : > { %s24_s24 = ssub.s32 %s5665_s21, %s5759_s23  ;;  %p34_p7 = scmp.ne.s32.totalorder %s5661_s20, %s5657_s19 }
  0x14   : > { %p25_p6 = scmp.eq.s32.totalorder %s24_s24, 0  ;;  %p35_p8 = scmp.eq.s32.totalorder %s5665_s21, 0 }
  0x15   : > { %p40_p9 = scmp.ne.s32.totalorder %s5657_s19, %s5653_s18  ;;  %p5452_p12 = scmp.lt.s32.totalorder %s5665_s21, 2 }
  0x16   : > { %s5770_s28 = scalar_select %p25_p6, %s5661_s20, %s27_s27  }
  0x17   : > { %p36_p10 = por %p35_p8, %p34_p7  ;;  %p5774_p11 = por %p41_p1, %p40_p9 }
  0x18   : > { %s217_s30 = sand.u32 1, %s5661_s20   ;;  %s223_s8 = scalar_lea.hbm %s6722_s0, %s5665_s21 }
  0x19   : > { %s220_s9 = scalar_lea.vmem [#allocation3], %s217_s30  ;;  %s225_s11 = sshll.u32 %s223_s8, 4  ;;  %s226_s11 = int_to_ptr.hbm [resolvable:$true] %s225_s11 }
  0x1a   : > { %s227_s10 = sshll.u32 %s220_s9, 4  ;;  %p5784_p13 = pnand %p5452_p12, %p36_p10  ;;  %s228_s10 = int_to_ptr.vmem [resolvable:$true] %s227_s10 }
  0x1b   : > { %s218_s12 = scalar_lea.sflag [#allocation4], %s217_s30  ;;  %s5593_s13 = sshra.s32 %s226_s11, 4  ;;  %s5594_s13 = int_to_ptr.hbm [resolvable:$true] %s5593_s13 }
  0x1c   : > { %s5595_s14 = scalar_lea.hbm %s5594_s13, 1  ;;  %p5597_p2 = pneg %p5784_p13 }
  0x1d   : > { %p5596_p0 = scmp.ne.s32.totalorder %s5594_s13, %s5595_s14  ;;  %s5600_s16 = scalar_lea.hbm %s6722_s0, 2 }
  0x1e   : > { %p5601_p6 = scmp.lt.s32.totalorder %s5594_s13, %s6722_s0  ;;  %p5602_p7 = scmp.lt.s32.totalorder %s5600_s16, %s5595_s14 }
  0x1f   : > { %p5598_p4 = pnand %p5597_p2, %p5596_p0 }
  0x20   : > { %p5603_p8 = por %p5602_p7, %p5601_p6 }
  0x21   : > { %p5599_p5 = pneg %p5598_p4 }
  0x23   : > { %p5604_p9 = pnand %p5603_p8, %p5599_p5 }
  0x25   : > { %5607 = shalt.err (!%p5604_p9)
}
  0x26   : > { %5448 = dma.hbm_to_vmem [thread:$0]  (!%p5784_p13), %s226_s11, 16, %s228_s10, %s218_s12  }
  0x27   : > { %236 = sbr.rel (%p5734_p3) target bundleno = 817 (0x331), region = 40  ;;  %s238_s24 = sand.u32 (!%p5734_p3), 1, %s5657_s19  }
  0x28   : > { %s239_s27 = scalar_lea.sflag (!%p5734_p3), [#allocation4], %s238_s24  ;;  %s241_s30 = scalar_lea.vmem (!%p5734_p3), [#allocation3], %s238_s24 }
  0x2c   : > { %5640 = dma.done.wait (%p5774_p11), %s239_s27, 16  }
  0x2d   : > { %5642 = vsyncadd (%p5774_p11), %s239_s27, 4294967280 }
  0x2e   : > { %5644 = dma.done.wait (%p41_p1), [#allocation6], 13328  }
  0x2f   : > { %5646 = vsyncadd (%p41_p1), [#allocation6], 4294953968 }
  0x30   : > { %5648 = dma.done.wait (%p41_p1), [#allocation9], 18432  }
  0x31   : > { %5650 = vsyncadd (%p41_p1), [#allocation9], 4294948864  ;;  %vm995_vm0 = vcmask 261120   ;;  %v4279_v0 = vld [vmem:[#allocation5 + $0x188] sm:$0xf]  ;;  %vm1724_vm1 = vcmask 1041409  }
  0x32   : > { %v5228_v1 = vld [vmem:[#allocation5 + $0x248] sm:$0xf0]  ;;  %v4281_v4 = vld [vmem:[#allocation5 + $0x24c] sm:$0xf0]  ;;  %v5205_v5 = vld [vmem:[#allocation5 + $0x194] sm:$0xf] }
  0x33   : > { %v5204_v2 = vld [vmem:[#allocation5 + $0x18c] sm:$0xf]  ;;  %v4280_v3 = vor.u32 %v5228_v1, %v4279_v0  ;;  %v4289_v6 = vld [vmem:[#allocation5 + $0x254] sm:$0xf0]  ;;  %v4083_v9 = vld [vmem:[#allocation5] sm:$0xf] }
  0x34   : > { %v4284_v7 = vor.u32 %v5204_v2, %v4281_v4  ;;  %v4292_v8 = vor.u32 %v5205_v5, %v4289_v6  ;;  %v5179_v10 = vld [vmem:[#allocation5 + $0xc0] sm:$0xf0]  ;;  %v4085_v13 = vld [vmem:[#allocation5 + $0xc4] sm:$0xf0]  ;;  %v289_v14 = vld [vmem:[%s241_s30] sm:$0x1] }
  0x35   : > { %v5155_v11 = vld [vmem:[#allocation5 + $0x4] sm:$0xf]  ;;  %1005 = vmatpush.bf16.msra.mxu0 %v4280_v3  ;;  %v4084_v12 = vor.u32 %v5179_v10, %v4083_v9  ;;  %v4287_v15 = vld [vmem:[#allocation5 + $0x190] sm:$0xf]  ;;  %v5229_v17 = vld [vmem:[#allocation5 + $0x250] sm:$0xf0]  ;;  %v5813_v25 = vpack.c.bf16 %v289_v14, %v289_v14 }
  0x36   : > { %1018 = vmatpush.bf16.msra.mxu1 %v4284_v7  ;;  %1044 = vmatpush.bf16.msra.mxu3 %v4292_v8  ;;  %v4088_v16 = vor.u32 %v5155_v11, %v4085_v13  ;;  %v5156_v18 = vld [vmem:[#allocation5 + $0xc] sm:$0xf]  ;;  %v4093_v19 = vld [vmem:[#allocation5 + $0xcc] sm:$0xf0]  ;;  %v4288_v20 = vor.u32 %v5229_v17, %v4287_v15  ;;  %v4091_v22 = vld [vmem:[#allocation5 + $0x8] sm:$0xf] }
  0x37   : > { %v4096_v21 = vor.u32 %v5156_v18, %v4093_v19  ;;  %v5180_v23 = vld [vmem:[#allocation5 + $0xc8] sm:$0xf0]  ;;  %v4303_v24 = vld [vmem:[#allocation5 + $0x1a0] sm:$0xf]  ;;  %v5231_v26 = vld [vmem:[#allocation5 + $0x260] sm:$0xf0] }
  0x38   : > { %v5207_v27 = vld [vmem:[#allocation5 + $0x1a4] sm:$0xf]  ;;  %v4305_v28 = vld [vmem:[#allocation5 + $0x264] sm:$0xf0]  ;;  %v4304_v29 = vor.u32 %v5231_v26, %v4303_v24  ;;  %v4295_v31 = vld [vmem:[#allocation5 + $0x198] sm:$0xf]  ;;  %v4092_v34 = vor.u32 %v5180_v23, %v4091_v22 }
  0x39   : > { %1006 = vmatpush.bf16.msra.mxu0 %v4084_v12  ;;  %v4308_v30 = vor.u32 %v5207_v27, %v4305_v28  ;;  %v5230_v32 = vld [vmem:[#allocation5 + $0x258] sm:$0xf0]  ;;  %v4297_v35 = vld [vmem:[#allocation5 + $0x25c] sm:$0xf0]  ;;  %v4107_v36 = vld [vmem:[#allocation5 + $0x18] sm:$0xf] }
  0x3a   : > { %v5206_v33 = vld [vmem:[#allocation5 + $0x19c] sm:$0xf]  ;;  %1019 = vmatpush.bf16.msra.mxu1 %v4088_v16  ;;  %1045 = vmatpush.bf16.msra.mxu3 %v4096_v21  ;;  %v4296_v38 = vor.u32 %v5230_v32, %v4295_v31  ;;  %v4109_v41 = vld [vmem:[#allocation5 + $0xdc] sm:$0xf0]  ;;  %v5157_v42 = vld [vmem:[#allocation5 + $0x14] sm:$0xf] }
  0x3b   : > { %v5182_v37 = vld [vmem:[#allocation5 + $0xd8] sm:$0xf0]  ;;  %1083 = vmatpush.bf16.msra.mxu2 %v4304_v29  ;;  %v4300_v39 = vor.u32 %v5206_v33, %v4297_v35  ;;  %v4101_v45 = vld [vmem:[#allocation5 + $0xd4] sm:$0xf0]  ;;  %v4099_v46 = vld [vmem:[#allocation5 + $0x10] sm:$0xf] }
  0x3c   : > { %v5158_v40 = vld [vmem:[#allocation5 + $0x1c] sm:$0xf]  ;;  %4473 = vmatmul.msk.bf16.vlgmr.msra.gmra.mxu0 %vm995_vm0, %v5813_v25  ;;  %v4108_v43 = vor.u32 %v5182_v37, %v4107_v36  ;;  %v5181_v47 = vld [vmem:[#allocation5 + $0xd0] sm:$0xf0]  ;;  %v4319_v48 = vld [vmem:[#allocation5 + $0x1b0] sm:$0xf]  ;;  %v4104_v53 = vor.u32 %v5157_v42, %v4101_v45 }
  0x3d   : > { %1031 = vmatpush.bf16.msrb.mxu0 %v4288_v20  ;;  %v4112_v44 = vor.u32 %v5158_v40, %v4109_v41  ;;  %4474 = vmatmul.msk.bf16.vlgmr.msra.gmra.mxu1 %vm995_vm0, %v5813_v25  ;;  %v5233_v49 = vld [vmem:[#allocation5 + $0x270] sm:$0xf0]  ;;  %v4321_v52 = vld [vmem:[#allocation5 + $0x274] sm:$0xf0]  ;;  %v5208_v55 = vld [vmem:[#allocation5 + $0x1ac] sm:$0xf]  ;;  %v4100_v58 = vor.u32 %v5181_v47, %v4099_v46 }
  0x3e   : > { %1096 = vmatpush.bf16.msrb.mxu3 %v4308_v30  ;;  %v5209_v50 = vld [vmem:[#allocation5 + $0x1b4] sm:$0xf]  ;;  %v4320_v51 = vor.u32 %v5233_v49, %v4319_v48  ;;  %1070 = vmatpush.bf16.msrb.mxu1 %v4300_v39  ;;  %v4313_v56 = vld [vmem:[#allocation5 + $0x26c] sm:$0xf0]  ;;  %v4123_v57 = vld [vmem:[#allocation5 + $0x28] sm:$0xf] }
  0x3f   : > { %4476 = vmatmul.msk.bf16.vlgmr.msra.gmra.mxu3 %vm995_vm0, %v5813_v25  ;;  %v4324_v54 = vor.u32 %v5209_v50, %v4321_v52  ;;  %1084 = vmatpush.bf16.msra.mxu2 %v4108_v43  ;;  %v4316_v59 = vor.u32 %v5208_v55, %v4313_v56  ;;  %v5184_v60 = vld [vmem:[#allocation5 + $0xe8] sm:$0xf0]  ;;  %v4125_v62 = vld [vmem:[#allocation5 + $0xec] sm:$0xf0]  ;;  %v5159_v1 = vld [vmem:[#allocation5 + $0x24] sm:$0xf] }
  0x40   : > { %v5160_v61 = vld [vmem:[#allocation5 + $0x2c] sm:$0xf]  ;;  %v4124_v63 = vor.u32 %v5184_v60, %v4123_v57  ;;  %v4117_v2 = vld [vmem:[#allocation5 + $0xe4] sm:$0xf0]  ;;  %v4335_v3 = vld [vmem:[#allocation5 + $0x1c0] sm:$0xf] }
  0x41   : > { %1032 = vmatpush.bf16.msrb.mxu0 %v4092_v34  ;;  %v4128_v0 = vor.u32 %v5160_v61, %v4125_v62  ;;  %v5235_v4 = vld [vmem:[#allocation5 + $0x280] sm:$0xf0]  ;;  %v4120_v6 = vor.u32 %v5159_v1, %v4117_v2  ;;  %v4311_v7 = vld [vmem:[#allocation5 + $0x1a8] sm:$0xf]  ;;  %v5232_v8 = vld [vmem:[#allocation5 + $0x268] sm:$0xf0] }
  0x42   : > { %1097 = vmatpush.bf16.msrb.mxu3 %v4112_v44  ;;  %4479 = vmatmul.msk.bf16.vlgmr.msra.gmra.mxu2 %vm995_vm0, %v5813_v25  ;;  %v4336_v5 = vor.u32 %v5235_v4, %v4335_v3  ;;  %v5211_v9 = vld [vmem:[#allocation5 + $0x1c4] sm:$0xf]  ;;  %v4337_v10 = vld [vmem:[#allocation5 + $0x284] sm:$0xf0]  ;;  %v4312_v11 = vor.u32 %v5232_v8, %v4311_v7  ;;  %v4115_v12 = vld [vmem:[#allocation5 + $0x20] sm:$0xf] }
  0x43   : > { %1135 = vmatpush.bf16.msrb.mxu2 %v4320_v51  ;;  %1071 = vmatpush.bf16.msrb.mxu1 %v4104_v53  ;;  %v5183_v13 = vld [vmem:[#allocation5 + $0xe0] sm:$0xf0]  ;;  %v4139_v14 = vld [vmem:[#allocation5 + $0x38] sm:$0xf]  ;;  %v5186_v15 = vld [vmem:[#allocation5 + $0xf8] sm:$0xf0]  ;;  %v4340_v16 = vor.u32 %v5211_v9, %v4337_v10 }
  0x44   : > { %v5210_v17 = vld [vmem:[#allocation5 + $0x1bc] sm:$0xf]  ;;  %v4329_v18 = vld [vmem:[#allocation5 + $0x27c] sm:$0xf0]  ;;  %v4140_v19 = vor.u32 %v5186_v15, %v4139_v14  ;;  %v4116_v23 = vor.u32 %v5183_v13, %v4115_v12  ;;  %v5161_v24 = vld [vmem:[#allocation5 + $0x34] sm:$0xf] }
  0x45   : > { %1057 = vmatpush.bf16.msra.mxu0 %v4296_v38  ;;  %v4332_v20 = vor.u32 %v5210_v17, %v4329_v18  ;;  %v5162_v21 = vld [vmem:[#allocation5 + $0x3c] sm:$0xf]  ;;  %v4141_v22 = vld [vmem:[#allocation5 + $0xfc] sm:$0xf0]  ;;  %v4133_v26 = vld [vmem:[#allocation5 + $0xf4] sm:$0xf0] }
  0x46   : > { %1148 = vmatpush.bf16.msra.mxu3 %v4324_v54  ;;  %v4144_v27 = vor.u32 %v5162_v21, %v4141_v22  ;;  %v4136_v28 = vor.u32 %v5161_v24, %v4133_v26  ;;  %v4351_v29 = vld [vmem:[#allocation5 + $0x1d0] sm:$0xf]  ;;  %v5237_v30 = vld [vmem:[#allocation5 + $0x290] sm:$0xf0]  ;;  %v4327_v32 = vld [vmem:[#allocation5 + $0x1b8] sm:$0xf] }
  0x47   : > { %1122 = vmatpush.bf16.msra.mxu1 %v4316_v59  ;;  %1136 = vmatpush.bf16.msrb.mxu2 %v4124_v63  ;;  %v4352_v31 = vor.u32 %v5237_v30, %v4351_v29  ;;  %v5234_v33 = vld [vmem:[#allocation5 + $0x278] sm:$0xf0]  ;;  %v5213_v34 = vld [vmem:[#allocation5 + $0x1d4] sm:$0xf]  ;;  %v4353_v35 = vld [vmem:[#allocation5 + $0x294] sm:$0xf0] }
  0x48   : > { %v4328_v36 = vor.u32 %v5234_v33, %v4327_v32  ;;  %v4131_v37 = vld [vmem:[#allocation5 + $0x30] sm:$0xf]  ;;  %v5185_v38 = vld [vmem:[#allocation5 + $0xf0] sm:$0xf0]  ;;  %v4155_v39 = vld [vmem:[#allocation5 + $0x48] sm:$0xf]  ;;  %v4356_v41 = vor.u32 %v5213_v34, %v4353_v35 }
  0x49   : > { %1058 = vmatpush.bf16.msra.mxu0 %v4100_v58  ;;  %v5188_v40 = vld [vmem:[#allocation5 + $0x108] sm:$0xf0]  ;;  %v4345_v43 = vld [vmem:[#allocation5 + $0x28c] sm:$0xf0]  ;;  %v4132_v48 = vor.u32 %v5185_v38, %v4131_v37  ;;  %v5163_v49 = vld [vmem:[#allocation5 + $0x44] sm:$0xf] }
  0x4a   : > { %1149 = vmatpush.bf16.msra.mxu3 %v4128_v0  ;;  %v5212_v42 = vld [vmem:[#allocation5 + $0x1cc] sm:$0xf]  ;;  %v4156_v44 = vor.u32 %v5188_v40, %v4155_v39  ;;  %v4157_v47 = vld [vmem:[#allocation5 + $0x10c] sm:$0xf0]  ;;  %v4149_v50 = vld [vmem:[#allocation5 + $0x104] sm:$0xf0] }
  0x4b   : > { %1187 = vmatpush.bf16.msra.mxu2 %v4336_v5  ;;  %1123 = vmatpush.bf16.msra.mxu1 %v4120_v6  ;;  %v4348_v45 = vor.u32 %v5212_v42, %v4345_v43  ;;  %v5164_v46 = vld [vmem:[#allocation5 + $0x4c] sm:$0xf]  ;;  %v4152_v52 = vor.u32 %v5163_v49, %v4149_v50  ;;  %v4367_v53 = vld [vmem:[#allocation5 + $0x1e0] sm:$0xf]  ;;  %v5239_v54 = vld [vmem:[#allocation5 + $0x2a0] sm:$0xf0] }
  0x4c   : > { %4475 = vmatmul.msk.bf16.vlgmr.msrb.gmra.mxu0 %vm995_vm0, %v5813_v25  ;;  %v4160_v51 = vor.u32 %v5164_v46, %v4157_v47  ;;  %v4368_v55 = vor.u32 %v5239_v54, %v4367_v53  ;;  %v4343_v56 = vld [vmem:[#allocation5 + $0x1c8] sm:$0xf]  ;;  %v5236_v57 = vld [vmem:[#allocation5 + $0x288] sm:$0xf0]  ;;  %v5215_v58 = vld [vmem:[#allocation5 + $0x1e4] sm:$0xf] }
  0x4d   : > { %4478 = vmatmul.msk.bf16.vlgmr.msrb.gmra.mxu1 %vm995_vm0, %v5813_v25  ;;  %1109 = vmatpush.bf16.msrb.mxu0 %v4312_v11  ;;  %v4369_v59 = vld [vmem:[#allocation5 + $0x2a4] sm:$0xf0]  ;;  %v4344_v60 = vor.u32 %v5236_v57, %v4343_v56  ;;  %v4147_v61 = vld [vmem:[#allocation5 + $0x40] sm:$0xf]  ;;  %v5187_v62 = vld [vmem:[#allocation5 + $0x100] sm:$0xf0] }
  0x4e   : > { %v4171_v63 = vld [vmem:[#allocation5 + $0x58] sm:$0xf]  ;;  %v5190_v0 = vld [vmem:[#allocation5 + $0x118] sm:$0xf0]  ;;  %v4372_v1 = vor.u32 %v5215_v58, %v4369_v59  ;;  %v4361_v3 = vld [vmem:[#allocation5 + $0x29c] sm:$0xf0]  ;;  %v4148_v8 = vor.u32 %v5187_v62, %v4147_v61 }
  0x4f   : > { %4480 = vmatmul.msk.bf16.vlgmr.msrb.gmra.mxu3 %vm995_vm0, %v5813_v25  ;;  %1174 = vmatpush.bf16.msrb.mxu1 %v4332_v20  ;;  %v5214_v2 = vld [vmem:[#allocation5 + $0x1dc] sm:$0xf]  ;;  %v4172_v4 = vor.u32 %v5190_v0, %v4171_v63  ;;  %v4173_v7 = vld [vmem:[#allocation5 + $0x11c] sm:$0xf0]  ;;  %v5165_v9 = vld [vmem:[#allocation5 + $0x54] sm:$0xf] }
  0x50   : > { %1200 = vmatpush.bf16.msrb.mxu3 %v4340_v16  ;;  %1188 = vmatpush.bf16.msra.mxu2 %v4140_v19  ;;  %v4364_v5 = vor.u32 %v5214_v2, %v4361_v3  ;;  %v5166_v6 = vld [vmem:[#allocation5 + $0x5c] sm:$0xf]  ;;  %v4165_v10 = vld [vmem:[#allocation5 + $0x114] sm:$0xf0]  ;;  %v4163_v16 = vld [vmem:[#allocation5 + $0x50] sm:$0xf] }
  0x51   : > { %1110 = vmatpush.bf16.msrb.mxu0 %v4116_v23  ;;  %v4176_v11 = vor.u32 %v5166_v6, %v4173_v7  ;;  %v4168_v12 = vor.u32 %v5165_v9, %v4165_v10  ;;  %v4359_v13 = vld [vmem:[#allocation5 + $0x1d8] sm:$0xf]  ;;  %v5238_v14 = vld [vmem:[#allocation5 + $0x298] sm:$0xf0]  ;;  %v5189_v17 = vld [vmem:[#allocation5 + $0x110] sm:$0xf0] }
  0x52   : > { %4483 = vmatmul.msk.bf16.vlgmr.msrb.gmra.mxu2 %vm995_vm0, %v5813_v25  ;;  %v4360_v15 = vor.u32 %v5238_v14, %v4359_v13  ;;  %v5216_v18 = vld [vmem:[#allocation5 + $0x1ec] sm:$0xf]  ;;  %v4377_v19 = vld [vmem:[#allocation5 + $0x2ac] sm:$0xf0]  ;;  %v4164_v22 = vor.u32 %v5189_v17, %v4163_v16  ;;  %v5241_v23 = vld [vmem:[#allocation5 + $0x2b0] sm:$0xf0] }
  0x53   : > { %1175 = vmatpush.bf16.msrb.mxu1 %v4136_v28  ;;  %v4380_v20 = vor.u32 %v5216_v18, %v4377_v19  ;;  %v4383_v21 = vld [vmem:[#allocation5 + $0x1f0] sm:$0xf]  ;;  %v5217_v24 = vld [vmem:[#allocation5 + $0x1f4] sm:$0xf]  ;;  %v4385_v26 = vld [vmem:[#allocation5 + $0x2b4] sm:$0xf0] }
  0x54   : > { %1201 = vmatpush.bf16.msrb.mxu3 %v4144_v27  ;;  %1239 = vmatpush.bf16.msrb.mxu2 %v4352_v31  ;;  %v4384_v27 = vor.u32 %v5241_v23, %v4383_v21  ;;  %v4388_v28 = vor.u32 %v5217_v24, %v4385_v26  ;;  %v5167_v29 = vld [vmem:[#allocation5 + $0x64] sm:$0xf]  ;;  %v4181_v30 = vld [vmem:[#allocation5 + $0x124] sm:$0xf0]  ;;  %v5192_v33 = vld [vmem:[#allocation5 + $0x128] sm:$0xf0] }
  0x55   : > { %v4187_v31 = vld [vmem:[#allocation5 + $0x68] sm:$0xf]  ;;  %v4184_v32 = vor.u32 %v5167_v29, %v4181_v30  ;;  %v5168_v34 = vld [vmem:[#allocation5 + $0x6c] sm:$0xf]  ;;  %v4189_v35 = vld [vmem:[#allocation5 + $0x12c] sm:$0xf0] }
  0x56   : > { %v4192_v37 = vor.u32 %v5168_v34, %v4189_v35  ;;  %v4375_v38 = vld [vmem:[#allocation5 + $0x1e8] sm:$0xf]  ;;  %v5240_v39 = vld [vmem:[#allocation5 + $0x2a8] sm:$0xf0]  ;;  %v5191_v42 = vld [vmem:[#allocation5 + $0x120] sm:$0xf0] }
  0x57   : > { %v4376_v40 = vor.u32 %v5240_v39, %v4375_v38  ;;  %v5218_v43 = vld [vmem:[#allocation5 + $0x1fc] sm:$0xf]  ;;  %v4399_v46 = vld [vmem:[#allocation5 + $0x200] sm:$0xf]  ;;  %v5219_v49 = vld [vmem:[#allocation5 + $0x204] sm:$0xf] }
  0x58   : > { %1240 = vmatpush.bf16.msrb.mxu2 %v4156_v44  ;;  %v4393_v44 = vld [vmem:[#allocation5 + $0x2bc] sm:$0xf0]  ;;  %v4401_v50 = vld [vmem:[#allocation5 + $0x2c4] sm:$0xf0]  ;;  %v5169_v53 = vld [vmem:[#allocation5 + $0x74] sm:$0xf] }
  0x59   : > { %v4197_v54 = vld [vmem:[#allocation5 + $0x134] sm:$0xf0]  ;;  %v5194_v57 = vld [vmem:[#allocation5 + $0x138] sm:$0xf0]  ;;  %v4205_v59 = vld [vmem:[#allocation5 + $0x13c] sm:$0xf0] }
  0x5a   : > { %v4200_v56 = vor.u32 %v5169_v53, %v4197_v54  ;;  %v5170_v58 = vld [vmem:[#allocation5 + $0x7c] sm:$0xf]  ;;  %v4391_v62 = vld [vmem:[#allocation5 + $0x1f8] sm:$0xf]  ;;  %v5193_v2 = vld [vmem:[#allocation5 + $0x130] sm:$0xf0] }
  0x5b   : > { %v4208_v61 = vor.u32 %v5170_v58, %v4205_v59  ;;  %v5242_v63 = vld [vmem:[#allocation5 + $0x2b8] sm:$0xf0]  ;;  %v5674_v3 = vmov 0   ;;  %v4415_v7 = vld [vmem:[#allocation5 + $0x210] sm:$0xf]  ;;  %vm1744_vm6 = vcmask 1042434  }
  0x5c   : > { %4477 = vmatmul.msk.bf16.vlgmr.msra.gmra.mxu0 %vm995_vm0, %v5813_v25  ;;  %v4392_v0 = vor.u32 %v5242_v63, %v4391_v62  ;;  %1711 = vst [vmem:[#allocation2 + $0x4] sm:$0xf] %v5674_v3  ;;  %v5171_v14 = vld [vmem:[#allocation5 + $0x84] sm:$0xf]  ;;  %v4219_v17 = vld [vmem:[#allocation5 + $0x88] sm:$0xf] }
  0x5d   : > { %4482 = vmatmul.msk.bf16.vlgmr.msra.gmra.mxu1 %vm995_vm0, %v5813_v25  ;;  %1161 = vmatpush.bf16.msra.mxu0 %v4328_v36  ;;  %v4188_v36 = vor.u32 %v5192_v33, %v4187_v31  ;;  %1710 = vst [vmem:[#allocation2] sm:$0xf] %v5674_v3  ;;  %v5196_v18 = vld [vmem:[#allocation5 + $0x148] sm:$0xf0]  ;;  %v4221_v21 = vld [vmem:[#allocation5 + $0x14c] sm:$0xf0] }
  0x5e   : > { %1226 = vmatpush.bf16.msra.mxu1 %v4348_v45  ;;  %v4396_v45 = vor.u32 %v5218_v43, %v4393_v44  ;;  %1712 = vst [vmem:[#allocation2 + $0x8] sm:$0xf] %v5674_v3  ;;  %v4220_v19 = vor.u32 %v5196_v18, %v4219_v17  ;;  %v4407_v23 = vld [vmem:[#allocation5 + $0x208] sm:$0xf]  ;;  %v5244_v24 = vld [vmem:[#allocation5 + $0x2c8] sm:$0xf0] }
  0x5f   : > { %4484 = vmatmul.msk.bf16.vlgmr.msra.gmra.mxu3 %vm995_vm0, %v5813_v25  ;;  %1713 = vst [vmem:[#allocation2 + $0xc] sm:$0xf] %v5674_v3  ;;  %v4408_v26 = vor.u32 %v5244_v24, %v4407_v23  ;;  %v5222_v29 = vld [vmem:[#allocation5 + $0x21c] sm:$0xf]  ;;  %v4425_v30 = vld [vmem:[#allocation5 + $0x2dc] sm:$0xf0] }
  0x60   : > { %1252 = vmatpush.bf16.msra.mxu3 %v4356_v41  ;;  %v4179_v41 = vld [vmem:[#allocation5 + $0x60] sm:$0xf]  ;;  %1714 = vst [vmem:[#allocation2 + $0x10] sm:$0xf] %v5674_v3  ;;  %v4428_v31 = vor.u32 %v5222_v29, %v4425_v30  ;;  %v5247_v33 = vld [vmem:[#allocation5 + $0x2e0] sm:$0xf0] }
  0x61   : > { %1162 = vmatpush.bf16.msra.mxu0 %v4132_v48  ;;  %v4180_v47 = vor.u32 %v5191_v42, %v4179_v41  ;;  %v5243_v48 = vld [vmem:[#allocation5 + $0x2c0] sm:$0xf0]  ;;  %1715 = vst [vmem:[#allocation2 + $0x14] sm:$0xf] %v5674_v3  ;;  %v5173_v39 = vld [vmem:[#allocation5 + $0x94] sm:$0xf] }
  0x62   : > { %1227 = vmatpush.bf16.msra.mxu1 %v4152_v52  ;;  %4487 = vmatmul.msk.bf16.vlgmr.msra.gmra.mxu2 %vm995_vm0, %v5813_v25  ;;  %v4404_v52 = vor.u32 %v5219_v49, %v4401_v50  ;;  %1716 = vst [vmem:[#allocation2 + $0x18] sm:$0xf] %v5674_v3  ;;  %v5223_v34 = vld [vmem:[#allocation5 + $0x224] sm:$0xf]  ;;  %v4235_v42 = vld [vmem:[#allocation5 + $0x98] sm:$0xf] }
  0x63   : > { %1291 = vmatpush.bf16.msra.mxu2 %v4368_v55  ;;  %v4203_v55 = vld [vmem:[#allocation5 + $0x78] sm:$0xf]  ;;  %1717 = vst [vmem:[#allocation2 + $0x1c] sm:$0xf] %v5674_v3  ;;  %v5198_v43 = vld [vmem:[#allocation5 + $0x158] sm:$0xf0] }
  0x64   : > { %1253 = vmatpush.bf16.msra.mxu3 %v4160_v51  ;;  %v4400_v51 = vor.u32 %v5243_v48, %v4399_v46  ;;  %1718 = vst [vmem:[#allocation2 + $0x20] sm:$0xf] %v5674_v3  ;;  %v4236_v44 = vor.u32 %v5198_v43, %v4235_v42  ;;  %v4237_v46 = vld [vmem:[#allocation5 + $0x15c] sm:$0xf0]  ;;  %v4423_v50 = vld [vmem:[#allocation5 + $0x218] sm:$0xf] }
  0x65   : > { %1719 = vst [vmem:[#allocation2 + $0x24] sm:$0xf] %v5674_v3  ;;  %v5197_v58 = vld [vmem:[#allocation5 + $0x150] sm:$0xf0]  ;;  %vm1725_vm2 = vsmask.f32 1280 }
  0x66   : > { %1720 = vst [vmem:[#allocation2 + $0x28] sm:$0xf] %v5674_v3  ;;  %v5249_v3 = vld [vmem:[#allocation5 + $0x2f0] sm:$0xf0]  ;;  %vm5890_vm3 = vmand %vm1724_vm1, %vm1725_vm2  ;;  %v4251_v17 = vld [vmem:[#allocation5 + $0xa8] sm:$0xf] }
  0x67   : > { %1292 = vmatpush.bf16.msra.mxu2 %v4172_v4  ;;  %v5220_v4 = vld [vmem:[#allocation5 + $0x20c] sm:$0xf]  ;;  %vm1736_vm4 = vsmask.f32 7942  ;;  %v4243_v42 = vld [vmem:[#allocation5 + $0xa0] sm:$0xf] }
  0x68   : > { %vm5901_vm5 = vmand %vm1724_vm1, %vm1736_vm4  ;;  %v5199_v43 = vld [vmem:[#allocation5 + $0x160] sm:$0xf0]  ;;  %vm1745_vm7 = vsmask.f32 2304  ;;  %vm1781_vm9 = vcmask 1040384   ;;  %vm1764_vm14 = vcmask 1043459  }
  0x69   : > { %vm5916_vm8 = vmand %vm1744_vm6, %vm1745_vm7  ;;  %vm1782_vm10 = vsmask.f32 256  ;;  %vm1756_vm11 = vsmask.f32 7946  ;;  %vm1765_vm15 = vsmask.f32 3328 }
  0x6a   : > { %vm5928_vm12 = vmand %vm1781_vm9, %vm1782_vm10  ;;  %vm1776_vm2 = vsmask.f32 7950  ;;  %vm2487_vm10 = vcmask 1046528   ;;  %p283_p1 = scmp.lt.s32.totalorder %s5729_s25, 1 }
  0x6b   : > { %vm5936_vm13 = vmand %vm1744_vm6, %vm1756_vm11  ;;  %vm1834_vm6 = vsmask.f32 7938 }
  0x6c   : > { %4481 = vmatmul.msk.bf16.vlgmr.msrb.gmra.mxu0 %vm995_vm0, %v5813_v25  ;;  %vm5954_vm1 = vmand %vm1764_vm14, %vm1765_vm15  ;;  %s6753_s25 = smov (!%p283_p1, %s5729_s25), 1 }
  0x6d   : > { %4486 = vmatmul.msk.bf16.vlgmr.msrb.gmra.mxu1 %vm995_vm0, %v5813_v25  ;;  %1213 = vmatpush.bf16.msrb.mxu0 %v4344_v60  ;;  %v4204_v60 = vor.u32 %v5194_v57, %v4203_v55  ;;  %v4227_v57 = vld [vmem:[#allocation5 + $0x90] sm:$0xf]  ;;  %vm5965_vm4 = vmand %vm1764_vm14, %vm1776_vm2  ;;  %s5154_s6 = sshll.u32 %s6753_s25, 6 }
  0x6e   : > { %1278 = vmatpush.bf16.msrb.mxu1 %v4364_v5  ;;  %v4409_v5 = vld [vmem:[#allocation5 + $0x2cc] sm:$0xf0]  ;;  %vm6006_vm7 = vmand %vm1781_vm9, %vm1834_vm6  ;;  %vm3755_vm9 = vcmask 1045504   ;;  %s6651_s9 = scalar_lea.vmem %s6727_s5, %s5154_s6 }
  0x6f   : > { %4488 = vmatmul.msk.bf16.vlgmr.msrb.gmra.mxu3 %vm995_vm0, %v5813_v25  ;;  %v4412_v6 = vor.u32 %v5220_v4, %v4409_v5 }
  0x70   : > { %1304 = vmatpush.bf16.msrb.mxu3 %v4372_v1  ;;  %v4195_v1 = vld [vmem:[#allocation5 + $0x70] sm:$0xf] }
  0x71   : > { %1214 = vmatpush.bf16.msrb.mxu0 %v4148_v8  ;;  %v5245_v8 = vld [vmem:[#allocation5 + $0x2d0] sm:$0xf0]  ;;  %v4196_v9 = vor.u32 %v5193_v2, %v4195_v1  ;;  %v4447_v2 = vld [vmem:[#allocation5 + $0x230] sm:$0xf] }
  0x72   : > { %1279 = vmatpush.bf16.msrb.mxu1 %v4168_v12  ;;  %4491 = vmatmul.msk.bf16.vlgmr.msrb.gmra.mxu2 %vm995_vm0, %v5813_v25  ;;  %v4416_v10 = vor.u32 %v5245_v8, %v4415_v7  ;;  %v4417_v12 = vld [vmem:[#allocation5 + $0x2d4] sm:$0xf0]  ;;  %v4448_v5 = vor.u32 %v5249_v3, %v4447_v2  ;;  %v5175_v8 = vld [vmem:[#allocation5 + $0xa4] sm:$0xf]  ;;  %v4463_v3 = vld [vmem:[#allocation5 + $0x240] sm:$0xf] }
  0x73   : > { %1343 = vmatpush.bf16.msrb.mxu2 %v4384_v27  ;;  %v4211_v27 = vld [vmem:[#allocation5 + $0x80] sm:$0xf]  ;;  %v4449_v7 = vld [vmem:[#allocation5 + $0x2f4] sm:$0xf0] }
  0x74   : > { %1305 = vmatpush.bf16.msrb.mxu3 %v4176_v11  ;;  %v5221_v11 = vld [vmem:[#allocation5 + $0x214] sm:$0xf] }
  0x75   : > { %v4420_v13 = vor.u32 %v5221_v11, %v4417_v12 }
  0x77   : > { %1344 = vmatpush.bf16.msrb.mxu2 %v4188_v36 }
  0x7c   : > { %4485 = vmatmul.msk.bf16.vlgmr.msra.gmra.mxu0 %vm995_vm0, %v5813_v25 }
  0x7d   : > { %4490 = vmatmul.msk.bf16.vlgmr.msra.gmra.mxu1 %vm995_vm0, %v5813_v25  ;;  %1265 = vmatpush.bf16.msra.mxu0 %v4360_v15  ;;  %v4213_v15 = vld [vmem:[#allocation5 + $0x144] sm:$0xf0] }
  0x7e   : > { %1330 = vmatpush.bf16.msra.mxu1 %v4380_v20  ;;  %v4216_v16 = vor.u32 %v5171_v14, %v4213_v15  ;;  %v5172_v20 = vld [vmem:[#allocation5 + $0x8c] sm:$0xf] }
  0x7f   : > { %4492 = vmatmul.msk.bf16.vlgmr.msra.gmra.mxu3 %vm995_vm0, %v5813_v25 }
  0x80   : > { %1356 = vmatpush.bf16.msra.mxu3 %v4388_v28  ;;  %v5195_v28 = vld [vmem:[#allocation5 + $0x140] sm:$0xf0] }
  0x81   : > { %1266 = vmatpush.bf16.msra.mxu0 %v4164_v22  ;;  %v4224_v22 = vor.u32 %v5172_v20, %v4221_v21  ;;  %v4212_v35 = vor.u32 %v5195_v28, %v4211_v27  ;;  %v5200_v20 = vld [vmem:[#allocation5 + $0x168] sm:$0xf0] }
  0x82   : > { %1331 = vmatpush.bf16.msra.mxu1 %v4184_v32  ;;  %4495 = vmatmul.msk.bf16.vlgmr.msra.gmra.mxu2 %vm995_vm0, %v5813_v25  ;;  %v4431_v32 = vld [vmem:[#allocation5 + $0x220] sm:$0xf]  ;;  %v5176_v21 = vld [vmem:[#allocation5 + $0xac] sm:$0xf]  ;;  %v4252_v24 = vor.u32 %v5200_v20, %v4251_v17  ;;  %v1793_v17 = vld [vmem:[#allocation2 + $0x8] sm:$0x2] }
  0x83   : > { %1395 = vmatpush.bf16.msra.mxu2 %v4400_v51  ;;  %v4432_v36 = vor.u32 %v5247_v33, %v4431_v32  ;;  %v5246_v51 = vld [vmem:[#allocation5 + $0x2d8] sm:$0xf0]  ;;  %v5248_v32 = vld [vmem:[#allocation5 + $0x2e8] sm:$0xf0] }
  0x84   : > { %1357 = vmatpush.bf16.msra.mxu3 %v4192_v37  ;;  %v4433_v37 = vld [vmem:[#allocation5 + $0x2e4] sm:$0xf0]  ;;  %v4424_v54 = vor.u32 %v5246_v51, %v4423_v50 }
  0x85   : > { %v4436_v38 = vor.u32 %v5223_v34, %v4433_v37 }
  0x87   : > { %1396 = vmatpush.bf16.msra.mxu2 %v4204_v60  ;;  %v5224_v60 = vld [vmem:[#allocation5 + $0x22c] sm:$0xf] }
  0x8c   : > { %4489 = vmatmul.msk.bf16.vlgmr.msrb.gmra.mxu0 %vm995_vm0, %v5813_v25 }
  0x8d   : > { %4494 = vmatmul.msk.bf16.vlgmr.msrb.gmra.mxu1 %vm995_vm0, %v5813_v25  ;;  %1317 = vmatpush.bf16.msrb.mxu0 %v4376_v40  ;;  %v4229_v40 = vld [vmem:[#allocation5 + $0x154] sm:$0xf0] }
  0x8e   : > { %1382 = vmatpush.bf16.msrb.mxu1 %v4396_v45  ;;  %v4232_v41 = vor.u32 %v5173_v39, %v4229_v40  ;;  %v5174_v45 = vld [vmem:[#allocation5 + $0x9c] sm:$0xf] }
  0x8f   : > { %4496 = vmatmul.msk.bf16.vlgmr.msrb.gmra.mxu3 %vm995_vm0, %v5813_v25  ;;  %v4240_v48 = vor.u32 %v5174_v45, %v4237_v46 }
  0x90   : > { %1408 = vmatpush.bf16.msrb.mxu3 %v4404_v52 }
  0x91   : > { %1318 = vmatpush.bf16.msrb.mxu0 %v4180_v47  ;;  %v5877_v47 = vld [vmem:[#allocation7] sm:$0xff] }
  0x92   : > { %1383 = vmatpush.bf16.msrb.mxu1 %v4200_v56  ;;  %4499 = vmatmul.msk.bf16.vlgmr.msrb.gmra.mxu2 %vm995_vm0, %v5813_v25  ;;  %v897_v49 = vperm.slane %v5877_v47, 0  ;;  %v898_v52 = vperm.slane %v5877_v47, 1  ;;  %v900_v14 = vperm.slane %v5877_v47, 3  ;;  %v899_v29 = vperm.slane %v5877_v47, 2 }
  0x93   : > { %1447 = vmatpush.bf16.msrb.mxu2 %v4416_v10  ;;  %v1727_v10 = vld [vmem:[#allocation2 + $0x4] sm:$0x2]  ;;  %v904_v51 = vperm.slane %v5877_v47, 7 }
  0x94   : > { %1409 = vmatpush.bf16.msrb.mxu3 %v4208_v61  ;;  %v4441_v61 = vld [vmem:[#allocation5 + $0x2ec] sm:$0xf0] }
  0x95   : > { %v4444_v1 = vor.u32 %v5224_v60, %v4441_v61 }
  0x97   : > { %1448 = vmatpush.bf16.msrb.mxu2 %v4220_v19 }
  0x9c   : > { %4493 = vmatmul.msk.bf16.vlgmr.msra.gmra.mxu0 %vm995_vm0, %v5813_v25 }
  0x9d   : > { %4498 = vmatmul.msk.bf16.vlgmr.msra.gmra.mxu1 %vm995_vm0, %v5813_v25  ;;  %1369 = vmatpush.bf16.msra.mxu0 %v4392_v0  ;;  %v4228_v0 = vor.u32 %v5197_v58, %v4227_v57  ;;  %v902_v57 = vperm.slane %v5877_v47, 5 }
  0x9e   : > { %1434 = vmatpush.bf16.msra.mxu1 %v4412_v6  ;;  %v5225_v6 = vld [vmem:[#allocation5 + $0x234] sm:$0xf] }
  0x9f   : > { %4500 = vmatmul.msk.bf16.vlgmr.msra.gmra.mxu3 %vm995_vm0, %v5813_v25  ;;  %v4452_v11 = vor.u32 %v5225_v6, %v4449_v7  ;;  %v5227_v7 = vld [vmem:[#allocation5 + $0x244] sm:$0xf] }
  0xa0   : > { %1460 = vmatpush.bf16.msra.mxu3 %v4420_v13 }
  0xa1   : > { %1370 = vmatpush.bf16.msra.mxu0 %v4196_v9 }
  0xa2   : > { %1435 = vmatpush.bf16.msra.mxu1 %v4216_v16  ;;  %4503 = vmatmul.msk.bf16.vlgmr.msra.gmra.mxu2 %vm995_vm0, %v5813_v25  ;;  %v4245_v16 = vld [vmem:[#allocation5 + $0x164] sm:$0xf0] }
  0xa3   : > { %1499 = vmatpush.bf16.msra.mxu2 %v4432_v36  ;;  %v4248_v19 = vor.u32 %v5175_v8, %v4245_v16  ;;  %v903_v36 = vperm.slane %v5877_v47, 6  ;;  %v4465_v8 = vld [vmem:[#allocation5 + $0x304] sm:$0xf0] }
  0xa4   : > { %1461 = vmatpush.bf16.msra.mxu3 %v4224_v22  ;;  %v4253_v22 = vld [vmem:[#allocation5 + $0x16c] sm:$0xf0]  ;;  %v4468_v16 = vor.u32 %v5227_v7, %v4465_v8 }
  0xa7   : > { %1500 = vmatpush.bf16.msra.mxu2 %v4236_v44 }
  0xac   : > { %4497 = vmatmul.msk.bf16.vlgmr.msrb.gmra.mxu0 %vm995_vm0, %v5813_v25 }
  0xad   : > { %4502 = vmatmul.msk.bf16.vlgmr.msrb.gmra.mxu1 %vm995_vm0, %v5813_v25  ;;  %1421 = vmatpush.bf16.msrb.mxu0 %v4408_v26  ;;  %v4256_v26 = vor.u32 %v5176_v21, %v4253_v22 }
  0xae   : > { %1486 = vmatpush.bf16.msrb.mxu1 %v4428_v31  ;;  %v4439_v31 = vld [vmem:[#allocation5 + $0x228] sm:$0xf] }
  0xaf   : > { %4504 = vmatmul.msk.bf16.vlgmr.msrb.gmra.mxu3 %vm995_vm0, %v5813_v25  ;;  %v4440_v37 = vor.u32 %v5248_v32, %v4439_v31 }
  0xb0   : > { %1512 = vmatpush.bf16.msrb.mxu3 %v4436_v38 }
  0xb1   : > { %1422 = vmatpush.bf16.msrb.mxu0 %v4212_v35 }
  0xb2   : > { %1487 = vmatpush.bf16.msrb.mxu1 %v4232_v41  ;;  %4507 = vmatmul.msk.bf16.vlgmr.msrb.gmra.mxu2 %vm995_vm0, %v5813_v25 }
  0xb3   : > { %1551 = vmatpush.bf16.msrb.mxu2 %v4448_v5 }
  0xb4   : > { %1513 = vmatpush.bf16.msrb.mxu3 %v4240_v48  ;;  %v4244_v48 = vor.u32 %v5199_v43, %v4243_v42 }
  0xb7   : > { %1552 = vmatpush.bf16.msrb.mxu2 %v4252_v24 }
  0xb9   : > { %v1008_v53 = vpop.f32.mrf.mxu0 }
  0xba   : > { %v1009_v55 = vadd.f32 %v1008_v53, %v897_v49  ;;  %v1021_v56 = vpop.f32.mrf.mxu1  ;;  %v4692_v53 = vld [vmem:[#allocation8 + $0x118] sm:$0xf0] }
  0xbb   : > { %v1022_v59 = vadd.f32 %v1021_v56, %v898_v52 }
  0xbc   : > { %v1636_v62 = vmax.f32 %v1009_v55, 0.0  ;;  %4501 = vmatmul.msk.bf16.vlgmr.msra.gmra.mxu0 %vm995_vm0, %v5813_v25 }
  0xbd   : > { %v1637_v63 = vmax.f32 %v1022_v59, 0.0  ;;  %4506 = vmatmul.msk.bf16.vlgmr.msra.gmra.mxu1 %vm995_vm0, %v5813_v25  ;;  %1473 = vmatpush.bf16.msra.mxu0 %v4424_v54  ;;  %v1747_v54 = vld [vmem:[#allocation2 + $0x4] sm:$0x4] }
  0xbe   : > { %1538 = vmatpush.bf16.msra.mxu1 %v4444_v1 }
  0xbf   : > { %4508 = vmatmul.msk.bf16.vlgmr.msra.gmra.mxu3 %vm995_vm0, %v5813_v25  ;;  %v1685_v4 = vpack.c.bf16 %v1637_v63, %v1636_v62  ;;  %v1784_v63 = vld [vmem:[#allocation2 + $0x8] sm:$0x1] }
  0xc0   : > { %1564 = vmatpush.bf16.msra.mxu3 %v4452_v11 }
  0xc1   : > { %v1722_v12 = vrot.slane %v1685_v4, 7  ;;  %v1010_v13 = vpop.f32.mrf.mxu0  ;;  %1474 = vmatpush.bf16.msra.mxu0 %v4228_v0  ;;  %v1731_v27 = vshll.u32 %v1685_v4, 16  ;;  %v5923_v0 = vld [vmem:[#allocation7 + $0x8] sm:$0xff]  ;;  %v5251_v4 = vld [vmem:[#allocation5 + $0x300] sm:$0xf0] }
  0xc2   : > { %v1047_v15 = vpop.f32.mrf.mxu3  ;;  %v1023_v18 = vpop.f32.mrf.mxu1  ;;  %4511 = vmatmul.msk.bf16.vlgmr.msra.gmra.mxu2 %vm995_vm0, %v5813_v25  ;;  %1539 = vmatpush.bf16.msra.mxu1 %v4248_v19  ;;  %v4464_v6 = vor.u32 %v5251_v4, %v4463_v3  ;;  %v905_v8 = vperm.slane %v5923_v0, 0 }
  0xc3   : > { %v1728_v23 = vsel %vm5890_vm3, %v1722_v12, %v1727_v10  ;;  %v1048_v28 = vadd.f32 %v1047_v15, %v900_v14  ;;  %v4522_v38 = vrot.slane %v1731_v27, 11  ;;  %v901_v12 = vperm.slane %v5877_v47, 4  ;;  %v4455_v14 = vld [vmem:[#allocation5 + $0x238] sm:$0xf]  ;;  %v5250_v15 = vld [vmem:[#allocation5 + $0x2f8] sm:$0xf0] }
  0xc4   : > { %1729 = vst [vmem:[#allocation2 + $0x4] sm:$0x2] %v1728_v23  ;;  %1565 = vmatpush.bf16.msra.mxu3 %v4256_v26  ;;  %v907_v18 = vperm.slane %v5923_v0, 2  ;;  %1603 = vmatpush.bf16.msra.mxu2 %v4464_v6  ;;  %v4267_v47 = vld [vmem:[#allocation5 + $0xb8] sm:$0xf]  ;;  %v4456_v27 = vor.u32 %v5250_v15, %v4455_v14 }
  0xc5   : > { %v1086_v30 = vpop.f32.mrf.mxu2  ;;  %v1639_v39 = vmax.f32 %v1048_v28, 0.0  ;;  %v5202_v23 = vld [vmem:[#allocation5 + $0x178] sm:$0xf0]  ;;  %v4259_v28 = vld [vmem:[#allocation5 + $0xb0] sm:$0xf] }
  0xc6   : > { %v1087_v50 = vadd.f32 %v1086_v30, %v903_v36  ;;  %v4268_v30 = vor.u32 %v5202_v23, %v4267_v47  ;;  %v4610_v47 = vld [vmem:[#allocation8 + $0xf0] sm:$0xf] }
  0xc8   : > { %v1642_v60 = vmax.f32 %v1087_v50, 0.0  ;;  %1604 = vmatpush.bf16.msra.mxu2 %v4268_v30 }
  0xc9   : > { %v1034_v34 = vpop.f32.mrf.mxu0 }
  0xca   : > { %v1049_v35 = vpop.f32.mrf.mxu3  ;;  %v1035_v40 = vadd.f32 %v1034_v34, %v899_v29  ;;  %v1073_v41 = vpop.f32.mrf.mxu1  ;;  %v5201_v29 = vld [vmem:[#allocation5 + $0x170] sm:$0xf0] }
  0xcb   : > { %v1738_v44 = vld [vmem:[#allocation2 + $0x4] sm:$0x2]  ;;  %v1074_v10 = vadd.f32 %v1073_v41, %v902_v57  ;;  %v4457_v41 = vld [vmem:[#allocation5 + $0x2fc] sm:$0xf0] }
  0xcc   : > { %v1739_v45 = vsel %vm5901_vm5, %v4522_v38, %v1738_v44  ;;  %v1638_v46 = vmax.f32 %v1035_v40, 0.0  ;;  %4505 = vmatmul.msk.bf16.vlgmr.msrb.gmra.mxu0 %vm995_vm0, %v5813_v25  ;;  %v5226_v40 = vld [vmem:[#allocation5 + $0x23c] sm:$0xf]  ;;  %v4260_v44 = vor.u32 %v5201_v29, %v4259_v28  ;;  %v4275_v28 = vld [vmem:[#allocation5 + $0xc0] sm:$0xf] }
  0xcd   : > { %1740 = vst [vmem:[#allocation2 + $0x4] sm:$0x2] %v1739_v45  ;;  %4510 = vmatmul.msk.bf16.vlgmr.msrb.gmra.mxu1 %vm995_vm0, %v5813_v25  ;;  %1525 = vmatpush.bf16.msrb.mxu0 %v4440_v37  ;;  %v1088_v52 = vpop.f32.mrf.mxu2  ;;  %v1641_v32 = vmax.f32 %v1074_v10, 0.0  ;;  %v5178_v37 = vld [vmem:[#allocation5 + $0xbc] sm:$0xf] }
  0xce   : > { %v1686_v49 = vpack.c.bf16 %v1639_v39, %v1638_v46  ;;  %v4269_v39 = vld [vmem:[#allocation5 + $0x17c] sm:$0xf0]  ;;  %v4460_v46 = vor.u32 %v5226_v40, %v4457_v41  ;;  %v5203_v29 = vld [vmem:[#allocation5 + $0x180] sm:$0xf0] }
  0xcf   : > { %4512 = vmatmul.msk.bf16.vlgmr.msrb.gmra.mxu3 %vm995_vm0, %v5813_v25  ;;  %v4272_v45 = vor.u32 %v5178_v37, %v4269_v39  ;;  %v1799_v37 = vld [vmem:[#allocation2 + $0x8] sm:$0x4]  ;;  %v4612_v39 = vld [vmem:[#allocation8 + $0xf8] sm:$0xf0] }
  0xd0   : > { %v1742_v55 = vrot.slane %v1686_v49, 6  ;;  %v1751_v1 = vshll.u32 %v1686_v49, 16  ;;  %1616 = vmatpush.bf16.msrb.mxu3 %v4468_v16  ;;  %v1767_v49 = vld [vmem:[#allocation2 + $0x4] sm:$0x8]  ;;  %1590 = vmatpush.bf16.msrb.mxu1 %v4460_v46  ;;  %v5285_v46 = vld [vmem:[#allocation8 + $0xe4] sm:$0xf0] }
  0xd1   : > { %v1036_v56 = vpop.f32.mrf.mxu0  ;;  %1526 = vmatpush.bf16.msrb.mxu0 %v4244_v48 }
  0xd2   : > { %v1099_v58 = vpop.f32.mrf.mxu3  ;;  %v1748_v59 = vsel %vm5916_vm8, %v1742_v55, %v1747_v54  ;;  %v1075_v62 = vpop.f32.mrf.mxu1  ;;  %4515 = vmatmul.msk.bf16.vlgmr.msrb.gmra.mxu2 %vm995_vm0, %v5813_v25  ;;  %v4523_v19 = vrot.slane %v1751_v1, 10  ;;  %v5177_v55 = vld [vmem:[#allocation5 + $0xb4] sm:$0xf]  ;;  %v4261_v56 = vld [vmem:[#allocation5 + $0x174] sm:$0xf0] }
  0xd3   : > { %v1100_v61 = vadd.f32 %v1099_v58, %v904_v51  ;;  %1749 = vst [vmem:[#allocation2 + $0x4] sm:$0x4] %v1748_v59  ;;  %v908_v51 = vperm.slane %v5923_v0, 3  ;;  %v4264_v58 = vor.u32 %v5177_v55, %v4261_v56  ;;  %v5353_v54 = vld [vmem:[#allocation8 + $0x2f4] sm:$0xf] }
  0xd4   : > { %1617 = vmatpush.bf16.msrb.mxu3 %v4272_v45  ;;  %v4602_v45 = vld [vmem:[#allocation8 + $0xe0] sm:$0xf] }
  0xd5   : > { %v1643_v2 = vmax.f32 %v1100_v61, 0.0  ;;  %v1138_v13 = vpop.f32.mrf.mxu2  ;;  %1591 = vmatpush.bf16.msrb.mxu1 %v4264_v58  ;;  %v4594_v58 = vld [vmem:[#allocation8 + $0xd0] sm:$0xf] }
  0xd6   : > { %v1139_v50 = vadd.f32 %v1138_v13, %v907_v18  ;;  %v1814_v13 = vld [vmem:[#allocation2 + $0x8] sm:$0x8] }
  0xd7   : > { %v1688_v11 = vpack.c.bf16 %v1643_v2, %v1642_v60  ;;  %v906_v60 = vperm.slane %v5923_v0, 1 }
  0xd9   : > { %v1785_v21 = vsel %vm5928_vm12, %v1688_v11, %v1784_v63  ;;  %v1788_v22 = vshll.u32 %v1688_v11, 16  ;;  %v1060_v24 = vpop.f32.mrf.mxu0  ;;  %v1646_v63 = vmax.f32 %v1139_v50, 0.0  ;;  %v4471_v11 = vld [vmem:[#allocation5 + $0x248] sm:$0xf] }
  0xda   : > { %1786 = vst [vmem:[#allocation2 + $0x8] sm:$0x1] %v1785_v21  ;;  %v1101_v26 = vpop.f32.mrf.mxu3  ;;  %v1758_v31 = vld [vmem:[#allocation2 + $0x4] sm:$0x4]  ;;  %v1061_v35 = vadd.f32 %v1060_v24, %v901_v12  ;;  %v1125_v36 = vpop.f32.mrf.mxu1  ;;  %v5252_v12 = vld [vmem:[#allocation5 + $0x308] sm:$0xf0] }
  0xdb   : > { %v4525_v34 = vrot.slane %v1788_v22, 11  ;;  %v1759_v38 = vsel %vm5936_vm13, %v4523_v19, %v1758_v31  ;;  %v1126_v6 = vadd.f32 %v1125_v36, %v906_v60  ;;  %v911_v21 = vperm.slane %v5923_v0, 6  ;;  %v5286_v36 = vld [vmem:[#allocation8 + $0xf4] sm:$0xf]  ;;  %v5284_v50 = vld [vmem:[#allocation8 + $0xe4] sm:$0xf] }
  0xdc   : > { %1760 = vst [vmem:[#allocation2 + $0x4] sm:$0x4] %v1759_v38  ;;  %v1640_v43 = vmax.f32 %v1061_v35, 0.0  ;;  %4509 = vmatmul.msk.bf16.vlgmr.msra.gmra.mxu0 %vm995_vm0, %v5813_v25  ;;  %v4472_v22 = vor.u32 %v5252_v12, %v4471_v11  ;;  %v4276_v38 = vor.u32 %v5203_v29, %v4275_v28  ;;  %v5282_v60 = vld [vmem:[#allocation8 + $0xd4] sm:$0xf] }
  0xdd   : > { %v1794_v42 = vsel %vm5901_vm5, %v4525_v34, %v1793_v17  ;;  %4514 = vmatmul.msk.bf16.vlgmr.msra.gmra.mxu1 %vm995_vm0, %v5813_v25  ;;  %1577 = vmatpush.bf16.msra.mxu0 %v4456_v27  ;;  %v1140_v52 = vpop.f32.mrf.mxu2  ;;  %v1645_v17 = vmax.f32 %v1126_v6, 0.0  ;;  %v5268_v28 = vld [vmem:[#allocation8 + $0x64] sm:$0xf] }
  0xde   : > { %1795 = vst [vmem:[#allocation2 + $0x8] sm:$0x2] %v1794_v42  ;;  %v1687_v48 = vpack.c.bf16 %v1641_v32, %v1640_v43  ;;  %v5287_v32 = vld [vmem:[#allocation8 + $0xf4] sm:$0xf0]  ;;  %v912_v42 = vperm.slane %v5923_v0, 7 }
  0xdf   : > { %4516 = vmatmul.msk.bf16.vlgmr.msra.gmra.mxu3 %vm995_vm0, %v5813_v25  ;;  %v4611_v35 = vor.u32 %v5287_v32, %v4610_v47  ;;  %v5280_v47 = vld [vmem:[#allocation8 + $0xc4] sm:$0xf] }
  0xe0   : > { %v1762_v57 = vrot.slane %v1687_v48, 5  ;;  %v1771_v4 = vshll.u32 %v1687_v48, 16 }
  0xe1   : > { %v1062_v59 = vpop.f32.mrf.mxu0  ;;  %1578 = vmatpush.bf16.msra.mxu0 %v4260_v44  ;;  %2266 = vmatpush.bf16.msra.mxu1 %v4611_v35  ;;  %v4615_v44 = vor.u32 %v5286_v36, %v4612_v39 }
  0xe2   : > { %v1151_v61 = vpop.f32.mrf.mxu3  ;;  %v1768_v62 = vsel %vm5954_vm1, %v1762_v57, %v1767_v49  ;;  %v1127_v2 = vpop.f32.mrf.mxu1  ;;  %4519 = vmatmul.msk.bf16.vlgmr.msra.gmra.mxu2 %vm995_vm0, %v5813_v25  ;;  %v4524_v16 = vrot.slane %v1771_v4, 9  ;;  %v4603_v49 = vor.u32 %v5285_v46, %v4602_v45  ;;  %5413 = vmatpush.bf16.msra.mxu3 %v4611_v35  ;;  %v5283_v59 = vld [vmem:[#allocation8 + $0xd4] sm:$0xf0]  ;;  %v4578_v35 = vld [vmem:[#allocation8 + $0xb0] sm:$0xf] }
  0xe3   : > { %v1152_v1 = vadd.f32 %v1151_v61, %v908_v51  ;;  %1769 = vst [vmem:[#allocation2 + $0x4] sm:$0x8] %v1768_v62  ;;  %v4604_v51 = vld [vmem:[#allocation8 + $0xe8] sm:$0xf0]  ;;  %2295 = vmatpush.bf16.msrb.mxu2 %v4615_v44  ;;  %v4595_v6 = vor.u32 %v5283_v59, %v4594_v58  ;;  %v1826_v45 = vld [vmem:[#allocation2 + $0xc] sm:$0x1] }
  0xe4   : > { %v4607_v55 = vor.u32 %v5284_v50, %v4604_v51  ;;  %v4580_v50 = vld [vmem:[#allocation8 + $0xb8] sm:$0xf0] }
  0xe5   : > { %v1647_v3 = vmax.f32 %v1152_v1, 0.0  ;;  %v1190_v10 = vpop.f32.mrf.mxu2  ;;  %2267 = vmatpush.bf16.msra.mxu1 %v4603_v49 }
  0xe6   : > { %v1191_v41 = vadd.f32 %v1190_v10, %v911_v21  ;;  %5414 = vmatpush.bf16.msra.mxu3 %v4603_v49  ;;  %v5270_v10 = vld [vmem:[#allocation8 + $0x74] sm:$0xf] }
  0xe7   : > { %v1690_v7 = vpack.c.bf16 %v1647_v3, %v1646_v63  ;;  %v910_v63 = vperm.slane %v5923_v0, 5  ;;  %2296 = vmatpush.bf16.msrb.mxu2 %v4607_v55  ;;  %v5266_v55 = vld [vmem:[#allocation8 + $0x54] sm:$0xf] }
  0xe8   : > { %v1650_v1 = vmax.f32 %v1191_v41, 0.0 }
  0xe9   : > { %v1812_v15 = vrot.slane %v1690_v7, 5  ;;  %v1112_v18 = vpop.f32.mrf.mxu0  ;;  %v1818_v31 = vshll.u32 %v1690_v7, 16  ;;  %v4596_v7 = vld [vmem:[#allocation8 + $0xd8] sm:$0xf0]  ;;  %2268 = vmatpush.bf16.msra.mxu1 %v4595_v6 }
  0xea   : > { %v1153_v19 = vpop.f32.mrf.mxu3  ;;  %v1778_v23 = vld [vmem:[#allocation2 + $0x4] sm:$0x8]  ;;  %v1113_v26 = vadd.f32 %v1112_v18, %v905_v8  ;;  %v1177_v27 = vpop.f32.mrf.mxu1  ;;  %v4599_v11 = vor.u32 %v5282_v60, %v4596_v7  ;;  %5415 = vmatpush.bf16.msra.mxu3 %v4595_v6 }
  0xeb   : > { %v1815_v24 = vsel %vm5954_vm1, %v1812_v15, %v1814_v13  ;;  %v1779_v30 = vsel %vm5965_vm4, %v4524_v16, %v1778_v23  ;;  %v4527_v48 = vrot.slane %v1818_v31, 9  ;;  %v909_v13 = vperm.slane %v5923_v0, 4  ;;  %v4586_v15 = vld [vmem:[#allocation8 + $0xc0] sm:$0xf]  ;;  %v5281_v16 = vld [vmem:[#allocation8 + $0xc4] sm:$0xf0] }
  0xec   : > { %1816 = vst [vmem:[#allocation2 + $0x8] sm:$0x8] %v1815_v24  ;;  %v1644_v34 = vmax.f32 %v1113_v26, 0.0  ;;  %4513 = vmatmul.msk.bf16.vlgmr.msrb.gmra.mxu0 %vm995_vm0, %v5813_v25  ;;  %v4676_v19 = vld [vmem:[#allocation8 + $0x78] sm:$0xf0]  ;;  %2297 = vmatpush.bf16.msrb.mxu2 %v4599_v11 }
  0xed   : > { %1780 = vst [vmem:[#allocation2 + $0x4] sm:$0x8] %v1779_v30  ;;  %1629 = vmatpush.bf16.msrb.mxu0 %v4472_v22  ;;  %4518 = vmatmul.msk.bf16.vlgmr.msrb.gmra.mxu1 %vm995_vm0, %v5813_v25  ;;  %v1192_v43 = vpop.f32.mrf.mxu2  ;;  %v4587_v22 = vor.u32 %v5281_v16, %v4586_v15  ;;  %v4588_v23 = vld [vmem:[#allocation8 + $0xc8] sm:$0xf0]  ;;  %v1842_v24 = vld [vmem:[#allocation2 + $0xc] sm:$0x4]  ;;  %v4679_v0 = vor.u32 %v5270_v10, %v4676_v19 }
  0xee   : > { %v1689_v40 = vpack.c.bf16 %v1645_v17, %v1644_v34  ;;  %v1178_v17 = vadd.f32 %v1177_v27, %v910_v63  ;;  %v4591_v29 = vor.u32 %v5280_v47, %v4588_v23  ;;  %v5987_v34 = vld [vmem:[#allocation7 + $0x10] sm:$0xff]  ;;  %v4668_v27 = vld [vmem:[#allocation8 + $0x68] sm:$0xf0]  ;;  %v5275_v47 = vld [vmem:[#allocation8 + $0x94] sm:$0xf0] }
  0xef   : > { %4520 = vmatmul.msk.bf16.vlgmr.msrb.gmra.mxu3 %vm995_vm0, %v5813_v25  ;;  %v915_v41 = vperm.slane %v5987_v34, 2  ;;  %2269 = vmatpush.bf16.msra.mxu1 %v4587_v22  ;;  %v4671_v51 = vor.u32 %v5268_v28, %v4668_v27  ;;  %v5276_v63 = vld [vmem:[#allocation8 + $0xa4] sm:$0xf]  ;;  %v914_v16 = vperm.slane %v5987_v34, 1  ;;  %v5274_v23 = vld [vmem:[#allocation8 + $0x94] sm:$0xf] }
  0xf0   : > { %v1797_v52 = vrot.slane %v1689_v40, 6  ;;  %v1803_v12 = vshll.u32 %v1689_v40, 16  ;;  %5416 = vmatpush.bf16.msra.mxu3 %v4587_v22  ;;  %2298 = vmatpush.bf16.msrb.mxu2 %v4591_v29  ;;  %v5264_v11 = vld [vmem:[#allocation8 + $0x44] sm:$0xf]  ;;  %v4562_v22 = vld [vmem:[#allocation8 + $0x90] sm:$0xf] }
  0xf1   : > { %v1114_v56 = vpop.f32.mrf.mxu0  ;;  %1630 = vmatpush.bf16.msrb.mxu0 %v4276_v38  ;;  %v1869_v28 = vld [vmem:[#allocation2 + $0x10] sm:$0x1]  ;;  %v913_v29 = vperm.slane %v5987_v34, 0 }
  0xf2   : > { %v1203_v57 = vpop.f32.mrf.mxu3  ;;  %v1800_v62 = vsel %vm5916_vm8, %v1797_v52, %v1799_v37  ;;  %v1179_v3 = vpop.f32.mrf.mxu1  ;;  %v4526_v30 = vrot.slane %v1803_v12, 10  ;;  %v1649_v37 = vmax.f32 %v1178_v17, 0.0  ;;  %v916_v52 = vperm.slane %v5987_v34, 3  ;;  %v4660_v56 = vld [vmem:[#allocation8 + $0x58] sm:$0xf0] }
  0xf3   : > { %v1823_v61 = vld [vmem:[#allocation2 + $0x8] sm:$0x8]  ;;  %v1204_v2 = vadd.f32 %v1203_v57, %v912_v42  ;;  %1801 = vst [vmem:[#allocation2 + $0x8] sm:$0x4] %v1800_v62  ;;  %v5277_v62 = vld [vmem:[#allocation8 + $0xa4] sm:$0xf0]  ;;  %v4663_v10 = vor.u32 %v5266_v55, %v4660_v56 }
  0xf4   : > { %v1824_v4 = vsel %vm5965_vm4, %v4527_v48, %v1823_v61  ;;  %v5279_v42 = vld [vmem:[#allocation8 + $0xb4] sm:$0xf0]  ;;  %v5278_v48 = vld [vmem:[#allocation8 + $0xb4] sm:$0xf]  ;;  %v4570_v61 = vld [vmem:[#allocation8 + $0xa0] sm:$0xf] }
  0xf5   : > { %1825 = vst [vmem:[#allocation2 + $0x8] sm:$0x8] %v1824_v4  ;;  %v1651_v8 = vmax.f32 %v1204_v2, 0.0  ;;  %v1242_v21 = vpop.f32.mrf.mxu2  ;;  %v4579_v46 = vor.u32 %v5279_v42, %v4578_v35  ;;  %v4583_v57 = vor.u32 %v5278_v48, %v4580_v50  ;;  %v4571_v2 = vor.u32 %v5277_v62, %v4570_v61  ;;  %v4572_v3 = vld [vmem:[#allocation8 + $0xa8] sm:$0xf0] }
  0xf6   : > { %v1243_v59 = vadd.f32 %v1242_v21, %v915_v41  ;;  %v4575_v6 = vor.u32 %v5276_v63, %v4572_v3  ;;  %v4652_v12 = vld [vmem:[#allocation8 + $0x48] sm:$0xf0]  ;;  %v4554_v27 = vld [vmem:[#allocation8 + $0x80] sm:$0xf]  ;;  %v5273_v41 = vld [vmem:[#allocation8 + $0x84] sm:$0xf0] }
  0xf7   : > { %v1692_v18 = vpack.c.bf16 %v1651_v8, %v1650_v1  ;;  %2270 = vmatpush.bf16.msra.mxu1 %v4579_v46  ;;  %5417 = vmatpush.bf16.msra.mxu3 %v4579_v46  ;;  %v5272_v42 = vld [vmem:[#allocation8 + $0x84] sm:$0xf]  ;;  %v919_v61 = vperm.slane %v5987_v34, 6 }
  0xf8   : > { %2299 = vmatpush.bf16.msrb.mxu2 %v4583_v57  ;;  %v1654_v17 = vmax.f32 %v1243_v59, 0.0  ;;  %v5260_v56 = vld [vmem:[#allocation8 + $0x24] sm:$0xf] }
  0xf9   : > { %v1840_v26 = vrot.slane %v1692_v18, 6  ;;  %v1164_v31 = vpop.f32.mrf.mxu0  ;;  %v1846_v44 = vshll.u32 %v1692_v18, 16 }
  0xfa   : > { %v1205_v32 = vpop.f32.mrf.mxu3  ;;  %v1808_v36 = vld [vmem:[#allocation2 + $0x8] sm:$0x4]  ;;  %v1165_v39 = vadd.f32 %v1164_v31, %v909_v13  ;;  %v5991_v40 = vpop.f32.mrf.mxu1  ;;  %v4655_v31 = vor.u32 %v5264_v11, %v4652_v12 }
  0xfb   : > { %v1843_v38 = vsel %vm5916_vm8, %v1840_v26, %v1842_v24  ;;  %v1809_v43 = vsel %vm5936_vm13, %v4526_v30, %v1808_v36  ;;  %v4528_v1 = vrot.slane %v1846_v44, 10  ;;  %2271 = vmatpush.bf16.msra.mxu1 %v4571_v2  ;;  %5418 = vmatpush.bf16.msra.mxu3 %v4571_v2  ;;  %v4563_v30 = vor.u32 %v5275_v47, %v4562_v22  ;;  %v5262_v32 = vld [vmem:[#allocation8 + $0x34] sm:$0xf]  ;;  %v4666_v24 = vld [vmem:[#allocation8 + $0x60] sm:$0xf] }
  0xfc   : > { %1844 = vst [vmem:[#allocation2 + $0xc] sm:$0x4] %v1843_v38  ;;  %v1648_v49 = vmax.f32 %v1165_v39, 0.0  ;;  %4517 = vmatmul.msk.bf16.vlgmr.msra.gmra.mxu0 %vm995_vm0, %v5813_v25  ;;  %2300 = vmatpush.bf16.msrb.mxu2 %v4575_v6  ;;  %v1230_v35 = vadd.f32 %v5991_v40, %v914_v16  ;;  %v4555_v44 = vor.u32 %v5273_v41, %v4554_v27  ;;  %v5258_v6 = vld [vmem:[#allocation8 + $0x14] sm:$0xf] }
  0xfd   : > { %1810 = vst [vmem:[#allocation2 + $0x8] sm:$0x4] %v1809_v43  ;;  %2437 = vmatpush.bf16.msra.mxu0 %v4679_v0  ;;  %v1244_v60 = vpop.f32.mrf.mxu2  ;;  %v4564_v0 = vld [vmem:[#allocation8 + $0x98] sm:$0xf0]  ;;  %v1898_v27 = vld [vmem:[#allocation2 + $0x10] sm:$0x8] }
  0xfe   : > { %v1691_v58 = vpack.c.bf16 %v1649_v37, %v1648_v49  ;;  %v4644_v37 = vld [vmem:[#allocation8 + $0x38] sm:$0xf0]  ;;  %v4567_v39 = vor.u32 %v5274_v23, %v4564_v0  ;;  %v1653_v57 = vmax.f32 %v1230_v35, 0.0  ;;  %v4636_v60 = vld [vmem:[#allocation8 + $0x28] sm:$0xf0] }
  0xff   : > { %2272 = vmatpush.bf16.msra.mxu1 %v4563_v30  ;;  %5419 = vmatpush.bf16.msra.mxu3 %v4563_v30  ;;  %v4647_v55 = vor.u32 %v5262_v32, %v4644_v37  ;;  %v4620_v23 = vld [vmem:[#allocation8 + $0x8] sm:$0xf0]  ;;  %v917_v32 = vperm.slane %v5987_v34, 4 }
 0x100   : > { %v1827_v4 = vsel %vm5928_vm12, %v1691_v58, %v1826_v45  ;;  %v1830_v15 = vshll.u32 %v1691_v58, 16  ;;  %v4556_v45 = vld [vmem:[#allocation8 + $0x88] sm:$0xf0]  ;;  %2301 = vmatpush.bf16.msrb.mxu2 %v4567_v39 }
 0x101   : > { %1828 = vst [vmem:[#allocation2 + $0xc] sm:$0x1] %v1827_v4  ;;  %v1166_v7 = vpop.f32.mrf.mxu0  ;;  %2438 = vmatpush.bf16.msra.mxu0 %v4671_v51  ;;  %v4559_v49 = vor.u32 %v5272_v42, %v4556_v45  ;;  %v920_v4 = vperm.slane %v5987_v34, 7  ;;  %v6026_v39 = vld [vmem:[#allocation7 + $0x18] sm:$0xff] }
 0x102   : > { %v1255_v8 = vpop.f32.mrf.mxu3  ;;  %v1231_v19 = vpop.f32.mrf.mxu1  ;;  %v1832_v43 = vrot.slane %v1830_v15, 4  ;;  %v4628_v7 = vld [vmem:[#allocation8 + $0x18] sm:$0xf0] }
 0x103   : > { %v1851_v13 = vld [vmem:[#allocation2 + $0xc] sm:$0x4]  ;;  %v1256_v18 = vadd.f32 %v1255_v8, %v916_v52  ;;  %2273 = vmatpush.bf16.msra.mxu1 %v4555_v44  ;;  %5420 = vmatpush.bf16.msra.mxu3 %v4555_v44  ;;  %v4631_v16 = vor.u32 %v5258_v6, %v4628_v7  ;;  %v918_v19 = vperm.slane %v5987_v34, 5 }
 0x104   : > { %v1852_v21 = vsel %vm5936_vm13, %v4528_v1, %v1851_v13  ;;  %2302 = vmatpush.bf16.msrb.mxu2 %v4559_v49  ;;  %v4639_v1 = vor.u32 %v5260_v56, %v4636_v60  ;;  %v5407_v49 = vld [vmem:[#allocation2] sm:$0xff]  }
 0x105   : > { %1853 = vst [vmem:[#allocation2 + $0xc] sm:$0x4] %v1852_v21  ;;  %v1655_v26 = vmax.f32 %v1256_v18, 0.0  ;;  %2439 = vmatpush.bf16.msra.mxu0 %v4663_v10  ;;  %v1294_v38 = vpop.f32.mrf.mxu2  ;;  %v1857_v10 = vld [vmem:[#allocation2 + $0xc] sm:$0x8] }
 0x106   : > { %v1295_v3 = vadd.f32 %v1294_v38, %v919_v61  ;;  %v1892_v61 = vld [vmem:[#allocation2 + $0x10] sm:$0x4] }
 0x107   : > { %v1694_v36 = vpack.c.bf16 %v1655_v26, %v1654_v17  ;;  %v5256_v17 = vld [vmem:[#allocation8 + $0x4] sm:$0xf] }
 0x108   : > { %v1836_v46 = vld [vmem:[#allocation2 + $0xc] sm:$0x1]  ;;  %v1658_v21 = vmax.f32 %v1295_v3, 0.0 }
 0x109   : > { %v1870_v48 = vsel %vm5928_vm12, %v1694_v36, %v1869_v28  ;;  %v1837_v40 = vsel %vm6006_vm7, %v1832_v43, %v1836_v46  ;;  %v1873_v50 = vshll.u32 %v1694_v36, 16  ;;  %v1216_v51 = vpop.f32.mrf.mxu0  ;;  %2440 = vmatpush.bf16.msra.mxu0 %v4655_v31  ;;  %v923_v46 = vperm.slane %v6026_v39, 2 }
 0x10a   : > { %1871 = vst [vmem:[#allocation2 + $0x10] sm:$0x1] %v1870_v48  ;;  %v1257_v52 = vpop.f32.mrf.mxu3  ;;  %v1217_v58 = vadd.f32 %v1216_v51, %v913_v29  ;;  %v1281_v59 = vpop.f32.mrf.mxu1  ;;  %v4623_v29 = vor.u32 %v5256_v17, %v4620_v23 }
 0x10b   : > { %1838 = vst [vmem:[#allocation2 + $0xc] sm:$0x1] %v1837_v40  ;;  %v1875_v63 = vrot.slane %v1873_v50, 4  ;;  %v1282_v30 = vadd.f32 %v1281_v59, %v918_v19  ;;  %v924_v52 = vperm.slane %v6026_v39, 3 }
 0x10c   : > { %v1652_v62 = vmax.f32 %v1217_v58, 0.0  ;;  %4521 = vmatmul.msk.bf16.vlgmr.msrb.gmra.mxu0 %vm995_vm0, %v5813_v25  ;;  %v2149_v58 = vshll.u32 %v5407_v49, 16  ;;  %vm2145_vm0 = vsmask.f32 7424 }
 0x10d   : > { %2441 = vmatpush.bf16.msra.mxu0 %v4647_v55  ;;  %v1296_v8 = vpop.f32.mrf.mxu2  ;;  %v1657_v42 = vmax.f32 %v1282_v30, 0.0 }
 0x10e   : > { %v1693_v2 = vpack.c.bf16 %v1653_v57, %v1652_v62  ;;  %v1883_v57 = vld [vmem:[#allocation2 + $0x10] sm:$0x2] }
 0x110   : > { %v1855_v12 = vrot.slane %v1693_v2, 5  ;;  %v1861_v28 = vshll.u32 %v1693_v2, 16 }
 0x111   : > { %v1877_v11 = vld [vmem:[#allocation2 + $0x10] sm:$0x1]  ;;  %v1218_v15 = vpop.f32.mrf.mxu0  ;;  %2442 = vmatpush.bf16.msra.mxu0 %v4639_v1 }
 0x112   : > { %v1878_v13 = vsel %vm6006_vm7, %v1875_v63, %v1877_v11  ;;  %v1307_v25 = vpop.f32.mrf.mxu3  ;;  %v1858_v18 = vsel %vm5954_vm1, %v1855_v12, %v1857_v10  ;;  %v1283_v47 = vpop.f32.mrf.mxu1  ;;  %v4529_v36 = vrot.slane %v1861_v28, 9  ;;  %v922_v63 = vperm.slane %v6026_v39, 1 }
 0x113   : > { %1879 = vst [vmem:[#allocation2 + $0x10] sm:$0x1] %v1878_v13  ;;  %v1308_v22 = vadd.f32 %v1307_v25, %v920_v4  ;;  %v2151_v11 = vrot.slane %v2149_v58, 1  ;;  %v2147_v25 = vshrl.u32 %v5407_v49, 16 }
 0x114   : > { %1859 = vst [vmem:[#allocation2 + $0xc] sm:$0x8] %v1858_v18  ;;  %v921_v18 = vperm.slane %v6026_v39, 0 }
 0x115   : > { %v1659_v26 = vmax.f32 %v1308_v22, 0.0  ;;  %2443 = vmatpush.bf16.msra.mxu0 %v4631_v16  ;;  %v1346_v0 = vpop.f32.mrf.mxu2  ;;  %v1924_v22 = vld [vmem:[#allocation2 + $0x14] sm:$0x2]  ;;  %v2152_v47 = vor.u32 %v2151_v11, %v2147_v25  ;;  %v4714_v11 = vld [vmem:[#allocation8 + $0x140] sm:$0xf] }
 0x116   : > { %v1347_v51 = vadd.f32 %v1346_v0, %v923_v46  ;;  %v928_v46 = vperm.slane %v6026_v39, 7 }
 0x117   : > { %v1696_v31 = vpack.c.bf16 %v1659_v26, %v1658_v21 }
 0x118   : > { %v1662_v7 = vmax.f32 %v1347_v51, 0.0 }
 0x119   : > { %v1896_v35 = vrot.slane %v1696_v31, 5  ;;  %v1268_v37 = vpop.f32.mrf.mxu0  ;;  %2444 = vmatpush.bf16.msra.mxu0 %v4623_v29  ;;  %v1902_v48 = vshll.u32 %v1696_v31, 16 }
 0x11a   : > { %v1309_v38 = vpop.f32.mrf.mxu3  ;;  %v1269_v44 = vadd.f32 %v1268_v37, %v917_v32  ;;  %v1333_v45 = vpop.f32.mrf.mxu1  ;;  %v5303_v37 = vld [vmem:[#allocation8 + $0x174] sm:$0xf0] }
 0x11b   : > { %v1866_v41 = vld [vmem:[#allocation2 + $0xc] sm:$0x8]  ;;  %v1899_v43 = vsel %vm5954_vm1, %v1896_v35, %v1898_v27  ;;  %v4531_v56 = vrot.slane %v1902_v48, 9  ;;  %v1334_v17 = vadd.f32 %v1333_v45, %v922_v63  ;;  %v927_v35 = vperm.slane %v6026_v39, 6  ;;  %v4730_v48 = vld [vmem:[#allocation8 + $0x160] sm:$0xf] }
 0x11c   : > { %v1867_v34 = vsel %vm5965_vm4, %v4529_v36, %v1866_v41  ;;  %1900 = vst [vmem:[#allocation2 + $0x10] sm:$0x8] %v1899_v43  ;;  %v1656_v40 = vmax.f32 %v1269_v44, 0.0  ;;  %2445 = vmatmul.bf16.vlgmr.msra.gmra.mxu0 %v5407_v49  ;;  %v4738_v36 = vld [vmem:[#allocation8 + $0x170] sm:$0xf] }
 0x11d   : > { %1868 = vst [vmem:[#allocation2 + $0xc] sm:$0x8] %v1867_v34  ;;  %v1348_v55 = vpop.f32.mrf.mxu2  ;;  %v1661_v31 = vmax.f32 %v1334_v17, 0.0  ;;  %v4739_v41 = vor.u32 %v5303_v37, %v4738_v36  ;;  %v1910_v43 = vld [vmem:[#allocation2 + $0x14] sm:$0x1] }
 0x11e   : > { %v1695_v50 = vpack.c.bf16 %v1657_v42, %v1656_v40  ;;  %v5301_v49 = vld [vmem:[#allocation8 + $0x164] sm:$0xf0] }
 0x11f   : > { %2581 = vmatpush.bf16.msrb.mxu1 %v4739_v41  ;;  %v4698_v41 = vld [vmem:[#allocation8 + $0x120] sm:$0xf] }
 0x120   : > { %v1881_v59 = vrot.slane %v1695_v50, 7  ;;  %v1887_v60 = vshll.u32 %v1695_v50, 16  ;;  %v4731_v50 = vor.u32 %v5301_v49, %v4730_v48 }
 0x121   : > { %v1270_v62 = vpop.f32.mrf.mxu0 }
 0x122   : > { %v1359_v1 = vpop.f32.mrf.mxu3  ;;  %v1884_v3 = vsel %vm5890_vm3, %v1881_v59, %v1883_v57  ;;  %v4530_v4 = vrot.slane %v1887_v60, 10  ;;  %v1335_v6 = vpop.f32.mrf.mxu1  ;;  %v926_v57 = vperm.slane %v6026_v39, 5 }
 0x123   : > { %v1907_v2 = vld [vmem:[#allocation2 + $0x10] sm:$0x8]  ;;  %v1360_v8 = vadd.f32 %v1359_v1, %v924_v52  ;;  %1885 = vst [vmem:[#allocation2 + $0x10] sm:$0x2] %v1884_v3  ;;  %2582 = vmatpush.bf16.msrb.mxu1 %v4731_v50  ;;  %v5299_v1 = vld [vmem:[#allocation8 + $0x154] sm:$0xf0] }
 0x124   : > { %v1908_v10 = vsel %vm5965_vm4, %v4531_v56, %v1907_v2  ;;  %v6039_v12 = vld [vmem:[#allocation2 + $0x8] sm:$0xff]  ;;  %v1893_v13 = vsel %vm5936_vm13, %v4530_v4, %v1892_v61  ;;  %v4722_v61 = vld [vmem:[#allocation8 + $0x150] sm:$0xf]  ;;  %v1951_v4 = vld [vmem:[#allocation2 + $0x18] sm:$0x1] }
 0x125   : > { %1909 = vst [vmem:[#allocation2 + $0x10] sm:$0x8] %v1908_v10  ;;  %v1663_v15 = vmax.f32 %v1360_v8, 0.0  ;;  %v2154_v16 = vshll.u32 %v6039_v12, 16  ;;  %v1398_v21 = vpop.f32.mrf.mxu2  ;;  %v4723_v3 = vor.u32 %v5299_v1, %v4722_v61 }
 0x126   : > { %1894 = vst [vmem:[#allocation2 + $0x10] sm:$0x4] %v1893_v13  ;;  %v1399_v45 = vadd.f32 %v1398_v21, %v927_v35  ;;  %v5297_v13 = vld [vmem:[#allocation8 + $0x144] sm:$0xf0] }
 0x127   : > { %v1698_v19 = vpack.c.bf16 %v1663_v15, %v1662_v7  ;;  %v6045_v23 = vrot.slane %v2154_v16, 1  ;;  %v925_v7 = vperm.slane %v6026_v39, 4  ;;  %2583 = vmatpush.bf16.msrb.mxu1 %v4723_v3  ;;  %v4715_v25 = vor.u32 %v5297_v13, %v4714_v11  ;;  %v5289_v3 = vld [vmem:[#allocation8 + $0x104] sm:$0xf0] }
 0x128   : > { %v1666_v59 = vmax.f32 %v1399_v45, 0.0 }
 0x129   : > { %v1922_v26 = vrot.slane %v1698_v19, 7  ;;  %v1320_v28 = vpop.f32.mrf.mxu0  ;;  %v2157_v29 = vsel %vm2145_vm0, %v2152_v47, %v6045_v23  ;;  %v1928_v38 = vshll.u32 %v1698_v19, 16  ;;  %v6064_v47 = vld [vmem:[#allocation7 + $0x20] sm:$0xff] }
 0x12a   : > { %v1361_v30 = vpop.f32.mrf.mxu3  ;;  %v1321_v32 = vadd.f32 %v1320_v28, %v921_v18  ;;  %2274 = vmatmul.bf16.vlgmr.msra.gmra.mxu1 %v2157_v29  ;;  %2303 = vmatmul.bf16.vlgmr.msrb.gmra.mxu2 %v2157_v29  ;;  %v1385_v27 = vpop.f32.mrf.mxu1  ;;  %v931_v29 = vperm.slane %v6064_v47, 2  ;;  %v932_v37 = vperm.slane %v6064_v47, 3  ;;  %v930_v49 = vperm.slane %v6064_v47, 1 }
 0x12b   : > { %v1925_v0 = vsel %vm5890_vm3, %v1922_v26, %v1924_v22  ;;  %v4532_v40 = vrot.slane %v1928_v38, 11  ;;  %v1386_v6 = vadd.f32 %v1385_v27, %v926_v57  ;;  %2584 = vmatpush.bf16.msrb.mxu1 %v4715_v25  ;;  %v4706_v30 = vld [vmem:[#allocation8 + $0x130] sm:$0xf]  ;;  %v5291_v57 = vld [vmem:[#allocation8 + $0x114] sm:$0xf0] }
 0x12c   : > { %1926 = vst [vmem:[#allocation2 + $0x14] sm:$0x2] %v1925_v0  ;;  %v1660_v42 = vmax.f32 %v1321_v32, 0.0  ;;  %2450 = vmatmul.bf16.gmra.mxu0 %v6039_v12 }
 0x12d   : > { %v1400_v34 = vpop.f32.mrf.mxu2  ;;  %v1665_v39 = vmax.f32 %v1386_v6, 0.0 }
 0x12e   : > { %v1697_v44 = vpack.c.bf16 %v1661_v31, %v1660_v42  ;;  %v5295_v31 = vld [vmem:[#allocation8 + $0x134] sm:$0xf0]  ;;  %v5293_v42 = vld [vmem:[#allocation8 + $0x124] sm:$0xf0] }
 0x12f   : > { %v4707_v0 = vor.u32 %v5295_v31, %v4706_v30 }
 0x130   : > { %v1911_v51 = vsel %vm5928_vm12, %v1697_v44, %v1910_v43  ;;  %v1914_v62 = vshll.u32 %v1697_v44, 16  ;;  %v1939_v43 = vld [vmem:[#allocation2 + $0x14] sm:$0x8]  ;;  %v4699_v44 = vor.u32 %v5293_v42, %v4698_v41 }
 0x131   : > { %1912 = vst [vmem:[#allocation2 + $0x14] sm:$0x1] %v1911_v51  ;;  %v1322_v52 = vpop.f32.mrf.mxu0  ;;  %2585 = vmatpush.bf16.msrb.mxu1 %v4707_v0 }
 0x132   : > { %v1411_v55 = vpop.f32.mrf.mxu3  ;;  %v1387_v58 = vpop.f32.mrf.mxu1  ;;  %v1916_v15 = vrot.slane %v1914_v62, 4  ;;  %v929_v62 = vperm.slane %v6064_v47, 0 }
 0x133   : > { %v1933_v56 = vld [vmem:[#allocation2 + $0x14] sm:$0x2]  ;;  %v1412_v60 = vadd.f32 %v1411_v55, %v928_v46 }
 0x134   : > { %v1934_v63 = vsel %vm5901_vm5, %v4532_v40, %v1933_v56  ;;  %v4690_v56 = vld [vmem:[#allocation8 + $0x110] sm:$0xf] }
 0x135   : > { %1935 = vst [vmem:[#allocation2 + $0x14] sm:$0x2] %v1934_v63  ;;  %v1667_v2 = vmax.f32 %v1412_v60, 0.0  ;;  %v1450_v10 = vpop.f32.mrf.mxu2  ;;  %2586 = vmatpush.bf16.msrb.mxu1 %v4699_v44 }
 0x136   : > { %v1451_v36 = vadd.f32 %v1450_v10, %v931_v29  ;;  %v6081_v29 = vld [vmem:[#allocation2 + $0xc] sm:$0xf] }
 0x137   : > { %v1700_v8 = vpack.c.bf16 %v1667_v2, %v1666_v59  ;;  %v4691_v59 = vor.u32 %v5291_v57, %v4690_v56  ;;  %v4682_v2 = vld [vmem:[#allocation8 + $0x100] sm:$0xf] }
 0x138   : > { %v1918_v16 = vld [vmem:[#allocation2 + $0x14] sm:$0x1]  ;;  %v1670_v52 = vmax.f32 %v1451_v36, 0.0  ;;  %v4683_v6 = vor.u32 %v5289_v3, %v4682_v2  ;;  %v3331_v36 = vunpack.c.l.b16 %v6081_v29 }
 0x139   : > { %v1952_v17 = vsel %vm5928_vm12, %v1700_v8, %v1951_v4  ;;  %v1919_v18 = vsel %vm6006_vm7, %v1916_v15, %v1918_v16  ;;  %v1372_v19 = vpop.f32.mrf.mxu0  ;;  %v1955_v21 = vshll.u32 %v1700_v8, 16  ;;  %2587 = vmatpush.bf16.msrb.mxu1 %v4691_v59  ;;  %v1980_v4 = vld [vmem:[#allocation2 + $0x18] sm:$0x4]  ;;  %v1989_v15 = vld [vmem:[#allocation2 + $0x18] sm:$0x8] }
 0x13a   : > { %1953 = vst [vmem:[#allocation2 + $0x18] sm:$0x1] %v1952_v17  ;;  %v1413_v22 = vpop.f32.mrf.mxu3  ;;  %v1373_v26 = vadd.f32 %v1372_v19, %v925_v7  ;;  %v1437_v28 = vpop.f32.mrf.mxu1 }
 0x13b   : > { %1920 = vst [vmem:[#allocation2 + $0x14] sm:$0x1] %v1919_v18  ;;  %v1957_v27 = vrot.slane %v1955_v21, 4  ;;  %v1438_v61 = vadd.f32 %v1437_v28, %v930_v49  ;;  %v935_v22 = vperm.slane %v6064_v47, 6 }
 0x13c   : > { %v1664_v32 = vmax.f32 %v1373_v26, 0.0 }
 0x13d   : > { %v1452_v38 = vpop.f32.mrf.mxu2  ;;  %v1669_v11 = vmax.f32 %v1438_v61, 0.0  ;;  %2588 = vmatpush.bf16.msrb.mxu1 %v4683_v6  ;;  %v2006_v61 = vld [vmem:[#allocation2 + $0x1c] sm:$0x2] }
 0x13e   : > { %v1699_v35 = vpack.c.bf16 %v1665_v39, %v1664_v32  ;;  %v936_v32 = vperm.slane %v6064_v47, 7 }
 0x140   : > { %v1937_v45 = vrot.slane %v1699_v35, 5  ;;  %v1943_v60 = vshll.u32 %v1699_v35, 16  ;;  %v1965_v35 = vld [vmem:[#allocation2 + $0x18] sm:$0x2] }
 0x141   : > { %v1959_v46 = vld [vmem:[#allocation2 + $0x18] sm:$0x1]  ;;  %v1374_v48 = vpop.f32.mrf.mxu0 }
 0x142   : > { %v1960_v34 = vsel %vm6006_vm7, %v1957_v27, %v1959_v46  ;;  %v1463_v40 = vpop.f32.mrf.mxu3  ;;  %v1940_v50 = vsel %vm5954_vm1, %v1937_v45, %v1939_v43  ;;  %v1439_v51 = vpop.f32.mrf.mxu1  ;;  %v4533_v10 = vrot.slane %v1943_v60, 9  ;;  %v3734_v27 = vld [vmem:[#allocation2 + $0x8] sm:$0xc]  ;;  %v934_v43 = vperm.slane %v6064_v47, 5 }
 0x143   : > { %1961 = vst [vmem:[#allocation2 + $0x18] sm:$0x1] %v1960_v34  ;;  %v1464_v55 = vadd.f32 %v1463_v40, %v932_v37  ;;  %v3753_v42 = vunpack.c.l.b16 %v3734_v27  ;;  %v933_v51 = vperm.slane %v6064_v47, 4  ;;  %v4732_v27 = vld [vmem:[#allocation8 + $0x168] sm:$0xf0] }
 0x144   : > { %1941 = vst [vmem:[#allocation2 + $0x14] sm:$0x8] %v1940_v50 }
 0x145   : > { %v1671_v58 = vmax.f32 %v1464_v55, 0.0  ;;  %v1502_v1 = vpop.f32.mrf.mxu2  ;;  %v3754_v49 = vpack.c.b16 %v3331_v36, %v3753_v42 }
 0x146   : > { %v1503_v31 = vadd.f32 %v1502_v1, %v935_v22 }
 0x147   : > { %v1702_v63 = vpack.c.bf16 %v1671_v58, %v1670_v52  ;;  %v2158_v52 = vshrl.u32 %v6039_v12, 16  ;;  %v6098_v58 = vld [vmem:[#allocation7 + $0x28] sm:$0xff]  ;;  %v3756_v1 = vrot.slane %v3754_v49, 2 }
 0x148   : > { %v1674_v45 = vmax.f32 %v1503_v31, 0.0  ;;  %v4800_v49 = vld [vmem:[#allocation8 + $0x1d8] sm:$0xf0] }
 0x149   : > { %v1978_v7 = vrot.slane %v1702_v63, 6  ;;  %v1984_v8 = vshll.u32 %v1702_v63, 16  ;;  %v1424_v13 = vpop.f32.mrf.mxu0 }
 0x14a   : > { %v1465_v25 = vpop.f32.mrf.mxu3  ;;  %v1425_v17 = vadd.f32 %v1424_v13, %v929_v62  ;;  %v1489_v21 = vpop.f32.mrf.mxu1  ;;  %v2160_v62 = vor.u32 %v2158_v52, %v6045_v23  ;;  %v4724_v52 = vld [vmem:[#allocation8 + $0x158] sm:$0xf0] }
 0x14b   : > { %v1948_v16 = vld [vmem:[#allocation2 + $0x14] sm:$0x8]  ;;  %v1981_v18 = vsel %vm5916_vm8, %v1978_v7, %v1980_v4  ;;  %v4535_v19 = vrot.slane %v1984_v8, 9  ;;  %v1490_v56 = vadd.f32 %v1489_v21, %v934_v43  ;;  %v939_v7 = vperm.slane %v6098_v58, 2  ;;  %v5321_v8 = vld [vmem:[#allocation8 + $0x1f4] sm:$0xf] }
 0x14c   : > { %v1949_v39 = vsel %vm5965_vm4, %v4533_v10, %v1948_v16  ;;  %1982 = vst [vmem:[#allocation2 + $0x18] sm:$0x4] %v1981_v18  ;;  %v1668_v26 = vmax.f32 %v1425_v17, 0.0  ;;  %v4816_v10 = vld [vmem:[#allocation8 + $0x1f8] sm:$0xf0] }
 0x14d   : > { %1950 = vst [vmem:[#allocation2 + $0x14] sm:$0x8] %v1949_v39  ;;  %v1990_v28 = vsel %vm5965_vm4, %v4535_v19, %v1989_v15  ;;  %v1504_v0 = vpop.f32.mrf.mxu2  ;;  %v1673_v13 = vmax.f32 %v1490_v56, 0.0  ;;  %v4819_v17 = vor.u32 %v5321_v8, %v4816_v10  ;;  %v1992_v19 = vld [vmem:[#allocation2 + $0x1c] sm:$0x1] }
 0x14e   : > { %1991 = vst [vmem:[#allocation2 + $0x18] sm:$0x8] %v1990_v28  ;;  %v1701_v30 = vpack.c.bf16 %v1669_v11, %v1668_v26  ;;  %v5302_v39 = vld [vmem:[#allocation8 + $0x174] sm:$0xf]  ;;  %v940_v26 = vperm.slane %v6098_v58, 3 }
 0x14f   : > { %2853 = vmatpush.bf16.msrb.mxu0 %v4819_v17  ;;  %v4740_v28 = vld [vmem:[#allocation8 + $0x178] sm:$0xf0]  ;;  %v5315_v8 = vld [vmem:[#allocation8 + $0x1c4] sm:$0xf]  ;;  %v4792_v10 = vld [vmem:[#allocation8 + $0x1c8] sm:$0xf0] }
 0x150   : > { %v1963_v37 = vrot.slane %v1701_v30, 7  ;;  %v1969_v50 = vshll.u32 %v1701_v30, 16  ;;  %v5300_v30 = vld [vmem:[#allocation8 + $0x164] sm:$0xf]  ;;  %v4743_v0 = vor.u32 %v5302_v39, %v4740_v28  ;;  %v4795_v17 = vor.u32 %v5315_v8, %v4792_v10  ;;  %v5309_v10 = vld [vmem:[#allocation8 + $0x194] sm:$0xf] }
 0x151   : > { %v1426_v38 = vpop.f32.mrf.mxu0 }
 0x152   : > { %v1515_v41 = vpop.f32.mrf.mxu3  ;;  %v1966_v14 = vsel %vm5890_vm3, %v1963_v37, %v1965_v35  ;;  %v1491_v44 = vpop.f32.mrf.mxu1  ;;  %v4534_v47 = vrot.slane %v1969_v50, 11  ;;  %v5319_v37 = vld [vmem:[#allocation8 + $0x1e4] sm:$0xf]  ;;  %v4808_v38 = vld [vmem:[#allocation8 + $0x1e8] sm:$0xf0]  ;;  %2610 = vmatpush.bf16.msra.mxu2 %v4743_v0 }
 0x153   : > { %v1516_v46 = vadd.f32 %v1515_v41, %v936_v32  ;;  %1967 = vst [vmem:[#allocation2 + $0x18] sm:$0x2] %v1966_v14  ;;  %v4811_v42 = vor.u32 %v5319_v37, %v4808_v38  ;;  %v5317_v14 = vld [vmem:[#allocation8 + $0x1d4] sm:$0xf] }
 0x154   : > { %v6088_v34 = vld [vmem:[#allocation2 + $0x10] sm:$0xff]  ;;  %v5410_v44 = vld [vmem:[#allocation2] sm:$0xf0] }
 0x155   : > { %v6090_v48 = vld [vmem:[#allocation2 + $0x10] sm:$0xff]  ;;  %v1675_v40 = vmax.f32 %v1516_v46, 0.0  ;;  %2455 = vmatmul.bf16.gmra.mxu0 %v6088_v34  ;;  %v2162_v55 = vshll.u32 %v6088_v34, 16  ;;  %v1554_v59 = vpop.f32.mrf.mxu2  ;;  %v4735_v46 = vor.u32 %v5300_v30, %v4732_v27  ;;  %v943_v27 = vperm.slane %v6098_v58, 6 }
 0x156   : > { %v3757_v60 = vrot.slane %v6090_v48, 2  ;;  %v1555_v32 = vadd.f32 %v1554_v59, %v939_v7  ;;  %2854 = vmatpush.bf16.msrb.mxu0 %v4811_v42  ;;  %v2033_v7 = vld [vmem:[#allocation2 + $0x20] sm:$0x1]  ;;  %v2021_v42 = vld [vmem:[#allocation2 + $0x1c] sm:$0x4]  ;;  %v2166_v9 = vshrl.u32 %v6088_v34, 16 }
 0x157   : > { %v1704_v57 = vpack.c.bf16 %v1675_v40, %v1674_v45  ;;  %v6102_v63 = vrot.slane %v2162_v55, 1  ;;  %v5411_v45 = vld [vmem:[#allocation2] sm:$0xe]  ;;  %v4803_v55 = vor.u32 %v5317_v14, %v4800_v49  ;;  %2611 = vmatpush.bf16.msra.mxu2 %v4735_v46 }
 0x158   : > { %v6110_v11 = vsel %vm3755_vm9, %v3756_v1, %v3757_v60 }
 0x159   : > { %v2004_v2 = vrot.slane %v1704_v57, 7  ;;  %v1476_v3 = vpop.f32.mrf.mxu0  ;;  %v2165_v4 = vsel %vm2145_vm0, %v2160_v62, %v6102_v63  ;;  %v2010_v21 = vshll.u32 %v1704_v57, 16  ;;  %v938_v57 = vperm.slane %v6098_v58, 1 }
 0x15a   : > { %v1517_v6 = vpop.f32.mrf.mxu3  ;;  %v1974_v23 = vld [vmem:[#allocation2 + $0x18] sm:$0x2]  ;;  %v1477_v15 = vadd.f32 %v1476_v3, %v933_v51  ;;  %2279 = vmatmul.bf16.gmra.mxu1 %v2165_v4  ;;  %2308 = vmatmul.bf16.gmra.mxu2 %v2165_v4  ;;  %v1541_v16 = vpop.f32.mrf.mxu1  ;;  %v5298_v51 = vld [vmem:[#allocation8 + $0x154] sm:$0xf]  ;;  %v2489_v4 = vrot.slane %v6039_v12, 1 }
 0x15b   : > { %v2007_v25 = vsel %vm5890_vm3, %v2004_v2, %v2006_v61  ;;  %v1975_v18 = vsel %vm5901_vm5, %v4534_v47, %v1974_v23  ;;  %v4536_v41 = vrot.slane %v2010_v21, 11  ;;  %v1678_v61 = vmax.f32 %v1555_v32, 0.0  ;;  %2855 = vmatpush.bf16.msrb.mxu0 %v4803_v55 }
 0x15c   : > { %2008 = vst [vmem:[#allocation2 + $0x1c] sm:$0x2] %v2007_v25  ;;  %v1672_v22 = vmax.f32 %v1477_v15, 0.0  ;;  %v5412_v47 = vor.u32 %v5411_v45, %v5410_v44  ;;  %v4727_v6 = vor.u32 %v5298_v51, %v4724_v52  ;;  %v1542_v23 = vadd.f32 %v1541_v16, %v938_v57  ;;  %v4716_v44 = vld [vmem:[#allocation8 + $0x148] sm:$0xf0] }
 0x15d   : > { %1976 = vst [vmem:[#allocation2 + $0x18] sm:$0x2] %v1975_v18  ;;  %v1556_v35 = vpop.f32.mrf.mxu2  ;;  %v5311_v51 = vld [vmem:[#allocation8 + $0x1a4] sm:$0xf]  ;;  %v4878_v57 = vld [vmem:[#allocation8 + $0x270] sm:$0xf] }
 0x15e   : > { %v1703_v31 = vpack.c.bf16 %v1673_v13, %v1672_v22  ;;  %v937_v13 = vperm.slane %v6098_v58, 0  ;;  %2612 = vmatpush.bf16.msra.mxu2 %v4727_v6  ;;  %v1677_v32 = vmax.f32 %v1542_v23, 0.0  ;;  %v4784_v35 = vld [vmem:[#allocation8 + $0x1b8] sm:$0xf0]  ;;  %v941_v6 = vperm.slane %v6098_v58, 4 }
 0x15f   : > { %2856 = vmatpush.bf16.msrb.mxu0 %v4795_v17  ;;  %v4768_v23 = vld [vmem:[#allocation8 + $0x198] sm:$0xf0] }
 0x160   : > { %v1993_v43 = vsel %vm5928_vm12, %v1703_v31, %v1992_v19  ;;  %v1996_v1 = vshll.u32 %v1703_v31, 16  ;;  %v2488_v19 = vrot.slane %v5412_v47, 1  ;;  %v5313_v31 = vld [vmem:[#allocation8 + $0x1b4] sm:$0xf] }
 0x161   : > { %1994 = vst [vmem:[#allocation2 + $0x1c] sm:$0x1] %v1993_v43  ;;  %v1478_v40 = vpop.f32.mrf.mxu0  ;;  %v4787_v37 = vor.u32 %v5313_v31, %v4784_v35  ;;  %v944_v43 = vperm.slane %v6098_v58, 7  ;;  %v4870_v31 = vld [vmem:[#allocation8 + $0x260] sm:$0xf] }
 0x162   : > { %v1567_v50 = vpop.f32.mrf.mxu3  ;;  %v1543_v59 = vpop.f32.mrf.mxu1  ;;  %v1998_v18 = vrot.slane %v1996_v1, 4  ;;  %v6131_v16 = vsel %vm2487_vm10, %v2488_v19, %v2489_v4  ;;  %v4674_v40 = vld [vmem:[#allocation8 + $0x70] sm:$0xf]  ;;  %v5294_v19 = vld [vmem:[#allocation8 + $0x134] sm:$0xf] }
 0x163   : > { %v2015_v56 = vld [vmem:[#allocation2 + $0x1c] sm:$0x2]  ;;  %v1568_v62 = vadd.f32 %v1567_v50, %v940_v26  ;;  %2857 = vmatpush.bf16.msrb.mxu0 %v4787_v37  ;;  %v5271_v50 = vld [vmem:[#allocation8 + $0x74] sm:$0xf0] }
 0x164   : > { %v2016_v2 = vsel %vm5901_vm5, %v4536_v41, %v2015_v56  ;;  %v5296_v41 = vld [vmem:[#allocation8 + $0x144] sm:$0xf]  ;;  %v4675_v55 = vor.u32 %v5271_v50, %v4674_v40  ;;  %v4776_v56 = vld [vmem:[#allocation8 + $0x1a8] sm:$0xf0]  ;;  %v5338_v59 = vld [vmem:[#allocation8 + $0x274] sm:$0xf0] }
 0x165   : > { %2017 = vst [vmem:[#allocation2 + $0x1c] sm:$0x2] %v2016_v2  ;;  %v1679_v3 = vmax.f32 %v1568_v62, 0.0  ;;  %v1606_v25 = vpop.f32.mrf.mxu2  ;;  %v4719_v49 = vor.u32 %v5296_v41, %v4716_v44  ;;  %v4779_v1 = vor.u32 %v5311_v51, %v4776_v56  ;;  %v4879_v2 = vor.u32 %v5338_v59, %v4878_v57  ;;  %v5267_v35 = vld [vmem:[#allocation8 + $0x54] sm:$0xf0] }
 0x166   : > { %v1607_v46 = vadd.f32 %v1606_v25, %v943_v27  ;;  %2408 = vmatpush.bf16.msrb.mxu3 %v4675_v55  ;;  %v5336_v27 = vld [vmem:[#allocation8 + $0x264] sm:$0xf0]  ;;  %v4700_v40 = vld [vmem:[#allocation8 + $0x128] sm:$0xf0]  ;;  %v4650_v55 = vld [vmem:[#allocation8 + $0x40] sm:$0xf] }
 0x167   : > { %v1706_v15 = vpack.c.bf16 %v1679_v3, %v1678_v61  ;;  %2613 = vmatpush.bf16.msra.mxu2 %v4719_v49  ;;  %2858 = vmatpush.bf16.msrb.mxu0 %v4779_v1  ;;  %v4871_v41 = vor.u32 %v5336_v27, %v4870_v31  ;;  %v5292_v49 = vld [vmem:[#allocation8 + $0x124] sm:$0xf]  ;;  %v5265_v56 = vld [vmem:[#allocation8 + $0x44] sm:$0xf0] }
 0x168   : > { %v2000_v21 = vld [vmem:[#allocation2 + $0x1c] sm:$0x1]  ;;  %v1682_v25 = vmax.f32 %v1607_v46, 0.0  ;;  %3012 = vmatpush.bf16.msra.mxu1 %v4879_v2  ;;  %v5334_v46 = vld [vmem:[#allocation8 + $0x254] sm:$0xf0]  ;;  %v4651_v12 = vor.u32 %v5265_v56, %v4650_v55 }
 0x169   : > { %v2034_v22 = vsel %vm5928_vm12, %v1706_v15, %v2033_v7  ;;  %v2001_v39 = vsel %vm6006_vm7, %v1998_v18, %v2000_v21  ;;  %v1528_v26 = vpop.f32.mrf.mxu0  ;;  %v2037_v28 = vshll.u32 %v1706_v15, 16  ;;  %v2491_v7 = vrot.slane %v6088_v34, 1  ;;  %v4708_v21 = vld [vmem:[#allocation8 + $0x138] sm:$0xf0] }
 0x16a   : > { %2035 = vst [vmem:[#allocation2 + $0x20] sm:$0x1] %v2034_v22  ;;  %v1569_v30 = vpop.f32.mrf.mxu3  ;;  %v1529_v0 = vadd.f32 %v1528_v26, %v937_v13  ;;  %2589 = vmatmul.bf16.vlgmr.msrb.gmra.mxu1 %v6131_v16  ;;  %v1593_v5 = vpop.f32.mrf.mxu1  ;;  %v942_v15 = vperm.slane %v6098_v58, 5  ;;  %v4771_v22 = vor.u32 %v5309_v10, %v4768_v23  ;;  %v4658_v58 = vld [vmem:[#allocation8 + $0x50] sm:$0xf] }
 0x16b   : > { %2002 = vst [vmem:[#allocation2 + $0x1c] sm:$0x1] %v2001_v39  ;;  %v2039_v14 = vrot.slane %v2037_v28, 4  ;;  %v4711_v28 = vor.u32 %v5294_v19, %v4708_v21  ;;  %v5269_v30 = vld [vmem:[#allocation8 + $0x64] sm:$0xf0]  ;;  %v4659_v44 = vor.u32 %v5267_v35, %v4658_v58  ;;  %v6152_v59 = vsel %vm2487_vm10, %v2489_v4, %v2491_v7  ;;  %v6159_v19 = vld [vmem:[#allocation2 + $0x4] sm:$0xff]  }
 0x16c   : > { %v1676_v38 = vmax.f32 %v1529_v0, 0.0  ;;  %v4667_v0 = vor.u32 %v5269_v30, %v4666_v24  ;;  %v1594_v37 = vadd.f32 %v1593_v5, %v942_v15  ;;  %2859 = vmatpush.bf16.msrb.mxu0 %v4771_v22  ;;  %3013 = vmatpush.bf16.msra.mxu1 %v4871_v41  ;;  %v4642_v4 = vld [vmem:[#allocation8 + $0x30] sm:$0xf]  ;;  %v5290_v24 = vld [vmem:[#allocation8 + $0x114] sm:$0xf] }
 0x16d   : > { %v1608_v52 = vpop.f32.mrf.mxu2  ;;  %2614 = vmatpush.bf16.msra.mxu2 %v4711_v28  ;;  %v6161_v21 = vld [vmem:[#allocation2 + $0x4] sm:$0xf0]  ;;  %v4695_v22 = vor.u32 %v5290_v24, %v4692_v53  ;;  %v4838_v58 = vld [vmem:[#allocation8 + $0x220] sm:$0xf]  ;;  %v5328_v35 = vld [vmem:[#allocation8 + $0x224] sm:$0xf0] }
 0x16e   : > { %v6136_v45 = vpack.c.bf16 %v1677_v32, %v1676_v38  ;;  %v2062_v32 = vld [vmem:[#allocation2 + $0x20] sm:$0x4]  ;;  %2409 = vmatpush.bf16.msrb.mxu3 %v4667_v0  ;;  %v4703_v52 = vor.u32 %v5292_v49, %v4700_v40  ;;  %v5261_v0 = vld [vmem:[#allocation8 + $0x24] sm:$0xf0]  ;;  %v5288_v49 = vld [vmem:[#allocation8 + $0x104] sm:$0xf] }
 0x16f   : > { %v4626_v41 = vld [vmem:[#allocation8 + $0x10] sm:$0xf]  ;;  %v4684_v40 = vld [vmem:[#allocation8 + $0x108] sm:$0xf0]  ;;  %v5496_v55 = vld [vmem:[#allocation7 + $0x30] ss:$0 sm:$0xff] }
 0x170   : > { %v2019_v61 = vrot.slane %v6136_v45, 6  ;;  %v2025_v39 = vshll.u32 %v6136_v45, 16  ;;  %v4687_v20 = vor.u32 %v5288_v49, %v4684_v40  ;;  %v4814_v24 = vld [vmem:[#allocation8 + $0x1f0] sm:$0xf]  ;;  %v5322_v53 = vld [vmem:[#allocation8 + $0x1f4] sm:$0xf0] }
 0x171   : > { %v2041_v62 = vld [vmem:[#allocation2 + $0x20] sm:$0x1]  ;;  %v1530_v3 = vpop.f32.mrf.mxu0  ;;  %2615 = vmatpush.bf16.msra.mxu2 %v4703_v52  ;;  %v5326_v52 = vld [vmem:[#allocation8 + $0x214] sm:$0xf0]  ;;  %v5335_v49 = vld [vmem:[#allocation8 + $0x264] sm:$0xf] }
 0x172   : > { %v2042_v47 = vsel %vm6006_vm7, %v2039_v14, %v2041_v62  ;;  %v1619_v8 = vpop.f32.mrf.mxu3  ;;  %v2022_v13 = vsel %vm5916_vm8, %v2019_v61, %v2021_v42  ;;  %v1595_v18 = vpop.f32.mrf.mxu1  ;;  %v5307_v42 = vld [vmem:[#allocation8 + $0x184] sm:$0xf]  ;;  %v4760_v14 = vld [vmem:[#allocation8 + $0x188] sm:$0xf0]  ;;  %v4537_v5 = vrot.slane %v2025_v39, 10  ;;  %v1681_v3 = vmax.f32 %v1594_v37, 0.0  ;;  %2410 = vmatpush.bf16.msrb.mxu3 %v4659_v44 }
 0x173   : > { %2043 = vst [vmem:[#allocation2 + $0x20] sm:$0x1] %v2042_v47  ;;  %v1620_v17 = vadd.f32 %v1619_v8, %v944_v43  ;;  %v4862_v43 = vld [vmem:[#allocation8 + $0x250] sm:$0xf]  ;;  %v4763_v45 = vor.u32 %v5307_v42, %v4760_v14  ;;  %v4854_v61 = vld [vmem:[#allocation8 + $0x240] sm:$0xf] }
 0x174   : > { %2023 = vst [vmem:[#allocation2 + $0x1c] sm:$0x4] %v2022_v13  ;;  %v4863_v51 = vor.u32 %v5334_v46, %v4862_v43  ;;  %v5332_v62 = vld [vmem:[#allocation8 + $0x244] sm:$0xf0]  ;;  %v5263_v13 = vld [vmem:[#allocation8 + $0x34] sm:$0xf0]  ;;  %v4839_v46 = vor.u32 %v5328_v35, %v4838_v58 }
 0x175   : > { %v1683_v26 = vmax.f32 %v1620_v17, 0.0  ;;  %2860 = vmatpush.bf16.msrb.mxu0 %v4763_v45  ;;  %v5330_v17 = vld [vmem:[#allocation8 + $0x234] sm:$0xf0]  ;;  %v2047_v39 = vld [vmem:[#allocation2 + $0x20] sm:$0x2]  ;;  %v4643_v28 = vor.u32 %v5263_v13, %v4642_v4  ;;  %2616 = vmatpush.bf16.msra.mxu2 %v4695_v22 }
 0x176   : > { %3014 = vmatpush.bf16.msra.mxu1 %v4863_v51  ;;  %2411 = vmatpush.bf16.msrb.mxu3 %v4651_v12  ;;  %v5259_v45 = vld [vmem:[#allocation8 + $0x14] sm:$0xf0]  ;;  %v4830_v51 = vld [vmem:[#allocation8 + $0x210] sm:$0xf]  ;;  %v2707_v12 = vshll.u32 %v6159_v19, 16 }
 0x177   : > { %v1708_v38 = vpack.c.bf16 %v1683_v26, %v1682_v25  ;;  %v4846_v25 = vld [vmem:[#allocation8 + $0x230] sm:$0xf]  ;;  %v5324_v4 = vld [vmem:[#allocation8 + $0x204] sm:$0xf0] }
 0x178   : > { %v4847_v31 = vor.u32 %v5330_v17, %v4846_v25  ;;  %v2709_v58 = vrot.slane %v2707_v12, 1  ;;  %v2077_v35 = vld [vmem:[#allocation2 + $0x20] sm:$0x8]  ;;  %v5333_v12 = vld [vmem:[#allocation8 + $0x254] sm:$0xf] }
 0x179   : > { %v2060_v50 = vrot.slane %v1708_v38, 6  ;;  %v1580_v57 = vpop.f32.mrf.mxu0  ;;  %v2066_v10 = vshll.u32 %v1708_v38, 16  ;;  %2617 = vmatpush.bf16.msra.mxu2 %v4687_v20 }
 0x17a   : > { %v1621_v1 = vpop.f32.mrf.mxu3  ;;  %v1581_v47 = vadd.f32 %v1580_v57, %v941_v6  ;;  %2594 = vmatmul.bf16.gmra.mxu1 %v6152_v59  ;;  %v4855_v6 = vor.u32 %v5332_v62, %v4854_v61  ;;  %2412 = vmatpush.bf16.msrb.mxu3 %v4643_v28  ;;  %v6176_v62 = vld [vmem:[#allocation2 + $0xc] sm:$0xff] }
 0x17b   : > { %v2030_v2 = vld [vmem:[#allocation2 + $0x1c] sm:$0x4]  ;;  %v2063_v8 = vsel %vm5916_vm8, %v2060_v50, %v2062_v32  ;;  %v4539_v26 = vrot.slane %v2066_v10, 10  ;;  %v4634_v32 = vld [vmem:[#allocation8 + $0x20] sm:$0xf]  ;;  %v2712_v22 = vshll.u32 %v6176_v62, 16 }
 0x17c   : > { %v2031_v23 = vsel %vm5936_vm13, %v4537_v5, %v2030_v2  ;;  %2064 = vst [vmem:[#allocation2 + $0x20] sm:$0x4] %v2063_v8  ;;  %v1680_v15 = vmax.f32 %v1581_v47, 0.0  ;;  %3015 = vmatpush.bf16.msra.mxu1 %v4855_v6  ;;  %v4635_v44 = vor.u32 %v5261_v0, %v4634_v32  ;;  %v2168_v5 = vor.u32 %v2166_v9, %v6102_v63  ;;  %v2104_v1 = vld [vmem:[#allocation2 + $0x20] sm:$0x1] }
 0x17d   : > { %2032 = vst [vmem:[#allocation2 + $0x1c] sm:$0x4] %v2031_v23  ;;  %v4627_v2 = vor.u32 %v5259_v45, %v4626_v41  ;;  %v4831_v47 = vor.u32 %v5326_v52, %v4830_v51  ;;  %v5257_v8 = vld [vmem:[#allocation8 + $0x4] sm:$0xf0]  ;;  %v4822_v63 = vld [vmem:[#allocation8 + $0x200] sm:$0xf]  ;;  %v2139_v17 = vunpack.c.l.b16 %v2104_v1 }
 0x17e   : > { %v1707_v18 = vpack.c.bf16 %v1681_v3, %v1680_v15  ;;  %2413 = vmatpush.bf16.msrb.mxu3 %v4635_v44  ;;  %v4618_v3 = vld [vmem:[#allocation8] sm:$0xf]  ;;  %v4880_v28 = vld [vmem:[#allocation8 + $0x278] sm:$0xf0]  ;;  %v2705_v41 = vshrl.u32 %v6159_v19, 16  ;;  %v6213_v1 = vld [vmem:[#allocation2 + $0x14] sm:$0xff] }
 0x17f   : > { %v2144_v33 = vpack.c.b16 %v2139_v17, %v2139_v17  ;;  %v4806_v45 = vld [vmem:[#allocation8 + $0x1e0] sm:$0xf] }
 0x180   : > { %v2045_v30 = vrot.slane %v1707_v18, 7  ;;  %v2051_v42 = vshll.u32 %v1707_v18, 16  ;;  %3016 = vmatpush.bf16.msra.mxu1 %v4847_v31  ;;  %v4823_v31 = vor.u32 %v5324_v4, %v4822_v63  ;;  %v2710_v48 = vor.u32 %v2709_v58, %v2705_v41 }
 0x181   : > { %v1582_v27 = vpop.f32.mrf.mxu0  ;;  %v2720_v63 = vshll.u32 %v6213_v1, 16 }
 0x182   : > { %v2048_v37 = vsel %vm5890_vm3, %v2045_v30, %v2047_v39  ;;  %v4538_v57 = vrot.slane %v2051_v42, 11  ;;  %2414 = vmatpush.bf16.msrb.mxu3 %v4627_v2  ;;  %v4619_v39 = vor.u32 %v5257_v8, %v4618_v3  ;;  %v2714_v42 = vrot.slane %v2712_v22, 1  ;;  %v4798_v3 = vld [vmem:[#allocation8 + $0x1d0] sm:$0xf] }
 0x183   : > { %v2071_v38 = vld [vmem:[#allocation2 + $0x20] sm:$0x4]  ;;  %2049 = vst [vmem:[#allocation2 + $0x20] sm:$0x2] %v2048_v37  ;;  %vm3107_vm3 = vsmask.f32 6400 }
 0x184   : > { %v2072_v14 = vsel %vm5936_vm13, %v4539_v26, %v2071_v38  ;;  %v6167_v43 = vld [vmem:[#allocation2 + $0x18] sm:$0xff]  ;;  %3017 = vmatpush.bf16.msra.mxu1 %v4839_v46  ;;  %v5337_v26 = vld [vmem:[#allocation8 + $0x274] sm:$0xf]  ;;  %v6209_v51 = vsel %vm2145_vm0, %v2710_v48, %v2714_v42 }
 0x185   : > { %2073 = vst [vmem:[#allocation2 + $0x20] sm:$0x4] %v2072_v14  ;;  %2460 = vmatmul.bf16.gmra.mxu0 %v6167_v43  ;;  %v2170_v50 = vshll.u32 %v6167_v43, 16  ;;  %v2493_v56 = vrot.slane %v6167_v43, 1  ;;  %v6181_v13 = vld [vmem:[#allocation2 + $0x18] sm:$0xff]  ;;  %v4883_v32 = vor.u32 %v5337_v26, %v4880_v28  ;;  %v2178_v14 = vshll.u32 %v2144_v33, 16 }
 0x186   : > { %v3759_v0 = vrot.slane %v6181_v13, 2  ;;  %2415 = vmatpush.bf16.msrb.mxu3 %v4619_v39  ;;  %v5320_v46 = vld [vmem:[#allocation8 + $0x1e4] sm:$0xf0]  ;;  %v5347_v28 = vld [vmem:[#allocation8 + $0x2c4] sm:$0xf] }
 0x187   : > { %v6174_v61 = vrot.slane %v2170_v50, 1  ;;  %v6188_v25 = vsel %vm2487_vm10, %v2491_v7, %v2493_v56  ;;  %v4815_v7 = vor.u32 %v5322_v53, %v4814_v24  ;;  %3041 = vmatpush.bf16.msrb.mxu2 %v4883_v32  ;;  %v4807_v9 = vor.u32 %v5320_v46, %v4806_v45  ;;  %v4928_v24 = vld [vmem:[#allocation8 + $0x2d8] sm:$0xf0]  ;;  %v4790_v53 = vld [vmem:[#allocation8 + $0x1c0] sm:$0xf] }
 0x188   : > { %3018 = vmatpush.bf16.msra.mxu1 %v4831_v47  ;;  %v6200_v37 = vsel %vm3755_vm9, %v3757_v60, %v3759_v0  ;;  %v4872_v60 = vld [vmem:[#allocation8 + $0x268] sm:$0xf0]  ;;  %v2174_v50 = vshrl.u32 %v6167_v43, 16  ;;  %v2180_v20 = vrot.slane %v2178_v14, 1  ;;  %v2716_v32 = vshrl.u32 %v6176_v62, 16 }
 0x189   : > { %v1632_v10 = vpop.f32.mrf.mxu0  ;;  %v2173_v23 = vsel %vm2145_vm0, %v2168_v5, %v6174_v61  ;;  %v4875_v19 = vor.u32 %v5335_v49, %v4872_v60  ;;  %v4944_v5 = vld [vmem:[#allocation8 + $0x2f8] sm:$0xf0]  ;;  %v5345_v45 = vld [vmem:[#allocation8 + $0x2b4] sm:$0xf]  ;;  %v2920_v49 = vrot.slane %v6176_v62, 1 }
 0x18a   : > { %v2056_v15 = vld [vmem:[#allocation2 + $0x20] sm:$0x2]  ;;  %v1633_v6 = vadd.f32 %v5496_v55, %v1632_v10  ;;  %2284 = vmatmul.bf16.vlgmr.msra.gmra.mxu3 %v2173_v23  ;;  %2313 = vmatmul.bf16.gmra.mxu2 %v2173_v23  ;;  %v2176_v52 = vor.u32 %v2174_v50, %v6174_v61  ;;  %v2495_v55 = vrot.slane %v2144_v33, 1  ;;  %v5318_v61 = vld [vmem:[#allocation8 + $0x1d4] sm:$0xf0] }
 0x18b   : > { %v2057_v18 = vsel %vm5901_vm5, %v4538_v57, %v2056_v15  ;;  %2599 = vmatmul.bf16.gmra.mxu1 %v6188_v25  ;;  %2824 = vmatpush.bf16.msra.mxu3 %v4815_v7  ;;  %v4947_v57 = vor.u32 %v5353_v54, %v4944_v5  ;;  %v4799_v8 = vor.u32 %v5318_v61, %v4798_v3  ;;  %v5351_v10 = vld [vmem:[#allocation8 + $0x2e4] sm:$0xf]  ;;  %v4936_v23 = vld [vmem:[#allocation8 + $0x2e8] sm:$0xf0]  ;;  %v4864_v15 = vld [vmem:[#allocation8 + $0x258] sm:$0xf0] }
 0x18c   : > { %2058 = vst [vmem:[#allocation2 + $0x20] sm:$0x2] %v2057_v18  ;;  %v1684_v30 = vmax.f32 %v1633_v6, 0.0  ;;  %3019 = vmatpush.bf16.msra.mxu1 %v4823_v31  ;;  %3042 = vmatpush.bf16.msrb.mxu2 %v4875_v19  ;;  %v2181_v2 = vsel %vm2145_vm0, %v2176_v52, %v2180_v20  ;;  %v6219_v47 = vsel %vm2487_vm10, %v2493_v56, %v2495_v55  ;;  %v5349_v6 = vld [vmem:[#allocation8 + $0x2d4] sm:$0xf] }
 0x18d   : > { %3250 = vmatpush.bf16.msra.mxu0 %v4947_v57  ;;  %v4939_v4 = vor.u32 %v5351_v10, %v4936_v23  ;;  %v4867_v17 = vor.u32 %v5333_v12, %v4864_v15  ;;  %v5316_v18 = vld [vmem:[#allocation8 + $0x1c4] sm:$0xf0]  ;;  %v5501_v56 = vld [vmem:[#allocation2 + $0x4] sm:$0xe]  ;;  %v4931_v39 = vor.u32 %v5349_v6, %v4928_v24  ;;  %v5331_v31 = vld [vmem:[#allocation8 + $0x244] sm:$0xf] }
 0x18e   : > { %v1709_v27 = vpack.c.bf16 %v1684_v30, %v1684_v30  ;;  %v4791_v26 = vor.u32 %v5316_v18, %v4790_v53  ;;  %v4920_v30 = vld [vmem:[#allocation8 + $0x2c8] sm:$0xf0]  ;;  %v4912_v46 = vld [vmem:[#allocation8 + $0x2b8] sm:$0xf0]  ;;  %v4782_v50 = vld [vmem:[#allocation8 + $0x1b0] sm:$0xf] }
 0x18f   : > { %2825 = vmatpush.bf16.msra.mxu3 %v4807_v9  ;;  %v4856_v7 = vld [vmem:[#allocation8 + $0x248] sm:$0xf0]  ;;  %v4915_v48 = vor.u32 %v5345_v45, %v4912_v46  ;;  %v5497_v9 = vld [vmem:[#allocation2] sm:$0xff]   ;;  %v5314_v19 = vld [vmem:[#allocation8 + $0x1b4] sm:$0xf0]  ;;  %v2724_v53 = vshrl.u32 %v6213_v1, 16 }
 0x190   : > { %v2075_v38 = vrot.slane %v1709_v27, 5  ;;  %3043 = vmatpush.bf16.msrb.mxu2 %v4867_v17  ;;  %v2722_v27 = vrot.slane %v2720_v63, 1  ;;  %v4859_v58 = vor.u32 %v5331_v31, %v4856_v7  ;;  %v4783_v52 = vor.u32 %v5314_v19, %v4782_v50  ;;  %v5343_v20 = vld [vmem:[#allocation8 + $0x2a4] sm:$0xf]  ;;  %v4904_v55 = vld [vmem:[#allocation8 + $0x2a8] sm:$0xf0] }
 0x191   : > { %v1634_v44 = vpop.f32.mrf.mxu0  ;;  %3251 = vmatpush.bf16.msra.mxu0 %v4939_v4  ;;  %v5018_v54 = vld [vmem:[#allocation8 + $0x370] sm:$0xf]  ;;  %v4907_v5 = vor.u32 %v5343_v20, %v4904_v55  ;;  %v5373_v57 = vld [vmem:[#allocation8 + $0x374] sm:$0xf0]  ;;  %v5341_v23 = vld [vmem:[#allocation8 + $0x294] sm:$0xf] }
 0x192   : > { %v2078_v40 = vsel %vm5954_vm1, %v2075_v38, %v2077_v35  ;;  %v2718_v35 = vor.u32 %v2716_v32, %v2714_v42  ;;  %v4923_v38 = vor.u32 %v5347_v28, %v4920_v30  ;;  %v6235_v44 = vor.u32 %v5501_v56, %v6161_v21  ;;  %v4896_v12 = vld [vmem:[#allocation8 + $0x298] sm:$0xf0]  ;;  %v5010_v4 = vld [vmem:[#allocation8 + $0x360] sm:$0xf]  ;;  %v5371_v6 = vld [vmem:[#allocation8 + $0x364] sm:$0xf0] }
 0x193   : > { %2079 = vst [vmem:[#allocation2 + $0x20] sm:$0x8] %v2078_v40  ;;  %2826 = vmatpush.bf16.msra.mxu3 %v4799_v8  ;;  %v5019_v8 = vor.u32 %v5373_v57, %v5018_v54  ;;  %v4899_v17 = vor.u32 %v5341_v23, %v4896_v12  ;;  %v5011_v24 = vor.u32 %v5371_v6, %v5010_v4  ;;  %v2663_v56 = vld [vmem:[#allocation2 + $0x24] sm:$0x1]  ;;  %v5312_v28 = vld [vmem:[#allocation8 + $0x1a4] sm:$0xf0] }
 0x194   : > { %3044 = vmatpush.bf16.msrb.mxu2 %v4859_v58  ;;  %v6232_v14 = vsel %vm2145_vm0, %v2718_v35, %v2722_v27  ;;  %v2919_v21 = vrot.slane %v6235_v44, 1  ;;  %v5339_v30 = vld [vmem:[#allocation8 + $0x284] sm:$0xf]  ;;  %v4888_v7 = vld [vmem:[#allocation8 + $0x288] sm:$0xf0]  ;;  %v2698_v50 = vunpack.c.l.b16 %v2663_v56  ;;  %v5498_v55 = vld [vmem:[#allocation2 + $0x8] sm:$0xff] }
 0x195   : > { %2861 = vmatmul.bf16.vlgmr.msrb.gmra.mxu0 %v6209_v51  ;;  %3437 = vmatpush.bf16.msrb.mxu1 %v5019_v8  ;;  %v5002_v58 = vld [vmem:[#allocation8 + $0x350] sm:$0xf]  ;;  %v5369_v35 = vld [vmem:[#allocation8 + $0x354] sm:$0xf0]  ;;  %v4891_v45 = vor.u32 %v5339_v30, %v4888_v7  ;;  %v4994_v19 = vld [vmem:[#allocation8 + $0x340] sm:$0xf] }
 0x196   : > { %3252 = vmatpush.bf16.msra.mxu0 %v4931_v39  ;;  %v6253_v60 = vsel %vm2487_vm10, %v2919_v21, %v2920_v49  ;;  %v2726_v39 = vor.u32 %v2724_v53, %v2722_v27  ;;  %v5003_v46 = vor.u32 %v5369_v35, %v5002_v58  ;;  %v4840_v21 = vld [vmem:[#allocation8 + $0x228] sm:$0xf0]  ;;  %v4766_v57 = vld [vmem:[#allocation8 + $0x190] sm:$0xf]  ;;  %v5325_v8 = vld [vmem:[#allocation8 + $0x214] sm:$0xf] }
 0x197   : > { %2827 = vmatpush.bf16.msra.mxu3 %v4791_v26  ;;  %v4774_v26 = vld [vmem:[#allocation8 + $0x1a0] sm:$0xf]  ;;  %v5363_v6 = vld [vmem:[#allocation8 + $0x324] sm:$0xf0]  ;;  %v5323_v7 = vld [vmem:[#allocation8 + $0x204] sm:$0xf] }
 0x198   : > { %v4775_v31 = vor.u32 %v5312_v28, %v4774_v26  ;;  %v4978_v4 = vld [vmem:[#allocation8 + $0x320] sm:$0xf]  ;;  %v5308_v26 = vld [vmem:[#allocation8 + $0x184] sm:$0xf0]  ;;  %v4970_v28 = vld [vmem:[#allocation8 + $0x310] sm:$0xf] }
 0x199   : > { %v2446_v3 = vpop.f32.mrf.mxu0  ;;  %3438 = vmatpush.bf16.msrb.mxu1 %v5011_v24  ;;  %v4824_v58 = vld [vmem:[#allocation8 + $0x208] sm:$0xf0] }
 0x19a   : > { %2289 = vmatmul.bf16.gmra.mxu3 %v2181_v2  ;;  %2318 = vmatmul.bf16.gmra.mxu2 %v2181_v2  ;;  %v6226_v33 = vld [vmem:[#allocation2 + $0x20] sm:$0xff]  ;;  %v4827_v35 = vor.u32 %v5323_v7, %v4824_v58  ;;  %v3121_v7 = vrot.slane %v2720_v63, 2 }
 0x19b   : > { %2604 = vmatmul.bf16.gmra.mxu1 %v6219_v47  ;;  %v3761_v41 = vrot.slane %v6226_v33, 2  ;;  %v6246_v40 = vld [vmem:[#allocation2 + $0x1c] sm:$0xff]  ;;  %3253 = vmatpush.bf16.msra.mxu0 %v4923_v38  ;;  %v5329_v2 = vld [vmem:[#allocation8 + $0x234] sm:$0xf] }
 0x19c   : > { %2828 = vmatpush.bf16.msra.mxu3 %v4783_v52  ;;  %v5367_v52 = vld [vmem:[#allocation8 + $0x344] sm:$0xf0]  ;;  %v4926_v58 = vld [vmem:[#allocation8 + $0x2d0] sm:$0xf] }
 0x19d   : > { %v6243_v42 = vsel %vm3755_vm9, %v3759_v0, %v3761_v41  ;;  %v2728_v0 = vshll.u32 %v6246_v40, 16  ;;  %3439 = vmatpush.bf16.msrb.mxu1 %v5003_v46  ;;  %v4995_v20 = vor.u32 %v5367_v52, %v4994_v19  ;;  %v3109_v52 = vshrl.u32 %v6235_v44, 16 }
 0x19f   : > { %3254 = vmatpush.bf16.msra.mxu0 %v4915_v48  ;;  %v2730_v18 = vrot.slane %v2728_v0, 1  ;;  %v5327_v48 = vld [vmem:[#allocation8 + $0x224] sm:$0xf] }
 0x1a0   : > { %2829 = vmatpush.bf16.msra.mxu3 %v4775_v31  ;;  %v4843_v27 = vor.u32 %v5327_v48, %v4840_v21  ;;  %v5361_v31 = vld [vmem:[#allocation8 + $0x314] sm:$0xf0]  ;;  %v4962_v48 = vld [vmem:[#allocation8 + $0x300] sm:$0xf]  ;;  %v5359_v21 = vld [vmem:[#allocation8 + $0x304] sm:$0xf0] }
 0x1a1   : > { %v6265_v38 = vsel %vm2145_vm0, %v2726_v39, %v2730_v18  ;;  %3440 = vmatpush.bf16.msrb.mxu1 %v4995_v20  ;;  %v4979_v39 = vor.u32 %v5363_v6, %v4978_v4  ;;  %v4971_v46 = vor.u32 %v5361_v31, %v4970_v28  ;;  %v3112_v20 = vshll.u32 %v6235_v44, 16  ;;  %v4934_v44 = vld [vmem:[#allocation8 + $0x2e0] sm:$0xf]  ;;  %v5012_v4 = vld [vmem:[#allocation8 + $0x368] sm:$0xf0] }
 0x1a2   : > { %v3120_v31 = vrot.slane %v2724_v53, 1 }
 0x1a3   : > { %3255 = vmatpush.bf16.msra.mxu0 %v4907_v5  ;;  %v6275_v5 = vpack.c.b16 %v2698_v50, %v2698_v50 }
 0x1a5   : > { %2866 = vmatmul.bf16.gmra.mxu0 %v6232_v14 }
 0x1a7   : > { %3256 = vmatpush.bf16.msra.mxu0 %v4899_v17  ;;  %v4758_v17 = vld [vmem:[#allocation8 + $0x180] sm:$0xf]  ;;  %v6287_v50 = vpop.f32.mrf.mxu1 }
 0x1a8   : > { %v4759_v30 = vor.u32 %v5308_v26, %v4758_v17  ;;  %v2926_v26 = vrot.slane %v6275_v5, 1 }
 0x1aa   : > { %2416 = vmatmul.bf16.vlgmr.msrb.gmra.mxu3 %v5497_v9  ;;  %2618 = vmatmul.bf16.vlgmr.msra.gmra.mxu2 %v6131_v16  ;;  %v4848_v16 = vld [vmem:[#allocation8 + $0x238] sm:$0xf0]  ;;  %v2922_v9 = vrot.slane %v6213_v1, 1 }
 0x1ab   : > { %3020 = vmatmul.bf16.vlgmr.msra.gmra.mxu1 %v6253_v60  ;;  %v4851_v10 = vor.u32 %v5329_v2, %v4848_v16  ;;  %3257 = vmatpush.bf16.msra.mxu0 %v4891_v45  ;;  %v5310_v2 = vld [vmem:[#allocation8 + $0x194] sm:$0xf0] }
 0x1ac   : > { %v6273_v54 = vsel %vm2487_vm10, %v2920_v49, %v2922_v9  ;;  %v4767_v16 = vor.u32 %v5310_v2, %v4766_v57  ;;  %v2732_v49 = vshrl.u32 %v6246_v40, 16  ;;  %v5354_v57 = vld [vmem:[#allocation8 + $0x2f4] sm:$0xf0] }
 0x1ad   : > { %v2304_v61 = vpop.f32.mrf.mxu2  ;;  %3045 = vmatpush.bf16.msrb.mxu2 %v4851_v10  ;;  %v2736_v10 = vshll.u32 %v6275_v5, 16 }
 0x1ae   : > { %v6257_v15 = vadd.f32 %v2446_v3, %v2304_v61  ;;  %v4986_v3 = vld [vmem:[#allocation8 + $0x330] sm:$0xf]  ;;  %v5365_v61 = vld [vmem:[#allocation8 + $0x334] sm:$0xf0]  ;;  %2830 = vmatpush.bf16.msra.mxu3 %v4767_v16  ;;  %v2734_v24 = vor.u32 %v2732_v49, %v2730_v18  ;;  %v2924_v18 = vrot.slane %v6246_v40, 1 }
 0x1af   : > { %v4987_v23 = vor.u32 %v5365_v61, %v4986_v3  ;;  %v2738_v56 = vrot.slane %v2736_v10, 1  ;;  %v5372_v16 = vld [vmem:[#allocation8 + $0x374] sm:$0xf]  ;;  %v5020_v3 = vld [vmem:[#allocation8 + $0x378] sm:$0xf0]  ;;  %v3116_v61 = vrot.slane %v2716_v32, 1  ;;  %v6301_v32 = vpop.f32.mrf.mxu0  ;;  %v6303_v62 = vpop.f32.mrf.mxu1 }
 0x1b0   : > { %v6292_v19 = vsel %vm2487_vm10, %v2922_v9, %v2924_v18  ;;  %v3111_v9 = vrot.slane %v3109_v52, 1  ;;  %v5352_v10 = vld [vmem:[#allocation8 + $0x2e4] sm:$0xf0]  ;;  %v5068_v52 = vld [vmem:[#allocation8 + $0x3d8] sm:$0xf0] }
 0x1b1   : > { %3046 = vmatpush.bf16.msrb.mxu2 %v4843_v27  ;;  %3441 = vmatpush.bf16.msrb.mxu1 %v4987_v23  ;;  %v6283_v45 = vsel %vm2145_vm0, %v2734_v24, %v2738_v56  ;;  %v4963_v27 = vor.u32 %v5359_v21, %v4962_v48  ;;  %v5370_v23 = vld [vmem:[#allocation8 + $0x364] sm:$0xf]  ;;  %v5388_v56 = vld [vmem:[#allocation8 + $0x3f4] sm:$0xf]  ;;  %v5076_v48 = vld [vmem:[#allocation8 + $0x3e8] sm:$0xf0] }
 0x1b2   : > { %2831 = vmatpush.bf16.msra.mxu3 %v4759_v30  ;;  %v5015_v6 = vor.u32 %v5370_v23, %v5012_v4  ;;  %v6315_v30 = vsel %vm2487_vm10, %v2924_v18, %v2926_v26  ;;  %v5368_v21 = vld [vmem:[#allocation8 + $0x354] sm:$0xf]  ;;  %v5036_v40 = vld [vmem:[#allocation8 + $0x398] sm:$0xf0] }
 0x1b3   : > { %v5384_v18 = vld [vmem:[#allocation8 + $0x3d4] sm:$0xf] }
 0x1b4   : > { %v5071_v63 = vor.u32 %v5384_v18, %v5068_v52  ;;  %v5376_v52 = vld [vmem:[#allocation8 + $0x394] sm:$0xf] }
 0x1b5   : > { %2871 = vmatmul.bf16.gmra.mxu0 %v6265_v38  ;;  %3442 = vmatpush.bf16.msrb.mxu1 %v4979_v39  ;;  %v6308_v24 = vpop.f32.mrf.mxu2  ;;  %v5084_v39 = vld [vmem:[#allocation8 + $0x3f8] sm:$0xf0] }
 0x1b6   : > { %v5087_v28 = vor.u32 %v5388_v56, %v5084_v39  ;;  %v6339_v39 = vld [vmem:[#allocation2 + $0x10] sm:$0xff] }
 0x1b7   : > { %v3345_v26 = vrot.slane %v6339_v39, 1 }
 0x1b8   : > { %3689 = vmatpush.bf16.msrb.mxu0 %v5087_v28  ;;  %v3124_v28 = vrot.slane %v2732_v49, 1 }
 0x1b9   : > { %3443 = vmatpush.bf16.msrb.mxu1 %v4971_v46  ;;  %v5386_v46 = vld [vmem:[#allocation8 + $0x3e4] sm:$0xf] }
 0x1ba   : > { %2421 = vmatmul.bf16.gmra.mxu3 %v5498_v55  ;;  %2623 = vmatmul.bf16.gmra.mxu2 %v6152_v59  ;;  %v4832_v59 = vld [vmem:[#allocation8 + $0x218] sm:$0xf0]  ;;  %v4942_v55 = vld [vmem:[#allocation8 + $0x2f0] sm:$0xf] }
 0x1bb   : > { %3025 = vmatmul.bf16.gmra.mxu1 %v6273_v54  ;;  %v4835_v12 = vor.u32 %v5325_v8, %v4832_v59  ;;  %v4943_v2 = vor.u32 %v5354_v57, %v4942_v55  ;;  %v3114_v8 = vrot.slane %v3112_v20, 2  ;;  %v2451_v20 = vpop.f32.mrf.mxu0  ;;  %v3295_v57 = vld [vmem:[#allocation2 + $0x8] sm:$0xe] }
 0x1bd   : > { %3047 = vmatpush.bf16.msrb.mxu2 %v4835_v12  ;;  %3444 = vmatpush.bf16.msrb.mxu1 %v4963_v27  ;;  %v4935_v12 = vor.u32 %v5352_v10, %v4934_v44  ;;  %v3115_v17 = vor.u32 %v3114_v8, %v3111_v9  ;;  %v5004_v27 = vld [vmem:[#allocation8 + $0x358] sm:$0xf0]  ;;  %v5060_v9 = vld [vmem:[#allocation8 + $0x3c8] sm:$0xf0]  ;;  %v5366_v8 = vld [vmem:[#allocation8 + $0x344] sm:$0xf] }
 0x1be   : > { %3221 = vmatpush.bf16.msrb.mxu3 %v4943_v2  ;;  %v5007_v53 = vor.u32 %v5368_v21, %v5004_v27  ;;  %v6326_v2 = vor.u32 %v3121_v7, %v3120_v31  ;;  %v4996_v44 = vld [vmem:[#allocation8 + $0x348] sm:$0xf0]  ;;  %v3125_v31 = vrot.slane %v2728_v0, 2  ;;  %v4910_v7 = vld [vmem:[#allocation8 + $0x2b0] sm:$0xf]  ;;  %v5039_v0 = vor.u32 %v5376_v52, %v5036_v40 }
 0x1bf   : > { %v4999_v4 = vor.u32 %v5366_v8, %v4996_v44  ;;  %v5364_v21 = vld [vmem:[#allocation8 + $0x334] sm:$0xf]  ;;  %v5028_v8 = vld [vmem:[#allocation8 + $0x388] sm:$0xf0]  ;;  %v5130_v44 = vld [vmem:[#allocation8 + $0x450] sm:$0xf] }
 0x1c0   : > { %v3086_v27 = vld [vmem:[#allocation2 + $0x24] sm:$0x3] }
 0x1c1   : > { %3048 = vmatpush.bf16.msrb.mxu2 %v4827_v35  ;;  %v5350_v35 = vld [vmem:[#allocation8 + $0x2d4] sm:$0xf0]  ;;  %v5360_v52 = vld [vmem:[#allocation8 + $0x314] sm:$0xf] }
 0x1c2   : > { %3222 = vmatpush.bf16.msrb.mxu3 %v4935_v12  ;;  %v4927_v5 = vor.u32 %v5350_v35, %v4926_v58  ;;  %v5346_v58 = vld [vmem:[#allocation8 + $0x2b4] sm:$0xf0] }
 0x1c3   : > { %v4911_v35 = vor.u32 %v5346_v58, %v4910_v7  ;;  %v3347_v7 = vrot.slane %v6181_v13, 1 }
 0x1c5   : > { %2876 = vmatmul.bf16.gmra.mxu0 %v6283_v45 }
 0x1c6   : > { %3223 = vmatpush.bf16.msrb.mxu3 %v4927_v5  ;;  %v5044_v5 = vld [vmem:[#allocation8 + $0x3a8] sm:$0xf0] }
 0x1ca   : > { %2426 = vmatmul.bf16.gmra.mxu3 %v6088_v34  ;;  %2628 = vmatmul.bf16.gmra.mxu2 %v6188_v25  ;;  %v3117_v34 = vrot.slane %v2712_v22, 2  ;;  %v5023_v25 = vor.u32 %v5372_v16, %v5020_v3  ;;  %v3330_v16 = vunpack.c.l.b16 %v3295_v57  ;;  %v4918_v3 = vld [vmem:[#allocation8 + $0x2c0] sm:$0xf]  ;;  %v5403_v57 = vld [vmem:[#allocation8 + $0x464] sm:$0xf0] }
 0x1cb   : > { %3030 = vmatmul.bf16.gmra.mxu1 %v6292_v19 }
 0x1cc   : > { %3466 = vmatpush.bf16.msra.mxu2 %v5023_v25  ;;  %v3118_v59 = vor.u32 %v3117_v34, %v3116_v61  ;;  %v5348_v61 = vld [vmem:[#allocation8 + $0x2c4] sm:$0xf0]  ;;  %v5382_v34 = vld [vmem:[#allocation8 + $0x3c4] sm:$0xf]  ;;  %v6334_v23 = vpack.c.b16 %v3331_v36, %v3330_v16 }
 0x1cd   : > { %v4919_v25 = vor.u32 %v5348_v61, %v4918_v3  ;;  %v5063_v12 = vor.u32 %v5382_v34, %v5060_v9  ;;  %v6359_v3 = vpop.f32.mrf.mxu0  ;;  %v4902_v61 = vld [vmem:[#allocation8 + $0x2a0] sm:$0xf]  ;;  %v5344_v34 = vld [vmem:[#allocation8 + $0x2a4] sm:$0xf0] }
 0x1ce   : > { %v6306_v22 = vsel %vm3107_vm3, %v3115_v17, %v3118_v59  ;;  %v6330_v10 = vsel %vm3107_vm3, %v3118_v59, %v6326_v2  ;;  %v5052_v17 = vld [vmem:[#allocation8 + $0x3b8] sm:$0xf0]  ;;  %v3344_v29 = vrot.slane %v6334_v23, 1  ;;  %v4903_v9 = vor.u32 %v5344_v34, %v4902_v61  ;;  %v4886_v61 = vld [vmem:[#allocation8 + $0x280] sm:$0xf] }
 0x1cf   : > { %3224 = vmatpush.bf16.msrb.mxu3 %v4919_v25  ;;  %v5374_v25 = vld [vmem:[#allocation8 + $0x384] sm:$0xf]  ;;  %v5340_v34 = vld [vmem:[#allocation8 + $0x284] sm:$0xf0] }
 0x1d0   : > { %3467 = vmatpush.bf16.msra.mxu2 %v5015_v6  ;;  %v5380_v6 = vld [vmem:[#allocation8 + $0x3b4] sm:$0xf]  ;;  %v6348_v36 = vsel %vm2487_vm10, %v3344_v29, %v3345_v26  ;;  %v5362_v29 = vld [vmem:[#allocation8 + $0x324] sm:$0xf] }
 0x1d1   : > { %v5055_v59 = vor.u32 %v5380_v6, %v5052_v17  ;;  %v5031_v17 = vor.u32 %v5374_v25, %v5028_v8  ;;  %v5098_v25 = vld [vmem:[#allocation8 + $0x410] sm:$0xf]  ;;  %v5393_v8 = vld [vmem:[#allocation8 + $0x414] sm:$0xf0] }
 0x1d3   : > { %3225 = vmatpush.bf16.msrb.mxu3 %v4911_v35 }
 0x1d4   : > { %3468 = vmatpush.bf16.msra.mxu2 %v5007_v53  ;;  %v3105_v53 = vunpack.c.l.b16 %v3086_v27 }
 0x1d5   : > { %3258 = vmatmul.bf16.vlgmr.msra.gmra.mxu0 %v6306_v22 }
 0x1d6   : > { %v3106_v6 = vpack.c.b16 %v3105_v53, %v3105_v53 }
 0x1d7   : > { %3226 = vmatpush.bf16.msrb.mxu3 %v4903_v9  ;;  %v4887_v9 = vor.u32 %v5340_v34, %v4886_v61 }
 0x1d8   : > { %3469 = vmatpush.bf16.msra.mxu2 %v4999_v4  ;;  %v3129_v58 = vshrl.u32 %v3106_v6, 16  ;;  %v3132_v35 = vshll.u32 %v3106_v6, 16 }
 0x1da   : > { %2431 = vmatmul.bf16.gmra.mxu3 %v6167_v43  ;;  %2633 = vmatmul.bf16.gmra.mxu2 %v6219_v47  ;;  %v6322_v43 = vpop.f32.mrf.mxu1  ;;  %v5079_v47 = vor.u32 %v5386_v46, %v5076_v48  ;;  %v5405_v48 = vld [vmem:[#allocation8 + $0x474] sm:$0xf0]  ;;  %v3131_v40 = vrot.slane %v3129_v58, 1  ;;  %v3349_v58 = vrot.slane %v6226_v33, 1 }
 0x1db   : > { %3035 = vmatmul.bf16.gmra.mxu1 %v6315_v30 }
 0x1dc   : > { %3690 = vmatpush.bf16.msrb.mxu0 %v5079_v47  ;;  %v4988_v47 = vld [vmem:[#allocation8 + $0x338] sm:$0xf0] }
 0x1dd   : > { %v2309_v55 = vpop.f32.mrf.mxu2  ;;  %v4991_v49 = vor.u32 %v5364_v21, %v4988_v47  ;;  %v4894_v21 = vld [vmem:[#allocation8 + $0x290] sm:$0xf]  ;;  %v5342_v47 = vld [vmem:[#allocation8 + $0x294] sm:$0xf0] }
 0x1de   : > { %v6324_v1 = vadd.f32 %v2451_v20, %v2309_v55  ;;  %v6357_v55 = vor.u32 %v3125_v31, %v3124_v28  ;;  %v4980_v28 = vld [vmem:[#allocation8 + $0x328] sm:$0xf0]  ;;  %v4895_v27 = vor.u32 %v5342_v47, %v4894_v21  ;;  %v6395_v21 = vsel %vm2487_vm10, %v3347_v7, %v3349_v58 }
 0x1df   : > { %3470 = vmatpush.bf16.msra.mxu2 %v4991_v49  ;;  %v4983_v31 = vor.u32 %v5362_v29, %v4980_v28  ;;  %v5397_v49 = vld [vmem:[#allocation8 + $0x434] sm:$0xf0]  ;;  %v5099_v29 = vor.u32 %v5393_v8, %v5098_v25  ;;  %v3533_v47 = vshrl.u32 %v6334_v23, 16  ;;  %v5387_v8 = vld [vmem:[#allocation8 + $0x3e4] sm:$0xf0] }
 0x1e0   : > { %3691 = vmatpush.bf16.msrb.mxu0 %v5071_v63  ;;  %v5138_v63 = vld [vmem:[#allocation8 + $0x460] sm:$0xf]  ;;  %v6364_v4 = vsel %vm3107_vm3, %v6326_v2, %v6357_v55  ;;  %3227 = vmatpush.bf16.msrb.mxu3 %v4895_v27  ;;  %v3536_v27 = vshll.u32 %v6334_v23, 16 }
 0x1e1   : > { %v5139_v16 = vor.u32 %v5403_v57, %v5138_v63  ;;  %v5395_v57 = vld [vmem:[#allocation8 + $0x424] sm:$0xf0] }
 0x1e2   : > { %v6337_v56 = vpop.f32.mrf.mxu1 }
 0x1e3   : > { %3471 = vmatpush.bf16.msra.mxu2 %v4983_v31 }
 0x1e4   : > { %3692 = vmatpush.bf16.msrb.mxu0 %v5063_v12  ;;  %v5401_v12 = vld [vmem:[#allocation8 + $0x454] sm:$0xf0]  ;;  %3228 = vmatpush.bf16.msrb.mxu3 %v4887_v9  ;;  %v5074_v9 = vld [vmem:[#allocation8 + $0x3e0] sm:$0xf] }
 0x1e5   : > { %3263 = vmatmul.bf16.gmra.mxu0 %v6330_v10  ;;  %v6386_v31 = vpop.f32.mrf.mxu2 }
 0x1e8   : > { %3693 = vmatpush.bf16.msrb.mxu0 %v5055_v59  ;;  %v5131_v59 = vor.u32 %v5401_v12, %v5130_v44  ;;  %v5358_v44 = vld [vmem:[#allocation8 + $0x304] sm:$0xf]  ;;  %v4964_v12 = vld [vmem:[#allocation8 + $0x308] sm:$0xf0] }
 0x1e9   : > { %v4967_v28 = vor.u32 %v5358_v44, %v4964_v12  ;;  %v5402_v44 = vld [vmem:[#allocation8 + $0x464] sm:$0xf]  ;;  %v5075_v12 = vor.u32 %v5387_v8, %v5074_v9  ;;  %v5124_v9 = vld [vmem:[#allocation8 + $0x448] sm:$0xf0] }
 0x1ea   : > { %2832 = vmatmul.bf16.vlgmr.msra.gmra.mxu3 %v6209_v51  ;;  %3049 = vmatmul.bf16.vlgmr.msrb.gmra.mxu2 %v6253_v60  ;;  %v5378_v51 = vld [vmem:[#allocation8 + $0x3a4] sm:$0xf]  ;;  %v5146_v60 = vld [vmem:[#allocation8 + $0x470] sm:$0xf]  ;;  %v6355_v20 = vpop.f32.mrf.mxu1 }
 0x1eb   : > { %3445 = vmatmul.bf16.vlgmr.msrb.gmra.mxu1 %v6348_v36  ;;  %v5047_v46 = vor.u32 %v5378_v51, %v5044_v5  ;;  %v5147_v18 = vor.u32 %v5405_v48, %v5146_v60  ;;  %v5122_v51 = vld [vmem:[#allocation8 + $0x440] sm:$0xf]  ;;  %v5399_v5 = vld [vmem:[#allocation8 + $0x444] sm:$0xf0]  ;;  %v6368_v60 = vpop.f32.mrf.mxu0  ;;  %v6377_v48 = vsel %vm2487_vm10, %v3345_v26, %v3347_v7 }
 0x1ec   : > { %v5123_v2 = vor.u32 %v5399_v5, %v5122_v51  ;;  %v5106_v26 = vld [vmem:[#allocation8 + $0x420] sm:$0xf]  ;;  %v3544_v51 = vshll.u32 %v6339_v39, 16 }
 0x1ed   : > { %3694 = vmatpush.bf16.msrb.mxu0 %v5047_v46  ;;  %3849 = vmatpush.bf16.msra.mxu1 %v5147_v18  ;;  %v5114_v18 = vld [vmem:[#allocation8 + $0x430] sm:$0xf]  ;;  %v5090_v5 = vld [vmem:[#allocation8 + $0x400] sm:$0xf] }
 0x1ee   : > { %v5115_v53 = vor.u32 %v5397_v49, %v5114_v18  ;;  %v5082_v18 = vld [vmem:[#allocation8 + $0x3f0] sm:$0xf]  ;;  %v5389_v49 = vld [vmem:[#allocation8 + $0x3f4] sm:$0xf0] }
 0x1f1   : > { %3695 = vmatpush.bf16.msrb.mxu0 %v5039_v0  ;;  %3850 = vmatpush.bf16.msra.mxu1 %v5139_v16  ;;  %v3134_v0 = vrot.slane %v3132_v35, 2  ;;  %v5107_v16 = vor.u32 %v5395_v57, %v5106_v26  ;;  %v3541_v35 = vshrl.u32 %v6339_v39, 16  ;;  %v3303_v39 = vld [vmem:[#allocation2 + $0x28] sm:$0x1]  ;;  %v3535_v26 = vrot.slane %v3533_v47, 1 }
 0x1f2   : > { %v6370_v46 = vpop.f32.mrf.mxu1  ;;  %v3538_v57 = vrot.slane %v3536_v27, 2  ;;  %v3550_v27 = vshrl.u32 %v6181_v13, 16 }
 0x1f3   : > { %v3135_v63 = vor.u32 %v3134_v0, %v3131_v40  ;;  %v2458_v6 = vpop.f32.mrf.mxu0  ;;  %v5404_v40 = vld [vmem:[#allocation8 + $0x474] sm:$0xf]  ;;  %v5148_v0 = vld [vmem:[#allocation8 + $0x478] sm:$0xf0] }
 0x1f4   : > { %v3539_v34 = vor.u32 %v3538_v57, %v3535_v26  ;;  %v5058_v57 = vld [vmem:[#allocation8 + $0x3c0] sm:$0xf] }
 0x1f5   : > { %3268 = vmatmul.bf16.gmra.mxu0 %v6364_v4  ;;  %3851 = vmatpush.bf16.msra.mxu1 %v5131_v59  ;;  %v6384_v59 = vsel %vm3107_vm3, %v6357_v55, %v3135_v63 }
 0x1f6   : > { %3696 = vmatpush.bf16.msrb.mxu0 %v5031_v17 }
 0x1f9   : > { %3852 = vmatpush.bf16.msra.mxu1 %v5123_v2  ;;  %v5391_v2 = vld [vmem:[#allocation8 + $0x404] sm:$0xf0] }
 0x1fa   : > { %2837 = vmatmul.bf16.gmra.mxu3 %v6232_v14  ;;  %3054 = vmatmul.bf16.gmra.mxu2 %v6273_v54  ;;  %v4972_v14 = vld [vmem:[#allocation8 + $0x318] sm:$0xf0]  ;;  %v6380_v17 = vpop.f32.mrf.mxu1  ;;  %v5091_v55 = vor.u32 %v5391_v2, %v5090_v5 }
 0x1fb   : > { %3450 = vmatmul.bf16.gmra.mxu1 %v6377_v48  ;;  %v4975_v54 = vor.u32 %v5360_v52, %v4972_v14  ;;  %v5083_v52 = vor.u32 %v5389_v49, %v5082_v18  ;;  %v3543_v14 = vrot.slane %v3541_v35, 1  ;;  %v3553_v18 = vshll.u32 %v6181_v13, 16 }
 0x1fd   : > { %3472 = vmatpush.bf16.msra.mxu2 %v4975_v54  ;;  %3853 = vmatpush.bf16.msra.mxu1 %v5115_v53 }
 0x1fe   : > { %3660 = vmatpush.bf16.msra.mxu3 %v5083_v52  ;;  %v5385_v52 = vld [vmem:[#allocation8 + $0x3d4] sm:$0xf0] }
 0x201   : > { %3854 = vmatpush.bf16.msra.mxu1 %v5107_v16  ;;  %3473 = vmatpush.bf16.msra.mxu2 %v4967_v28  ;;  %v3338_v16 = vunpack.c.l.b16 %v3303_v39  ;;  %v5066_v39 = vld [vmem:[#allocation8 + $0x3d0] sm:$0xf] }
 0x202   : > { %v2461_v53 = vpop.f32.mrf.mxu0  ;;  %v6402_v63 = vpop.f32.mrf.mxu1  ;;  %3661 = vmatpush.bf16.msra.mxu3 %v5075_v12 }
 0x203   : > { %v3343_v25 = vpack.c.b16 %v3338_v16, %v3338_v16  ;;  %v5383_v16 = vld [vmem:[#allocation8 + $0x3c4] sm:$0xf0] }
 0x205   : > { %3273 = vmatmul.bf16.gmra.mxu0 %v6384_v59  ;;  %3855 = vmatpush.bf16.msra.mxu1 %v5099_v29  ;;  %v5140_v29 = vld [vmem:[#allocation8 + $0x468] sm:$0xf0] }
 0x206   : > { %v5143_v35 = vor.u32 %v5402_v44, %v5140_v29 }
 0x209   : > { %3856 = vmatpush.bf16.msra.mxu1 %v5091_v55  ;;  %v3351_v55 = vrot.slane %v3343_v25, 1  ;;  %v5059_v25 = vor.u32 %v5383_v16, %v5058_v57  ;;  %v5042_v16 = vld [vmem:[#allocation8 + $0x3a0] sm:$0xf] }
 0x20a   : > { %2842 = vmatmul.bf16.gmra.mxu3 %v6265_v38  ;;  %3059 = vmatmul.bf16.gmra.mxu2 %v6292_v19  ;;  %v3546_v38 = vrot.slane %v3544_v51, 2  ;;  %v5151_v19 = vor.u32 %v5404_v40, %v5148_v0  ;;  %v2463_v5 = vpop.f32.mrf.mxu0  ;;  %v6415_v47 = vpop.f32.mrf.mxu1  ;;  %v5400_v40 = vld [vmem:[#allocation8 + $0x454] sm:$0xf]  ;;  %v5132_v0 = vld [vmem:[#allocation8 + $0x458] sm:$0xf0] }
 0x20b   : > { %3455 = vmatmul.bf16.gmra.mxu1 %v6395_v21  ;;  %v6422_v49 = vsel %vm2487_vm10, %v3349_v58, %v3351_v55 }
 0x20c   : > { %3878 = vmatpush.bf16.msrb.mxu2 %v5151_v19  ;;  %v3547_v61 = vor.u32 %v3546_v38, %v3543_v14  ;;  %v3552_v14 = vrot.slane %v3550_v27, 1  ;;  %v3555_v38 = vrot.slane %v3553_v18, 2  ;;  %v5135_v19 = vor.u32 %v5400_v40, %v5132_v0  ;;  %v5381_v27 = vld [vmem:[#allocation8 + $0x3b4] sm:$0xf0] }
 0x20d   : > { %v6400_v54 = vpop.f32.mrf.mxu3  ;;  %v2314_v7 = vpop.f32.mrf.mxu2 }
 0x20e   : > { %v6405_v23 = vadd.f32 %v6368_v60, %v2314_v7  ;;  %v6408_v28 = vsel %vm3107_vm3, %v3539_v34, %v3547_v61  ;;  %v3556_v58 = vor.u32 %v3555_v38, %v3552_v14  ;;  %v5398_v34 = vld [vmem:[#allocation8 + $0x444] sm:$0xf] }
 0x20f   : > { %v5127_v44 = vor.u32 %v5398_v34, %v5124_v9  ;;  %v5379_v34 = vld [vmem:[#allocation8 + $0x3a4] sm:$0xf0] }
 0x210   : > { %3879 = vmatpush.bf16.msrb.mxu2 %v5143_v35  ;;  %v6432_v8 = vsel %vm3107_vm3, %v3547_v61, %v3556_v58  ;;  %v3559_v35 = vshrl.u32 %v6226_v33, 16  ;;  %v5050_v61 = vld [vmem:[#allocation8 + $0x3b0] sm:$0xf]  ;;  %v5043_v9 = vor.u32 %v5379_v34, %v5042_v16 }
 0x211   : > { %v5051_v18 = vor.u32 %v5381_v27, %v5050_v61 }
 0x212   : > { %v6429_v26 = vpop.f32.mrf.mxu1 }
 0x214   : > { %3880 = vmatpush.bf16.msrb.mxu2 %v5135_v19  ;;  %v3511_v19 = vld [vmem:[#allocation2 + $0x28] sm:$0x3] }
 0x215   : > { %v6410_v51 = vpop.f32.mrf.mxu3  ;;  %v2316_v60 = vpop.f32.mrf.mxu2  ;;  %3697 = vmatmul.bf16.vlgmr.msrb.gmra.mxu0 %v6408_v28 }
 0x216   : > { %v6413_v2 = vadd.f32 %v2458_v6, %v2316_v60  ;;  %v5067_v6 = vor.u32 %v5385_v52, %v5066_v39  ;;  %v3562_v60 = vshll.u32 %v6226_v33, 16  ;;  %v5396_v39 = vld [vmem:[#allocation8 + $0x434] sm:$0xf]  ;;  %v5116_v52 = vld [vmem:[#allocation8 + $0x438] sm:$0xf0] }
 0x217   : > { %v5119_v0 = vor.u32 %v5396_v39, %v5116_v52 }
 0x218   : > { %3662 = vmatpush.bf16.msra.mxu3 %v5067_v6  ;;  %3881 = vmatpush.bf16.msrb.mxu2 %v5127_v44  ;;  %v3564_v40 = vrot.slane %v3562_v60, 2  ;;  %v5108_v44 = vld [vmem:[#allocation8 + $0x428] sm:$0xf0] }
 0x21a   : > { %2847 = vmatmul.bf16.gmra.mxu3 %v6283_v45  ;;  %3064 = vmatmul.bf16.gmra.mxu2 %v6315_v30  ;;  %v2862_v30 = vpop.f32.mrf.mxu0  ;;  %v6444_v6 = vpop.f32.mrf.mxu1 }
 0x21b   : > { %3460 = vmatmul.bf16.gmra.mxu1 %v6422_v49 }
 0x21c   : > { %3663 = vmatpush.bf16.msra.mxu3 %v5059_v25  ;;  %3882 = vmatpush.bf16.msrb.mxu2 %v5119_v0  ;;  %v5394_v25 = vld [vmem:[#allocation8 + $0x424] sm:$0xf]  ;;  %v5392_v0 = vld [vmem:[#allocation8 + $0x414] sm:$0xf] }
 0x21d   : > { %v6425_v7 = vpop.f32.mrf.mxu3  ;;  %v2319_v13 = vpop.f32.mrf.mxu2 }
 0x21e   : > { %v6427_v45 = vadd.f32 %v2461_v53, %v2319_v13  ;;  %v3530_v13 = vunpack.c.l.b16 %v3511_v19 }
 0x220   : > { %3664 = vmatpush.bf16.msra.mxu3 %v5051_v18  ;;  %v6456_v61 = vpack.c.b16 %v3530_v13, %v3530_v13 }
 0x222   : > { %v2864_v55 = vpop.f32.mrf.mxu0  ;;  %v3568_v52 = vshrl.u32 %v6456_v61, 16 }
 0x224   : > { %3665 = vmatpush.bf16.msra.mxu3 %v5043_v9  ;;  %v3570_v19 = vrot.slane %v3568_v52, 1  ;;  %v2454_v52 = vadd.f32 %v6359_v3, %v6386_v31 }
 0x225   : > { %v6434_v12 = vpop.f32.mrf.mxu3  ;;  %v2321_v29 = vpop.f32.mrf.mxu2  ;;  %3702 = vmatmul.bf16.gmra.mxu0 %v6432_v8 }
 0x226   : > { %v6437_v53 = vadd.f32 %v2463_v5, %v2321_v29  ;;  %v3561_v5 = vrot.slane %v3559_v35, 1  ;;  %v2449_v29 = vadd.f32 %v6301_v32, %v6308_v24  ;;  %v3571_v32 = vshll.u32 %v6456_v61, 16 }
 0x22a   : > { %3229 = vmatmul.bf16.vlgmr.msrb.gmra.mxu3 %v6306_v22  ;;  %3474 = vmatmul.bf16.vlgmr.msra.gmra.mxu2 %v6348_v36  ;;  %v3565_v36 = vor.u32 %v3564_v40, %v3561_v5  ;;  %v2867_v35 = vpop.f32.mrf.mxu0  ;;  %v5377_v5 = vld [vmem:[#allocation8 + $0x394] sm:$0xf0] }
 0x22b   : > { %3857 = vmatmul.bf16.vlgmr.msra.gmra.mxu1 %v6110_v11 }
 0x22c   : > { %v6454_v60 = vsel %vm3107_vm3, %v3556_v58, %v3565_v36  ;;  %v5034_v58 = vld [vmem:[#allocation8 + $0x390] sm:$0xf] }
 0x22d   : > { %v6446_v14 = vpop.f32.mrf.mxu3  ;;  %v2619_v38 = vpop.f32.mrf.mxu2  ;;  %v5035_v40 = vor.u32 %v5377_v5, %v5034_v58 }
 0x22e   : > { %v2640_v22 = vadd.f32 %v2619_v38, %v6257_v15  ;;  %v5111_v15 = vor.u32 %v5394_v25, %v5108_v44  ;;  %v5100_v38 = vld [vmem:[#allocation8 + $0x418] sm:$0xf0]  ;;  %v5026_v44 = vld [vmem:[#allocation8 + $0x380] sm:$0xf] }
 0x22f   : > { %v5103_v13 = vor.u32 %v5392_v0, %v5100_v38  ;;  %3666 = vmatpush.bf16.msra.mxu3 %v5035_v40 }
 0x230   : > { %v6449_v57 = vadd.f32 %v2862_v30, %v2640_v22  ;;  %v6461_v30 = vpop.f32.mrf.mxu1  ;;  %3883 = vmatpush.bf16.msrb.mxu2 %v5111_v15  ;;  %v3573_v22 = vrot.slane %v3571_v32, 2  ;;  %v5390_v15 = vld [vmem:[#allocation8 + $0x404] sm:$0xf] }
 0x234   : > { %3884 = vmatpush.bf16.msrb.mxu2 %v5103_v13 }
 0x235   : > { %v6458_v27 = vpop.f32.mrf.mxu3  ;;  %v2621_v18 = vpop.f32.mrf.mxu2  ;;  %3707 = vmatmul.bf16.gmra.mxu0 %v6454_v60 }
 0x236   : > { %v2642_v39 = vadd.f32 %v2621_v18, %v2449_v29  ;;  %v5375_v29 = vld [vmem:[#allocation8 + $0x384] sm:$0xf0] }
 0x237   : > { %v5027_v18 = vor.u32 %v5375_v29, %v5026_v44  ;;  %v3763_v44 = vrot.slane %v6456_v61, 2 }
 0x238   : > { %v6465_v24 = vadd.f32 %v2864_v55, %v2642_v39  ;;  %v2869_v55 = vpop.f32.mrf.mxu0  ;;  %v5092_v39 = vld [vmem:[#allocation8 + $0x408] sm:$0xf0] }
 0x239   : > { %v5095_v58 = vor.u32 %v5390_v15, %v5092_v39  ;;  %3667 = vmatpush.bf16.msra.mxu3 %v5027_v18 }
 0x23a   : > { %3234 = vmatmul.bf16.gmra.mxu3 %v6330_v10  ;;  %3479 = vmatmul.bf16.gmra.mxu2 %v6377_v48  ;;  %v6473_v10 = vpop.f32.mrf.mxu1  ;;  %v3574_v48 = vor.u32 %v3573_v22, %v3570_v19 }
 0x23b   : > { %3862 = vmatmul.bf16.gmra.mxu1 %v6200_v37  ;;  %3885 = vmatpush.bf16.msrb.mxu2 %v5095_v58  ;;  %v2418_v58 = vadd.f32 %v6446_v14, %v6287_v50 }
 0x23c   : > { %v6480_v32 = vsel %vm3107_vm3, %v3565_v36, %v3574_v48 }
 0x23d   : > { %v6470_v16 = vpop.f32.mrf.mxu3  ;;  %v2624_v34 = vpop.f32.mrf.mxu2 }
 0x23e   : > { %v2644_v25 = vadd.f32 %v2624_v34, %v6324_v1 }
 0x240   : > { %v6475_v9 = vadd.f32 %v2867_v35, %v2644_v25  ;;  %v2872_v0 = vpop.f32.mrf.mxu0 }
 0x242   : > { %v3023_v3 = vpop.f32.mrf.mxu1 }
 0x245   : > { %v2424_v5 = vpop.f32.mrf.mxu3  ;;  %v2626_v1 = vpop.f32.mrf.mxu2  ;;  %3712 = vmatmul.bf16.gmra.mxu0 %v6480_v32 }
 0x246   : > { %v2425_v35 = vadd.f32 %v2424_v5, %v6337_v56  ;;  %v2646_v40 = vadd.f32 %v2626_v1, %v2454_v52 }
 0x248   : > { %v6485_v38 = vadd.f32 %v6402_v63, %v2425_v35  ;;  %v6487_v19 = vadd.f32 %v2869_v55, %v2646_v40  ;;  %v2874_v34 = vpop.f32.mrf.mxu0 }
 0x24a   : > { %3239 = vmatmul.bf16.gmra.mxu3 %v6364_v4  ;;  %3484 = vmatmul.bf16.gmra.mxu2 %v6395_v21  ;;  %v3026_v55 = vpop.f32.mrf.mxu1 }
 0x24b   : > { %3867 = vmatmul.bf16.gmra.mxu1 %v6243_v42 }
 0x24d   : > { %v2427_v31 = vpop.f32.mrf.mxu3  ;;  %v2629_v36 = vpop.f32.mrf.mxu2 }
 0x24e   : > { %v2428_v22 = vadd.f32 %v2427_v31, %v6400_v54  ;;  %v2648_v56 = vadd.f32 %v2629_v36, %v6405_v23  ;;  %v6512_v23 = vsel %vm3755_vm9, %v3761_v41, %v3763_v44  ;;  %v2423_v31 = vadd.f32 %v6470_v16, %v6322_v43 }
 0x250   : > { %v6495_v13 = vadd.f32 %v6415_v47, %v2428_v22  ;;  %v6497_v63 = vadd.f32 %v2872_v0, %v2648_v56 }
 0x252   : > { %v3028_v61 = vpop.f32.mrf.mxu1 }
 0x255   : > { %v2429_v25 = vpop.f32.mrf.mxu3  ;;  %v2631_v48 = vpop.f32.mrf.mxu2 }
 0x256   : > { %v2430_v4 = vadd.f32 %v2429_v25, %v6410_v51  ;;  %v2650_v21 = vadd.f32 %v2631_v48, %v6413_v2  ;;  %v2877_v51 = vpop.f32.mrf.mxu0 }
 0x258   : > { %v6503_v29 = vadd.f32 %v6429_v26, %v2430_v4  ;;  %v6505_v54 = vadd.f32 %v2874_v34, %v2650_v21 }
 0x25a   : > { %3244 = vmatmul.bf16.gmra.mxu3 %v6384_v59  ;;  %3489 = vmatmul.bf16.gmra.mxu2 %v6422_v49  ;;  %v3031_v5 = vpop.f32.mrf.mxu1 }
 0x25b   : > { %3872 = vmatmul.bf16.gmra.mxu1 %v6512_v23 }
 0x25d   : > { %v2432_v2 = vpop.f32.mrf.mxu3  ;;  %v2634_v47 = vpop.f32.mrf.mxu2 }
 0x25e   : > { %v2433_v26 = vadd.f32 %v2432_v2, %v6425_v7  ;;  %v2652_v15 = vadd.f32 %v2634_v47, %v6427_v45  ;;  %v2879_v52 = vpop.f32.mrf.mxu0  ;;  %v2639_v45 = vadd.f32 %v6355_v20, %v2418_v58 }
 0x260   : > { %v6518_v18 = vadd.f32 %v6444_v6, %v2433_v26  ;;  %v6520_v59 = vadd.f32 %v2877_v51, %v2652_v15 }
 0x262   : > { %v3033_v14 = vpop.f32.mrf.mxu1 }
 0x265   : > { %v2434_v49 = vpop.f32.mrf.mxu3  ;;  %v2636_v33 = vpop.f32.mrf.mxu2 }
 0x266   : > { %v2435_v41 = vadd.f32 %v2434_v49, %v6434_v12  ;;  %v2654_v39 = vadd.f32 %v2636_v33, %v6437_v53  ;;  %v2420_v53 = vadd.f32 %v6458_v27, %v6303_v62  ;;  %v2643_v27 = vadd.f32 %v6380_v17, %v2423_v31  ;;  %v3259_v17 = vpop.f32.mrf.mxu0 }
 0x268   : > { %v2653_v7 = vadd.f32 %v6461_v30, %v2435_v41  ;;  %v2897_v1 = vadd.f32 %v2879_v52, %v2654_v39  ;;  %v2641_v30 = vadd.f32 %v6370_v46, %v2420_v53 }
 0x26a   : > { %3668 = vmatmul.bf16.vlgmr.msra.gmra.mxu3 %v6408_v28  ;;  %3886 = vmatmul.bf16.vlgmr.msrb.gmra.mxu2 %v6110_v11  ;;  %v3036_v62 = vpop.f32.mrf.mxu1 }
 0x26d   : > { %v2833_v6 = vpop.f32.mrf.mxu3  ;;  %v3050_v35 = vpop.f32.mrf.mxu2 }
 0x26e   : > { %v2882_v40 = vadd.f32 %v2833_v6, %v2639_v45  ;;  %v6531_v12 = vadd.f32 %v3050_v35, %v6449_v57  ;;  %v3261_v21 = vpop.f32.mrf.mxu0 }
 0x270   : > { %v6536_v50 = vadd.f32 %v6473_v10, %v2882_v40 }
 0x272   : > { %v3038_v43 = vpop.f32.mrf.mxu1 }
 0x275   : > { %v2835_v28 = vpop.f32.mrf.mxu3  ;;  %v3052_v0 = vpop.f32.mrf.mxu2 }
 0x276   : > { %v2884_v11 = vadd.f32 %v2835_v28, %v2641_v30  ;;  %v6540_v20 = vadd.f32 %v3052_v0, %v6465_v24 }
 0x278   : > { %v6544_v57 = vadd.f32 %v3023_v3, %v2884_v11 }
 0x27a   : > { %3673 = vmatmul.bf16.gmra.mxu3 %v6432_v8  ;;  %3891 = vmatmul.bf16.gmra.mxu2 %v6200_v37  ;;  %v3446_v48 = vpop.f32.mrf.mxu1 }
 0x27d   : > { %v2838_v10 = vpop.f32.mrf.mxu3  ;;  %v3055_v46 = vpop.f32.mrf.mxu2 }
 0x27e   : > { %v2886_v36 = vadd.f32 %v2838_v10, %v2643_v27  ;;  %v6550_v22 = vadd.f32 %v3055_v46, %v6475_v9 }
 0x280   : > { %v6552_v24 = vadd.f32 %v3026_v55, %v2886_v36 }
 0x282   : > { %v6574_v51 = vpop.f32.mrf.mxu1 }
 0x285   : > { %v2840_v56 = vpop.f32.mrf.mxu3  ;;  %v3057_v34 = vpop.f32.mrf.mxu2 }
 0x286   : > { %v2888_v16 = vadd.f32 %v2840_v56, %v6485_v38  ;;  %v6556_v8 = vadd.f32 %v3057_v34, %v6487_v19 }
 0x288   : > { %v6558_v37 = vadd.f32 %v3028_v61, %v2888_v16  ;;  %v6582_v61 = vpop.f32.mrf.mxu0  ;;  %v3280_v16 = vadd.f32 %v3259_v17, %v6531_v12 }
 0x28a   : > { %3678 = vmatmul.bf16.gmra.mxu3 %v6454_v60  ;;  %3896 = vmatmul.bf16.gmra.mxu2 %v6243_v42 }
 0x28d   : > { %v2843_v3 = vpop.f32.mrf.mxu3  ;;  %v3060_v9 = vpop.f32.mrf.mxu2 }
 0x28e   : > { %v2890_v55 = vadd.f32 %v2843_v3, %v6495_v13  ;;  %v6564_v25 = vadd.f32 %v3060_v9, %v6497_v63 }
 0x290   : > { %v6566_v4 = vadd.f32 %v3031_v5, %v2890_v55  ;;  %v3923_v55 = vld [vmem:[%s6726_s4] sm:$0x3] }
 0x295   : > { %v2845_v38 = vpop.f32.mrf.mxu3  ;;  %v3062_v19 = vpop.f32.mrf.mxu2 }
 0x296   : > { %v2892_v44 = vadd.f32 %v2845_v38, %v6503_v29  ;;  %v6570_v60 = vadd.f32 %v3062_v19, %v6505_v54  ;;  %v6586_v54 = vpop.f32.mrf.mxu1 }
 0x298   : > { %v6572_v42 = vadd.f32 %v3033_v14, %v2892_v44 }
 0x29a   : > { %3683 = vmatmul.bf16.gmra.mxu3 %v6480_v32  ;;  %3901 = vmatmul.bf16.gmra.mxu2 %v6512_v23  ;;  %v6592_v23 = vpop.f32.mrf.mxu0 }
 0x29d   : > { %v2848_v13 = vpop.f32.mrf.mxu3  ;;  %v3065_v63 = vpop.f32.mrf.mxu2 }
 0x29e   : > { %v2894_v2 = vadd.f32 %v2848_v13, %v6518_v18  ;;  %v6580_v47 = vadd.f32 %v3065_v63, %v6520_v59  ;;  %v6594_v39 = vpop.f32.mrf.mxu1  ;;  %v6638_v13 = vperm.slane %v3923_v55, 1 }
 0x2a0   : > { %v6584_v29 = vadd.f32 %v3036_v62, %v2894_v2 }
 0x2a2   : > { %v6596_v59 = vpop.f32.mrf.mxu0 }
 0x2a5   : > { %v2850_v26 = vpop.f32.mrf.mxu3  ;;  %v3067_v15 = vpop.f32.mrf.mxu2 }
 0x2a6   : > { %v2896_v49 = vadd.f32 %v2850_v26, %v2653_v7  ;;  %v6588_v33 = vadd.f32 %v3067_v15, %v2897_v1  ;;  %v6598_v5 = vpop.f32.mrf.mxu1  ;;  %v3282_v26 = vadd.f32 %v3261_v21, %v6540_v20 }
 0x2a8   : > { %v6590_v32 = vadd.f32 %v3038_v43, %v2896_v49  ;;  %v6641_v49 = vperm.slane %v3923_v55, 0 }
 0x2aa   : > { %v6600_v35 = vpop.f32.mrf.mxu0 }
 0x2ad   : > { %v3230_v41 = vpop.f32.mrf.mxu3  ;;  %v3475_v18 = vpop.f32.mrf.mxu2 }
 0x2ae   : > { %v6602_v7 = vpop.f32.mrf.mxu1  ;;  %v3279_v3 = vadd.f32 %v3230_v41, %v6536_v50  ;;  %v3496_v9 = vadd.f32 %v3475_v18, %v3280_v16 }
 0x2b0   : > { %v3495_v19 = vadd.f32 %v3446_v48, %v3279_v3 }
 0x2b2   : > { %v6608_v53 = vpop.f32.mrf.mxu0 }
 0x2b5   : > { %v3232_v52 = vpop.f32.mrf.mxu3  ;;  %v3477_v58 = vpop.f32.mrf.mxu2 }
 0x2b6   : > { %v6610_v14 = vpop.f32.mrf.mxu1  ;;  %v3281_v17 = vadd.f32 %v3232_v52, %v6544_v57  ;;  %v3498_v41 = vadd.f32 %v3477_v58, %v3282_v26  ;;  %v3284_v58 = vadd.f32 %v6582_v61, %v6550_v22 }
 0x2b8   : > { %v3497_v20 = vadd.f32 %v6574_v51, %v3281_v17 }
 0x2ba   : > { %v6616_v0 = vpop.f32.mrf.mxu0 }
 0x2bd   : > { %v3235_v45 = vpop.f32.mrf.mxu3  ;;  %v3480_v6 = vpop.f32.mrf.mxu2 }
 0x2be   : > { %v6622_v62 = vpop.f32.mrf.mxu1 }
 0x2c2   : > { %v3698_v27 = vpop.f32.mrf.mxu0 }
 0x2c3   : > { %v3719_v44 = vadd.f32 %v3698_v27, %v3496_v9 }
 0x2c5   : > { %v6604_v1 = vpop.f32.mrf.mxu3  ;;  %v6606_v40 = vpop.f32.mrf.mxu2 }
 0x2c6   : > { %v3858_v36 = vpop.f32.mrf.mxu1 }
 0x2ca   : > { %v3700_v43 = vpop.f32.mrf.mxu0 }
 0x2cb   : > { %v3721_v21 = vadd.f32 %v3700_v43, %v3498_v41 }
 0x2cd   : > { %v6612_v30 = vpop.f32.mrf.mxu3  ;;  %v6614_v28 = vpop.f32.mrf.mxu2 }
 0x2ce   : > { %v3860_v38 = vpop.f32.mrf.mxu1 }
 0x2d2   : > { %v3703_v50 = vpop.f32.mrf.mxu0 }
 0x2d5   : > { %v6618_v11 = vpop.f32.mrf.mxu3  ;;  %v6620_v31 = vpop.f32.mrf.mxu2 }
 0x2d6   : > { %v3863_v27 = vpop.f32.mrf.mxu1 }
 0x2dd   : > { %v6624_v10 = vpop.f32.mrf.mxu3  ;;  %v6626_v46 = vpop.f32.mrf.mxu2 }
 0x2e5   : > { %v6628_v56 = vpop.f32.mrf.mxu3  ;;  %v6630_v34 = vpop.f32.mrf.mxu2 }
 0x2ed   : > { %v3669_v63 = vpop.f32.mrf.mxu3  ;;  %v3887_v2 = vpop.f32.mrf.mxu2 }
 0x2ee   : > { %v3718_v15 = vadd.f32 %v3669_v63, %v3495_v19  ;;  %v3908_v12 = vadd.f32 %v3887_v2, %v3719_v44  ;;  %v3283_v44 = vadd.f32 %v3235_v45, %v6552_v24  ;;  %v3500_v63 = vadd.f32 %v3480_v6, %v3284_v58  ;;  %v3705_v2 = vpop.f32.mrf.mxu0 }
 0x2ef   : > { %v3286_v24 = vadd.f32 %v6592_v23, %v6556_v8 }
 0x2f0   : > { %v3907_v18 = vadd.f32 %v3858_v36, %v3718_v15  ;;  %v3930_v16 = vadd.f32 %v6638_v13, %v3908_v12  ;;  %v3499_v17 = vadd.f32 %v6586_v54, %v3283_v44  ;;  %v3723_v41 = vadd.f32 %v3703_v50, %v3500_v63 }
 0x2f2   : > { %v3929_v48 = vadd.f32 %v6641_v49, %v3907_v18  ;;  %v3946_v9 = vmax.f32 %v3930_v16, 0.0  ;;  %v3865_v18 = vpop.f32.mrf.mxu1  ;;  %v3285_v16 = vadd.f32 %v6604_v1, %v6558_v37  ;;  %v3288_v37 = vadd.f32 %v6596_v59, %v6564_v25 }
 0x2f4   : > { %v3945_v3 = vmax.f32 %v3929_v48, 0.0  ;;  %v3502_v48 = vadd.f32 %v6606_v40, %v3286_v24  ;;  %v3501_v8 = vadd.f32 %v6594_v39, %v3285_v16  ;;  %v3291_v16 = vadd.f32 %v6624_v10, %v6584_v29 }
 0x2f5   : > { %v3671_v57 = vpop.f32.mrf.mxu3  ;;  %v3889_v52 = vpop.f32.mrf.mxu2  ;;  %v3294_v29 = vadd.f32 %v6616_v0, %v6588_v33 }
 0x2f6   : > { %v3961_v36 = vpack.c.bf16 %v3946_v9, %v3945_v3  ;;  %v3720_v55 = vadd.f32 %v3671_v57, %v3497_v20  ;;  %v3910_v19 = vadd.f32 %v3889_v52, %v3721_v21  ;;  %v3708_v50 = vpop.f32.mrf.mxu0  ;;  %v3725_v23 = vadd.f32 %v3705_v2, %v3502_v48 }
 0x2f8   : > { %3969 = vst [vmem:[%s6651_s9] sm:$0xff] %v3961_v36  ;;  %v3909_v51 = vadd.f32 %v3860_v38, %v3720_v55  ;;  %v3932_v43 = vadd.f32 %v6638_v13, %v3910_v19  ;;  %v3287_v36 = vadd.f32 %v6612_v30, %v6566_v4  ;;  %v3504_v55 = vadd.f32 %v6614_v28, %v3288_v37 }
 0x2f9   : > { %v3510_v37 = vadd.f32 %v6630_v34, %v3294_v29 }
 0x2fa   : > { %v3931_v26 = vadd.f32 %v6641_v49, %v3909_v51  ;;  %v3948_v12 = vmax.f32 %v3932_v43, 0.0  ;;  %v3503_v25 = vadd.f32 %v6598_v5, %v3287_v36  ;;  %v3727_v59 = vadd.f32 %v3708_v50, %v3504_v55 }
 0x2fc   : > { %v3947_v15 = vmax.f32 %v3931_v26, 0.0  ;;  %v3290_v26 = vadd.f32 %v6600_v35, %v6570_v60 }
 0x2fd   : > { %v3674_v22 = vpop.f32.mrf.mxu3  ;;  %v3892_v61 = vpop.f32.mrf.mxu2 }
 0x2fe   : > { %v3962_v45 = vpack.c.bf16 %v3948_v12, %v3947_v15  ;;  %v3722_v6 = vadd.f32 %v3674_v22, %v3499_v17  ;;  %v3912_v38 = vadd.f32 %v3892_v61, %v3723_v41  ;;  %v3710_v15 = vpop.f32.mrf.mxu0  ;;  %v3289_v12 = vadd.f32 %v6618_v11, %v6572_v42 }
 0x2ff   : > { %v3506_v17 = vadd.f32 %v6620_v31, %v3290_v26  ;;  %v3292_v42 = vadd.f32 %v6608_v53, %v6580_v47  ;;  %v3507_v47 = vadd.f32 %v6610_v14, %v3291_v16 }
 0x300   : > { %3970 = vst [vmem:[%s6651_s9 + $0x8] sm:$0xff] %v3962_v45  ;;  %v3911_v3 = vadd.f32 %v3863_v27, %v3722_v6  ;;  %v3934_v9 = vadd.f32 %v6638_v13, %v3912_v38  ;;  %v3868_v27 = vpop.f32.mrf.mxu1  ;;  %v3505_v60 = vadd.f32 %v6602_v7, %v3289_v12 }
 0x301   : > { %v3729_v35 = vadd.f32 %v3710_v15, %v3506_v17  ;;  %v3508_v48 = vadd.f32 %v6626_v46, %v3292_v42 }
 0x302   : > { %v3933_v54 = vadd.f32 %v6641_v49, %v3911_v3  ;;  %v3950_v21 = vmax.f32 %v3934_v9, 0.0 }
 0x304   : > { %v3949_v20 = vmax.f32 %v3933_v54, 0.0 }
 0x305   : > { %v3676_v57 = vpop.f32.mrf.mxu3  ;;  %v3894_v52 = vpop.f32.mrf.mxu2 }
 0x306   : > { %v3963_v1 = vpack.c.bf16 %v3950_v21, %v3949_v20  ;;  %v3724_v40 = vadd.f32 %v3676_v57, %v3501_v8  ;;  %v3914_v58 = vadd.f32 %v3894_v52, %v3725_v23  ;;  %v3713_v7 = vpop.f32.mrf.mxu0  ;;  %v3293_v52 = vadd.f32 %v6628_v56, %v6590_v32 }
 0x307   : > { %v3731_v53 = vadd.f32 %v3713_v7, %v3508_v48 }
 0x308   : > { %3971 = vst [vmem:[%s6651_s9 + $0x10] sm:$0xff] %v3963_v1  ;;  %v3913_v19 = vadd.f32 %v3865_v18, %v3724_v40  ;;  %v3936_v39 = vadd.f32 %v6638_v13, %v3914_v58  ;;  %v3870_v22 = vpop.f32.mrf.mxu1  ;;  %v3509_v33 = vadd.f32 %v6622_v62, %v3293_v52 }
 0x30a   : > { %v3935_v44 = vadd.f32 %v6641_v49, %v3913_v19  ;;  %v3952_v51 = vmax.f32 %v3936_v39, 0.0 }
 0x30c   : > { %v3951_v63 = vmax.f32 %v3935_v44, 0.0 }
 0x30d   : > { %v3679_v43 = vpop.f32.mrf.mxu3  ;;  %v3897_v2 = vpop.f32.mrf.mxu2 }
 0x30e   : > { %v3964_v4 = vpack.c.bf16 %v3952_v51, %v3951_v63  ;;  %v3726_v30 = vadd.f32 %v3679_v43, %v3503_v25  ;;  %v3916_v28 = vadd.f32 %v3897_v2, %v3727_v59  ;;  %v3715_v58 = vpop.f32.mrf.mxu0 }
 0x30f   : > { %v3733_v0 = vadd.f32 %v3715_v58, %v3510_v37 }
 0x310   : > { %3972 = vst [vmem:[%s6651_s9 + $0x18] sm:$0xff] %v3964_v4  ;;  %v3915_v41 = vadd.f32 %v3868_v27, %v3726_v30  ;;  %v3938_v5 = vadd.f32 %v6638_v13, %v3916_v28  ;;  %v3873_v50 = vpop.f32.mrf.mxu1 }
 0x312   : > { %v3937_v61 = vadd.f32 %v6641_v49, %v3915_v41  ;;  %v3954_v24 = vmax.f32 %v3938_v5, 0.0 }
 0x314   : > { %v3953_v18 = vmax.f32 %v3937_v61, 0.0 }
 0x315   : > { %v3681_v45 = vpop.f32.mrf.mxu3  ;;  %v3899_v6 = vpop.f32.mrf.mxu2 }
 0x316   : > { %v3965_v11 = vpack.c.bf16 %v3954_v24, %v3953_v18  ;;  %v3728_v31 = vadd.f32 %v3681_v45, %v3505_v60  ;;  %v3918_v38 = vadd.f32 %v3899_v6, %v3729_v35 }
 0x318   : > { %3973 = vst [vmem:[%s6651_s9 + $0x20] sm:$0xff] %v3965_v11  ;;  %v3917_v3 = vadd.f32 %v3870_v22, %v3728_v31  ;;  %v3940_v9 = vadd.f32 %v6638_v13, %v3918_v38  ;;  %v3875_v34 = vpop.f32.mrf.mxu1 }
 0x31a   : > { %v3939_v54 = vadd.f32 %v6641_v49, %v3917_v3  ;;  %v3956_v21 = vmax.f32 %v3940_v9, 0.0 }
 0x31c   : > { %v3955_v20 = vmax.f32 %v3939_v54, 0.0 }
 0x31d   : > { %v3684_v8 = vpop.f32.mrf.mxu3  ;;  %v3902_v23 = vpop.f32.mrf.mxu2 }
 0x31e   : > { %v3966_v10 = vpack.c.bf16 %v3956_v21, %v3955_v20  ;;  %v3730_v46 = vadd.f32 %v3684_v8, %v3507_v47  ;;  %v3920_v57 = vadd.f32 %v3902_v23, %v3731_v53 }
 0x320   : > { %3974 = vst [vmem:[%s6651_s9 + $0x28] sm:$0xff] %v3966_v10  ;;  %v3919_v1 = vadd.f32 %v3873_v50, %v3730_v46  ;;  %v3942_v40 = vadd.f32 %v6638_v13, %v3920_v57 }
 0x322   : > { %v3941_v14 = vadd.f32 %v6641_v49, %v3919_v1  ;;  %v3958_v36 = vmax.f32 %v3942_v40, 0.0 }
 0x324   : > { %v3957_v27 = vmax.f32 %v3941_v14, 0.0 }
 0x325   : > { %v3686_v55 = vpop.f32.mrf.mxu3  ;;  %v3904_v19 = vpop.f32.mrf.mxu2 }
 0x326   : > { %v3967_v39 = vpack.c.bf16 %v3958_v36, %v3957_v27  ;;  %v3732_v32 = vadd.f32 %v3686_v55, %v3509_v33  ;;  %v3922_v56 = vadd.f32 %v3904_v19, %v3733_v0 }
 0x328   : > { %3975 = vst [vmem:[%s6651_s9 + $0x30] sm:$0xff] %v3967_v39  ;;  %v3921_v44 = vadd.f32 %v3875_v34, %v3732_v32  ;;  %v3944_v63 = vadd.f32 %v6638_v13, %v3922_v56 }
 0x32a   : > { %v3943_v51 = vadd.f32 %v6641_v49, %v3921_v44  ;;  %v3960_v59 = vmax.f32 %v3944_v63, 0.0 }
 0x32c   : > { %v3959_v25 = vmax.f32 %v3943_v51, 0.0 }
 0x32e   : > { %v3968_v43 = vpack.c.bf16 %v3960_v59, %v3959_v25 }
 0x330   : > { %3976 = vst [vmem:[%s6651_s9 + $0x38] sm:$0xff] %v3968_v43 }
 0x331 PF: > { %p17_p3 = scmp.ge.s32.totalorder %s5759_s23, 4   ;;  %s6748_s18 = smov %s5657_s19 }
 0x332   : > { %s6749_s19 = smov %s5661_s20  ;;  %s6750_s20 = smov %s5770_s28 }
 0x333   : > { %s6751_s21 = smov %s5759_s23  ;;  %19 = sbr.rel (!%p17_p3) target bundleno = 5 (0x5), region = 100 }
 0x338   :  { %3998 = vsyncpa [#allocation4], 1 }
 0x339   :  { %4000 = vsyncpa [#allocation4 + $0x1], 1 }
 0x33a   :  { %4001 = vsyncpa [#allocation6], 1 }
 0x33b   :  { %4002 = vsyncpa [#allocation9], 1 }

// kernel: generator_forward.3
= control target key start
LH: loop header
LB: loop body
LE: loop exit
PB: predicated region body
PF: predicated region fallthrough
CT: control target
= control target key end

     0   :  { %s8087_s18 = smov 0   ;;  %s10038_s0 = inlined_call_operand.vmem [shape: bf16[2,264,64], index: 0, kind: input, shape index: {}]   ;;  %s10039_s1 = inlined_call_operand.vmem [shape: bf16[9,64,128], index: 1, kind: input, shape index: {}]   ;;  %s10040_s2 = inlined_call_operand.vmem [shape: f32[1,128], index: 2, kind: input, shape index: {}]   ;;  %s10041_s3 = inlined_call_operand.vmem [shape: bf16[9,128,4], index: 3, kind: input, shape index: {}]   ;;  %s10042_s4 = inlined_call_operand.vmem [shape: f32[1,4], index: 4, kind: input, shape index: {}]   ;;  %s10043_s5 = inlined_call_operand.vmem [shape: f32[2,224,4], index: 5, kind: output, shape index: {}]  }
   0x1 LB: > { %s6374_s19 = sadd.s32 4294967295, %s8054_s18   ;;  %p6378_p0 = scmp.ge.s32.totalorder %s8054_s18, 1  ;;  %s8054_s18 = sphi %s8087_s18, %s15_s18  }
   0x2   : > { %p187_p1 = scmp.lt.s32.totalorder %s8054_s18, 3 }
   0x4   : > { %p188_p2 = pnand %p6378_p0, %p187_p1 }
   0x6   : > { %191 = sbr.rel (%p188_p2) target bundleno = 1338 (0x53a), region = 40 }
   0xb   : > { %v7689_v0 = vld [vmem:[%s10039_s1 + $0x38] sm:$0xff]  ;;  %p215_p3 = scmp.lt.s32.totalorder %s6374_s19, 1  ;;  %v7688_v2 = vld [vmem:[%s10039_s1 + $0x30] sm:$0xff]  ;;  %v7687_v4 = vld [vmem:[%s10039_s1 + $0x28] sm:$0xff]  ;;  %vm345_vm0 = vsmask.f32 7424 }
   0xc   : > { %v7685_v1 = vld [vmem:[%s10039_s1 + $0x18] sm:$0xff]  ;;  %533 = vmatpush.bf16.msra.mxu0 %v7689_v0  ;;  %7957 = vmatpush.bf16.msra.mxu2 %v7689_v0  ;;  %v7684_v3 = vld [vmem:[%s10039_s1 + $0x10] sm:$0xff]  ;;  %v7683_v5 = vld [vmem:[%s10039_s1 + $0x8] sm:$0xff]  ;;  %vm486_vm1 = vcmask 523264   ;;  %vm752_vm2 = vcmask 1046528   ;;  %vm3626_vm3 = vcmask 1043456  }
   0xd   : > { %s10077_s19 = smov (!%p215_p3, %s6374_s19), 1  ;;  %7961 = vmatpush.bf16.msra.mxu3 %v7685_v1  ;;  %664 = vmatpush.bf16.msra.mxu1 %v7685_v1  ;;  %v7686_v15 = vld [vmem:[%s10039_s1 + $0x20] sm:$0xff]  ;;  %v7693_v23 = vld [vmem:[%s10039_s1 + $0x58] sm:$0xff]  ;;  %v7692_v29 = vld [vmem:[%s10039_s1 + $0x50] sm:$0xff]  ;;  %vm3627_vm4 = vsmask.f32 7938 }
   0xe   : > { %s7965_s28 = smul.u32 132, %s10077_s19  ;;  %v7682_v18 = vld [vmem:[%s10039_s1] sm:$0xff]  ;;  %v7711_v24 = vld [vmem:[%s10039_s1 + $0x78] sm:$0xff]  ;;  %v7710_v30 = vld [vmem:[%s10039_s1 + $0x70] sm:$0xff]  ;;  %vm3343_vm7 = vsmask.f32 256 }
   0xf   : > { %v7728_v28 = vld [vmem:[%s10039_s1 + $0x98] sm:$0xff]  ;;  %v7727_v33 = vld [vmem:[%s10039_s1 + $0x90] sm:$0xff]  ;;  %v7691_v46 = vld [vmem:[%s10039_s1 + $0x48] sm:$0xff]  ;;  %vm3344_vm8 = vsmask.f32 4368  ;;  %s7966_s21 = smul.u32 224, %s10077_s19 }
  0x10   : > { %534 = vmatpush.bf16.msra.mxu0 %v7688_v2  ;;  %7958 = vmatpush.bf16.msra.mxu2 %v7688_v2  ;;  %s8119_s10 = scalar_lea.vmem %s10038_s0, %s7965_s28  ;;  %v7709_v47 = vld [vmem:[%s10039_s1 + $0x68] sm:$0xff]  ;;  %vm3628_vm5 = vmand %vm3626_vm3, %vm3627_vm4 }
  0x11   : > { %7962 = vmatpush.bf16.msra.mxu3 %v7684_v3  ;;  %665 = vmatpush.bf16.msra.mxu1 %v7684_v3  ;;  %v7912_v6 = vld [vmem:[%s8119_s10] sm:$0xff]   ;;  %v8123_v7 = vld [vmem:[%s8119_s10 + $0x8] sm:$0xff]  ;;  %v8126_v8 = vld [vmem:[%s8119_s10 + $0x38] sm:$0xff]  ;;  %s9918_s24 = scalar_lea.vmem %s10043_s5, %s7966_s21 }
  0x12   : > { %v347_v9 = vshrl.u32 %v7912_v6, 16  ;;  %v349_v10 = vshll.u32 %v7912_v6, 16  ;;  %v8129_v11 = vld [vmem:[%s8119_s10 + $0x40] sm:$0xff]  ;;  %v354_v12 = vshll.u32 %v8123_v7, 16  ;;  %v402_v13 = vshll.u32 %v8126_v8, 16  ;;  %v8167_v31 = vld [vmem:[%s8119_s10 + $0x10] sm:$0xff]  ;;  %vm8825_vm9 = vmor %vm3343_vm7, %vm3344_vm8 }
  0x13   : > { %v406_v14 = vshrl.u32 %v8126_v8, 16  ;;  %v410_v17 = vshll.u32 %v8129_v11, 16  ;;  %v8170_v32 = vld [vmem:[%s8119_s10 + $0x48] sm:$0xff]  ;;  %v358_v34 = vshrl.u32 %v8123_v7, 16  ;;  %v362_v35 = vshll.u32 %v8167_v31, 16  ;;  %v8184_v44 = vld [vmem:[%s8119_s10 + $0x18] sm:$0xff] }
  0x14   : > { %535 = vmatpush.bf16.msra.mxu0 %v7687_v4  ;;  %7959 = vmatpush.bf16.msra.mxu2 %v7687_v4  ;;  %v351_v16 = vrot.slane %v349_v10, 1  ;;  %v356_v19 = vrot.slane %v354_v12, 1  ;;  %v8141_v20 = vrot.slane %v402_v13, 1  ;;  %v414_v36 = vshrl.u32 %v8129_v11, 16  ;;  %v8191_v45 = vld [vmem:[%s8119_s10 + $0x50] sm:$0xff]  ;;  %v8212_v58 = vld [vmem:[%s8119_s10 + $0x20] sm:$0xff] }
  0x15   : > { %7963 = vmatpush.bf16.msra.mxu3 %v7683_v5  ;;  %666 = vmatpush.bf16.msra.mxu1 %v7683_v5  ;;  %v412_v22 = vrot.slane %v410_v17, 1  ;;  %v418_v37 = vshll.u32 %v8170_v32, 16  ;;  %v364_v39 = vrot.slane %v362_v35, 1  ;;  %v366_v48 = vshrl.u32 %v8167_v31, 16  ;;  %v8215_v59 = vld [vmem:[%s8119_s10 + $0x58] sm:$0xff]  ;;  %v7726_v60 = vld [vmem:[%s10039_s1 + $0x88] sm:$0xff] }
  0x16   : > { %v352_v21 = vor.u32 %v351_v16, %v347_v9  ;;  %v408_v25 = vor.u32 %v406_v14, %v8141_v20  ;;  %v360_v38 = vor.u32 %v358_v34, %v356_v19  ;;  %v370_v49 = vshll.u32 %v8184_v44, 16  ;;  %v8229_v9 = vld [vmem:[%s8119_s10 + $0x28] sm:$0xff]  ;;  %v8232_v10 = vld [vmem:[%s8119_s10 + $0x60] sm:$0xff] }
  0x17   : > { %v416_v40 = vor.u32 %v414_v36, %v412_v22  ;;  %v420_v41 = vrot.slane %v418_v37, 1  ;;  %v422_v50 = vshrl.u32 %v8170_v32, 16  ;;  %v426_v51 = vshll.u32 %v8191_v45, 16  ;;  %v7690_v12 = vld [vmem:[%s10039_s1 + $0x40] sm:$0xff] }
  0x18   : > { %536 = vmatpush.bf16.msra.mxu0 %v7686_v15  ;;  %7960 = vmatpush.bf16.msra.mxu2 %v7686_v15  ;;  %v357_v26 = vsel %vm345_vm0, %v352_v21, %v356_v19  ;;  %v413_v27 = vsel %vm345_vm0, %v408_v25, %v412_v22  ;;  %v365_v42 = vsel %vm345_vm0, %v360_v38, %v364_v39  ;;  %v372_v53 = vrot.slane %v370_v49, 1  ;;  %v7708_v13 = vld [vmem:[%s10039_s1 + $0x60] sm:$0xff]  ;;  %v7730_v49 = vld [vmem:[%s10039_s1 + $0xa8] sm:$0xff] }
  0x19   : > { %7964 = vmatpush.bf16.msra.mxu3 %v7682_v18  ;;  %667 = vmatpush.bf16.msra.mxu1 %v7682_v18  ;;  %v421_v43 = vsel %vm345_vm0, %v416_v40, %v420_v41  ;;  %v368_v52 = vor.u32 %v366_v48, %v364_v39  ;;  %v424_v54 = vor.u32 %v422_v50, %v420_v41  ;;  %v428_v55 = vrot.slane %v426_v51, 1  ;;  %v7725_v14 = vld [vmem:[%s10039_s1 + $0x80] sm:$0xff]  ;;  %v262_v39 = vld [vmem:[%s8119_s10 + $0x70] sm:$0x1]  ;;  %v7767_v48 = vld [vmem:[%s10039_s1 + $0xf8] sm:$0xff] }
  0x1a   : > { %v374_v61 = vshrl.u32 %v8184_v44, 16  ;;  %v378_v62 = vshll.u32 %v8212_v58, 16  ;;  %v430_v63 = vshrl.u32 %v8191_v45, 16  ;;  %v434_v0 = vshll.u32 %v8215_v59, 16  ;;  %v7771_v50 = vld [vmem:[%s10039_s1 + $0x118] sm:$0xff] }
  0x1b   : > { %6457 = vmatmul.msk.bf16.vlgmr.msra.gmra.mxu0 %vm486_vm1, %v357_v26  ;;  %6464 = vmatmul.msk.bf16.vlgmr.msra.gmra.mxu2 %vm486_vm1, %v413_v27  ;;  %v373_v56 = vsel %vm345_vm0, %v368_v52, %v372_v53  ;;  %v429_v57 = vsel %vm345_vm0, %v424_v54, %v428_v55  ;;  %v382_v15 = vshrl.u32 %v8212_v58, 16  ;;  %v386_v16 = vshll.u32 %v8229_v9, 16  ;;  %v8260_v26 = vld [vmem:[%s8119_s10 + $0x30] sm:$0xff]  ;;  %v8263_v27 = vld [vmem:[%s8119_s10 + $0x68] sm:$0xff]  ;;  %v7729_v54 = vld [vmem:[%s10039_s1 + $0xa0] sm:$0xff] }
  0x1c   : > { %852 = vmatpush.bf16.msrb.mxu2 %v7693_v23  ;;  %6494 = vmatmul.msk.bf16.vlgmr.msra.gmra.mxu3 %vm486_vm1, %v8126_v8  ;;  %v376_v1 = vor.u32 %v374_v61, %v372_v53  ;;  %v380_v2 = vrot.slane %v378_v62, 1  ;;  %v432_v3 = vor.u32 %v430_v63, %v428_v55  ;;  %v436_v4 = vrot.slane %v434_v0, 1  ;;  %v7938_v62 = vld [vmem:[%s8119_s10 + $0x8] sm:$0xff]   ;;  %v7712_v63 = vld [vmem:[%s8119_s10 + $0x10] sm:$0xff] }
  0x1d   : > { %1132 = vmatpush.bf16.msrb.mxu3 %v7711_v24  ;;  %6487 = vmatmul.msk.bf16.vlgmr.msra.gmra.mxu1 %vm486_vm1, %v7912_v6  ;;  %v438_v17 = vshrl.u32 %v8215_v59, 16  ;;  %v442_v18 = vshll.u32 %v8232_v10, 16  ;;  %v388_v21 = vrot.slane %v386_v16, 1  ;;  %v450_v34 = vshll.u32 %v8263_v27, 16 }
  0x1e   : > { %1532 = vmatpush.bf16.msrb.mxu0 %v7728_v28  ;;  %v381_v5 = vsel %vm345_vm0, %v376_v1, %v380_v2  ;;  %v437_v6 = vsel %vm345_vm0, %v432_v3, %v436_v4  ;;  %v384_v19 = vor.u32 %v382_v15, %v380_v2  ;;  %v7732_v28 = vld [vmem:[%s10039_s1 + $0xb8] sm:$0xff]  ;;  %v398_v51 = vshrl.u32 %v8260_v26, 16  ;;  %v7935_v1 = vld [vmem:[%s8119_s10] sm:$0xf0]  ;;  %v7936_v2 = vld [vmem:[%s8119_s10] sm:$0xe] }
  0x1f   : > { %v440_v22 = vor.u32 %v438_v17, %v436_v4  ;;  %v444_v23 = vrot.slane %v442_v18, 1  ;;  %1747 = vmatpush.bf16.msrb.mxu1 %v7732_v28  ;;  %v452_v38 = vrot.slane %v450_v34, 1  ;;  %v454_v52 = vshrl.u32 %v8263_v27, 16  ;;  %v7939_v3 = vld [vmem:[%s8119_s10 + $0x8] sm:$0xf0] }
  0x20   : > { %853 = vmatpush.bf16.msrb.mxu2 %v7692_v29  ;;  %v389_v24 = vsel %vm345_vm0, %v384_v19, %v388_v21  ;;  %v390_v29 = vshrl.u32 %v8229_v9, 16  ;;  %v1349_v0 = vshll.u32 %v7938_v62, 16  ;;  %v7937_v4 = vor.u32 %v7936_v2, %v7935_v1  ;;  %v7696_v2 = vld [vmem:[%s8119_s10 + $0x18] sm:$0xff] }
  0x21   : > { %1133 = vmatpush.bf16.msrb.mxu3 %v7710_v30  ;;  %v445_v25 = vsel %vm345_vm0, %v440_v22, %v444_v23  ;;  %v394_v30 = vshll.u32 %v8260_v26, 16  ;;  %v754_v15 = vrot.slane %v8123_v7, 1  ;;  %v1649_v19 = vrot.slane %v7712_v63, 1  ;;  %v7694_v22 = vld [vmem:[%s8119_s10 + $0x8] sm:$0xff] }
  0x22   : > { %1533 = vmatpush.bf16.msrb.mxu0 %v7727_v33  ;;  %v446_v33 = vshrl.u32 %v8232_v10, 16  ;;  %v392_v35 = vor.u32 %v390_v29, %v388_v21  ;;  %v756_v29 = vrot.slane %v8167_v31, 1 }
  0x23   : > { %v396_v36 = vrot.slane %v394_v30, 1 }
  0x24   : > { %854 = vmatpush.bf16.msrb.mxu2 %v7691_v46  ;;  %v448_v37 = vor.u32 %v446_v33, %v444_v23 }
  0x25   : > { %1134 = vmatpush.bf16.msrb.mxu3 %v7709_v47  ;;  %v397_v40 = vsel %vm345_vm0, %v392_v35, %v396_v36  ;;  %v7750_v47 = vld [vmem:[%s10039_s1 + $0xd8] sm:$0xff]  ;;  %v400_v55 = vor.u32 %v398_v51, %v396_v36  ;;  %v757_v36 = vsel %vm752_vm2, %v754_v15, %v756_v29 }
  0x26   : > { %1534 = vmatpush.bf16.msrb.mxu0 %v7726_v60  ;;  %v453_v41 = vsel %vm345_vm0, %v448_v37, %v452_v38  ;;  %v7695_v37 = vld [vmem:[%s8119_s10 + $0x10] sm:$0xff] }
  0x27   : > { %v405_v60 = vsel %vm345_vm0, %v400_v55, %v8141_v20  ;;  %v7940_v20 = vld [vmem:[%s8119_s10 + $0x8] sm:$0xe]  ;;  %v758_v55 = vrot.slane %v8184_v44, 1 }
  0x28   : > { %855 = vmatpush.bf16.msrb.mxu2 %v7690_v12  ;;  %v1354_v12 = vshll.u32 %v7712_v63, 16 }
  0x29   : > { %1135 = vmatpush.bf16.msrb.mxu3 %v7708_v13  ;;  %v7941_v13 = vor.u32 %v7940_v20, %v7939_v3  ;;  %v759_v1 = vsel %vm752_vm2, %v756_v29, %v758_v55 }
  0x2a   : > { %1535 = vmatpush.bf16.msrb.mxu0 %v7725_v14  ;;  %v753_v14 = vrot.slane %v7937_v4, 1  ;;  %v1356_v17 = vrot.slane %v1354_v12, 1 }
  0x2b   : > { %6458 = vmatmul.msk.bf16.gmra.mxu0 %vm486_vm1, %v365_v42  ;;  %6465 = vmatmul.msk.bf16.gmra.mxu2 %vm486_vm1, %v421_v43  ;;  %v329_v42 = vunpack.c.l.b16 %v262_v39  ;;  %v7731_v43 = vld [vmem:[%s10039_s1 + $0xb0] sm:$0xff]  ;;  %v1648_v18 = vrot.slane %v7941_v13, 1 }
  0x2c   : > { %6495 = vmatmul.msk.bf16.gmra.mxu3 %vm486_vm1, %v8129_v11  ;;  %1748 = vmatpush.bf16.msrb.mxu1 %v7731_v43  ;;  %v755_v21 = vsel %vm752_vm2, %v753_v14, %v754_v15 }
  0x2d   : > { %6488 = vmatmul.msk.bf16.gmra.mxu1 %vm486_vm1, %v8123_v7  ;;  %v8284_v46 = vpack.c.b16 %v329_v42, %v329_v42  ;;  %2027 = vmatpush.bf16.msra.mxu2 %v7750_v47  ;;  %v7713_v7 = vld [vmem:[%s8119_s10 + $0x18] sm:$0xff] }
  0x2e   : > { %2427 = vmatpush.bf16.msra.mxu3 %v7767_v48  ;;  %2642 = vmatpush.bf16.msra.mxu0 %v7771_v50  ;;  %v1362_v28 = vshll.u32 %v7713_v7, 16  ;;  %v1651_v34 = vrot.slane %v7713_v7, 1 }
  0x2f   : > { %v458_v53 = vshll.u32 %v8284_v46, 16 }
  0x30   : > { %1749 = vmatpush.bf16.msrb.mxu1 %v7730_v49  ;;  %v1364_v33 = vrot.slane %v1362_v28, 1  ;;  %v1366_v49 = vshrl.u32 %v7713_v7, 16 }
  0x34   : > { %1750 = vmatpush.bf16.msrb.mxu1 %v7729_v54  ;;  %v7766_v54 = vld [vmem:[%s10039_s1 + $0xf0] sm:$0xff] }
  0x35   : > { %2428 = vmatpush.bf16.msra.mxu3 %v7766_v54 }
  0x3b   : > { %6459 = vmatmul.msk.bf16.gmra.mxu0 %vm486_vm1, %v373_v56  ;;  %6466 = vmatmul.msk.bf16.gmra.mxu2 %vm486_vm1, %v429_v57  ;;  %v456_v56 = vor.u32 %v454_v52, %v452_v38  ;;  %v460_v57 = vrot.slane %v458_v53, 1  ;;  %v7749_v53 = vld [vmem:[%s10039_s1 + $0xd0] sm:$0xff] }
  0x3c   : > { %6496 = vmatmul.msk.bf16.gmra.mxu3 %vm486_vm1, %v8170_v32  ;;  %2028 = vmatpush.bf16.msra.mxu2 %v7749_v53 }
  0x3d   : > { %6489 = vmatmul.msk.bf16.gmra.mxu1 %vm486_vm1, %v8167_v31  ;;  %v461_v61 = vsel %vm345_vm0, %v456_v56, %v460_v57  ;;  %v7714_v31 = vld [vmem:[%s8119_s10 + $0x20] sm:$0xff]  ;;  %v1368_v56 = vor.u32 %v1366_v49, %v1364_v33 }
  0x3e   : > { %v1370_v50 = vshll.u32 %v7714_v31, 16 }
  0x40   : > { %v1372_v57 = vrot.slane %v1370_v50, 1  ;;  %v762_v50 = vrot.slane %v8229_v9, 1 }
  0x42   : > { %v1373_v3 = vsel %vm345_vm0, %v1368_v56, %v1372_v57 }
  0x4b   : > { %6460 = vmatmul.msk.bf16.gmra.mxu0 %vm486_vm1, %v381_v5  ;;  %6467 = vmatmul.msk.bf16.gmra.mxu2 %vm486_vm1, %v437_v6  ;;  %v1347_v5 = vshrl.u32 %v7938_v62, 16  ;;  %v1351_v6 = vrot.slane %v1349_v0, 1 }
  0x4c   : > { %6497 = vmatmul.msk.bf16.gmra.mxu3 %vm486_vm1, %v8191_v45 }
  0x4d   : > { %6490 = vmatmul.msk.bf16.gmra.mxu1 %vm486_vm1, %v8184_v44  ;;  %v1352_v16 = vor.u32 %v1351_v6, %v1347_v5  ;;  %v7715_v5 = vld [vmem:[%s8119_s10 + $0x28] sm:$0xff]  ;;  %v7770_v6 = vld [vmem:[%s10039_s1 + $0x110] sm:$0xff] }
  0x4e   : > { %2643 = vmatpush.bf16.msra.mxu0 %v7770_v6 }
  0x4f   : > { %v1357_v23 = vsel %vm345_vm0, %v1352_v16, %v1356_v17  ;;  %v1374_v16 = vshrl.u32 %v7714_v31, 16 }
  0x5b   : > { %6461 = vmatmul.msk.bf16.gmra.mxu0 %vm486_vm1, %v389_v24  ;;  %6468 = vmatmul.msk.bf16.gmra.mxu2 %vm486_vm1, %v445_v25  ;;  %v1650_v24 = vsel %vm752_vm2, %v1648_v18, %v1649_v19  ;;  %v1358_v25 = vshrl.u32 %v7712_v63, 16 }
  0x5c   : > { %6498 = vmatmul.msk.bf16.gmra.mxu3 %vm486_vm1, %v8215_v59 }
  0x5d   : > { %6491 = vmatmul.msk.bf16.gmra.mxu1 %vm486_vm1, %v8212_v58  ;;  %v1360_v30 = vor.u32 %v1358_v25, %v1356_v17  ;;  %v1378_v17 = vshll.u32 %v7715_v5, 16 }
  0x5f   : > { %v1365_v38 = vsel %vm345_vm0, %v1360_v30, %v1364_v33  ;;  %v7697_v33 = vld [vmem:[%s8119_s10 + $0x20] sm:$0xff] }
  0x6b   : > { %6462 = vmatmul.msk.bf16.gmra.mxu0 %vm486_vm1, %v397_v40  ;;  %6469 = vmatmul.msk.bf16.gmra.mxu2 %vm486_vm1, %v453_v41  ;;  %v1652_v40 = vsel %vm752_vm2, %v1649_v19, %v1651_v34 }
  0x6c   : > { %6499 = vmatmul.msk.bf16.gmra.mxu3 %vm486_vm1, %v8232_v10 }
  0x6d   : > { %6492 = vmatmul.msk.bf16.gmra.mxu1 %vm486_vm1, %v8229_v9  ;;  %v7717_v9 = vld [vmem:[%s8119_s10 + $0x38] sm:$0xff] }
  0x7b   : > { %6463 = vmatmul.msk.bf16.gmra.mxu0 %vm486_vm1, %v405_v60  ;;  %6470 = vmatmul.msk.bf16.gmra.mxu2 %vm486_vm1, %v461_v61  ;;  %v1653_v60 = vrot.slane %v7714_v31, 1 }
  0x7c   : > { %6500 = vmatmul.msk.bf16.gmra.mxu3 %vm486_vm1, %v8263_v27 }
  0x7d   : > { %6493 = vmatmul.msk.bf16.gmra.mxu1 %vm486_vm1, %v8260_v26  ;;  %v1654_v4 = vsel %vm752_vm2, %v1651_v34, %v1653_v60 }
  0x8b   : > { %6525 = vmatmul.msk.bf16.vlgmr.msrb.gmra.mxu2 %vm486_vm1, %v755_v21  ;;  %6709 = vmatmul.msk.bf16.vlgmr.msrb.gmra.mxu0 %vm486_vm1, %v1357_v23  ;;  %v760_v21 = vrot.slane %v8212_v58, 1  ;;  %v1380_v23 = vrot.slane %v1378_v17, 1  ;;  %v7716_v58 = vld [vmem:[%s8119_s10 + $0x30] sm:$0xff]  ;;  %v764_v17 = vrot.slane %v8260_v26, 1  ;;  %v7718_v26 = vld [vmem:[%s8119_s10 + $0x40] sm:$0xff] }
  0x8c   : > { %6619 = vmatmul.msk.bf16.vlgmr.msrb.gmra.mxu3 %vm486_vm1, %v7694_v22  ;;  %v1376_v22 = vor.u32 %v1374_v16, %v1372_v57  ;;  %v1657_v54 = vrot.slane %v7716_v58, 1 }
  0x8d   : > { %6747 = vmatmul.msk.bf16.vlgmr.msrb.gmra.mxu1 %vm486_vm1, %v1650_v24  ;;  %v1655_v24 = vrot.slane %v7715_v5, 1  ;;  %v761_v30 = vsel %vm752_vm2, %v758_v55, %v760_v21 }
  0x8e   : > { %v1381_v34 = vsel %vm345_vm0, %v1376_v22, %v1380_v23  ;;  %v1659_v22 = vrot.slane %v7717_v9, 1 }
  0x98   : > { %v538_v35 = vpop.f32.mrf.mxu0 }
  0x9a   : > { %v669_v39 = vpop.f32.mrf.mxu1 }
  0x9b   : > { %v8334_v41 = vadd.f32 %v669_v39, %v538_v35  ;;  %6526 = vmatmul.msk.bf16.gmra.mxu2 %vm486_vm1, %v757_v36  ;;  %6710 = vmatmul.msk.bf16.gmra.mxu0 %vm486_vm1, %v1365_v38  ;;  %v1656_v36 = vsel %vm752_vm2, %v1653_v60, %v1655_v24 }
  0x9c   : > { %6620 = vmatmul.msk.bf16.gmra.mxu3 %vm486_vm1, %v7695_v37 }
  0x9d   : > { %6748 = vmatmul.msk.bf16.gmra.mxu1 %vm486_vm1, %v1652_v40 }
  0x9e   : > { %v573_v42 = vpop.f32.mrf.mxu2 }
  0x9f   : > { %v704_v43 = vpop.f32.mrf.mxu3 }
  0xa0   : > { %v8341_v47 = vadd.f32 %v704_v43, %v573_v42  ;;  %v540_v48 = vpop.f32.mrf.mxu0  ;;  %v1382_v42 = vshrl.u32 %v7715_v5, 16  ;;  %v1386_v43 = vshll.u32 %v7716_v58, 16 }
  0xa2   : > { %v671_v51 = vpop.f32.mrf.mxu1  ;;  %v1388_v53 = vrot.slane %v1386_v43, 1 }
  0xa3   : > { %v8343_v52 = vadd.f32 %v671_v51, %v540_v48  ;;  %v1384_v51 = vor.u32 %v1382_v42, %v1380_v23 }
  0xa6   : > { %v575_v61 = vpop.f32.mrf.mxu2 }
  0xa7   : > { %v706_v62 = vpop.f32.mrf.mxu3 }
  0xa8   : > { %v8352_v63 = vadd.f32 %v706_v62, %v575_v61  ;;  %v543_v0 = vpop.f32.mrf.mxu0  ;;  %v763_v61 = vsel %vm752_vm2, %v760_v21, %v762_v50  ;;  %v7698_v62 = vld [vmem:[%s8119_s10 + $0x28] sm:$0xff] }
  0xaa   : > { %v674_v20 = vpop.f32.mrf.mxu1 }
  0xab   : > { %v8358_v44 = vadd.f32 %v674_v20, %v543_v0  ;;  %6527 = vmatmul.msk.bf16.gmra.mxu2 %vm486_vm1, %v759_v1  ;;  %6711 = vmatmul.msk.bf16.gmra.mxu0 %vm486_vm1, %v1373_v3  ;;  %v1389_v0 = vsel %vm345_vm0, %v1384_v51, %v1388_v53 }
  0xac   : > { %6621 = vmatmul.msk.bf16.gmra.mxu3 %vm486_vm1, %v7696_v2  ;;  %v1658_v2 = vsel %vm752_vm2, %v1655_v24, %v1657_v54 }
  0xad   : > { %6749 = vmatmul.msk.bf16.gmra.mxu1 %vm486_vm1, %v1654_v4 }
  0xae   : > { %v578_v12 = vpop.f32.mrf.mxu2 }
  0xaf   : > { %v709_v13 = vpop.f32.mrf.mxu3 }
  0xb0   : > { %v8368_v14 = vadd.f32 %v709_v13, %v578_v12  ;;  %v545_v15 = vpop.f32.mrf.mxu0  ;;  %v1390_v12 = vshrl.u32 %v7716_v58, 16  ;;  %v1394_v13 = vshll.u32 %v7717_v9, 16  ;;  %v7748_v58 = vld [vmem:[%s10039_s1 + $0xc8] sm:$0xff] }
  0xb1   : > { %2029 = vmatpush.bf16.msra.mxu2 %v7748_v58 }
  0xb2   : > { %v676_v18 = vpop.f32.mrf.mxu1  ;;  %v1396_v21 = vrot.slane %v1394_v13, 1 }
  0xb3   : > { %v8370_v19 = vadd.f32 %v676_v18, %v545_v15  ;;  %v1392_v18 = vor.u32 %v1390_v12, %v1388_v53 }
  0xb6   : > { %v580_v7 = vpop.f32.mrf.mxu2 }
  0xb7   : > { %v711_v25 = vpop.f32.mrf.mxu3 }
  0xb8   : > { %v8373_v28 = vadd.f32 %v711_v25, %v580_v7  ;;  %v548_v29 = vpop.f32.mrf.mxu0 }
  0xba   : > { %v679_v35 = vpop.f32.mrf.mxu1 }
  0xbb   : > { %v8379_v37 = vadd.f32 %v679_v35, %v548_v29  ;;  %6528 = vmatmul.msk.bf16.gmra.mxu2 %vm486_vm1, %v761_v30  ;;  %6712 = vmatmul.msk.bf16.gmra.mxu0 %vm486_vm1, %v1381_v34  ;;  %v765_v29 = vsel %vm752_vm2, %v762_v50, %v764_v17  ;;  %v7699_v30 = vld [vmem:[%s8119_s10 + $0x30] sm:$0xff]  ;;  %v1660_v35 = vsel %vm752_vm2, %v1657_v54, %v1659_v22  ;;  %v1402_v50 = vshll.u32 %v7718_v26, 16  ;;  %v7769_v54 = vld [vmem:[%s10039_s1 + $0x108] sm:$0xff] }
  0xbc   : > { %6622 = vmatmul.msk.bf16.gmra.mxu3 %vm486_vm1, %v7697_v33  ;;  %v1397_v33 = vsel %vm345_vm0, %v1392_v18, %v1396_v21  ;;  %2644 = vmatpush.bf16.msra.mxu0 %v7769_v54 }
  0xbd   : > { %6750 = vmatmul.msk.bf16.gmra.mxu1 %vm486_vm1, %v1656_v36 }
  0xbe   : > { %v583_v38 = vpop.f32.mrf.mxu2 }
  0xbf   : > { %v714_v39 = vpop.f32.mrf.mxu3 }
  0xc0   : > { %v8386_v40 = vadd.f32 %v714_v39, %v583_v38  ;;  %v550_v31 = vpop.f32.mrf.mxu0  ;;  %v7765_v38 = vld [vmem:[%s10039_s1 + $0xe8] sm:$0xff] }
  0xc1   : > { %2429 = vmatpush.bf16.msra.mxu3 %v7765_v38 }
  0xc2   : > { %v681_v48 = vpop.f32.mrf.mxu1 }
  0xc3   : > { %v8388_v49 = vadd.f32 %v681_v48, %v550_v31  ;;  %v1398_v48 = vshrl.u32 %v7717_v9, 16 }
  0xc6   : > { %v585_v55 = vpop.f32.mrf.mxu2 }
  0xc7   : > { %v716_v56 = vpop.f32.mrf.mxu3 }
  0xc8   : > { %v8391_v57 = vadd.f32 %v716_v56, %v585_v55  ;;  %v553_v60 = vpop.f32.mrf.mxu0  ;;  %v766_v55 = vrot.slane %v8126_v8, 1  ;;  %v1400_v56 = vor.u32 %v1398_v48, %v1396_v21  ;;  %v7719_v8 = vld [vmem:[%s8119_s10 + $0x48] sm:$0xff] }
  0xca   : > { %v684_v1 = vpop.f32.mrf.mxu1  ;;  %v767_v9 = vsel %vm752_vm2, %v764_v17, %v766_v55 }
  0xcb   : > { %v8397_v3 = vadd.f32 %v684_v1, %v553_v60  ;;  %6529 = vmatmul.msk.bf16.gmra.mxu2 %vm486_vm1, %v763_v61  ;;  %6713 = vmatmul.msk.bf16.gmra.mxu0 %vm486_vm1, %v1389_v0  ;;  %v1404_v60 = vrot.slane %v1402_v50, 1  ;;  %v1661_v61 = vrot.slane %v7718_v26, 1 }
  0xcc   : > { %6623 = vmatmul.msk.bf16.gmra.mxu3 %vm486_vm1, %v7698_v62 }
  0xcd   : > { %6751 = vmatmul.msk.bf16.gmra.mxu1 %vm486_vm1, %v1658_v2  ;;  %v1662_v12 = vsel %vm752_vm2, %v1659_v22, %v1661_v61 }
  0xce   : > { %v588_v20 = vpop.f32.mrf.mxu2 }
  0xcf   : > { %v719_v4 = vpop.f32.mrf.mxu3 }
  0xd0   : > { %v8404_v5 = vadd.f32 %v719_v4, %v588_v20  ;;  %v555_v6 = vpop.f32.mrf.mxu0  ;;  %v7700_v20 = vld [vmem:[%s8119_s10 + $0x38] sm:$0xff]  ;;  %v1405_v4 = vsel %vm345_vm0, %v1400_v56, %v1404_v60 }
  0xd2   : > { %v686_v15 = vpop.f32.mrf.mxu1 }
  0xd3   : > { %v8406_v16 = vadd.f32 %v686_v15, %v555_v6 }
  0xd6   : > { %v590_v23 = vpop.f32.mrf.mxu2 }
  0xd7   : > { %v721_v24 = vpop.f32.mrf.mxu3 }
  0xd8   : > { %v8409_v7 = vadd.f32 %v721_v24, %v590_v23  ;;  %v558_v25 = vpop.f32.mrf.mxu0  ;;  %v1406_v23 = vshrl.u32 %v7718_v26, 16  ;;  %v1410_v24 = vshll.u32 %v7719_v8, 16 }
  0xda   : > { %v689_v34 = vpop.f32.mrf.mxu1 }
  0xdb   : > { %v8415_v36 = vadd.f32 %v689_v34, %v558_v25  ;;  %6530 = vmatmul.msk.bf16.gmra.mxu2 %vm486_vm1, %v765_v29  ;;  %6714 = vmatmul.msk.bf16.gmra.mxu0 %vm486_vm1, %v1397_v33  ;;  %v768_v29 = vrot.slane %v8129_v11, 1  ;;  %v1412_v33 = vrot.slane %v1410_v24, 1  ;;  %v1663_v34 = vrot.slane %v7719_v8, 1  ;;  %v7720_v11 = vld [vmem:[%s8119_s10 + $0x50] sm:$0xff]  ;;  %v7702_v24 = vld [vmem:[%s8119_s10 + $0x48] sm:$0xff] }
  0xdc   : > { %6624 = vmatmul.msk.bf16.gmra.mxu3 %vm486_vm1, %v7699_v30  ;;  %v1408_v30 = vor.u32 %v1406_v23, %v1404_v60 }
  0xdd   : > { %6752 = vmatmul.msk.bf16.gmra.mxu1 %vm486_vm1, %v1660_v35  ;;  %v1664_v50 = vsel %vm752_vm2, %v1661_v61, %v1663_v34 }
  0xde   : > { %v593_v39 = vpop.f32.mrf.mxu2  ;;  %v1413_v26 = vsel %vm345_vm0, %v1408_v30, %v1412_v33  ;;  %v8483_v30 = vld [vmem:[%s8119_s10 + $0x58] sm:$0xff] }
  0xdf   : > { %v724_v31 = vpop.f32.mrf.mxu3 }
  0xe0   : > { %v8428_v42 = vadd.f32 %v724_v31, %v593_v39  ;;  %v560_v43 = vpop.f32.mrf.mxu0  ;;  %v769_v31 = vsel %vm752_vm2, %v766_v55, %v768_v29 }
  0xe2   : > { %v691_v51 = vpop.f32.mrf.mxu1 }
  0xe3   : > { %v8430_v53 = vadd.f32 %v691_v51, %v560_v43  ;;  %v7701_v43 = vld [vmem:[%s8119_s10 + $0x40] sm:$0xff] }
  0xe6   : > { %v595_v62 = vpop.f32.mrf.mxu2 }
  0xe7   : > { %v726_v0 = vpop.f32.mrf.mxu3 }
  0xe8   : > { %v8436_v1 = vadd.f32 %v726_v0, %v595_v62  ;;  %v563_v2 = vpop.f32.mrf.mxu0  ;;  %v1414_v62 = vshrl.u32 %v7719_v8, 16  ;;  %v1418_v0 = vshll.u32 %v7720_v11, 16 }
  0xea   : > { %v694_v6 = vpop.f32.mrf.mxu1 }
  0xeb   : > { %v8442_v13 = vadd.f32 %v694_v6, %v563_v2  ;;  %6531 = vmatmul.msk.bf16.gmra.mxu2 %vm486_vm1, %v767_v9  ;;  %6715 = vmatmul.msk.bf16.gmra.mxu0 %vm486_vm1, %v1405_v4  ;;  %v770_v9 = vrot.slane %v8170_v32, 1  ;;  %v1420_v4 = vrot.slane %v1418_v0, 1  ;;  %v1665_v6 = vrot.slane %v7720_v11, 1 }
  0xec   : > { %6625 = vmatmul.msk.bf16.gmra.mxu3 %vm486_vm1, %v7700_v20  ;;  %v1416_v20 = vor.u32 %v1414_v62, %v1412_v33 }
  0xed   : > { %6753 = vmatmul.msk.bf16.gmra.mxu1 %vm486_vm1, %v1662_v12  ;;  %v771_v23 = vsel %vm752_vm2, %v768_v29, %v770_v9 }
  0xee   : > { %v598_v15 = vpop.f32.mrf.mxu2  ;;  %v1421_v8 = vsel %vm345_vm0, %v1416_v20, %v1420_v4 }
  0xef   : > { %v729_v18 = vpop.f32.mrf.mxu3 }
  0xf0   : > { %v8449_v17 = vadd.f32 %v729_v18, %v598_v15  ;;  %v565_v21 = vpop.f32.mrf.mxu0 }
  0xf2   : > { %v696_v22 = vpop.f32.mrf.mxu1 }
  0xf3   : > { %v8451_v25 = vadd.f32 %v696_v22, %v565_v21  ;;  %v1666_v22 = vsel %vm752_vm2, %v1663_v34, %v1665_v6 }
  0xf6   : > { %v600_v35 = vpop.f32.mrf.mxu2 }
  0xf7   : > { %v731_v58 = vpop.f32.mrf.mxu3 }
  0xf8   : > { %v8454_v38 = vadd.f32 %v731_v58, %v600_v35  ;;  %v568_v39 = vpop.f32.mrf.mxu0 }
  0xfa   : > { %v699_v48 = vpop.f32.mrf.mxu1 }
  0xfb   : > { %v8460_v51 = vadd.f32 %v699_v48, %v568_v39  ;;  %6532 = vmatmul.msk.bf16.gmra.mxu2 %vm486_vm1, %v769_v31  ;;  %6716 = vmatmul.msk.bf16.gmra.mxu0 %vm486_vm1, %v1413_v26  ;;  %v1422_v39 = vshrl.u32 %v7720_v11, 16  ;;  %v1426_v31 = vshll.u32 %v8483_v30, 16  ;;  %v772_v48 = vrot.slane %v8191_v45, 1  ;;  %v7764_v11 = vld [vmem:[%s10039_s1 + $0xe0] sm:$0xff] }
  0xfc   : > { %6626 = vmatmul.msk.bf16.gmra.mxu3 %vm486_vm1, %v7701_v43  ;;  %v7747_v43 = vld [vmem:[%s10039_s1 + $0xc0] sm:$0xff] }
  0xfd   : > { %6754 = vmatmul.msk.bf16.gmra.mxu1 %vm486_vm1, %v1664_v50  ;;  %2030 = vmatpush.bf16.msra.mxu2 %v7747_v43  ;;  %v1424_v50 = vor.u32 %v1422_v39, %v1420_v4  ;;  %v773_v45 = vsel %vm752_vm2, %v770_v9, %v772_v48  ;;  %v7703_v4 = vld [vmem:[%s8119_s10 + $0x50] sm:$0xff]  ;;  %v7722_v9 = vld [vmem:[%s8119_s10 + $0x60] sm:$0xff] }
  0xfe   : > { %v603_v54 = vpop.f32.mrf.mxu2  ;;  %2430 = vmatpush.bf16.msra.mxu3 %v7764_v11  ;;  %v1669_v11 = vrot.slane %v7722_v9, 1 }
  0xff   : > { %v734_v56 = vpop.f32.mrf.mxu3 }
 0x100   : > { %v8467_v55 = vadd.f32 %v734_v56, %v603_v54  ;;  %v570_v60 = vpop.f32.mrf.mxu0  ;;  %v1428_v54 = vrot.slane %v1426_v31, 1 }
 0x102   : > { %v701_v61 = vpop.f32.mrf.mxu1 }
 0x103   : > { %v8469_v2 = vadd.f32 %v701_v61, %v570_v60 }
 0x106   : > { %v605_v12 = vpop.f32.mrf.mxu2 }
 0x107   : > { %v736_v15 = vpop.f32.mrf.mxu3 }
 0x108   : > { %v8472_v18 = vadd.f32 %v736_v15, %v605_v12  ;;  %v1537_v21 = vpop.f32.mrf.mxu0  ;;  %v1429_v12 = vsel %vm345_vm0, %v1424_v50, %v1428_v54 }
 0x10a   : > { %v1752_v32 = vpop.f32.mrf.mxu1 }
 0x10b   : > { %6533 = vmatmul.msk.bf16.gmra.mxu2 %vm486_vm1, %v771_v23  ;;  %6717 = vmatmul.msk.bf16.gmra.mxu0 %vm486_vm1, %v1421_v8  ;;  %v7800_v23 = vld [vmem:[%s10041_s3 + $0x78] sm:$0xff] }
 0x10c   : > { %6627 = vmatmul.msk.bf16.gmra.mxu3 %vm486_vm1, %v7702_v24  ;;  %3977 = vmatpush.bf16.msra.mxu1 %v7800_v23 }
 0x10d   : > { %6755 = vmatmul.msk.bf16.gmra.mxu1 %vm486_vm1, %v1666_v22 }
 0x10e   : > { %v857_v33 = vpop.f32.mrf.mxu2 }
 0x10f   : > { %v927_v35 = vadd.f32 %v857_v33, %v8334_v41  ;;  %v1137_v29 = vpop.f32.mrf.mxu3  ;;  %v1667_v41 = vrot.slane %v8483_v30, 1 }
 0x110   : > { %v1539_v58 = vpop.f32.mrf.mxu0 }
 0x111   : > { %v1207_v34 = vadd.f32 %v1137_v29, %v927_v35  ;;  %v1430_v29 = vshrl.u32 %v8483_v30, 16 }
 0x112   : > { %v1754_v62 = vpop.f32.mrf.mxu1 }
 0x113   : > { %v1607_v26 = vadd.f32 %v1537_v21, %v1207_v34  ;;  %v1668_v21 = vsel %vm752_vm2, %v1665_v6, %v1667_v41  ;;  %v7768_v6 = vld [vmem:[%s10039_s1 + $0x100] sm:$0xff]  ;;  %v774_v34 = vrot.slane %v8215_v59, 1  ;;  %v1432_v43 = vor.u32 %v1430_v29, %v1428_v54 }
 0x114   : > { %2645 = vmatpush.bf16.msra.mxu0 %v7768_v6 }
 0x115   : > { %v8491_v56 = vadd.f32 %v1752_v32, %v1607_v26 }
 0x116   : > { %v859_v60 = vpop.f32.mrf.mxu2 }
 0x117   : > { %v928_v0 = vadd.f32 %v859_v60, %v8343_v52  ;;  %v1139_v61 = vpop.f32.mrf.mxu3 }
 0x118   : > { %v1542_v20 = vpop.f32.mrf.mxu0 }
 0x119   : > { %v1208_v15 = vadd.f32 %v1139_v61, %v928_v0  ;;  %v775_v61 = vsel %vm752_vm2, %v772_v48, %v774_v34 }
 0x11a   : > { %v1757_v35 = vpop.f32.mrf.mxu1 }
 0x11b   : > { %6534 = vmatmul.msk.bf16.gmra.mxu2 %vm486_vm1, %v773_v45  ;;  %6718 = vmatmul.msk.bf16.gmra.mxu0 %vm486_vm1, %v1429_v12  ;;  %v1608_v52 = vadd.f32 %v1539_v58, %v1208_v15  ;;  %v1434_v58 = vshll.u32 %v7722_v9, 16  ;;  %v7704_v45 = vld [vmem:[%s8119_s10 + $0x58] sm:$0xff] }
 0x11c   : > { %6628 = vmatmul.msk.bf16.gmra.mxu3 %vm486_vm1, %v7703_v4 }
 0x11d   : > { %6756 = vmatmul.msk.bf16.gmra.mxu1 %vm486_vm1, %v1668_v21  ;;  %v8510_v24 = vadd.f32 %v1754_v62, %v1608_v52  ;;  %v1436_v26 = vrot.slane %v1434_v58, 1 }
 0x11e   : > { %v862_v8 = vpop.f32.mrf.mxu2 }
 0x11f   : > { %v929_v22 = vadd.f32 %v862_v8, %v8358_v44  ;;  %v1142_v32 = vpop.f32.mrf.mxu3  ;;  %v1437_v30 = vsel %vm345_vm0, %v1432_v43, %v1436_v26  ;;  %v7705_v43 = vld [vmem:[%s8119_s10 + $0x60] sm:$0xff] }
 0x120   : > { %v1544_v33 = vpop.f32.mrf.mxu0 }
 0x121   : > { %v1209_v39 = vadd.f32 %v1142_v32, %v929_v22  ;;  %v776_v22 = vrot.slane %v8232_v10, 1  ;;  %v7799_v10 = vld [vmem:[%s10041_s3 + $0x70] sm:$0xff] }
 0x122   : > { %v1759_v59 = vpop.f32.mrf.mxu1  ;;  %3978 = vmatpush.bf16.msra.mxu1 %v7799_v10 }
 0x123   : > { %v1609_v31 = vadd.f32 %v1542_v20, %v1209_v39  ;;  %v1670_v20 = vsel %vm752_vm2, %v1667_v41, %v1669_v11  ;;  %v1438_v41 = vshrl.u32 %v7722_v9, 16 }
 0x125   : > { %v8518_v50 = vadd.f32 %v1757_v35, %v1609_v31  ;;  %v1440_v32 = vor.u32 %v1438_v41, %v1436_v26 }
 0x126   : > { %v864_v60 = vpop.f32.mrf.mxu2 }
 0x127   : > { %v930_v44 = vadd.f32 %v864_v60, %v8370_v19  ;;  %v1144_v62 = vpop.f32.mrf.mxu3  ;;  %v7723_v19 = vld [vmem:[%s8119_s10 + $0x68] sm:$0xff] }
 0x128   : > { %v1547_v0 = vpop.f32.mrf.mxu0  ;;  %v1442_v52 = vshll.u32 %v7723_v19, 16  ;;  %v1671_v35 = vrot.slane %v7723_v19, 1 }
 0x129   : > { %v1210_v4 = vadd.f32 %v1144_v62, %v930_v44 }
 0x12a   : > { %v1672_v44 = vsel %vm752_vm2, %v1669_v11, %v1671_v35 }
 0x12b   : > { %6535 = vmatmul.msk.bf16.gmra.mxu2 %vm486_vm1, %v775_v61  ;;  %6719 = vmatmul.msk.bf16.gmra.mxu0 %vm486_vm1, %v1437_v30  ;;  %v1610_v54 = vadd.f32 %v1544_v33, %v1210_v4  ;;  %v1444_v33 = vrot.slane %v1442_v52, 1  ;;  %v1446_v61 = vshrl.u32 %v7723_v19, 16 }
 0x12c   : > { %6629 = vmatmul.msk.bf16.gmra.mxu3 %vm486_vm1, %v7704_v45 }
 0x12d   : > { %6757 = vmatmul.msk.bf16.gmra.mxu1 %vm486_vm1, %v1670_v20  ;;  %v8530_v12 = vadd.f32 %v1759_v59, %v1610_v54  ;;  %v1445_v9 = vsel %vm345_vm0, %v1440_v32, %v1444_v33  ;;  %v778_v20 = vrot.slane %v8263_v27, 1  ;;  %v1448_v59 = vor.u32 %v1446_v61, %v1444_v33 }
 0x12e   : > { %v867_v48 = vpop.f32.mrf.mxu2 }
 0x12f   : > { %v931_v15 = vadd.f32 %v867_v48, %v8379_v37  ;;  %v1147_v21 = vpop.f32.mrf.mxu3  ;;  %v777_v37 = vsel %vm752_vm2, %v774_v34, %v776_v22 }
 0x130   : > { %v1549_v23 = vpop.f32.mrf.mxu0 }
 0x131   : > { %v1211_v6 = vadd.f32 %v1147_v21, %v931_v15  ;;  %v1263_v15 = vld [vmem:[%s8119_s10 + $0x78] sm:$0x1] }
 0x132   : > { %v1330_v32 = vunpack.c.l.b16 %v1263_v15 }
 0x133   : > { %v8533_v8 = vadd.f32 %v1547_v0, %v1211_v6  ;;  %v7706_v6 = vld [vmem:[%s8119_s10 + $0x68] sm:$0xff] }
 0x136   : > { %v869_v29 = vpop.f32.mrf.mxu2 }
 0x137   : > { %v932_v58 = vadd.f32 %v869_v29, %v8388_v49  ;;  %v1149_v39 = vpop.f32.mrf.mxu3  ;;  %v7724_v49 = vld [vmem:[%s8119_s10 + $0x70] sm:$0xff] }
 0x138   : > { %v1552_v31 = vpop.f32.mrf.mxu0  ;;  %v1450_v45 = vshll.u32 %v7724_v49, 16  ;;  %v1673_v48 = vrot.slane %v7724_v49, 1 }
 0x139   : > { %v1212_v60 = vadd.f32 %v1149_v39, %v932_v58 }
 0x13a   : > { %v1452_v54 = vrot.slane %v1450_v45, 1  ;;  %v1674_v58 = vsel %vm752_vm2, %v1671_v35, %v1673_v48  ;;  %v7707_v45 = vld [vmem:[%s8119_s10 + $0x70] sm:$0xff] }
 0x13b   : > { %6536 = vmatmul.msk.bf16.gmra.mxu2 %vm486_vm1, %v777_v37  ;;  %6720 = vmatmul.msk.bf16.gmra.mxu0 %vm486_vm1, %v1445_v9  ;;  %v8546_v26 = vadd.f32 %v1549_v23, %v1212_v60  ;;  %v1454_v37 = vshrl.u32 %v7724_v49, 16  ;;  %v7798_v9 = vld [vmem:[%s10041_s3 + $0x68] sm:$0xff] }
 0x13c   : > { %6630 = vmatmul.msk.bf16.gmra.mxu3 %vm486_vm1, %v7705_v43  ;;  %v1453_v19 = vsel %vm345_vm0, %v1448_v59, %v1452_v54  ;;  %3979 = vmatpush.bf16.msra.mxu1 %v7798_v9 }
 0x13d   : > { %6758 = vmatmul.msk.bf16.gmra.mxu1 %vm486_vm1, %v1672_v44  ;;  %v780_v44 = vrot.slane %v8284_v46, 1  ;;  %v1456_v10 = vor.u32 %v1454_v37, %v1452_v54  ;;  %v7942_v46 = vld [vmem:[%s8119_s10 + $0x10] sm:$0xff]  }
 0x13e   : > { %v872_v34 = vpop.f32.mrf.mxu2 }
 0x13f   : > { %v933_v11 = vadd.f32 %v872_v34, %v8397_v3  ;;  %v1152_v62 = vpop.f32.mrf.mxu3  ;;  %v779_v3 = vsel %vm752_vm2, %v776_v22, %v778_v20  ;;  %v781_v61 = vsel %vm752_vm2, %v778_v20, %v780_v44  ;;  %v7943_v20 = vld [vmem:[%s8119_s10 + $0x10] sm:$0xf0] }
 0x140   : > { %v1554_v0 = vpop.f32.mrf.mxu0 }
 0x141   : > { %v1213_v30 = vadd.f32 %v1152_v62, %v933_v11 }
 0x143   : > { %v8552_v4 = vadd.f32 %v1552_v31, %v1213_v30 }
 0x146   : > { %v874_v21 = vpop.f32.mrf.mxu2 }
 0x147   : > { %v934_v23 = vadd.f32 %v874_v21, %v8406_v16  ;;  %v1154_v41 = vpop.f32.mrf.mxu3  ;;  %v1345_v16 = vpack.c.b16 %v1330_v32, %v1330_v32  ;;  %v2244_v21 = vshll.u32 %v7942_v46, 16  ;;  %v2242_v32 = vshrl.u32 %v7942_v46, 16 }
 0x148   : > { %v1557_v52 = vpop.f32.mrf.mxu0 }
 0x149   : > { %v1214_v29 = vadd.f32 %v1154_v41, %v934_v23  ;;  %v1458_v43 = vshll.u32 %v1345_v16, 16  ;;  %v1675_v11 = vrot.slane %v1345_v16, 1  ;;  %v7944_v23 = vld [vmem:[%s8119_s10 + $0x10] sm:$0xe] }
 0x14b   : > { %6537 = vmatmul.msk.bf16.gmra.mxu2 %vm486_vm1, %v779_v3  ;;  %6721 = vmatmul.msk.bf16.gmra.mxu0 %vm486_vm1, %v1453_v19  ;;  %v8563_v27 = vadd.f32 %v1554_v0, %v1214_v29  ;;  %v1460_v34 = vrot.slane %v1458_v43, 1  ;;  %v1676_v15 = vsel %vm752_vm2, %v1673_v48, %v1675_v11  ;;  %v2246_v29 = vrot.slane %v2244_v21, 1 }
 0x14c   : > { %6631 = vmatmul.msk.bf16.gmra.mxu3 %vm486_vm1, %v7706_v6  ;;  %v7945_v6 = vor.u32 %v7944_v23, %v7943_v20 }
 0x14d   : > { %6759 = vmatmul.msk.bf16.gmra.mxu1 %vm486_vm1, %v1674_v58  ;;  %v1461_v30 = vsel %vm345_vm0, %v1456_v10, %v1460_v34 }
 0x14e   : > { %v877_v33 = vpop.f32.mrf.mxu2 }
 0x14f   : > { %v935_v22 = vadd.f32 %v877_v33, %v8415_v36  ;;  %v1157_v39 = vpop.f32.mrf.mxu3  ;;  %v2543_v33 = vrot.slane %v7945_v6, 1 }
 0x150   : > { %v1559_v31 = vpop.f32.mrf.mxu0 }
 0x151   : > { %v1215_v35 = vadd.f32 %v1157_v39, %v935_v22  ;;  %v2247_v39 = vor.u32 %v2246_v29, %v2242_v32  ;;  %v7753_v32 = vld [vmem:[%s8119_s10 + $0x28] sm:$0xff] }
 0x153   : > { %v8571_v60 = vadd.f32 %v1557_v52, %v1215_v35 }
 0x156   : > { %v879_v36 = vpop.f32.mrf.mxu2 }
 0x157   : > { %v936_v62 = vadd.f32 %v879_v36, %v8430_v53  ;;  %v1159_v49 = vpop.f32.mrf.mxu3  ;;  %v7751_v53 = vld [vmem:[%s8119_s10 + $0x18] sm:$0xff]  ;;  %v7752_v36 = vld [vmem:[%s8119_s10 + $0x20] sm:$0xff] }
 0x158   : > { %v1562_v0 = vpop.f32.mrf.mxu0  ;;  %v2249_v58 = vshll.u32 %v7751_v53, 16  ;;  %v2544_v22 = vrot.slane %v7751_v53, 1  ;;  %v2546_v46 = vrot.slane %v7752_v36, 1 }
 0x159   : > { %v1216_v59 = vadd.f32 %v1159_v49, %v936_v62 }
 0x15a   : > { %v2545_v44 = vsel %vm752_vm2, %v2543_v33, %v2544_v22 }
 0x15b   : > { %6538 = vmatmul.msk.bf16.gmra.mxu2 %vm486_vm1, %v781_v61  ;;  %6722 = vmatmul.msk.bf16.gmra.mxu0 %vm486_vm1, %v1461_v30  ;;  %v8582_v54 = vadd.f32 %v1559_v31, %v1216_v59  ;;  %v2251_v31 = vrot.slane %v2249_v58, 1  ;;  %v2257_v30 = vshll.u32 %v7752_v36, 16  ;;  %v7797_v59 = vld [vmem:[%s10041_s3 + $0x60] sm:$0xff] }
 0x15c   : > { %6632 = vmatmul.msk.bf16.gmra.mxu3 %vm486_vm1, %v7707_v45  ;;  %v2253_v45 = vshrl.u32 %v7751_v53, 16  ;;  %3980 = vmatpush.bf16.msra.mxu1 %v7797_v59  ;;  %v2547_v53 = vsel %vm752_vm2, %v2544_v22, %v2546_v46  ;;  %v2261_v22 = vshrl.u32 %v7752_v36, 16  ;;  %v7796_v36 = vld [vmem:[%s10041_s3 + $0x58] sm:$0xff] }
 0x15d   : > { %6760 = vmatmul.msk.bf16.gmra.mxu1 %vm486_vm1, %v1676_v15  ;;  %v2252_v34 = vsel %vm345_vm0, %v2247_v39, %v2251_v31  ;;  %v2259_v20 = vrot.slane %v2257_v30, 1 }
 0x15e   : > { %v882_v41 = vpop.f32.mrf.mxu2  ;;  %v2255_v21 = vor.u32 %v2253_v45, %v2251_v31  ;;  %v2265_v31 = vshll.u32 %v7753_v32, 16 }
 0x15f   : > { %v937_v52 = vadd.f32 %v882_v41, %v8442_v13  ;;  %v1162_v48 = vpop.f32.mrf.mxu3  ;;  %v7733_v13 = vld [vmem:[%s8119_s10 + $0x10] sm:$0xff] }
 0x160   : > { %v1564_v3 = vpop.f32.mrf.mxu0  ;;  %v2260_v6 = vsel %vm345_vm0, %v2255_v21, %v2259_v20  ;;  %3981 = vmatpush.bf16.msra.mxu1 %v7796_v36  ;;  %v2269_v21 = vshrl.u32 %v7753_v32, 16  ;;  %v8652_v36 = vpop.f32.mrf.mxu1 }
 0x161   : > { %v1217_v19 = vadd.f32 %v1162_v48, %v937_v52  ;;  %v7734_v52 = vld [vmem:[%s8119_s10 + $0x18] sm:$0xff] }
 0x163   : > { %v8590_v16 = vadd.f32 %v1562_v0, %v1217_v19 }
 0x166   : > { %v884_v37 = vpop.f32.mrf.mxu2 }
 0x167   : > { %v938_v43 = vadd.f32 %v884_v37, %v8451_v25  ;;  %v1164_v35 = vpop.f32.mrf.mxu3 }
 0x168   : > { %v1567_v9 = vpop.f32.mrf.mxu0 }
 0x169   : > { %v1218_v10 = vadd.f32 %v1164_v35, %v938_v43  ;;  %v2548_v43 = vrot.slane %v7753_v32, 1  ;;  %v2263_v35 = vor.u32 %v2261_v22, %v2259_v20 }
 0x16b   : > { %6841 = vmatmul.msk.bf16.vlgmr.msra.gmra.mxu2 %vm486_vm1, %v7733_v13  ;;  %6969 = vmatmul.msk.bf16.vlgmr.msra.gmra.mxu0 %vm486_vm1, %v2545_v44  ;;  %v8598_v11 = vadd.f32 %v1564_v3, %v1218_v10  ;;  %v2267_v13 = vrot.slane %v2265_v31, 1 }
 0x16c   : > { %6931 = vmatmul.msk.bf16.vlgmr.msra.gmra.mxu3 %vm486_vm1, %v2252_v34  ;;  %v7735_v34 = vld [vmem:[%s8119_s10 + $0x20] sm:$0xff] }
 0x16e   : > { %v887_v62 = vpop.f32.mrf.mxu2 }
 0x16f   : > { %v939_v25 = vadd.f32 %v887_v62, %v8460_v51  ;;  %v1167_v49 = vpop.f32.mrf.mxu3 }
 0x170   : > { %v1569_v0 = vpop.f32.mrf.mxu0 }
 0x171   : > { %v1219_v61 = vadd.f32 %v1167_v49, %v939_v25  ;;  %v2549_v25 = vsel %vm752_vm2, %v2546_v46, %v2548_v43  ;;  %v2268_v49 = vsel %vm345_vm0, %v2263_v35, %v2267_v13 }
 0x173   : > { %v8606_v15 = vadd.f32 %v1567_v9, %v1219_v61 }
 0x176   : > { %v889_v23 = vpop.f32.mrf.mxu2 }
 0x177   : > { %v940_v41 = vadd.f32 %v889_v23, %v8469_v2  ;;  %v1169_v51 = vpop.f32.mrf.mxu3 }
 0x178   : > { %v1572_v48 = vpop.f32.mrf.mxu0 }
 0x179   : > { %v1220_v3 = vadd.f32 %v1169_v51, %v940_v41  ;;  %v2271_v51 = vor.u32 %v2269_v21, %v2267_v13 }
 0x17b   : > { %6842 = vmatmul.msk.bf16.gmra.mxu2 %vm486_vm1, %v7734_v52  ;;  %6970 = vmatmul.msk.bf16.gmra.mxu0 %vm486_vm1, %v2547_v53  ;;  %v8614_v19 = vadd.f32 %v1569_v0, %v1220_v3 }
 0x17c   : > { %6932 = vmatmul.msk.bf16.gmra.mxu3 %vm486_vm1, %v2260_v6  ;;  %v7736_v6 = vld [vmem:[%s8119_s10 + $0x28] sm:$0xff] }
 0x17e   : > { %v892_v29 = vpop.f32.mrf.mxu2 }
 0x17f   : > { %v941_v2 = vadd.f32 %v892_v29, %v8341_v47  ;;  %v1172_v58 = vpop.f32.mrf.mxu3 }
 0x180   : > { %v1574_v33 = vpop.f32.mrf.mxu0 }
 0x181   : > { %v1221_v39 = vadd.f32 %v1172_v58, %v941_v2 }
 0x183   : > { %v8619_v37 = vadd.f32 %v1572_v48, %v1221_v39 }
 0x186   : > { %v894_v9 = vpop.f32.mrf.mxu2 }
 0x187   : > { %v942_v44 = vadd.f32 %v894_v9, %v8352_v63  ;;  %v1174_v10 = vpop.f32.mrf.mxu3  ;;  %v7754_v63 = vld [vmem:[%s8119_s10 + $0x30] sm:$0xff] }
 0x188   : > { %v1577_v62 = vpop.f32.mrf.mxu0  ;;  %v2273_v20 = vshll.u32 %v7754_v63, 16  ;;  %v2550_v41 = vrot.slane %v7754_v63, 1 }
 0x189   : > { %v1222_v47 = vadd.f32 %v1174_v10, %v942_v44 }
 0x18a   : > { %v2275_v52 = vrot.slane %v2273_v20, 1  ;;  %v2551_v2 = vsel %vm752_vm2, %v2548_v43, %v2550_v41  ;;  %v2277_v43 = vshrl.u32 %v7754_v63, 16 }
 0x18b   : > { %6843 = vmatmul.msk.bf16.gmra.mxu2 %vm486_vm1, %v7735_v34  ;;  %6971 = vmatmul.msk.bf16.gmra.mxu0 %vm486_vm1, %v2549_v25  ;;  %v8630_v0 = vadd.f32 %v1574_v33, %v1222_v47  ;;  %v7755_v33 = vld [vmem:[%s8119_s10 + $0x38] sm:$0xff] }
 0x18c   : > { %6933 = vmatmul.msk.bf16.gmra.mxu3 %vm486_vm1, %v2268_v49  ;;  %v2276_v58 = vsel %vm345_vm0, %v2271_v51, %v2275_v52  ;;  %v2281_v13 = vshll.u32 %v7755_v33, 16  ;;  %v2552_v44 = vrot.slane %v7755_v33, 1  ;;  %v2279_v10 = vor.u32 %v2277_v43, %v2275_v52  ;;  %v7737_v49 = vld [vmem:[%s8119_s10 + $0x30] sm:$0xff] }
 0x18d   : > { %v2285_v52 = vshrl.u32 %v7755_v33, 16 }
 0x18e   : > { %v897_v61 = vpop.f32.mrf.mxu2  ;;  %v2283_v34 = vrot.slane %v2281_v13, 1  ;;  %v7757_v13 = vld [vmem:[%s8119_s10 + $0x48] sm:$0xff] }
 0x18f   : > { %v943_v45 = vadd.f32 %v897_v61, %v8368_v14  ;;  %v1177_v30 = vpop.f32.mrf.mxu3 }
 0x190   : > { %v1579_v59 = vpop.f32.mrf.mxu0  ;;  %v2284_v63 = vsel %vm345_vm0, %v2279_v10, %v2283_v34 }
 0x191   : > { %v1223_v46 = vadd.f32 %v1177_v30, %v943_v45  ;;  %v7795_v30 = vld [vmem:[%s10041_s3 + $0x50] sm:$0xff] }
 0x192   : > { %3982 = vmatpush.bf16.msra.mxu1 %v7795_v30 }
 0x193   : > { %v8635_v23 = vadd.f32 %v1577_v62, %v1223_v46 }
 0x196   : > { %v899_v48 = vpop.f32.mrf.mxu2 }
 0x197   : > { %v944_v53 = vadd.f32 %v899_v48, %v8373_v28  ;;  %v1179_v3 = vpop.f32.mrf.mxu3 }
 0x198   : > { %v1582_v29 = vpop.f32.mrf.mxu0 }
 0x199   : > { %v1224_v14 = vadd.f32 %v1179_v3, %v944_v53  ;;  %v8666_v53 = vpop.f32.mrf.mxu1 }
 0x19b   : > { %6844 = vmatmul.msk.bf16.gmra.mxu2 %vm486_vm1, %v7736_v6  ;;  %6972 = vmatmul.msk.bf16.gmra.mxu0 %vm486_vm1, %v2551_v2  ;;  %v8643_v32 = vadd.f32 %v1579_v59, %v1224_v14 }
 0x19c   : > { %6934 = vmatmul.msk.bf16.gmra.mxu3 %vm486_vm1, %v2276_v58 }
 0x19e   : > { %v902_v39 = vpop.f32.mrf.mxu2 }
 0x19f   : > { %v945_v28 = vadd.f32 %v902_v39, %v8386_v40  ;;  %v1182_v22 = vpop.f32.mrf.mxu3  ;;  %v2553_v40 = vsel %vm752_vm2, %v2550_v41, %v2552_v44 }
 0x1a0   : > { %v1584_v31 = vpop.f32.mrf.mxu0 }
 0x1a1   : > { %v1225_v35 = vadd.f32 %v1182_v22, %v945_v28  ;;  %v7738_v28 = vld [vmem:[%s8119_s10 + $0x38] sm:$0xff]  ;;  %v8678_v43 = vpop.f32.mrf.mxu1 }
 0x1a3   : > { %v8648_v9 = vadd.f32 %v1582_v29, %v1225_v35  ;;  %v2287_v29 = vor.u32 %v2285_v52, %v2283_v34 }
 0x1a6   : > { %v904_v62 = vpop.f32.mrf.mxu2 }
 0x1a7   : > { %v946_v25 = vadd.f32 %v904_v62, %v8391_v57  ;;  %v1184_v47 = vpop.f32.mrf.mxu3  ;;  %v7756_v57 = vld [vmem:[%s8119_s10 + $0x40] sm:$0xff] }
 0x1a8   : > { %v1587_v61 = vpop.f32.mrf.mxu0  ;;  %v2289_v48 = vshll.u32 %v7756_v57, 16  ;;  %v2554_v6 = vrot.slane %v7756_v57, 1 }
 0x1a9   : > { %v1226_v45 = vadd.f32 %v1184_v47, %v946_v25  ;;  %v2293_v25 = vshrl.u32 %v7756_v57, 16  ;;  %v2297_v47 = vshll.u32 %v7757_v13, 16  ;;  %v8688_v30 = vpop.f32.mrf.mxu1 }
 0x1aa   : > { %v2291_v2 = vrot.slane %v2289_v48, 1 }
 0x1ab   : > { %6845 = vmatmul.msk.bf16.gmra.mxu2 %vm486_vm1, %v7737_v49  ;;  %6973 = vmatmul.msk.bf16.gmra.mxu0 %vm486_vm1, %v2553_v40  ;;  %v8661_v59 = vadd.f32 %v1584_v31, %v1226_v45  ;;  %v7794_v49 = vld [vmem:[%s10041_s3 + $0x48] sm:$0xff]  ;;  %v2556_v40 = vrot.slane %v7757_v13, 1 }
 0x1ac   : > { %6935 = vmatmul.msk.bf16.gmra.mxu3 %vm486_vm1, %v2284_v63  ;;  %v2292_v33 = vsel %vm345_vm0, %v2287_v29, %v2291_v2  ;;  %3983 = vmatpush.bf16.msra.mxu1 %v7794_v49  ;;  %v2295_v45 = vor.u32 %v2293_v25, %v2291_v2  ;;  %v2299_v63 = vrot.slane %v2297_v47, 1  ;;  %v7758_v29 = vld [vmem:[%s8119_s10 + $0x50] sm:$0xff]  ;;  %v8056_v47 = vmov 0  }
 0x1ad   : > { %3284 = vst [vmem:[#allocation2 + $0x8] sm:$0xf] %v8056_v47 }
 0x1ae   : > { %v907_v46 = vpop.f32.mrf.mxu2  ;;  %v2300_v52 = vsel %vm345_vm0, %v2295_v45, %v2299_v63  ;;  %3282 = vst [vmem:[#allocation2] sm:$0xf] %v8056_v47 }
 0x1af   : > { %v947_v21 = vadd.f32 %v907_v46, %v8404_v5  ;;  %v1187_v20 = vpop.f32.mrf.mxu3  ;;  %v2555_v5 = vsel %vm752_vm2, %v2552_v44, %v2554_v6  ;;  %3283 = vst [vmem:[#allocation2 + $0x4] sm:$0xf] %v8056_v47 }
 0x1b0   : > { %v1589_v41 = vpop.f32.mrf.mxu0  ;;  %3285 = vst [vmem:[#allocation2 + $0xc] sm:$0xf] %v8056_v47 }
 0x1b1   : > { %v1227_v51 = vadd.f32 %v1187_v20, %v947_v21  ;;  %v7739_v20 = vld [vmem:[%s8119_s10 + $0x40] sm:$0xff]  ;;  %3286 = vst [vmem:[#allocation2 + $0x10] sm:$0xf] %v8056_v47 }
 0x1b2   : > { %3287 = vst [vmem:[#allocation2 + $0x14] sm:$0xf] %v8056_v47 }
 0x1b3   : > { %v8668_v3 = vadd.f32 %v1587_v61, %v1227_v51  ;;  %3288 = vst [vmem:[#allocation2 + $0x18] sm:$0xf] %v8056_v47 }
 0x1b4   : > { %3289 = vst [vmem:[#allocation2 + $0x1c] sm:$0xf] %v8056_v47 }
 0x1b5   : > { %3290 = vst [vmem:[#allocation2 + $0x20] sm:$0xf] %v8056_v47 }
 0x1b6   : > { %v909_v14 = vpop.f32.mrf.mxu2  ;;  %3291 = vst [vmem:[#allocation2 + $0x24] sm:$0xf] %v8056_v47 }
 0x1b7   : > { %v948_v58 = vadd.f32 %v909_v14, %v8409_v7  ;;  %v1189_v39 = vpop.f32.mrf.mxu3  ;;  %3292 = vst [vmem:[#allocation2 + $0x28] sm:$0xf] %v8056_v47 }
 0x1b8   : > { %v1592_v22 = vpop.f32.mrf.mxu0  ;;  %3293 = vst [vmem:[#allocation2 + $0x2c] sm:$0xf] %v8056_v47 }
 0x1b9   : > { %v1228_v31 = vadd.f32 %v1189_v39, %v948_v58  ;;  %v8701_v58 = vpop.f32.mrf.mxu1  ;;  %3294 = vst [vmem:[#allocation2 + $0x30] sm:$0xf] %v8056_v47 }
 0x1ba   : > { %3295 = vst [vmem:[#allocation2 + $0x34] sm:$0xf] %v8056_v47 }
 0x1bb   : > { %6846 = vmatmul.msk.bf16.gmra.mxu2 %vm486_vm1, %v7738_v28  ;;  %6974 = vmatmul.msk.bf16.gmra.mxu0 %vm486_vm1, %v2555_v5  ;;  %v8676_v35 = vadd.f32 %v1589_v41, %v1228_v31  ;;  %v2557_v41 = vsel %vm752_vm2, %v2554_v6, %v2556_v40  ;;  %v2301_v28 = vshrl.u32 %v7757_v13, 16  ;;  %v2558_v31 = vrot.slane %v7758_v29, 1  ;;  %3296 = vst [vmem:[#allocation2 + $0x38] sm:$0xf] %v8056_v47 }
 0x1bc   : > { %6936 = vmatmul.msk.bf16.gmra.mxu3 %vm486_vm1, %v2292_v33  ;;  %3297 = vst [vmem:[#allocation2 + $0x3c] sm:$0xf] %v8056_v47 }
 0x1bd   : > { %v2303_v33 = vor.u32 %v2301_v28, %v2299_v63  ;;  %3298 = vst [vmem:[#allocation2 + $0x40] sm:$0xf] %v8056_v47 }
 0x1be   : > { %v912_v7 = vpop.f32.mrf.mxu2  ;;  %3299 = vst [vmem:[#allocation2 + $0x44] sm:$0xf] %v8056_v47 }
 0x1bf   : > { %v949_v10 = vadd.f32 %v912_v7, %v8428_v42  ;;  %v1192_v34 = vpop.f32.mrf.mxu3  ;;  %3300 = vst [vmem:[#allocation2 + $0x48] sm:$0xf] %v8056_v47 }
 0x1c0   : > { %v1594_v44 = vpop.f32.mrf.mxu0  ;;  %3301 = vst [vmem:[#allocation2 + $0x4c] sm:$0xf] %v8056_v47 }
 0x1c1   : > { %v1229_v62 = vadd.f32 %v1192_v34, %v949_v10  ;;  %v8711_v45 = vpop.f32.mrf.mxu1  ;;  %3302 = vst [vmem:[#allocation2 + $0x50] sm:$0xf] %v8056_v47 }
 0x1c2   : > { %3303 = vst [vmem:[#allocation2 + $0x54] sm:$0xf] %v8056_v47 }
 0x1c3   : > { %v8686_v61 = vadd.f32 %v1592_v22, %v1229_v62  ;;  %v2305_v22 = vshll.u32 %v7758_v29, 16  ;;  %v7740_v62 = vld [vmem:[%s8119_s10 + $0x48] sm:$0xff]  ;;  %3304 = vst [vmem:[#allocation2 + $0x58] sm:$0xf] %v8056_v47 }
 0x1c4   : > { %3305 = vst [vmem:[#allocation2 + $0x5c] sm:$0xf] %v8056_v47 }
 0x1c5   : > { %v2307_v7 = vrot.slane %v2305_v22, 1  ;;  %3306 = vst [vmem:[#allocation2 + $0x60] sm:$0xf] %v8056_v47 }
 0x1c6   : > { %v914_v42 = vpop.f32.mrf.mxu2  ;;  %3307 = vst [vmem:[#allocation2 + $0x64] sm:$0xf] %v8056_v47 }
 0x1c7   : > { %v950_v46 = vadd.f32 %v914_v42, %v8436_v1  ;;  %v1194_v21 = vpop.f32.mrf.mxu3  ;;  %v2308_v13 = vsel %vm345_vm0, %v2303_v33, %v2307_v7  ;;  %3308 = vst [vmem:[#allocation2 + $0x68] sm:$0xf] %v8056_v47 }
 0x1c8   : > { %v1597_v57 = vpop.f32.mrf.mxu0  ;;  %3309 = vst [vmem:[#allocation2 + $0x6c] sm:$0xf] %v8056_v47 }
 0x1c9   : > { %v1230_v51 = vadd.f32 %v1194_v21, %v950_v46  ;;  %3310 = vst [vmem:[#allocation2 + $0x70] sm:$0xf] %v8056_v47 }
 0x1ca   : > { %3311 = vst [vmem:[#allocation2 + $0x74] sm:$0xf] %v8056_v47 }
 0x1cb   : > { %6847 = vmatmul.msk.bf16.gmra.mxu2 %vm486_vm1, %v7739_v20  ;;  %6975 = vmatmul.msk.bf16.gmra.mxu0 %vm486_vm1, %v2557_v41  ;;  %v8696_v48 = vadd.f32 %v1594_v44, %v1230_v51  ;;  %3312 = vst [vmem:[#allocation2 + $0x78] sm:$0xf] %v8056_v47 }
 0x1cc   : > { %6937 = vmatmul.msk.bf16.gmra.mxu3 %vm486_vm1, %v2300_v52  ;;  %v8734_v52 = vpop.f32.mrf.mxu1  ;;  %3313 = vst [vmem:[#allocation2 + $0x7c] sm:$0xf] %v8056_v47 }
 0x1cd   : > { %3314 = vst [vmem:[#allocation2 + $0x80] sm:$0xf] %v8056_v47  ;;  %v3629_v47 = vld [vmem:[#allocation2 + $0x8] sm:$0xf] }
 0x1ce   : > { %v917_v2 = vpop.f32.mrf.mxu2 }
 0x1cf   : > { %v951_v1 = vadd.f32 %v917_v2, %v8449_v17  ;;  %v1197_v14 = vpop.f32.mrf.mxu3  ;;  %v2559_v17 = vsel %vm752_vm2, %v2556_v40, %v2558_v31  ;;  %v8722_v40 = vld [vmem:[%s8119_s10 + $0x58] sm:$0xff] }
 0x1d0   : > { %v1599_v6 = vpop.f32.mrf.mxu0  ;;  %v2313_v41 = vshll.u32 %v8722_v40, 16 }
 0x1d1   : > { %v1231_v39 = vadd.f32 %v1197_v14, %v951_v1 }
 0x1d2   : > { %v2315_v1 = vrot.slane %v2313_v41, 1 }
 0x1d3   : > { %v8703_v5 = vadd.f32 %v1597_v57, %v1231_v39  ;;  %v2309_v57 = vshrl.u32 %v7758_v29, 16  ;;  %v7741_v39 = vld [vmem:[%s8119_s10 + $0x50] sm:$0xff] }
 0x1d5   : > { %v2311_v2 = vor.u32 %v2309_v57, %v2307_v7 }
 0x1d6   : > { %v919_v10 = vpop.f32.mrf.mxu2 }
 0x1d7   : > { %v952_v34 = vadd.f32 %v919_v10, %v8454_v38  ;;  %v1199_v44 = vpop.f32.mrf.mxu3  ;;  %v2316_v7 = vsel %vm345_vm0, %v2311_v2, %v2315_v1  ;;  %v8761_v10 = vpop.f32.mrf.mxu1 }
 0x1d8   : > { %v1602_v25 = vpop.f32.mrf.mxu0 }
 0x1d9   : > { %v1232_v49 = vadd.f32 %v1199_v44, %v952_v34  ;;  %v2805_v44 = vlaneseq }
 0x1db   : > { %6848 = vmatmul.msk.bf16.gmra.mxu2 %vm486_vm1, %v7740_v62  ;;  %6976 = vmatmul.msk.bf16.gmra.mxu0 %vm486_vm1, %v2559_v17  ;;  %v8716_v38 = vadd.f32 %v1599_v6, %v1232_v49 }
 0x1dc   : > { %6938 = vmatmul.msk.bf16.gmra.mxu3 %vm486_vm1, %v2308_v13  ;;  %v8770_v13 = vld [vmem:[%s10040_s2] ss:$0 sm:$0xff] }
 0x1de   : > { %v922_v63 = vpop.f32.mrf.mxu2 }
 0x1df   : > { %v953_v42 = vadd.f32 %v922_v63, %v8467_v55  ;;  %v1202_v46 = vpop.f32.mrf.mxu3  ;;  %v2560_v55 = vrot.slane %v8722_v40, 1  ;;  %v2317_v63 = vshrl.u32 %v8722_v40, 16 }
 0x1e0   : > { %v1604_v21 = vpop.f32.mrf.mxu0 }
 0x1e1   : > { %v1233_v20 = vadd.f32 %v1202_v46, %v953_v42  ;;  %v2561_v22 = vsel %vm752_vm2, %v2558_v31, %v2560_v55  ;;  %v8759_v31 = vld [vmem:[%s8119_s10 + $0x60] sm:$0xff]  ;;  %v2319_v41 = vor.u32 %v2317_v63, %v2315_v1 }
 0x1e2   : > { %v2321_v42 = vshll.u32 %v8759_v31, 16  ;;  %v7793_v46 = vld [vmem:[%s10041_s3 + $0x40] sm:$0xff] }
 0x1e3   : > { %v8731_v51 = vadd.f32 %v1602_v25, %v1233_v20  ;;  %v2562_v20 = vrot.slane %v8759_v31, 1  ;;  %3984 = vmatpush.bf16.msra.mxu1 %v7793_v46 }
 0x1e4   : > { %v2323_v2 = vrot.slane %v2321_v42, 1  ;;  %v8806_v42 = vld [vmem:[%s8119_s10 + $0x68] sm:$0xff] }
 0x1e5   : > { %10046 = vst [vmem:[#allocation3_spill] sm:$0xff] %v8731_v51  ;;  %v2563_v1 = vsel %vm752_vm2, %v2560_v55, %v2562_v20 }
 0x1e6   : > { %v924_v29 = vpop.f32.mrf.mxu2 }
 0x1e7   : > { %v954_v14 = vadd.f32 %v924_v29, %v8472_v18  ;;  %v1204_v6 = vpop.f32.mrf.mxu3 }
 0x1e8   : > { %v2647_v28 = vpop.f32.mrf.mxu0 }
 0x1e9   : > { %v1234_v33 = vadd.f32 %v1204_v6, %v954_v14 }
 0x1eb   : > { %6849 = vmatmul.msk.bf16.gmra.mxu2 %vm486_vm1, %v7741_v39  ;;  %6977 = vmatmul.msk.bf16.gmra.mxu0 %vm486_vm1, %v2561_v22  ;;  %v8752_v18 = vadd.f32 %v1604_v21, %v1234_v33  ;;  %v7742_v22 = vld [vmem:[%s8119_s10 + $0x58] sm:$0xff]  ;;  %v8791_v33 = vpop.f32.mrf.mxu1 }
 0x1ec   : > { %6939 = vmatmul.msk.bf16.gmra.mxu3 %vm486_vm1, %v2316_v7 }
 0x1ed   : > { %10047 = vst [vmem:[#allocation4_spill] sm:$0xff] %v8752_v18 }
 0x1ee   : > { %v2032_v34 = vpop.f32.mrf.mxu2 }
 0x1ef   : > { %v2102_v62 = vadd.f32 %v2032_v34, %v8491_v56  ;;  %v2432_v25 = vpop.f32.mrf.mxu3  ;;  %v8776_v56 = vshrl.u32 %v2805_v44, 7 }
 0x1f0   : > { %v2649_v17 = vpop.f32.mrf.mxu0 }
 0x1f1   : > { %v2502_v49 = vadd.f32 %v2432_v25, %v2102_v62  ;;  %v2807_v14 = vadd.s32 8, %v8776_v56 }
 0x1f3   : > { %v2717_v21 = vadd.f32 %v2647_v28, %v2502_v49  ;;  %v2845_v62 = vand.u32 15, %v2807_v14  ;;  %v2325_v14 = vshrl.u32 %v8759_v31, 16  ;;  %v7830_v31 = vld [vmem:[%s10041_s3 + $0xf8] sm:$0xff] }
 0x1f4   : > { %4593 = vmatpush.bf16.msrb.mxu0 %v7830_v31 }
 0x1f5   : > { %v2749_v57 = vadd.f32 %v8770_v13, %v2717_v21  ;;  %vm3171_vm6 = vcmp.lt.s32.totalorder %v2845_v62, 14 }
 0x1f6   : > { %v2034_v29 = vpop.f32.mrf.mxu2 }
 0x1f7   : > { %v2777_v6 = vmax.f32 %v2749_v57, 0.0  ;;  %v2103_v39 = vadd.f32 %v2034_v29, %v8510_v24  ;;  %v2434_v28 = vpop.f32.mrf.mxu3  ;;  %v2324_v24 = vsel %vm345_vm0, %v2319_v41, %v2323_v2 }
 0x1f8   : > { %v2652_v7 = vpop.f32.mrf.mxu0 }
 0x1f9   : > { %v3315_v34 = vpack.c.bf16 %v2777_v6, %v2777_v6  ;;  %v2503_v44 = vadd.f32 %v2434_v28, %v2103_v39 }
 0x1fb   : > { %v3347_v25 = vshrl.u32 %v3315_v34, 16  ;;  %v2718_v49 = vadd.f32 %v2649_v17, %v2503_v44  ;;  %6850 = vmatmul.msk.bf16.gmra.mxu2 %vm486_vm1, %v7742_v22  ;;  %6978 = vmatmul.msk.bf16.gmra.mxu0 %vm486_vm1, %v2563_v1  ;;  %v3350_v55 = vshll.u32 %v3315_v34, 16  ;;  %v2329_v22 = vshll.u32 %v8806_v42, 16  ;;  %v8811_v1 = vpop.f32.mrf.mxu1  ;;  %v7792_v44 = vld [vmem:[%s10041_s3 + $0x38] sm:$0xff] }
 0x1fc   : > { %6940 = vmatmul.msk.bf16.gmra.mxu3 %vm486_vm1, %v2324_v24  ;;  %4118 = vmatpush.bf16.msrb.mxu2 %v7792_v44 }
 0x1fd   : > { %v3349_v40 = vrot.slane %v3347_v25, 7  ;;  %v2750_v63 = vadd.f32 %v8770_v13, %v2718_v49  ;;  %v10044_v25 = vrot.slane %v8806_v42, 1 }
 0x1fe   : > { %v2037_v46 = vpop.f32.mrf.mxu2 }
 0x1ff   : > { %v3352_v21 = vor.u32 %v3350_v55, %v3349_v40  ;;  %v2778_v57 = vmax.f32 %v2750_v63, 0.0  ;;  %v2104_v17 = vadd.f32 %v2037_v46, %v8518_v50  ;;  %v2437_v41 = vpop.f32.mrf.mxu3  ;;  %v7808_v50 = vld [vmem:[%s10041_s3 + $0xb8] sm:$0xff]  ;;  %v2327_v55 = vor.u32 %v2325_v14, %v2323_v2 }
 0x200   : > { %v2654_v29 = vpop.f32.mrf.mxu0  ;;  %4309 = vmatpush.bf16.msrb.mxu3 %v7808_v50  ;;  %v8821_v63 = vrot.slane %v2329_v22, 1  ;;  %v2565_v14 = vsel %vm752_vm2, %v2562_v20, %v10044_v25  ;;  %v7851_v20 = vld [vmem:[%s10041_s3 + $0x138] sm:$0xff] }
 0x201   : > { %v3630_v6 = vsel %vm3628_vm5, %v3352_v21, %v3629_v47  ;;  %v3255_v39 = vsel %vm3171_vm6, %v2778_v57, 0.0  ;;  %v2504_v28 = vadd.f32 %v2437_v41, %v2104_v17  ;;  %v2809_v57 = vadd.s32 24, %v8776_v56  ;;  %4997 = vmatpush.bf16.msrb.mxu1 %v7851_v20 }
 0x202   : > { %3631 = vst [vmem:[#allocation2 + $0x8] sm:$0xf] %v3630_v6  ;;  %v3316_v34 = vpack.c.bf16 %v3255_v39, %v3255_v39  ;;  %v7743_v39 = vld [vmem:[%s8119_s10 + $0x60] sm:$0xff]  ;;  %v2332_v50 = vsel %vm345_vm0, %v2327_v55, %v8821_v63 }
 0x203   : > { %v2719_v24 = vadd.f32 %v2652_v7, %v2504_v28  ;;  %v3353_v28 = vrot.slane %v3349_v40, 4  ;;  %v8850_v55 = vpop.f32.mrf.mxu1 }
 0x204   : > { %v3355_v62 = vshrl.u32 %v3316_v34, 16  ;;  %v3358_v46 = vshll.u32 %v3316_v34, 16 }
 0x205   : > { %v2751_v49 = vadd.f32 %v8770_v13, %v2719_v24  ;;  %v8838_v24 = vld [vmem:[#allocation2] sm:$0xff]  }
 0x206   : > { %v3357_v47 = vrot.slane %v3355_v62, 7  ;;  %v2039_v21 = vpop.f32.mrf.mxu2  ;;  %v2859_v62 = vand.u32 15, %v2809_v57 }
 0x207   : > { %v2779_v17 = vmax.f32 %v2751_v49, 0.0  ;;  %v2105_v41 = vadd.f32 %v2039_v21, %v8530_v12  ;;  %v2439_v6 = vpop.f32.mrf.mxu3 }
 0x208   : > { %v3360_v44 = vor.u32 %v3358_v46, %v3357_v47  ;;  %v2657_v2 = vpop.f32.mrf.mxu0  ;;  %v3802_v46 = vshll.u32 %v8838_v24, 16  ;;  %vm3173_vm10 = vcmp.lt.s32.totalorder %v2859_v62, 14  ;;  %v2333_v62 = vshrl.u32 %v8806_v42, 16 }
 0x209   : > { %v3317_v22 = vpack.c.bf16 %v2779_v17, %v2779_v17  ;;  %v2505_v34 = vadd.f32 %v2439_v6, %v2105_v41  ;;  %v8860_v41 = vld [vmem:[%s8119_s10 + $0x70] sm:$0xff] }
 0x20a   : > { %v3361_v12 = vsel %vm8825_vm9, %v3353_v28, %v3360_v44  ;;  %v2337_v20 = vshll.u32 %v8860_v41, 16 }
 0x20b   : > { %3632 = vst [vmem:[#allocation2 + $0xc] sm:$0xf] %v3361_v12  ;;  %v3364_v40 = vshrl.u32 %v3317_v22, 16  ;;  %v2720_v49 = vadd.f32 %v2654_v29, %v2505_v34  ;;  %6851 = vmatmul.msk.bf16.gmra.mxu2 %vm486_vm1, %v7743_v39  ;;  %6979 = vmatmul.msk.bf16.gmra.mxu0 %vm486_vm1, %v2565_v14  ;;  %v1826_v29 = vadd.f32 %v8652_v36, %v8533_v8  ;;  %v3367_v57 = vshll.u32 %v3317_v22, 16  ;;  %v7791_v8 = vld [vmem:[%s10041_s3 + $0x30] sm:$0xff] }
 0x20c   : > { %6941 = vmatmul.msk.bf16.gmra.mxu3 %vm486_vm1, %v2332_v50  ;;  %v3362_v39 = vrot.slane %v3357_v47, 4  ;;  %v7807_v36 = vld [vmem:[%s10041_s3 + $0xb0] sm:$0xff]  ;;  %v3800_v47 = vshrl.u32 %v8838_v24, 16  ;;  %v3804_v12 = vrot.slane %v3802_v46, 1  ;;  %4119 = vmatpush.bf16.msrb.mxu2 %v7791_v8  ;;  %v7790_v46 = vld [vmem:[%s10041_s3 + $0x28] sm:$0xff] }
 0x20d   : > { %v8856_v21 = vrot.slane %v3364_v40, 7  ;;  %v2752_v17 = vadd.f32 %v8770_v13, %v2720_v49  ;;  %v7829_v22 = vld [vmem:[%s10041_s3 + $0xf0] sm:$0xff]  ;;  %4310 = vmatpush.bf16.msrb.mxu3 %v7807_v36  ;;  %v2335_v36 = vor.u32 %v2333_v62, %v8821_v63  ;;  %v7789_v63 = vld [vmem:[%s10041_s3 + $0x20] sm:$0xff] }
 0x20e   : > { %v2042_v6 = vpop.f32.mrf.mxu2  ;;  %4594 = vmatpush.bf16.msrb.mxu0 %v7829_v22  ;;  %v8894_v22 = vrot.slane %v2337_v20, 1  ;;  %v7805_v62 = vld [vmem:[%s10041_s3 + $0xa0] sm:$0xff] }
 0x20f   : > { %v3369_v28 = vor.u32 %v3367_v57, %v8856_v21  ;;  %v2780_v44 = vmax.f32 %v2752_v17, 0.0  ;;  %v2106_v14 = vadd.f32 %v2042_v6, %v1826_v29  ;;  %v2442_v34 = vpop.f32.mrf.mxu3  ;;  %v7806_v6 = vld [vmem:[%s10041_s3 + $0xa8] sm:$0xff]  ;;  %v7827_v20 = vld [vmem:[%s10041_s3 + $0xe0] sm:$0xff] }
 0x210   : > { %v2659_v50 = vpop.f32.mrf.mxu0  ;;  %4120 = vmatpush.bf16.msrb.mxu2 %v7790_v46  ;;  %v2340_v18 = vsel %vm345_vm0, %v2335_v36, %v8894_v22  ;;  %v7804_v36 = vld [vmem:[%s10041_s3 + $0x98] sm:$0xff] }
 0x211   : > { %v3370_v40 = vsel %vm8825_vm9, %v3362_v39, %v3369_v28  ;;  %v3257_v49 = vsel %vm3173_vm10, %v2780_v44, 0.0  ;;  %v2506_v31 = vadd.f32 %v2442_v34, %v2106_v14  ;;  %v7828_v39 = vld [vmem:[%s10041_s3 + $0xe8] sm:$0xff]  ;;  %v3805_v44 = vor.u32 %v3804_v12, %v3800_v47  ;;  %4311 = vmatpush.bf16.msrb.mxu3 %v7806_v6 }
 0x212   : > { %3633 = vst [vmem:[#allocation2 + $0x10] sm:$0xf] %v3370_v40  ;;  %v3318_v29 = vpack.c.bf16 %v3257_v49, %v3257_v49  ;;  %v8877_v57 = vld [vmem:[#allocation2 + $0x8] sm:$0xff]  ;;  %v8896_v40 = vpop.f32.mrf.mxu1  ;;  %v2811_v12 = vadd.s32 40, %v8776_v56  ;;  %4595 = vmatpush.bf16.msrb.mxu0 %v7828_v39 }
 0x213   : > { %v2721_v17 = vadd.f32 %v2657_v2, %v2506_v31  ;;  %v3807_v14 = vshll.u32 %v8877_v57, 16  ;;  %v1827_v2 = vadd.f32 %v8666_v53, %v8546_v26  ;;  %v7744_v34 = vld [vmem:[%s8119_s10 + $0x68] sm:$0xff] }
 0x214   : > { %v3373_v28 = vshrl.u32 %v3318_v29, 16  ;;  %v3376_v31 = vshll.u32 %v3318_v29, 16  ;;  %v3371_v29 = vrot.slane %v8856_v21, 4  ;;  %4121 = vmatpush.bf16.msrb.mxu2 %v7789_v63  ;;  %v3811_v63 = vshrl.u32 %v8877_v57, 16 }
 0x215   : > { %v2753_v8 = vadd.f32 %v8770_v13, %v2721_v17  ;;  %v8899_v25 = vrot.slane %v3807_v14, 1  ;;  %v10051_v14 = vrot.slane %v8806_v42, 1  ;;  %4312 = vmatpush.bf16.msrb.mxu3 %v7805_v62  ;;  %v7788_v42 = vld [vmem:[%s10041_s3 + $0x18] sm:$0xff] }
 0x216   : > { %v3375_v49 = vrot.slane %v3373_v28, 7  ;;  %v2044_v47 = vpop.f32.mrf.mxu2  ;;  %v10050_v28 = vrot.slane %v8860_v41, 1  ;;  %4596 = vmatpush.bf16.msrb.mxu0 %v7827_v20 }
 0x217   : > { %v2781_v26 = vmax.f32 %v2753_v8, 0.0  ;;  %v2107_v53 = vadd.f32 %v2044_v47, %v1827_v2  ;;  %v2444_v17 = vpop.f32.mrf.mxu3  ;;  %v3810_v39 = vsel %vm345_vm0, %v3805_v44, %v8899_v25 }
 0x218   : > { %v3378_v46 = vor.u32 %v3376_v31, %v3375_v49  ;;  %v2662_v6 = vpop.f32.mrf.mxu0  ;;  %v2567_v2 = vsel %vm752_vm2, %v10051_v14, %v10050_v28  ;;  %3985 = vmatmul.bf16.vlgmr.msra.gmra.mxu1 %v3810_v39  ;;  %v2873_v31 = vand.u32 15, %v2811_v12  ;;  %v7826_v12 = vld [vmem:[%s10041_s3 + $0xd8] sm:$0xff]  ;;  %4122 = vmatpush.bf16.msrb.mxu2 %v7788_v42  ;;  %v3380_v62 = vrot.slane %v3375_v49, 4  ;;  %v7825_v39 = vld [vmem:[%s10041_s3 + $0xd0] sm:$0xff] }
 0x219   : > { %v3319_v8 = vpack.c.bf16 %v2781_v26, %v2781_v26  ;;  %v2507_v47 = vadd.f32 %v2444_v17, %v2107_v53  ;;  %v8941_v17 = vld [vmem:[%s8119_s10 + $0x78] sm:$0xff]  ;;  %4313 = vmatpush.bf16.msrb.mxu3 %v7804_v36  ;;  %v2341_v14 = vshrl.u32 %v8860_v41, 16  ;;  %v1829_v42 = vadd.f32 %v8688_v30, %v8563_v27 }
 0x21a   : > { %v3379_v21 = vsel %vm8825_vm9, %v3371_v29, %v3378_v46  ;;  %vm8943_vm11 = vcmp.lt.s32.totalorder %v2873_v31, 14  ;;  %4597 = vmatpush.bf16.msrb.mxu0 %v7826_v12  ;;  %v7803_v46 = vld [vmem:[%s10041_s3 + $0x90] sm:$0xff]  ;;  %v8957_v28 = vpop.f32.mrf.mxu1  ;;  %v7786_v12 = vld [vmem:[%s10041_s3 + $0x8] sm:$0xff]  ;;  %v2568_v30 = vrot.slane %v8941_v17, 1 }
 0x21b   : > { %3634 = vst [vmem:[#allocation2 + $0x14] sm:$0xf] %v3379_v21  ;;  %v3382_v44 = vshrl.u32 %v3319_v8, 16  ;;  %v2722_v51 = vadd.f32 %v2659_v50, %v2507_v47  ;;  %6852 = vmatmul.msk.bf16.gmra.mxu2 %vm486_vm1, %v7744_v34  ;;  %6980 = vmatmul.msk.bf16.gmra.mxu0 %vm486_vm1, %v2567_v2  ;;  %v1828_v50 = vadd.f32 %v8678_v43, %v8552_v4  ;;  %v3385_v26 = vshll.u32 %v3319_v8, 16 }
 0x21c   : > { %6942 = vmatmul.msk.bf16.gmra.mxu3 %vm486_vm1, %v2340_v18  ;;  %v2345_v21 = vshll.u32 %v8941_v17, 16 }
 0x21d   : > { %v8937_v34 = vrot.slane %v3382_v44, 7  ;;  %v2754_v53 = vadd.f32 %v8770_v13, %v2722_v51  ;;  %v7787_v51 = vld [vmem:[%s10041_s3 + $0x10] sm:$0xff]  ;;  %4314 = vmatpush.bf16.msrb.mxu3 %v7803_v46 }
 0x21e   : > { %v2047_v18 = vpop.f32.mrf.mxu2  ;;  %4123 = vmatpush.bf16.msrb.mxu2 %v7787_v51  ;;  %4598 = vmatpush.bf16.msrb.mxu0 %v7825_v39  ;;  %v3813_v51 = vor.u32 %v3811_v63, %v8899_v25  ;;  %v7745_v39 = vld [vmem:[%s8119_s10 + $0x70] sm:$0xff]  ;;  %v7823_v25 = vld [vmem:[%s10041_s3 + $0xc0] sm:$0xff] }
 0x21f   : > { %v3387_v20 = vor.u32 %v3385_v26, %v8937_v34  ;;  %v2782_v29 = vmax.f32 %v2754_v53, 0.0  ;;  %v2108_v4 = vadd.f32 %v2047_v18, %v1828_v50  ;;  %v2447_v43 = vpop.f32.mrf.mxu3  ;;  %v7802_v50 = vld [vmem:[%s10041_s3 + $0x88] sm:$0xff]  ;;  %v2813_v18 = vadd.s32 56, %v8776_v56 }
 0x220   : > { %v2664_v49 = vpop.f32.mrf.mxu0  ;;  %v7824_v26 = vld [vmem:[%s10041_s3 + $0xc8] sm:$0xff] }
 0x221   : > { %v3388_v2 = vsel %vm8825_vm9, %v3380_v62, %v3387_v20  ;;  %v3259_v8 = vsel %vm8943_vm11, %v2782_v29, 0.0  ;;  %v2508_v47 = vadd.f32 %v2447_v43, %v2108_v4  ;;  %v2343_v62 = vor.u32 %v2341_v14, %v8894_v22  ;;  %4315 = vmatpush.bf16.msrb.mxu3 %v7802_v50  ;;  %v7785_v22 = vld [vmem:[%s10041_s3] sm:$0xff] }
 0x222   : > { %3635 = vst [vmem:[#allocation2 + $0x18] sm:$0xf] %v3388_v2  ;;  %v3320_v31 = vpack.c.bf16 %v3259_v8, %v3259_v8  ;;  %v8965_v44 = vld [vmem:[#allocation2 + $0x10] sm:$0xff]  ;;  %v8984_v20 = vrot.slane %v2345_v21, 1  ;;  %4124 = vmatpush.bf16.msrb.mxu2 %v7786_v12  ;;  %v2158_v2 = vld [vmem:[%s8119_s10 + $0x80] sm:$0x1]  ;;  %4599 = vmatpush.bf16.msrb.mxu0 %v7824_v26 }
 0x223   : > { %v2723_v36 = vadd.f32 %v2662_v6, %v2508_v47  ;;  %v3815_v27 = vshll.u32 %v8965_v44, 16  ;;  %v7801_v14 = vld [vmem:[%s10041_s3 + $0x80] sm:$0xff]  ;;  %v3389_v21 = vrot.slane %v8937_v34, 4  ;;  %v10054_v50 = vrot.slane %v8860_v41, 1  ;;  %v9010_v34 = vpop.f32.mrf.mxu1 }
 0x224   : > { %v3391_v53 = vshrl.u32 %v3320_v31, 16  ;;  %v3394_v4 = vshll.u32 %v3320_v31, 16  ;;  %vm3659_vm11 = vcmask 1040384  }
 0x225   : > { %v2755_v6 = vadd.f32 %v8770_v13, %v2723_v36  ;;  %v8987_v46 = vrot.slane %v3815_v27, 1  ;;  %v2569_v26 = vsel %vm752_vm2, %v10054_v50, %v2568_v30  ;;  %v2348_v27 = vsel %vm345_vm0, %v2343_v62, %v8984_v20  ;;  %4316 = vmatpush.bf16.msrb.mxu3 %v7801_v14  ;;  %v7850_v62 = vld [vmem:[%s10041_s3 + $0x130] sm:$0xff] }
 0x226   : > { %v3393_v29 = vrot.slane %v3391_v53, 7  ;;  %v2049_v43 = vpop.f32.mrf.mxu2  ;;  %4125 = vmatpush.bf16.msrb.mxu2 %v7785_v22  ;;  %4600 = vmatpush.bf16.msrb.mxu0 %v7823_v25 }
 0x227   : > { %v2783_v8 = vmax.f32 %v2755_v6, 0.0  ;;  %v2109_v47 = vadd.f32 %v2049_v43, %v1829_v42  ;;  %v2449_v36 = vpop.f32.mrf.mxu3  ;;  %v3818_v42 = vsel %vm345_vm0, %v3813_v51, %v8987_v46  ;;  %v2225_v6 = vunpack.c.l.b16 %v2158_v2  ;;  %4998 = vmatpush.bf16.msrb.mxu1 %v7850_v62 }
 0x228   : > { %v3396_v31 = vor.u32 %v3394_v4, %v3393_v29  ;;  %v2667_v12 = vpop.f32.mrf.mxu0  ;;  %3990 = vmatmul.bf16.gmra.mxu1 %v3818_v42  ;;  %v2887_v43 = vand.u32 15, %v2813_v18  ;;  %v1830_v2 = vadd.f32 %v8701_v58, %v8571_v60  ;;  %v2349_v42 = vshrl.u32 %v8941_v17, 16 }
 0x229   : > { %v3321_v53 = vpack.c.bf16 %v2783_v8, %v2783_v8  ;;  %v2509_v63 = vadd.f32 %v2449_v36, %v2109_v47  ;;  %v2240_v36 = vpack.c.b16 %v2225_v6, %v2225_v6  ;;  %v1832_v17 = vadd.f32 %v8734_v52, %v8590_v16 }
 0x22a   : > { %v3397_v4 = vsel %vm8825_vm9, %v3389_v21, %v3396_v31  ;;  %vm3177_vm12 = vcmp.lt.s32.totalorder %v2887_v43, 14  ;;  %v3819_v43 = vshrl.u32 %v8965_v44, 16 }
 0x22b   : > { %3636 = vst [vmem:[#allocation2 + $0x1c] sm:$0xf] %v3397_v4  ;;  %v3400_v41 = vshrl.u32 %v3321_v53, 16  ;;  %v2724_v51 = vadd.f32 %v2664_v49, %v2509_v63  ;;  %6853 = vmatmul.msk.bf16.gmra.mxu2 %vm486_vm1, %v7745_v39  ;;  %6981 = vmatmul.msk.bf16.gmra.mxu0 %vm486_vm1, %v2569_v26  ;;  %v3403_v18 = vshll.u32 %v3321_v53, 16  ;;  %v3398_v39 = vrot.slane %v3393_v29, 4  ;;  %v9030_v6 = vpop.f32.mrf.mxu1 }
 0x22c   : > { %6943 = vmatmul.msk.bf16.gmra.mxu3 %vm486_vm1, %v2348_v27  ;;  %v2353_v26 = vshll.u32 %v2240_v36, 16  ;;  %v1831_v29 = vadd.f32 %v8711_v45, %v8582_v54  ;;  %v3821_v45 = vor.u32 %v3819_v43, %v8987_v46 }
 0x22d   : > { %v3402_v8 = vrot.slane %v3400_v41, 7  ;;  %v2756_v47 = vadd.f32 %v8770_v13, %v2724_v51  ;;  %v2570_v51 = vrot.slane %v2240_v36, 1 }
 0x22e   : > { %v2052_v49 = vpop.f32.mrf.mxu2 }
 0x22f   : > { %v3405_v22 = vor.u32 %v3403_v18, %v3402_v8  ;;  %v2784_v14 = vmax.f32 %v2756_v47, 0.0  ;;  %v2110_v25 = vadd.f32 %v2052_v49, %v1830_v2  ;;  %v2452_v21 = vpop.f32.mrf.mxu3  ;;  %v2815_v2 = vadd.s32 72, %v8776_v56 }
 0x230   : > { %v2669_v31 = vpop.f32.mrf.mxu0  ;;  %v2351_v18 = vor.u32 %v2349_v42, %v8984_v20  ;;  %v2355_v47 = vrot.slane %v2353_v26, 1  ;;  %v2571_v20 = vsel %vm752_vm2, %v2568_v30, %v2570_v51 }
 0x231   : > { %v3406_v60 = vsel %vm8825_vm9, %v3398_v39, %v3405_v22  ;;  %v3261_v58 = vsel %vm3177_vm12, %v2784_v14, 0.0  ;;  %v2510_v50 = vadd.f32 %v2452_v21, %v2110_v25  ;;  %v7746_v21 = vld [vmem:[%s8119_s10 + $0x78] sm:$0xff]  ;;  %vm9423_vm12 = vmand %vm3659_vm11, %vm3343_vm7 }
 0x232   : > { %3637 = vst [vmem:[#allocation2 + $0x20] sm:$0xf] %v3406_v60  ;;  %v3322_v53 = vpack.c.bf16 %v3261_v58, %v3261_v58  ;;  %v9026_v63 = vld [vmem:[#allocation2 + $0x18] sm:$0xff]  ;;  %v3407_v60 = vrot.slane %v3402_v8, 4 }
 0x233   : > { %v2725_v27 = vadd.f32 %v2667_v12, %v2510_v50  ;;  %v3823_v41 = vshll.u32 %v9026_v63, 16 }
 0x234   : > { %v3409_v4 = vshrl.u32 %v3322_v53, 16  ;;  %v3412_v39 = vshll.u32 %v3322_v53, 16  ;;  %v2356_v53 = vsel %vm345_vm0, %v2351_v18, %v2355_v47 }
 0x235   : > { %v2757_v62 = vadd.f32 %v8770_v13, %v2725_v27  ;;  %v3825_v12 = vrot.slane %v3823_v41, 1  ;;  %v9052_v41 = vpop.f32.mrf.mxu1 }
 0x236   : > { %v3411_v49 = vrot.slane %v3409_v4, 7  ;;  %v2054_v54 = vpop.f32.mrf.mxu2 }
 0x237   : > { %v2785_v22 = vmax.f32 %v2757_v62, 0.0  ;;  %v2111_v14 = vadd.f32 %v2054_v54, %v1831_v29  ;;  %v2454_v25 = vpop.f32.mrf.mxu3  ;;  %v3826_v50 = vsel %vm345_vm0, %v3821_v45, %v3825_v12  ;;  %v2901_v29 = vand.u32 15, %v2815_v2  ;;  %v7946_v62 = vld [vmem:[#allocation2] sm:$0xf0]  ;;  %v7947_v2 = vld [vmem:[#allocation2] sm:$0xe] }
 0x238   : > { %v3414_v58 = vor.u32 %v3412_v39, %v3411_v49  ;;  %v2672_v36 = vpop.f32.mrf.mxu0  ;;  %3995 = vmatmul.bf16.gmra.mxu1 %v3826_v50 }
 0x239   : > { %v3323_v42 = vpack.c.bf16 %v2785_v22, %v2785_v22  ;;  %v2511_v26 = vadd.f32 %v2454_v25, %v2111_v14  ;;  %vm3179_vm13 = vcmp.lt.s32.totalorder %v2901_v29, 14  ;;  %v7948_v14 = vor.u32 %v7947_v2, %v7946_v62 }
 0x23a   : > { %v3415_v46 = vsel %vm8825_vm9, %v3407_v60, %v3414_v58  ;;  %v7849_v60 = vld [vmem:[%s10041_s3 + $0x128] sm:$0xff]  ;;  %v1833_v58 = vadd.f32 %v8761_v10, %v8598_v11  ;;  %v4219_v29 = vrot.slane %v8877_v57, 1 }
 0x23b   : > { %3638 = vst [vmem:[#allocation2 + $0x24] sm:$0xf] %v3415_v46  ;;  %v3418_v27 = vshrl.u32 %v3323_v42, 16  ;;  %v2726_v8 = vadd.f32 %v2669_v31, %v2511_v26  ;;  %6854 = vmatmul.msk.bf16.gmra.mxu2 %vm486_vm1, %v7746_v21  ;;  %6982 = vmatmul.msk.bf16.gmra.mxu0 %vm486_vm1, %v2571_v20  ;;  %v3421_v4 = vshll.u32 %v3323_v42, 16  ;;  %v3416_v31 = vrot.slane %v3411_v49, 4 }
 0x23c   : > { %6944 = vmatmul.msk.bf16.gmra.mxu3 %vm486_vm1, %v2356_v53  ;;  %v3827_v20 = vshrl.u32 %v9026_v63, 16  ;;  %4999 = vmatpush.bf16.msrb.mxu1 %v7849_v60  ;;  %v2817_v53 = vadd.s32 88, %v8776_v56  ;;  %v4218_v46 = vrot.slane %v7948_v14, 1 }
 0x23d   : > { %v3420_v30 = vrot.slane %v3418_v27, 7  ;;  %v2758_v43 = vadd.f32 %v8770_v13, %v2726_v8  ;;  %v9072_v2 = vpop.f32.mrf.mxu1 }
 0x23e   : > { %v2057_v51 = vpop.f32.mrf.mxu2  ;;  %v4220_v14 = vsel %vm752_vm2, %v4218_v46, %v4219_v29 }
 0x23f   : > { %v3423_v18 = vor.u32 %v3421_v4, %v3420_v30  ;;  %v2786_v47 = vmax.f32 %v2758_v43, 0.0  ;;  %v2112_v39 = vadd.f32 %v2057_v51, %v1832_v17  ;;  %v2457_v54 = vpop.f32.mrf.mxu3  ;;  %v9068_v51 = vld [vmem:[#allocation2 + $0x18] sm:$0xff] }
 0x240   : > { %v2674_v45 = vpop.f32.mrf.mxu0 }
 0x241   : > { %v3424_v22 = vsel %vm8825_vm9, %v3416_v31, %v3423_v18  ;;  %v3263_v16 = vsel %vm3179_vm13, %v2786_v47, 0.0  ;;  %v2512_v52 = vadd.f32 %v2457_v54, %v2112_v39  ;;  %v3425_v31 = vrot.slane %v3420_v30, 4 }
 0x242   : > { %3639 = vst [vmem:[#allocation2 + $0x28] sm:$0xf] %v3424_v22  ;;  %v3324_v25 = vpack.c.bf16 %v3263_v16, %v3263_v16  ;;  %v9056_v21 = vld [vmem:[#allocation2 + $0x20] sm:$0xff]  ;;  %v7809_v16 = vld [vmem:[#allocation2 + $0x8] sm:$0xff]  ;;  %v10045_v30 = vrot.slane %v9068_v51, 1 }
 0x243   : > { %v2727_v49 = vadd.f32 %v2672_v36, %v2512_v52  ;;  %v3831_v42 = vshll.u32 %v9056_v21, 16  ;;  %v3829_v36 = vor.u32 %v3827_v20, %v3825_v12  ;;  %v9070_v62 = vld [vmem:[#allocation2 + $0x20] sm:$0xff]  ;;  %v2915_v52 = vand.u32 15, %v2817_v53 }
 0x244   : > { %v3427_v50 = vshrl.u32 %v3324_v25, 16  ;;  %v3430_v8 = vshll.u32 %v3324_v25, 16 }
 0x245   : > { %v2759_v26 = vadd.f32 %v8770_v13, %v2727_v49  ;;  %v3833_v4 = vrot.slane %v3831_v42, 1  ;;  %v6035_v49 = vrot.slane %v9070_v62, 1  ;;  %vm3181_vm14 = vcmp.lt.s32.totalorder %v2915_v52, 14  ;;  %v7848_v62 = vld [vmem:[%s10041_s3 + $0x120] sm:$0xff] }
 0x246   : > { %v3429_v27 = vrot.slane %v3427_v50, 7  ;;  %v2059_v17 = vpop.f32.mrf.mxu2  ;;  %5000 = vmatpush.bf16.msrb.mxu1 %v7848_v62 }
 0x247   : > { %v2787_v43 = vmax.f32 %v2759_v26, 0.0  ;;  %v2113_v11 = vadd.f32 %v2059_v17, %v1833_v58  ;;  %v2459_v10 = vpop.f32.mrf.mxu3  ;;  %v3834_v39 = vsel %vm345_vm0, %v3829_v36, %v3833_v4  ;;  %v1834_v58 = vadd.f32 %v8791_v33, %v8606_v15 }
 0x248   : > { %v3432_v18 = vor.u32 %v3430_v8, %v3429_v27  ;;  %v2677_v47 = vpop.f32.mrf.mxu0  ;;  %4000 = vmatmul.bf16.gmra.mxu1 %v3834_v39  ;;  %v3434_v26 = vrot.slane %v3429_v27, 4  ;;  %v3835_v27 = vshrl.u32 %v9056_v21, 16 }
 0x249   : > { %v3325_v54 = vpack.c.bf16 %v2787_v43, %v2787_v43  ;;  %v2513_v22 = vadd.f32 %v2459_v10, %v2113_v11  ;;  %v9095_v11 = vpop.f32.mrf.mxu1 }
 0x24a   : > { %v3433_v12 = vsel %vm8825_vm9, %v3425_v31, %v3432_v18 }
 0x24b   : > { %3640 = vst [vmem:[#allocation2 + $0x2c] sm:$0xf] %v3433_v12  ;;  %v3436_v25 = vshrl.u32 %v3325_v54, 16  ;;  %v2728_v60 = vadd.f32 %v2674_v45, %v2513_v22  ;;  %4126 = vmatmul.bf16.vlgmr.msrb.gmra.mxu2 %v8838_v24  ;;  %4601 = vmatmul.bf16.vlgmr.msrb.gmra.mxu0 %v7809_v16  ;;  %v3439_v20 = vshll.u32 %v3325_v54, 16  ;;  %v9091_v45 = vsel %vm752_vm2, %v10045_v30, %v6035_v49 }
 0x24c   : > { %4317 = vmatmul.bf16.vlgmr.msrb.gmra.mxu3 %v4220_v14  ;;  %v1835_v22 = vadd.f32 %v8811_v1, %v8614_v19  ;;  %v2819_v12 = vadd.s32 104, %v8776_v56 }
 0x24d   : > { %v3438_v50 = vrot.slane %v3436_v25, 7  ;;  %v2760_v42 = vadd.f32 %v8770_v13, %v2728_v60  ;;  %v3837_v60 = vor.u32 %v3835_v27, %v3833_v4 }
 0x24e   : > { %v2062_v24 = vpop.f32.mrf.mxu2 }
 0x24f   : > { %v3441_v53 = vor.u32 %v3439_v20, %v3438_v50  ;;  %v2788_v46 = vmax.f32 %v2760_v42, 0.0  ;;  %v2114_v8 = vadd.f32 %v2062_v24, %v1834_v58  ;;  %v2462_v17 = vpop.f32.mrf.mxu3  ;;  %v4221_v24 = vrot.slane %v8965_v44, 1 }
 0x250   : > { %v2679_v15 = vpop.f32.mrf.mxu0 }
 0x251   : > { %v3442_v33 = vsel %vm8825_vm9, %v3434_v26, %v3441_v53  ;;  %v3265_v36 = vsel %vm3181_vm14, %v2788_v46, 0.0  ;;  %v2514_v43 = vadd.f32 %v2462_v17, %v2114_v8  ;;  %v3443_v53 = vrot.slane %v3438_v50, 4  ;;  %v9120_v27 = vpop.f32.mrf.mxu1 }
 0x252   : > { %3641 = vst [vmem:[#allocation2 + $0x30] sm:$0xf] %v3442_v33  ;;  %v3326_v10 = vpack.c.bf16 %v3265_v36, %v3265_v36  ;;  %v9097_v31 = vld [vmem:[#allocation2 + $0x28] sm:$0xff]  ;;  %v7810_v33 = vld [vmem:[#allocation2 + $0x10] sm:$0xff]  ;;  %v2929_v36 = vand.u32 15, %v2819_v12  ;;  %v4222_v50 = vsel %vm752_vm2, %v4219_v29, %v4221_v24 }
 0x253   : > { %v2729_v18 = vadd.f32 %v2677_v47, %v2514_v43  ;;  %v3839_v54 = vshll.u32 %v9097_v31, 16  ;;  %v9106_v26 = vld [vmem:[#allocation2 + $0x28] sm:$0xff] }
 0x254   : > { %v3445_v39 = vshrl.u32 %v3326_v10, 16  ;;  %v3448_v14 = vshll.u32 %v3326_v10, 16  ;;  %vm3183_vm15 = vcmp.lt.s32.totalorder %v2929_v36, 14 }
 0x255   : > { %v2761_v16 = vadd.f32 %v8770_v13, %v2729_v18  ;;  %v3841_v58 = vrot.slane %v3839_v54, 1  ;;  %v6037_v18 = vrot.slane %v9106_v26, 1 }
 0x256   : > { %v3447_v52 = vrot.slane %v3445_v39, 7  ;;  %v2064_v25 = vpop.f32.mrf.mxu2  ;;  %v1836_v39 = vadd.f32 %v8850_v55, %v8619_v37 }
 0x257   : > { %v2789_v20 = vmax.f32 %v2761_v16, 0.0  ;;  %v2115_v42 = vadd.f32 %v2064_v25, %v1835_v22  ;;  %v2464_v47 = vpop.f32.mrf.mxu3  ;;  %v3842_v19 = vsel %vm345_vm0, %v3837_v60, %v3841_v58 }
 0x258   : > { %v3450_v46 = vor.u32 %v3448_v14, %v3447_v52  ;;  %v2682_v8 = vpop.f32.mrf.mxu0  ;;  %4005 = vmatmul.bf16.gmra.mxu1 %v3842_v19  ;;  %v3452_v16 = vrot.slane %v3447_v52, 4 }
 0x259   : > { %v3327_v1 = vpack.c.bf16 %v2789_v20, %v2789_v20  ;;  %v2515_v17 = vadd.f32 %v2464_v47, %v2115_v42 }
 0x25a   : > { %v3451_v4 = vsel %vm8825_vm9, %v3443_v53, %v3450_v46  ;;  %v3843_v46 = vshrl.u32 %v9097_v31, 16 }
 0x25b   : > { %3642 = vst [vmem:[#allocation2 + $0x34] sm:$0xf] %v3451_v4  ;;  %v3454_v43 = vshrl.u32 %v3327_v1, 16  ;;  %v2730_v10 = vadd.f32 %v2679_v15, %v2515_v17  ;;  %4131 = vmatmul.bf16.gmra.mxu2 %v8877_v57  ;;  %4606 = vmatmul.bf16.gmra.mxu0 %v7810_v33  ;;  %v3457_v22 = vshll.u32 %v3327_v1, 16  ;;  %v9128_v57 = vsel %vm752_vm2, %v6035_v49, %v6037_v18  ;;  %v9143_v4 = vpop.f32.mrf.mxu1 }
 0x25c   : > { %4322 = vmatmul.bf16.gmra.mxu3 %v4222_v50  ;;  %v1837_v1 = vadd.f32 %v8896_v40, %v8630_v0  ;;  %v2821_v33 = vadd.s32 120, %v8776_v56  ;;  %v3845_v50 = vor.u32 %v3843_v46, %v3841_v58 }
 0x25d   : > { %v3456_v54 = vrot.slane %v3454_v43, 7  ;;  %v2762_v15 = vadd.f32 %v8770_v13, %v2730_v10 }
 0x25e   : > { %v2067_v29 = vpop.f32.mrf.mxu2 }
 0x25f   : > { %v3459_v12 = vor.u32 %v3457_v22, %v3456_v54  ;;  %v2790_v14 = vmax.f32 %v2762_v15, 0.0  ;;  %v2116_v37 = vadd.f32 %v2067_v29, %v1836_v39  ;;  %v2467_v55 = vpop.f32.mrf.mxu3  ;;  %v4223_v29 = vrot.slane %v9026_v63, 1 }
 0x260   : > { %v2684_v25 = vpop.f32.mrf.mxu0 }
 0x261   : > { %v3460_v60 = vsel %vm8825_vm9, %v3452_v16, %v3459_v12  ;;  %v3267_v20 = vsel %vm3183_vm15, %v2790_v14, 0.0  ;;  %v2516_v42 = vadd.f32 %v2467_v55, %v2116_v37  ;;  %v3461_v12 = vrot.slane %v3456_v54, 4 }
 0x262   : > { %3643 = vst [vmem:[#allocation2 + $0x38] sm:$0xf] %v3460_v60  ;;  %v3328_v47 = vpack.c.bf16 %v3267_v20, %v3267_v20  ;;  %v9132_v53 = vld [vmem:[#allocation2 + $0x30] sm:$0xff]  ;;  %v7811_v60 = vld [vmem:[#allocation2 + $0x18] sm:$0xff]  ;;  %v2943_v20 = vand.u32 15, %v2821_v33  ;;  %v4224_v54 = vsel %vm752_vm2, %v4221_v24, %v4223_v29 }
 0x263   : > { %v2731_v49 = vadd.f32 %v2682_v8, %v2516_v42  ;;  %v3847_v19 = vshll.u32 %v9132_v53, 16  ;;  %v9146_v16 = vld [vmem:[#allocation2 + $0x30] sm:$0xff] }
 0x264   : > { %v3463_v52 = vshrl.u32 %v3328_v47, 16  ;;  %v3466_v43 = vshll.u32 %v3328_v47, 16  ;;  %v6039_v62 = vrot.slane %v9146_v16, 1  ;;  %vm3185_vm1 = vcmp.lt.s32.totalorder %v2943_v20, 14 }
 0x265   : > { %v2763_v17 = vadd.f32 %v8770_v13, %v2731_v49  ;;  %v3849_v8 = vrot.slane %v3847_v19, 1  ;;  %v1838_v49 = vadd.f32 %v8957_v28, %v8635_v23  ;;  %v9168_v23 = vpop.f32.mrf.mxu1 }
 0x266   : > { %v3465_v36 = vrot.slane %v3463_v52, 7  ;;  %v2069_v10 = vpop.f32.mrf.mxu2 }
 0x267   : > { %v2791_v39 = vmax.f32 %v2763_v17, 0.0  ;;  %v2117_v22 = vadd.f32 %v2069_v10, %v1837_v1  ;;  %v2469_v15 = vpop.f32.mrf.mxu3  ;;  %v3850_v14 = vsel %vm345_vm0, %v3845_v50, %v3849_v8 }
 0x268   : > { %v3468_v0 = vor.u32 %v3466_v43, %v3465_v36  ;;  %v2687_v40 = vpop.f32.mrf.mxu0  ;;  %4010 = vmatmul.bf16.gmra.mxu1 %v3850_v14  ;;  %v3470_v24 = vrot.slane %v3465_v36, 4  ;;  %v3851_v36 = vshrl.u32 %v9132_v53, 16 }
 0x269   : > { %v3329_v37 = vpack.c.bf16 %v2791_v39, %v2791_v39  ;;  %v2517_v55 = vadd.f32 %v2469_v15, %v2117_v22 }
 0x26a   : > { %v3469_v58 = vsel %vm8825_vm9, %v3461_v12, %v3468_v0  ;;  %v1839_v12 = vadd.f32 %v9010_v34, %v8643_v32  ;;  %v9181_v0 = vld [vmem:[%s10040_s2] ss:$0 sm:$0xff] }
 0x26b   : > { %3644 = vst [vmem:[#allocation2 + $0x3c] sm:$0xf] %v3469_v58  ;;  %v3472_v42 = vshrl.u32 %v3329_v37, 16  ;;  %v2732_v47 = vadd.f32 %v2684_v25, %v2517_v55  ;;  %4136 = vmatmul.bf16.gmra.mxu2 %v8965_v44  ;;  %4611 = vmatmul.bf16.gmra.mxu0 %v7811_v60  ;;  %v3475_v46 = vshll.u32 %v3329_v37, 16  ;;  %v9166_v25 = vsel %vm752_vm2, %v6037_v18, %v6039_v62 }
 0x26c   : > { %4327 = vmatmul.bf16.gmra.mxu3 %v4224_v54  ;;  %v2823_v37 = vadd.s32 136, %v8776_v56  ;;  %v3853_v58 = vor.u32 %v3851_v36, %v3849_v8 }
 0x26d   : > { %v3474_v52 = vrot.slane %v3472_v42, 7  ;;  %v2764_v19 = vadd.f32 %v8770_v13, %v2732_v47 }
 0x26e   : > { %v2072_v44 = vpop.f32.mrf.mxu2 }
 0x26f   : > { %v3477_v1 = vor.u32 %v3475_v46, %v3474_v52  ;;  %v2792_v17 = vmax.f32 %v2764_v19, 0.0  ;;  %v2118_v33 = vadd.f32 %v2072_v44, %v1838_v49  ;;  %v2472_v43 = vpop.f32.mrf.mxu3  ;;  %v4225_v49 = vrot.slane %v9056_v21, 1 }
 0x270   : > { %v2689_v28 = vpop.f32.mrf.mxu0  ;;  %v3479_v34 = vrot.slane %v3474_v52, 4 }
 0x271   : > { %v3478_v13 = vsel %vm8825_vm9, %v3470_v24, %v3477_v1  ;;  %v3269_v10 = vsel %vm3185_vm1, %v2792_v17, 0.0  ;;  %v2518_v50 = vadd.f32 %v2472_v43, %v2118_v33  ;;  %v7812_v17 = vld [vmem:[#allocation2 + $0x20] sm:$0xff]  ;;  %v9189_v33 = vpop.f32.mrf.mxu1  ;;  %v2957_v43 = vand.u32 15, %v2823_v37 }
 0x272   : > { %3645 = vst [vmem:[#allocation2 + $0x40] sm:$0xf] %v3478_v13  ;;  %v3330_v26 = vpack.c.bf16 %v3269_v10, %v3269_v10  ;;  %v9172_v39 = vld [vmem:[#allocation2 + $0x38] sm:$0xff]  ;;  %v4226_v52 = vsel %vm752_vm2, %v4223_v29, %v4225_v49 }
 0x273   : > { %v2733_v18 = vadd.f32 %v2687_v40, %v2518_v50  ;;  %v3855_v15 = vshll.u32 %v9172_v39, 16  ;;  %v9186_v32 = vld [vmem:[#allocation2 + $0x38] sm:$0xff]  ;;  %vm3187_vm3 = vcmp.lt.s32.totalorder %v2957_v43, 14 }
 0x274   : > { %v3481_v22 = vshrl.u32 %v3330_v26, 16  ;;  %v3484_v60 = vshll.u32 %v3330_v26, 16  ;;  %v7847_v50 = vld [vmem:[%s10041_s3 + $0x118] sm:$0xff]  ;;  %v6041_v26 = vrot.slane %v9186_v32, 1 }
 0x275   : > { %v2765_v14 = vadd.f32 %v9181_v0, %v2733_v18  ;;  %v3857_v20 = vrot.slane %v3855_v15, 1  ;;  %v1840_v18 = vadd.f32 %v9030_v6, %v8648_v9  ;;  %5001 = vmatpush.bf16.msrb.mxu1 %v7847_v50  ;;  %v4227_v50 = vrot.slane %v9097_v31, 1 }
 0x276   : > { %v3483_v55 = vrot.slane %v3481_v22, 7  ;;  %v2074_v40 = vpop.f32.mrf.mxu2 }
 0x277   : > { %v2793_v42 = vmax.f32 %v2765_v14, 0.0  ;;  %v2119_v47 = vadd.f32 %v2074_v40, %v1839_v12  ;;  %v2474_v54 = vpop.f32.mrf.mxu3  ;;  %v3858_v44 = vsel %vm345_vm0, %v3853_v58, %v3857_v20 }
 0x278   : > { %v3486_v46 = vor.u32 %v3484_v60, %v3483_v55  ;;  %v2692_v19 = vpop.f32.mrf.mxu0  ;;  %4015 = vmatmul.bf16.gmra.mxu1 %v3858_v44  ;;  %v3488_v15 = vrot.slane %v3483_v55, 4  ;;  %v3859_v55 = vshrl.u32 %v9172_v39, 16 }
 0x279   : > { %v3331_v24 = vpack.c.bf16 %v2793_v42, %v2793_v42  ;;  %v2519_v1 = vadd.f32 %v2474_v54, %v2119_v47 }
 0x27a   : > { %v3487_v8 = vsel %vm8825_vm9, %v3479_v34, %v3486_v46  ;;  %v1841_v46 = vadd.f32 %v9052_v41, %v8661_v59  ;;  %v3861_v43 = vor.u32 %v3859_v55, %v3857_v20 }
 0x27b   : > { %3646 = vst [vmem:[#allocation2 + $0x44] sm:$0xf] %v3487_v8  ;;  %v3490_v13 = vshrl.u32 %v3331_v24, 16  ;;  %v2734_v10 = vadd.f32 %v2689_v28, %v2519_v1  ;;  %4141 = vmatmul.bf16.gmra.mxu2 %v9026_v63  ;;  %4616 = vmatmul.bf16.gmra.mxu0 %v7812_v17  ;;  %v3493_v22 = vshll.u32 %v3331_v24, 16  ;;  %v9211_v63 = vsel %vm752_vm2, %v6039_v62, %v6041_v26  ;;  %v9217_v62 = vpop.f32.mrf.mxu1 }
 0x27c   : > { %4332 = vmatmul.bf16.gmra.mxu3 %v4226_v52  ;;  %v2825_v24 = vadd.s32 152, %v8776_v56 }
 0x27d   : > { %v3492_v28 = vrot.slane %v3490_v13, 7  ;;  %v2766_v36 = vadd.f32 %v9181_v0, %v2734_v10 }
 0x27e   : > { %v2077_v29 = vpop.f32.mrf.mxu2 }
 0x27f   : > { %v3495_v12 = vor.u32 %v3493_v22, %v3492_v28  ;;  %v2794_v14 = vmax.f32 %v2766_v36, 0.0  ;;  %v2120_v37 = vadd.f32 %v2077_v29, %v1840_v18  ;;  %v2477_v9 = vpop.f32.mrf.mxu3  ;;  %v3497_v22 = vrot.slane %v3492_v28, 4 }
 0x280   : > { %v2694_v6 = vpop.f32.mrf.mxu0  ;;  %v4228_v28 = vsel %vm752_vm2, %v4225_v49, %v4227_v50 }
 0x281   : > { %v3496_v60 = vsel %vm8825_vm9, %v3488_v15, %v3495_v12  ;;  %v3271_v40 = vsel %vm3187_vm3, %v2794_v14, 0.0  ;;  %v2520_v58 = vadd.f32 %v2477_v9, %v2120_v37  ;;  %v7813_v12 = vld [vmem:[#allocation2 + $0x28] sm:$0xff]  ;;  %v2971_v14 = vand.u32 15, %v2825_v24 }
 0x282   : > { %3647 = vst [vmem:[#allocation2 + $0x48] sm:$0xf] %v3496_v60  ;;  %v3332_v42 = vpack.c.bf16 %v3271_v40, %v3271_v40  ;;  %v9215_v47 = vld [vmem:[#allocation2 + $0x40] sm:$0xff]  ;;  %v1842_v40 = vadd.f32 %v9072_v2, %v8668_v3 }
 0x283   : > { %v2735_v16 = vadd.f32 %v2692_v19, %v2520_v58  ;;  %v3863_v34 = vshll.u32 %v9215_v47, 16  ;;  %v9226_v18 = vld [vmem:[#allocation2 + $0x40] sm:$0xff]  ;;  %vm3189_vm4 = vcmp.lt.s32.totalorder %v2971_v14, 14 }
 0x284   : > { %v3499_v54 = vshrl.u32 %v3332_v42, 16  ;;  %v3502_v17 = vshll.u32 %v3332_v42, 16  ;;  %v6043_v60 = vrot.slane %v9226_v18, 1 }
 0x285   : > { %v2767_v44 = vadd.f32 %v9181_v0, %v2735_v16  ;;  %v3865_v13 = vrot.slane %v3863_v34, 1 }
 0x286   : > { %v3501_v1 = vrot.slane %v3499_v54, 7  ;;  %v2079_v8 = vpop.f32.mrf.mxu2 }
 0x287   : > { %v2795_v19 = vmax.f32 %v2767_v44, 0.0  ;;  %v2121_v10 = vadd.f32 %v2079_v8, %v1841_v46  ;;  %v2479_v52 = vpop.f32.mrf.mxu3  ;;  %v3866_v59 = vsel %vm345_vm0, %v3861_v43, %v3865_v13 }
 0x288   : > { %v3504_v36 = vor.u32 %v3502_v17, %v3501_v1  ;;  %v2697_v29 = vpop.f32.mrf.mxu0  ;;  %4020 = vmatmul.bf16.gmra.mxu1 %v3866_v59  ;;  %v3506_v54 = vrot.slane %v3501_v1, 4 }
 0x289   : > { %v3333_v41 = vpack.c.bf16 %v2795_v19, %v2795_v19  ;;  %v2521_v15 = vadd.f32 %v2479_v52, %v2121_v10  ;;  %v3867_v19 = vshrl.u32 %v9215_v47, 16  ;;  %v1843_v10 = vadd.f32 %v9095_v11, %v8676_v35 }
 0x28a   : > { %v3505_v20 = vsel %vm8825_vm9, %v3497_v22, %v3504_v36  ;;  %v2827_v22 = vadd.s32 168, %v8776_v56 }
 0x28b   : > { %3648 = vst [vmem:[#allocation2 + $0x4c] sm:$0xf] %v3505_v20  ;;  %v3508_v37 = vshrl.u32 %v3333_v41, 16  ;;  %v2736_v9 = vadd.f32 %v2694_v6, %v2521_v15  ;;  %4146 = vmatmul.bf16.gmra.mxu2 %v9056_v21  ;;  %4621 = vmatmul.bf16.gmra.mxu0 %v7813_v12  ;;  %v3511_v42 = vshll.u32 %v3333_v41, 16  ;;  %v9246_v6 = vsel %vm752_vm2, %v6041_v26, %v6043_v60  ;;  %v9248_v21 = vpop.f32.mrf.mxu1 }
 0x28c   : > { %4337 = vmatmul.bf16.gmra.mxu3 %v4228_v28  ;;  %v3869_v12 = vor.u32 %v3867_v19, %v3865_v13 }
 0x28d   : > { %v3510_v58 = vrot.slane %v3508_v37, 7  ;;  %v2768_v16 = vadd.f32 %v9181_v0, %v2736_v9  ;;  %v4229_v9 = vrot.slane %v9132_v53, 1 }
 0x28e   : > { %v2082_v49 = vpop.f32.mrf.mxu2 }
 0x28f   : > { %v3513_v55 = vor.u32 %v3511_v42, %v3510_v58  ;;  %v2796_v34 = vmax.f32 %v2768_v16, 0.0  ;;  %v2122_v3 = vadd.f32 %v2082_v49, %v1842_v40  ;;  %v2482_v2 = vpop.f32.mrf.mxu3  ;;  %v3515_v40 = vrot.slane %v3510_v58, 4 }
 0x290   : > { %v2699_v46 = vpop.f32.mrf.mxu0  ;;  %v4230_v58 = vsel %vm752_vm2, %v4227_v50, %v4229_v9 }
 0x291   : > { %v3514_v44 = vsel %vm8825_vm9, %v3506_v54, %v3513_v55  ;;  %v3273_v24 = vsel %vm3189_vm4, %v2796_v34, 0.0  ;;  %v2522_v17 = vadd.f32 %v2482_v2, %v2122_v3  ;;  %v7814_v54 = vld [vmem:[#allocation2 + $0x30] sm:$0xff]  ;;  %v2985_v55 = vand.u32 15, %v2827_v22 }
 0x292   : > { %3649 = vst [vmem:[#allocation2 + $0x50] sm:$0xf] %v3514_v44  ;;  %v3334_v32 = vpack.c.bf16 %v3273_v24, %v3273_v24  ;;  %v9252_v8 = vld [vmem:[#allocation2 + $0x48] sm:$0xff]  ;;  %v7846_v2 = vld [vmem:[%s10041_s3 + $0x110] sm:$0xff]  ;;  %v1844_v24 = vadd.f32 %v9120_v27, %v8686_v61 }
 0x293   : > { %v2737_v26 = vadd.f32 %v2697_v29, %v2522_v17  ;;  %v3871_v1 = vshll.u32 %v9252_v8, 16  ;;  %v9263_v28 = vld [vmem:[#allocation2 + $0x48] sm:$0xff]  ;;  %5002 = vmatpush.bf16.msrb.mxu1 %v7846_v2  ;;  %vm3191_vm5 = vcmp.lt.s32.totalorder %v2985_v55, 14 }
 0x294   : > { %v3517_v43 = vshrl.u32 %v3334_v32, 16  ;;  %v3520_v59 = vshll.u32 %v3334_v32, 16  ;;  %v6045_v44 = vrot.slane %v9263_v28, 1 }
 0x295   : > { %v2769_v52 = vadd.f32 %v9181_v0, %v2737_v26  ;;  %v9260_v15 = vpop.f32.mrf.mxu1  ;;  %v3873_v20 = vrot.slane %v3871_v1, 1 }
 0x296   : > { %v3519_v36 = vrot.slane %v3517_v43, 7  ;;  %v2084_v41 = vpop.f32.mrf.mxu2 }
 0x297   : > { %v2797_v29 = vmax.f32 %v2769_v52, 0.0  ;;  %v2123_v14 = vadd.f32 %v2084_v41, %v1843_v10  ;;  %v2484_v37 = vpop.f32.mrf.mxu3  ;;  %v3874_v42 = vsel %vm345_vm0, %v3869_v12, %v3873_v20 }
 0x298   : > { %v3522_v35 = vor.u32 %v3520_v59, %v3519_v36  ;;  %v2702_v11 = vpop.f32.mrf.mxu0  ;;  %4025 = vmatmul.bf16.gmra.mxu1 %v3874_v42  ;;  %v3524_v43 = vrot.slane %v3519_v36, 4 }
 0x299   : > { %v3335_v16 = vpack.c.bf16 %v2797_v29, %v2797_v29  ;;  %v2523_v49 = vadd.f32 %v2484_v37, %v2123_v14  ;;  %v3875_v29 = vshrl.u32 %v9252_v8, 16  ;;  %v1845_v14 = vadd.f32 %v9143_v4, %v8696_v48 }
 0x29a   : > { %v3523_v13 = vsel %vm8825_vm9, %v3515_v40, %v3522_v35  ;;  %v2829_v40 = vadd.s32 184, %v8776_v56 }
 0x29b   : > { %3650 = vst [vmem:[#allocation2 + $0x54] sm:$0xf] %v3523_v13  ;;  %v3526_v34 = vshrl.u32 %v3335_v16, 16  ;;  %v2738_v3 = vadd.f32 %v2699_v46, %v2523_v49  ;;  %4151 = vmatmul.bf16.gmra.mxu2 %v9097_v31  ;;  %4626 = vmatmul.bf16.gmra.mxu0 %v7814_v54  ;;  %v3529_v17 = vshll.u32 %v3335_v16, 16  ;;  %v9286_v31 = vsel %vm752_vm2, %v6043_v60, %v6045_v44 }
 0x29c   : > { %4342 = vmatmul.bf16.gmra.mxu3 %v4230_v58  ;;  %v3877_v54 = vor.u32 %v3875_v29, %v3873_v20 }
 0x29d   : > { %v3528_v46 = vrot.slane %v3526_v34, 7  ;;  %v2770_v32 = vadd.f32 %v9181_v0, %v2738_v3  ;;  %v9288_v26 = vpop.f32.mrf.mxu1  ;;  %v4231_v3 = vrot.slane %v9172_v39, 1 }
 0x29e   : > { %v2087_v50 = vpop.f32.mrf.mxu2 }
 0x29f   : > { %v3531_v19 = vor.u32 %v3529_v17, %v3528_v46  ;;  %v2798_v61 = vmax.f32 %v2770_v32, 0.0  ;;  %v2124_v27 = vadd.f32 %v2087_v50, %v1844_v24  ;;  %v2487_v1 = vpop.f32.mrf.mxu3  ;;  %v3533_v2 = vrot.slane %v3528_v46, 4  ;;  %v7815_v50 = vld [vmem:[#allocation2 + $0x38] sm:$0xff] }
 0x2a0   : > { %v2704_v10 = vpop.f32.mrf.mxu0  ;;  %v4232_v46 = vsel %vm752_vm2, %v4229_v9, %v4231_v3 }
 0x2a1   : > { %v3532_v52 = vsel %vm8825_vm9, %v3524_v43, %v3531_v19  ;;  %v3275_v22 = vsel %vm3191_vm5, %v2798_v61, 0.0  ;;  %v2524_v59 = vadd.f32 %v2487_v1, %v2124_v27  ;;  %v2999_v43 = vand.u32 15, %v2829_v40 }
 0x2a2   : > { %3651 = vst [vmem:[#allocation2 + $0x58] sm:$0xf] %v3532_v52  ;;  %v3336_v18 = vpack.c.bf16 %v3275_v22, %v3275_v22  ;;  %v9292_v41 = vld [vmem:[#allocation2 + $0x50] sm:$0xff]  ;;  %v1846_v1 = vadd.f32 %v9168_v23, %v8703_v5 }
 0x2a3   : > { %v2739_v60 = vadd.f32 %v2702_v11, %v2524_v59  ;;  %v3879_v36 = vshll.u32 %v9292_v41, 16  ;;  %v9303_v58 = vld [vmem:[#allocation2 + $0x50] sm:$0xff]  ;;  %vm3193_vm6 = vcmp.lt.s32.totalorder %v2999_v43, 14 }
 0x2a4   : > { %v3535_v12 = vshrl.u32 %v3336_v18, 16  ;;  %v3538_v42 = vshll.u32 %v3336_v18, 16  ;;  %v6047_v27 = vrot.slane %v9303_v58, 1 }
 0x2a5   : > { %v2771_v37 = vadd.f32 %v9181_v0, %v2739_v60  ;;  %v9300_v49 = vpop.f32.mrf.mxu1  ;;  %v3881_v13 = vrot.slane %v3879_v36, 1 }
 0x2a6   : > { %v3537_v35 = vrot.slane %v3535_v12, 7  ;;  %v2089_v16 = vpop.f32.mrf.mxu2 }
 0x2a7   : > { %v2799_v11 = vmax.f32 %v2771_v37, 0.0  ;;  %v2125_v55 = vadd.f32 %v2089_v16, %v1845_v14  ;;  %v2489_v34 = vpop.f32.mrf.mxu3  ;;  %v3882_v24 = vsel %vm345_vm0, %v3877_v54, %v3881_v13  ;;  %v3883_v16 = vshrl.u32 %v9292_v41, 16 }
 0x2a8   : > { %v3540_v48 = vor.u32 %v3538_v42, %v3537_v35  ;;  %v2707_v4 = vpop.f32.mrf.mxu0  ;;  %4030 = vmatmul.bf16.gmra.mxu1 %v3882_v24  ;;  %v3542_v18 = vrot.slane %v3537_v35, 4 }
 0x2a9   : > { %v3337_v17 = vpack.c.bf16 %v2799_v11, %v2799_v11  ;;  %v2525_v32 = vadd.f32 %v2489_v34, %v2125_v55  ;;  %v1847_v11 = vadd.f32 %v9189_v33, %v8716_v38  ;;  %v2831_v34 = vadd.s32 200, %v8776_v56 }
 0x2aa   : > { %v3541_v20 = vsel %vm8825_vm9, %v3533_v2, %v3540_v48 }
 0x2ab   : > { %3652 = vst [vmem:[#allocation2 + $0x5c] sm:$0xf] %v3541_v20  ;;  %v3544_v19 = vshrl.u32 %v3337_v17, 16  ;;  %v2740_v61 = vadd.f32 %v2704_v10, %v2525_v32  ;;  %4156 = vmatmul.bf16.gmra.mxu2 %v9132_v53  ;;  %4631 = vmatmul.bf16.gmra.mxu0 %v7815_v50  ;;  %v3547_v22 = vshll.u32 %v3337_v17, 16  ;;  %v9323_v10 = vsel %vm752_vm2, %v6045_v44, %v6047_v27  ;;  %v7845_v44 = vld [vmem:[%s10041_s3 + $0x108] sm:$0xff] }
 0x2ac   : > { %4347 = vmatmul.bf16.gmra.mxu3 %v4232_v46  ;;  %10055 = vst [vmem:[#allocation5_spill] sm:$0xff] %v9323_v10  ;;  %5003 = vmatpush.bf16.msrb.mxu1 %v7845_v44  ;;  %v3885_v32 = vor.u32 %v3883_v16, %v3881_v13  ;;  %v7865_v10 = vld [vmem:[#allocation2 + $0x38] sm:$0xff] }
 0x2ad   : > { %v3546_v52 = vrot.slane %v3544_v19, 7  ;;  %v2772_v59 = vadd.f32 %v9181_v0, %v2740_v61  ;;  %v9325_v9 = vpop.f32.mrf.mxu1  ;;  %v4233_v19 = vrot.slane %v9215_v47, 1 }
 0x2ae   : > { %v2092_v53 = vpop.f32.mrf.mxu2 }
 0x2af   : > { %v3549_v60 = vor.u32 %v3547_v22, %v3546_v52  ;;  %v2800_v12 = vmax.f32 %v2772_v59, 0.0  ;;  %v2126_v5 = vadd.f32 %v2092_v53, %v1846_v1  ;;  %v2492_v23 = vpop.f32.mrf.mxu3  ;;  %v3551_v61 = vrot.slane %v3546_v52, 4  ;;  %v7816_v53 = vld [vmem:[#allocation2 + $0x40] sm:$0xff] }
 0x2b0   : > { %v2709_v29 = vpop.f32.mrf.mxu0  ;;  %v4234_v52 = vsel %vm752_vm2, %v4231_v3, %v4233_v19 }
 0x2b1   : > { %v3550_v36 = vsel %vm8825_vm9, %v3542_v18, %v3549_v60  ;;  %v3277_v14 = vsel %vm3193_vm6, %v2800_v12, 0.0  ;;  %v2526_v37 = vadd.f32 %v2492_v23, %v2126_v5  ;;  %v3013_v18 = vand.u32 15, %v2831_v34  ;;  %v10056_v23 = vld [vmem:[#allocation3_spill] sm:$0xff] }
 0x2b2   : > { %3653 = vst [vmem:[#allocation2 + $0x60] sm:$0xf] %v3550_v36  ;;  %v3338_v28 = vpack.c.bf16 %v3277_v14, %v3277_v14  ;;  %v9329_v40 = vld [vmem:[#allocation2 + $0x58] sm:$0xff]  ;;  %v1848_v36 = vadd.f32 %v9217_v62, %v10056_v23 }
 0x2b3   : > { %v2741_v42 = vadd.f32 %v2707_v4, %v2526_v37  ;;  %v3887_v54 = vshll.u32 %v9329_v40, 16  ;;  %v9344_v33 = vld [vmem:[#allocation2 + $0x58] sm:$0xff]  ;;  %vm3195_vm8 = vcmp.lt.s32.totalorder %v3013_v18, 14 }
 0x2b4   : > { %v3553_v35 = vshrl.u32 %v3338_v28, 16  ;;  %v3556_v48 = vshll.u32 %v3338_v28, 16  ;;  %v6049_v5 = vrot.slane %v9344_v33, 1  ;;  %v7881_v33 = vld [vmem:[%s10041_s3 + $0x1b8] sm:$0xff] }
 0x2b5   : > { %v2773_v55 = vadd.f32 %v9181_v0, %v2741_v42  ;;  %v9340_v17 = vpop.f32.mrf.mxu1  ;;  %v3889_v4 = vrot.slane %v3887_v54, 1  ;;  %5500 = vmatpush.bf16.msra.mxu3 %v7881_v33 }
 0x2b6   : > { %v3555_v2 = vrot.slane %v3553_v35, 7  ;;  %v2094_v24 = vpop.f32.mrf.mxu2 }
 0x2b7   : > { %v2801_v50 = vmax.f32 %v2773_v55, 0.0  ;;  %v2127_v20 = vadd.f32 %v2094_v24, %v1847_v11  ;;  %v2494_v43 = vpop.f32.mrf.mxu3  ;;  %v3890_v38 = vsel %vm345_vm0, %v3885_v32, %v3889_v4  ;;  %v3891_v32 = vshrl.u32 %v9329_v40, 16 }
 0x2b8   : > { %v3558_v46 = vor.u32 %v3556_v48, %v3555_v2  ;;  %v2712_v1 = vpop.f32.mrf.mxu0  ;;  %4035 = vmatmul.bf16.gmra.mxu1 %v3890_v38  ;;  %v3560_v3 = vrot.slane %v3555_v2, 4  ;;  %v7844_v48 = vld [vmem:[%s10041_s3 + $0x100] sm:$0xff] }
 0x2b9   : > { %v3339_v22 = vpack.c.bf16 %v2801_v50, %v2801_v50  ;;  %v2527_v59 = vadd.f32 %v2494_v43, %v2127_v20  ;;  %5004 = vmatpush.bf16.msrb.mxu1 %v7844_v48  ;;  %v10058_v20 = vld [vmem:[#allocation4_spill] sm:$0xff] }
 0x2ba   : > { %v3559_v13 = vsel %vm8825_vm9, %v3551_v61, %v3558_v46  ;;  %v1849_v43 = vadd.f32 %v9248_v21, %v10058_v20  ;;  %v2833_v46 = vadd.s32 216, %v8776_v56 }
 0x2bb   : > { %3654 = vst [vmem:[#allocation2 + $0x64] sm:$0xf] %v3559_v13  ;;  %v3562_v60 = vshrl.u32 %v3339_v22, 16  ;;  %v2742_v12 = vadd.f32 %v2709_v29, %v2527_v59  ;;  %4161 = vmatmul.bf16.gmra.mxu2 %v9172_v39  ;;  %4636 = vmatmul.bf16.gmra.mxu0 %v7816_v53  ;;  %v3565_v37 = vshll.u32 %v3339_v22, 16  ;;  %v9365_v39 = vsel %vm752_vm2, %v6047_v27, %v6049_v5 }
 0x2bc   : > { %4352 = vmatmul.bf16.gmra.mxu3 %v4234_v52  ;;  %10057 = vst [vmem:[#allocation3_spill] sm:$0xff] %v9365_v39  ;;  %v3893_v13 = vor.u32 %v3891_v32, %v3889_v4  ;;  %v4235_v52 = vrot.slane %v9252_v8, 1 }
 0x2bd   : > { %v3564_v14 = vrot.slane %v3562_v60, 7  ;;  %v2774_v28 = vadd.f32 %v9181_v0, %v2742_v12  ;;  %v9358_v44 = vpop.f32.mrf.mxu1 }
 0x2be   : > { %v2097_v29 = vpop.f32.mrf.mxu2 }
 0x2bf   : > { %v3567_v42 = vor.u32 %v3565_v37, %v3564_v14  ;;  %v2802_v35 = vmax.f32 %v2774_v28, 0.0  ;;  %v2128_v16 = vadd.f32 %v2097_v29, %v1848_v36  ;;  %v2497_v62 = vpop.f32.mrf.mxu3  ;;  %v3569_v23 = vrot.slane %v3564_v14, 4 }
 0x2c0   : > { %v2714_v54 = vpop.f32.mrf.mxu0  ;;  %v4236_v14 = vsel %vm752_vm2, %v4233_v19, %v4235_v52 }
 0x2c1   : > { %v3568_v11 = vsel %vm8825_vm9, %v3560_v3, %v3567_v42  ;;  %v3279_v55 = vsel %vm3195_vm8, %v2802_v35, 0.0  ;;  %v2528_v34 = vadd.f32 %v2497_v62, %v2128_v16  ;;  %v7817_v3 = vld [vmem:[#allocation2 + $0x48] sm:$0xff]  ;;  %v3027_v42 = vand.u32 15, %v2833_v46 }
 0x2c2   : > { %3655 = vst [vmem:[#allocation2 + $0x68] sm:$0xf] %v3568_v11  ;;  %v3340_v58 = vpack.c.bf16 %v3279_v55, %v3279_v55  ;;  %v9372_v24 = vld [vmem:[#allocation2 + $0x60] sm:$0xff] }
 0x2c3   : > { %v2743_v27 = vadd.f32 %v2712_v1, %v2528_v34  ;;  %v3895_v50 = vshll.u32 %v9372_v24, 16  ;;  %v9384_v28 = vld [vmem:[#allocation2 + $0x60] sm:$0xff]  ;;  %vm3197_vm10 = vcmp.lt.s32.totalorder %v3027_v42, 14 }
 0x2c4   : > { %v3571_v2 = vshrl.u32 %v3340_v58, 16  ;;  %v3574_v22 = vshll.u32 %v3340_v58, 16  ;;  %v6051_v62 = vrot.slane %v9384_v28, 1 }
 0x2c5   : > { %v2775_v61 = vadd.f32 %v9181_v0, %v2743_v27  ;;  %v9380_v53 = vpop.f32.mrf.mxu1  ;;  %v3897_v1 = vrot.slane %v3895_v50, 1 }
 0x2c6   : > { %v3573_v38 = vrot.slane %v3571_v2, 7  ;;  %v2099_v59 = vpop.f32.mrf.mxu2 }
 0x2c7   : > { %v2803_v18 = vmax.f32 %v2775_v61, 0.0  ;;  %v2129_v60 = vadd.f32 %v2099_v59, %v1849_v43  ;;  %v2499_v12 = vpop.f32.mrf.mxu3  ;;  %v3898_v21 = vsel %vm345_vm0, %v3893_v13, %v3897_v1  ;;  %v7859_v61 = vld [vmem:[%s10041_s3 + $0x178] sm:$0xff] }
 0x2c8   : > { %v3576_v36 = vor.u32 %v3574_v22, %v3573_v38  ;;  %v4602_v37 = vpop.f32.mrf.mxu0  ;;  %4040 = vmatmul.bf16.gmra.mxu1 %v3898_v21  ;;  %v3578_v19 = vrot.slane %v3573_v38, 4  ;;  %5216 = vmatpush.bf16.msra.mxu2 %v7859_v61  ;;  %v3899_v22 = vshrl.u32 %v9372_v24, 16 }
 0x2c9   : > { %v3341_v56 = vpack.c.bf16 %v2803_v18, %v2803_v18  ;;  %v2529_v29 = vadd.f32 %v2499_v12, %v2129_v60 }
 0x2ca   : > { %v3577_v4 = vsel %vm8825_vm9, %v3569_v23, %v3576_v36  ;;  %v3901_v23 = vor.u32 %v3899_v22, %v3897_v1  ;;  %v7818_v1 = vld [vmem:[#allocation2 + $0x50] sm:$0xff] }
 0x2cb   : > { %3656 = vst [vmem:[#allocation2 + $0x6c] sm:$0xf] %v3577_v4  ;;  %v3580_v35 = vshrl.u32 %v3341_v56, 16  ;;  %v2744_v16 = vadd.f32 %v2714_v54, %v2529_v29  ;;  %4166 = vmatmul.bf16.gmra.mxu2 %v9215_v47  ;;  %4641 = vmatmul.bf16.gmra.mxu0 %v7817_v3  ;;  %v3583_v55 = vshll.u32 %v3341_v56, 16  ;;  %v9403_v47 = vsel %vm752_vm2, %v6049_v5, %v6051_v62 }
 0x2cc   : > { %4357 = vmatmul.bf16.gmra.mxu3 %v4236_v14  ;;  %10059 = vst [vmem:[#allocation4_spill] sm:$0xff] %v9403_v47  ;;  %v4237_v3 = vrot.slane %v9292_v41, 1 }
 0x2cd   : > { %v3582_v11 = vrot.slane %v3580_v35, 7  ;;  %v2776_v34 = vadd.f32 %v9181_v0, %v2744_v16  ;;  %v9396_v58 = vpop.f32.mrf.mxu1 }
 0x2ce   : > { %v4127_v48 = vpop.f32.mrf.mxu2 }
 0x2cf   : > { %v3585_v54 = vor.u32 %v3583_v55, %v3582_v11  ;;  %v2804_v27 = vmax.f32 %v2776_v34, 0.0  ;;  %v4128_v2 = vadd.f32 %v4127_v48, %v9260_v15  ;;  %v4318_v32 = vpop.f32.mrf.mxu3  ;;  %v3587_v42 = vrot.slane %v3582_v11, 4 }
 0x2d0   : > { %v4604_v50 = vpop.f32.mrf.mxu0 }
 0x2d1   : > { %v3586_v0 = vsel %vm8825_vm9, %v3578_v19, %v3585_v54  ;;  %v3281_v20 = vsel %vm3197_vm10, %v2804_v27, 0.0  ;;  %v4388_v43 = vadd.f32 %v4318_v32, %v4128_v2  ;;  %v7902_v19 = vld [vmem:[%s10041_s3 + $0x1f8] sm:$0xff]  ;;  %v4238_v2 = vsel %vm752_vm2, %v4235_v52, %v4237_v3 }
 0x2d2   : > { %3657 = vst [vmem:[#allocation2 + $0x70] sm:$0xf] %v3586_v0  ;;  %v3342_v5 = vpack.c.bf16 %v3281_v20, %v3281_v20  ;;  %v9414_v46 = vld [vmem:[#allocation2 + $0x68] sm:$0xff]  ;;  %v5635_v0 = vld [vmem:[#allocation2 + $0x80] sm:$0x1]  ;;  %5904 = vmatpush.bf16.msra.mxu0 %v7902_v19 }
 0x2d3   : > { %v9416_v15 = vadd.f32 %v4602_v37, %v4388_v43  ;;  %v3903_v59 = vshll.u32 %v9414_v46, 16  ;;  %v3661_v37 = vld [vmem:[#allocation2 + $0x78] sm:$0x1]  ;;  %v7892_v4 = vld [vmem:[#allocation2 + $0x68] sm:$0xff]  ;;  %v5710_v52 = vunpack.c.l.b16 %v5635_v0 }
 0x2d4   : > { %v3589_v38 = vshrl.u32 %v3342_v5, 16  ;;  %v3592_v18 = vshll.u32 %v3342_v5, 16  ;;  %v6053_v20 = vrot.slane %v7892_v4, 1 }
 0x2d5   : > { %v9420_v12 = vpop.f32.mrf.mxu1  ;;  %v3905_v36 = vrot.slane %v3903_v59, 1 }
 0x2d6   : > { %v3591_v13 = vrot.slane %v3589_v38, 7  ;;  %v4129_v60 = vpop.f32.mrf.mxu2  ;;  %v9453_v43 = vsel %vm752_vm2, %v6051_v62, %v6053_v20  ;;  %v3907_v62 = vshrl.u32 %v9414_v46, 16 }
 0x2d7   : > { %v4130_v56 = vadd.f32 %v4129_v60, %v9288_v26  ;;  %v4320_v29 = vpop.f32.mrf.mxu3  ;;  %v3906_v55 = vsel %vm345_vm0, %v3901_v23, %v3905_v36  ;;  %v7910_v26 = vld [vmem:[%s10041_s3 + $0x238] sm:$0xff]  ;;  %10062 = vst [vmem:[#allocation6_spill] sm:$0xff] %v9453_v43 }
 0x2d8   : > { %v3594_v35 = vor.u32 %v3592_v18, %v3591_v13  ;;  %v3596_v16 = vrot.slane %v3591_v13, 4  ;;  %v4607_v14 = vpop.f32.mrf.mxu0  ;;  %4045 = vmatmul.bf16.gmra.mxu1 %v3906_v55  ;;  %v9459_v13 = vpack.c.b16 %v5710_v52, %v5710_v52 }
 0x2d9   : > { %v4389_v34 = vadd.f32 %v4320_v29, %v4130_v56  ;;  %v3708_v48 = vld [vmem:[#allocation2 + $0x70] sm:$0x1]  ;;  %6123 = vmatpush.bf16.msra.mxu1 %v7910_v26  ;;  %v7949_v26 = vld [vmem:[#allocation2 + $0x8] sm:$0xff]  }
 0x2da   : > { %v3595_v11 = vsel %vm8825_vm9, %v3587_v42, %v3594_v35  ;;  %v3662_v54 = vsel %vm9423_vm12, %v3596_v16, %v3661_v37  ;;  %v3783_v27 = vunpack.c.l.b16 %v3708_v48  ;;  %v3909_v37 = vor.u32 %v3907_v62, %v3905_v36 }
 0x2db   : > { %3658 = vst [vmem:[#allocation2 + $0x74] sm:$0xf] %v3595_v11  ;;  %4171 = vmatmul.bf16.gmra.mxu2 %v9252_v8  ;;  %4646 = vmatmul.bf16.gmra.mxu0 %v7818_v1  ;;  %v9446_v32 = vadd.f32 %v4604_v50, %v4389_v34  ;;  %v4239_v42 = vrot.slane %v9329_v40, 1  ;;  %v7819_v1 = vld [vmem:[#allocation2 + $0x58] sm:$0xff]  ;;  %v7858_v34 = vld [vmem:[%s10041_s3 + $0x170] sm:$0xff] }
 0x2dc   : > { %3663 = vst [vmem:[#allocation2 + $0x78] sm:$0x1] %v3662_v54  ;;  %4362 = vmatmul.bf16.gmra.mxu3 %v4238_v2  ;;  %v9448_v7 = vpack.c.b16 %v3783_v27, %v3783_v27  ;;  %v9488_v54 = vld [vmem:[#allocation2 + $0x10] sm:$0xff]  ;;  %5217 = vmatpush.bf16.msra.mxu2 %v7858_v34  ;;  %v7899_v34 = vld [vmem:[%s10041_s3 + $0x1e0] sm:$0xff] }
 0x2dd   : > { %v9455_v8 = vpop.f32.mrf.mxu1  ;;  %v4240_v19 = vsel %vm752_vm2, %v4237_v3, %v4239_v42  ;;  %v7880_v27 = vld [vmem:[%s10041_s3 + $0x1b0] sm:$0xff]  ;;  %v4827_v52 = vshll.u32 %v9488_v54, 16 }
 0x2de   : > { %v4132_v61 = vpop.f32.mrf.mxu2  ;;  %v3911_v38 = vshll.u32 %v9448_v7, 16  ;;  %5501 = vmatpush.bf16.msra.mxu3 %v7880_v27  ;;  %v9534_v27 = vld [vmem:[#allocation2 + $0x18] sm:$0xff] }
 0x2df   : > { %v4133_v50 = vadd.f32 %v4132_v61, %v9300_v49  ;;  %v4323_v33 = vpop.f32.mrf.mxu3  ;;  %v6059_v49 = vrot.slane %v9459_v13, 1  ;;  %v4829_v62 = vrot.slane %v4827_v52, 1 }
 0x2e0   : > { %v4609_v5 = vpop.f32.mrf.mxu0  ;;  %v3913_v60 = vrot.slane %v3911_v38, 1  ;;  %v7879_v38 = vld [vmem:[%s10041_s3 + $0x1a8] sm:$0xff] }
 0x2e1   : > { %v4390_v22 = vadd.f32 %v4323_v33, %v4133_v50  ;;  %v7901_v33 = vld [vmem:[%s10041_s3 + $0x1f0] sm:$0xff] }
 0x2e2   : > { %v7893_v59 = vld [vmem:[#allocation2 + $0x70] sm:$0xff]  ;;  %5905 = vmatpush.bf16.msra.mxu0 %v7901_v33  ;;  %5502 = vmatpush.bf16.msra.mxu3 %v7879_v38 }
 0x2e3   : > { %v9461_v18 = vadd.f32 %v4607_v14, %v4390_v22  ;;  %v7894_v28 = vld [vmem:[#allocation2 + $0x78] sm:$0xff]  ;;  %v6055_v56 = vrot.slane %v7893_v59, 1  ;;  %v3914_v14 = vsel %vm345_vm0, %v3909_v37, %v3913_v60  ;;  %v7876_v38 = vld [vmem:[%s10041_s3 + $0x190] sm:$0xff] }
 0x2e4   : > { %v6057_v35 = vrot.slane %v7894_v28, 1  ;;  %v4820_v28 = vshrl.u32 %v7949_v26, 16 }
 0x2e5   : > { %v9464_v21 = vpop.f32.mrf.mxu1  ;;  %v9474_v36 = vsel %vm752_vm2, %v6053_v20, %v6055_v56  ;;  %v4822_v20 = vshll.u32 %v7949_v26, 16 }
 0x2e6   : > { %v4134_v23 = vpop.f32.mrf.mxu2  ;;  %10063 = vst [vmem:[#allocation7_spill] sm:$0xff] %v9474_v36  ;;  %v9477_v48 = vsel %vm752_vm2, %v6055_v56, %v6057_v35 }
 0x2e7   : > { %v4135_v29 = vadd.f32 %v4134_v23, %v9325_v9  ;;  %v4325_v4 = vpop.f32.mrf.mxu3  ;;  %10064 = vst [vmem:[#allocation8_spill] sm:$0xff] %v9477_v48  ;;  %v9480_v9 = vsel %vm752_vm2, %v6057_v35, %v6059_v49  ;;  %v4824_v22 = vrot.slane %v4822_v20, 1 }
 0x2e8   : > { %v4612_v16 = vpop.f32.mrf.mxu0  ;;  %4050 = vmatmul.bf16.gmra.mxu1 %v3914_v14  ;;  %10065 = vst [vmem:[#allocation9_spill] sm:$0xff] %v9480_v9  ;;  %v7820_v14 = vld [vmem:[#allocation2 + $0x60] sm:$0xff] }
 0x2e9   : > { %v4391_v55 = vadd.f32 %v4325_v4, %v4135_v29  ;;  %v4825_v37 = vor.u32 %v4824_v22, %v4820_v28  ;;  %v4241_v29 = vrot.slane %v9372_v24, 1 }
 0x2eb   : > { %4176 = vmatmul.bf16.gmra.mxu2 %v9292_v41  ;;  %4651 = vmatmul.bf16.gmra.mxu0 %v7819_v1  ;;  %v9486_v11 = vadd.f32 %v4609_v5, %v4391_v55  ;;  %v7857_v5 = vld [vmem:[%s10041_s3 + $0x168] sm:$0xff]  ;;  %v4830_v35 = vsel %vm345_vm0, %v4825_v37, %v4829_v62  ;;  %v7856_v1 = vld [vmem:[%s10041_s3 + $0x160] sm:$0xff] }
 0x2ec   : > { %4367 = vmatmul.bf16.gmra.mxu3 %v4240_v19  ;;  %5218 = vmatpush.bf16.msra.mxu2 %v7857_v5  ;;  %v4242_v19 = vsel %vm752_vm2, %v4239_v42, %v4241_v29  ;;  %v7898_v42 = vld [vmem:[%s10041_s3 + $0x1d8] sm:$0xff]  ;;  %v7854_v5 = vld [vmem:[%s10041_s3 + $0x150] sm:$0xff] }
 0x2ed   : > { %v9493_v0 = vpop.f32.mrf.mxu1 }
 0x2ee   : > { %v4137_v2 = vpop.f32.mrf.mxu2 }
 0x2ef   : > { %v4138_v41 = vadd.f32 %v4137_v2, %v9340_v17  ;;  %v4328_v3 = vpop.f32.mrf.mxu3  ;;  %v7900_v17 = vld [vmem:[%s10041_s3 + $0x1e8] sm:$0xff]  ;;  %v7855_v2 = vld [vmem:[%s10041_s3 + $0x158] sm:$0xff] }
 0x2f0   : > { %v4614_v61 = vpop.f32.mrf.mxu0  ;;  %5906 = vmatpush.bf16.msra.mxu0 %v7900_v17  ;;  %5219 = vmatpush.bf16.msra.mxu2 %v7856_v1  ;;  %v4831_v17 = vshrl.u32 %v9488_v54, 16 }
 0x2f1   : > { %v4392_v50 = vadd.f32 %v4328_v3, %v4138_v41 }
 0x2f3   : > { %v9509_v59 = vadd.f32 %v4612_v16, %v4392_v50  ;;  %v7909_v16 = vld [vmem:[%s10041_s3 + $0x230] sm:$0xff]  ;;  %v4835_v50 = vshll.u32 %v9534_v27, 16 }
 0x2f4   : > { %6124 = vmatpush.bf16.msra.mxu1 %v7909_v16  ;;  %5907 = vmatpush.bf16.msra.mxu0 %v7899_v34  ;;  %v4243_v16 = vrot.slane %v9414_v46, 1 }
 0x2f5   : > { %v9511_v23 = vpop.f32.mrf.mxu1  ;;  %5220 = vmatpush.bf16.msra.mxu2 %v7855_v2  ;;  %v4837_v28 = vrot.slane %v4835_v50, 1  ;;  %v7895_v2 = vld [vmem:[%s10041_s3 + $0x1c0] sm:$0xff] }
 0x2f6   : > { %v4139_v60 = vpop.f32.mrf.mxu2 }
 0x2f7   : > { %v4140_v56 = vadd.f32 %v4139_v60, %v9358_v44  ;;  %v4330_v49 = vpop.f32.mrf.mxu3  ;;  %v7878_v44 = vld [vmem:[%s10041_s3 + $0x1a0] sm:$0xff]  ;;  %v7853_v60 = vld [vmem:[%s10041_s3 + $0x148] sm:$0xff] }
 0x2f8   : > { %v4617_v4 = vpop.f32.mrf.mxu0  ;;  %5005 = vmatmul.bf16.vlgmr.msrb.gmra.mxu1 %v4830_v35  ;;  %5503 = vmatpush.bf16.msra.mxu3 %v7878_v44  ;;  %v7875_v35 = vld [vmem:[%s10041_s3 + $0x188] sm:$0xff] }
 0x2f9   : > { %v4393_v55 = vadd.f32 %v4330_v49, %v4140_v56  ;;  %5908 = vmatpush.bf16.msra.mxu0 %v7898_v42  ;;  %5221 = vmatpush.bf16.msra.mxu2 %v7854_v5  ;;  %v4833_v49 = vor.u32 %v4831_v17, %v4829_v62  ;;  %v7821_v62 = vld [vmem:[#allocation2 + $0x68] sm:$0xff]  ;;  %v9590_v42 = vld [vmem:[#allocation2 + $0x20] sm:$0xff] }
 0x2fb   : > { %4181 = vmatmul.bf16.gmra.mxu2 %v9329_v40  ;;  %4656 = vmatmul.bf16.gmra.mxu0 %v7820_v14  ;;  %v9532_v26 = vadd.f32 %v4614_v61, %v4393_v55  ;;  %v7877_v40 = vld [vmem:[%s10041_s3 + $0x198] sm:$0xff]  ;;  %v4838_v44 = vsel %vm345_vm0, %v4833_v49, %v4837_v28 }
 0x2fc   : > { %4372 = vmatmul.bf16.gmra.mxu3 %v4242_v19  ;;  %v7852_v19 = vld [vmem:[%s10041_s3 + $0x140] sm:$0xff] }
 0x2fd   : > { %v9542_v41 = vpop.f32.mrf.mxu1  ;;  %5504 = vmatpush.bf16.msra.mxu3 %v7877_v40  ;;  %5222 = vmatpush.bf16.msra.mxu2 %v7853_v60  ;;  %v4244_v40 = vsel %vm752_vm2, %v4241_v29, %v4243_v16  ;;  %v7908_v29 = vld [vmem:[%s10041_s3 + $0x228] sm:$0xff] }
 0x2fe   : > { %v4142_v20 = vpop.f32.mrf.mxu2  ;;  %6125 = vmatpush.bf16.msra.mxu1 %v7908_v29  ;;  %v4847_v29 = vshrl.u32 %v9590_v42, 16 }
 0x2ff   : > { %v4143_v3 = vadd.f32 %v4142_v20, %v9380_v53  ;;  %v4333_v61 = vpop.f32.mrf.mxu3  ;;  %v7897_v53 = vld [vmem:[%s10041_s3 + $0x1d0] sm:$0xff] }
 0x300   : > { %v4619_v52 = vpop.f32.mrf.mxu0  ;;  %5909 = vmatpush.bf16.msra.mxu0 %v7897_v53  ;;  %v4839_v53 = vshrl.u32 %v9534_v27, 16 }
 0x301   : > { %v4394_v33 = vadd.f32 %v4333_v61, %v4143_v3  ;;  %5505 = vmatpush.bf16.msra.mxu3 %v7876_v38  ;;  %5223 = vmatpush.bf16.msra.mxu2 %v7852_v19 }
 0x302   : > { %v4841_v49 = vor.u32 %v4839_v53, %v4837_v28  ;;  %v9611_v28 = vld [vmem:[#allocation2 + $0x28] sm:$0xff] }
 0x303   : > { %v9558_v22 = vadd.f32 %v4617_v4, %v4394_v33  ;;  %v7896_v4 = vld [vmem:[%s10041_s3 + $0x1c8] sm:$0xff] }
 0x304   : > { %5910 = vmatpush.bf16.msra.mxu0 %v7896_v4  ;;  %v4245_v4 = vrot.slane %v9448_v7, 1 }
 0x305   : > { %v9564_v56 = vpop.f32.mrf.mxu1  ;;  %5506 = vmatpush.bf16.msra.mxu3 %v7875_v35 }
 0x306   : > { %v4144_v37 = vpop.f32.mrf.mxu2 }
 0x307   : > { %v4145_v14 = vadd.f32 %v4144_v37, %v9396_v58  ;;  %v4335_v55 = vpop.f32.mrf.mxu3  ;;  %v7874_v58 = vld [vmem:[%s10041_s3 + $0x180] sm:$0xff] }
 0x308   : > { %v4622_v1 = vpop.f32.mrf.mxu0  ;;  %5010 = vmatmul.bf16.gmra.mxu1 %v4838_v44  ;;  %5911 = vmatpush.bf16.msra.mxu0 %v7895_v2 }
 0x309   : > { %v4395_v34 = vadd.f32 %v4335_v55, %v4145_v14  ;;  %5507 = vmatpush.bf16.msra.mxu3 %v7874_v58 }
 0x30b   : > { %4186 = vmatmul.bf16.gmra.mxu2 %v9372_v24  ;;  %4661 = vmatmul.bf16.gmra.mxu0 %v7821_v62  ;;  %v9588_v20 = vadd.f32 %v4619_v52, %v4395_v34  ;;  %v4843_v24 = vshll.u32 %v9590_v42, 16  ;;  %v7822_v34 = vld [vmem:[#allocation2 + $0x70] sm:$0xff] }
 0x30c   : > { %4377 = vmatmul.bf16.gmra.mxu3 %v4244_v40 }
 0x30d   : > { %v9592_v61 = vpop.f32.mrf.mxu1  ;;  %v4845_v17 = vrot.slane %v4843_v24, 1 }
 0x30e   : > { %v4147_v3 = vpop.f32.mrf.mxu2 }
 0x30f   : > { %v4148_v50 = vadd.f32 %v4147_v3, %v9420_v12  ;;  %v4338_v33 = vpop.f32.mrf.mxu3  ;;  %v4846_v55 = vsel %vm345_vm0, %v4841_v49, %v4845_v17  ;;  %v4851_v3 = vshll.u32 %v9611_v28, 16 }
 0x310   : > { %v4624_v5 = vpop.f32.mrf.mxu0 }
 0x311   : > { %v4396_v38 = vadd.f32 %v4338_v33, %v4148_v50  ;;  %v7950_v33 = vld [vmem:[#allocation2 + $0x8] sm:$0xf0]  ;;  %v4853_v53 = vrot.slane %v4851_v3, 1 }
 0x313   : > { %v9599_v52 = vadd.f32 %v4622_v1, %v4396_v38  ;;  %v4246_v1 = vsel %vm752_vm2, %v4243_v16, %v4245_v4  ;;  %v8035_v16 = vld [vmem:[#allocation2 + $0x18] sm:$0xff]  ;;  %v5126_v4 = vrot.slane %v9488_v54, 1 }
 0x314   : > { %v5734_v24 = vshll.u32 %v8035_v16, 16 }
 0x315   : > { %v9602_v37 = vpop.f32.mrf.mxu1 }
 0x316   : > { %v4149_v60 = vpop.f32.mrf.mxu2 }
 0x317   : > { %v4150_v12 = vadd.f32 %v4149_v60, %v9455_v8  ;;  %v4340_v35 = vpop.f32.mrf.mxu3  ;;  %v7953_v8 = vld [vmem:[#allocation2 + $0x10] sm:$0xff]  }
 0x318   : > { %v4627_v14 = vpop.f32.mrf.mxu0  ;;  %5015 = vmatmul.bf16.gmra.mxu1 %v4846_v55  ;;  %v5729_v50 = vshll.u32 %v7953_v8, 16  ;;  %v5727_v55 = vshrl.u32 %v7953_v8, 16 }
 0x319   : > { %v4397_v44 = vadd.f32 %v4340_v35, %v4150_v12 }
 0x31a   : > { %v5731_v49 = vrot.slane %v5729_v50, 1  ;;  %v7860_v50 = vld [vmem:[#allocation2 + $0x10] sm:$0xff] }
 0x31b   : > { %4191 = vmatmul.bf16.gmra.mxu2 %v9414_v46  ;;  %4666 = vmatmul.bf16.gmra.mxu0 %v7822_v34  ;;  %v9609_v62 = vadd.f32 %v4624_v5, %v4397_v44  ;;  %v7951_v5 = vld [vmem:[#allocation2 + $0x8] sm:$0xe]  ;;  %v5736_v44 = vrot.slane %v5734_v24, 1 }
 0x31c   : > { %4382 = vmatmul.bf16.gmra.mxu3 %v4246_v1  ;;  %v7952_v60 = vor.u32 %v7951_v5, %v7950_v33 }
 0x31d   : > { %v9613_v58 = vpop.f32.mrf.mxu1 }
 0x31e   : > { %v4152_v19 = vpop.f32.mrf.mxu2 }
 0x31f   : > { %v4153_v7 = vadd.f32 %v4152_v19, %v9464_v21  ;;  %v4343_v2 = vpop.f32.mrf.mxu3  ;;  %v4849_v21 = vor.u32 %v4847_v29, %v4845_v17  ;;  %v9629_v17 = vld [vmem:[#allocation2 + $0x30] sm:$0xff] }
 0x320   : > { %v4629_v40 = vpop.f32.mrf.mxu0 }
 0x321   : > { %v4398_v46 = vadd.f32 %v4343_v2, %v4153_v7  ;;  %v5125_v7 = vrot.slane %v7952_v60, 1  ;;  %v5732_v2 = vor.u32 %v5731_v49, %v5727_v55  ;;  %v4859_v60 = vshll.u32 %v9629_v17, 16 }
 0x323   : > { %v9617_v38 = vadd.f32 %v4627_v14, %v4398_v46  ;;  %v4854_v14 = vsel %vm345_vm0, %v4849_v21, %v4853_v53  ;;  %v5127_v3 = vsel %vm752_vm2, %v5125_v7, %v5126_v4  ;;  %v5737_v33 = vsel %vm345_vm0, %v5732_v2, %v5736_v44  ;;  %v8036_v21 = vld [vmem:[#allocation2 + $0x20] sm:$0xff] }
 0x324   : > { %v5128_v2 = vrot.slane %v9534_v27, 1  ;;  %v9650_v27 = vld [vmem:[#allocation2 + $0x38] sm:$0xff] }
 0x325   : > { %v9620_v35 = vpop.f32.mrf.mxu1 }
 0x326   : > { %v4154_v12 = vpop.f32.mrf.mxu2 }
 0x327   : > { %v4155_v34 = vadd.f32 %v4154_v12, %v9493_v0  ;;  %v4345_v1 = vpop.f32.mrf.mxu3  ;;  %v7907_v12 = vld [vmem:[%s10041_s3 + $0x220] sm:$0xff] }
 0x328   : > { %v4632_v19 = vpop.f32.mrf.mxu0  ;;  %5020 = vmatmul.bf16.gmra.mxu1 %v4854_v14 }
 0x329   : > { %v4399_v46 = vadd.f32 %v4345_v1, %v4155_v34  ;;  %6126 = vmatpush.bf16.msra.mxu1 %v7907_v12  ;;  %v4855_v34 = vshrl.u32 %v9611_v28, 16  ;;  %v4861_v1 = vrot.slane %v4859_v60, 1  ;;  %v7861_v60 = vld [vmem:[#allocation2 + $0x18] sm:$0xff] }
 0x32b   : > { %5224 = vmatmul.bf16.vlgmr.msra.gmra.mxu2 %v5127_v3  ;;  %5912 = vmatmul.bf16.vlgmr.msra.gmra.mxu0 %v5737_v33  ;;  %v9627_v54 = vadd.f32 %v4629_v40, %v4399_v46  ;;  %v5742_v40 = vshll.u32 %v8036_v21, 16  ;;  %v5738_v46 = vshrl.u32 %v8035_v16, 16 }
 0x32c   : > { %5508 = vmatmul.bf16.vlgmr.msra.gmra.mxu3 %v7860_v50 }
 0x32d   : > { %v9631_v8 = vpop.f32.mrf.mxu1  ;;  %v5744_v3 = vrot.slane %v5742_v40, 1 }
 0x32e   : > { %v4157_v0 = vpop.f32.mrf.mxu2 }
 0x32f   : > { %v4158_v24 = vadd.f32 %v4157_v0, %v9511_v23  ;;  %v4348_v5 = vpop.f32.mrf.mxu3  ;;  %v4857_v23 = vor.u32 %v4855_v34, %v4853_v53 }
 0x330   : > { %v4634_v29 = vpop.f32.mrf.mxu0 }
 0x331   : > { %v4400_v49 = vadd.f32 %v4348_v5, %v4158_v24  ;;  %v4862_v24 = vsel %vm345_vm0, %v4857_v23, %v4861_v1  ;;  %v5740_v5 = vor.u32 %v5738_v46, %v5736_v44  ;;  %v8037_v23 = vld [vmem:[#allocation2 + $0x28] sm:$0xff] }
 0x332   : > { %v5750_v46 = vshll.u32 %v8037_v23, 16 }
 0x333   : > { %v9638_v55 = vadd.f32 %v4632_v19, %v4400_v49  ;;  %v5129_v49 = vsel %vm752_vm2, %v5126_v4, %v5128_v2  ;;  %v5745_v12 = vsel %vm345_vm0, %v5740_v5, %v5744_v3 }
 0x335   : > { %v9641_v7 = vpop.f32.mrf.mxu1 }
 0x336   : > { %v4159_v14 = vpop.f32.mrf.mxu2 }
 0x337   : > { %v4160_v50 = vadd.f32 %v4159_v14, %v9542_v41  ;;  %v4350_v33 = vpop.f32.mrf.mxu3  ;;  %v4867_v14 = vshll.u32 %v9650_v27, 16 }
 0x338   : > { %v4637_v0 = vpop.f32.mrf.mxu0  ;;  %5025 = vmatmul.bf16.gmra.mxu1 %v4862_v24 }
 0x339   : > { %v4401_v19 = vadd.f32 %v4350_v33, %v4160_v50  ;;  %v4869_v33 = vrot.slane %v4867_v14, 1  ;;  %v7906_v14 = vld [vmem:[%s10041_s3 + $0x218] sm:$0xff] }
 0x33a   : > { %6127 = vmatpush.bf16.msra.mxu1 %v7906_v14 }
 0x33b   : > { %5229 = vmatmul.bf16.gmra.mxu2 %v5129_v49  ;;  %5917 = vmatmul.bf16.gmra.mxu0 %v5745_v12  ;;  %v9648_v53 = vadd.f32 %v4634_v29, %v4401_v19  ;;  %v4863_v29 = vshrl.u32 %v9629_v17, 16  ;;  %v5130_v49 = vrot.slane %v9590_v42, 1 }
 0x33c   : > { %5513 = vmatmul.bf16.gmra.mxu3 %v7861_v60  ;;  %v5746_v60 = vshrl.u32 %v8036_v21, 16 }
 0x33d   : > { %v9652_v16 = vpop.f32.mrf.mxu1  ;;  %v4865_v19 = vor.u32 %v4863_v29, %v4861_v1  ;;  %v7862_v1 = vld [vmem:[#allocation2 + $0x20] sm:$0xff] }
 0x33e   : > { %v4162_v41 = vpop.f32.mrf.mxu2 }
 0x33f   : > { %v4163_v40 = vadd.f32 %v4162_v41, %v9564_v56  ;;  %v4353_v44 = vpop.f32.mrf.mxu3  ;;  %v5752_v56 = vrot.slane %v5750_v46, 1 }
 0x340   : > { %v4639_v34 = vpop.f32.mrf.mxu0 }
 0x341   : > { %v4402_v4 = vadd.f32 %v4353_v44, %v4163_v40  ;;  %v4870_v40 = vsel %vm345_vm0, %v4865_v19, %v4869_v33  ;;  %v5748_v44 = vor.u32 %v5746_v60, %v5744_v3 }
 0x343   : > { %v9656_v50 = vadd.f32 %v4637_v0, %v4402_v4  ;;  %v5131_v4 = vsel %vm752_vm2, %v5128_v2, %v5130_v49  ;;  %v5753_v42 = vsel %vm345_vm0, %v5748_v44, %v5752_v56 }
 0x345   : > { %v9659_v5 = vpop.f32.mrf.mxu1 }
 0x346   : > { %v4164_v24 = vpop.f32.mrf.mxu2 }
 0x347   : > { %v4165_v12 = vadd.f32 %v4164_v24, %v9592_v61  ;;  %v4355_v41 = vpop.f32.mrf.mxu3  ;;  %v9671_v61 = vld [vmem:[#allocation2 + $0x40] sm:$0xff] }
 0x348   : > { %v4642_v30 = vpop.f32.mrf.mxu0  ;;  %5030 = vmatmul.bf16.gmra.mxu1 %v4870_v40  ;;  %v4875_v2 = vshll.u32 %v9671_v61, 16 }
 0x349   : > { %v4403_v0 = vadd.f32 %v4355_v41, %v4165_v12  ;;  %v8038_v12 = vld [vmem:[#allocation2 + $0x30] sm:$0xff] }
 0x34a   : > { %v5758_v41 = vshll.u32 %v8038_v12, 16  ;;  %v4877_v44 = vrot.slane %v4875_v2, 1  ;;  %v7863_v2 = vld [vmem:[#allocation2 + $0x28] sm:$0xff] }
 0x34b   : > { %5234 = vmatmul.bf16.gmra.mxu2 %v5131_v4  ;;  %5922 = vmatmul.bf16.gmra.mxu0 %v5753_v42  ;;  %v9669_v21 = vadd.f32 %v4639_v34, %v4403_v0  ;;  %v4871_v34 = vshrl.u32 %v9650_v27, 16  ;;  %v5754_v42 = vshrl.u32 %v8037_v23, 16 }
 0x34c   : > { %5518 = vmatmul.bf16.gmra.mxu3 %v7862_v1  ;;  %v5132_v1 = vrot.slane %v9611_v28, 1  ;;  %v9689_v28 = vld [vmem:[#allocation2 + $0x48] sm:$0xff] }
 0x34d   : > { %v9673_v46 = vpop.f32.mrf.mxu1  ;;  %v4873_v14 = vor.u32 %v4871_v34, %v4869_v33  ;;  %v4883_v34 = vshll.u32 %v9689_v28, 16 }
 0x34e   : > { %v4167_v3 = vpop.f32.mrf.mxu2 }
 0x34f   : > { %v4168_v29 = vadd.f32 %v4167_v3, %v9602_v37  ;;  %v4358_v24 = vpop.f32.mrf.mxu3  ;;  %v5760_v37 = vrot.slane %v5758_v41, 1 }
 0x350   : > { %v4644_v19 = vpop.f32.mrf.mxu0 }
 0x351   : > { %v4404_v60 = vadd.f32 %v4358_v24, %v4168_v29  ;;  %v4878_v29 = vsel %vm345_vm0, %v4873_v14, %v4877_v44  ;;  %v5756_v24 = vor.u32 %v5754_v42, %v5752_v56 }
 0x353   : > { %v9677_v40 = vadd.f32 %v4642_v30, %v4404_v60  ;;  %v5133_v60 = vsel %vm752_vm2, %v5130_v49, %v5132_v1  ;;  %v5761_v36 = vsel %vm345_vm0, %v5756_v24, %v5760_v37 }
 0x355   : > { %v9680_v4 = vpop.f32.mrf.mxu1 }
 0x356   : > { %v4169_v0 = vpop.f32.mrf.mxu2 }
 0x357   : > { %v4170_v3 = vadd.f32 %v4169_v0, %v9613_v58  ;;  %v4360_v9 = vpop.f32.mrf.mxu3  ;;  %v8039_v0 = vld [vmem:[#allocation2 + $0x38] sm:$0xff] }
 0x358   : > { %v4647_v48 = vpop.f32.mrf.mxu0  ;;  %5035 = vmatmul.bf16.gmra.mxu1 %v4878_v29  ;;  %v5766_v14 = vshll.u32 %v8039_v0, 16 }
 0x359   : > { %v4405_v30 = vadd.f32 %v4360_v9, %v4170_v3 }
 0x35b   : > { %5239 = vmatmul.bf16.gmra.mxu2 %v5133_v60  ;;  %5927 = vmatmul.bf16.gmra.mxu0 %v5761_v36  ;;  %v9687_v33 = vadd.f32 %v4644_v19, %v4405_v30  ;;  %v4879_v36 = vshrl.u32 %v9671_v61, 16  ;;  %v4885_v19 = vrot.slane %v4883_v34, 1  ;;  %v5134_v30 = vrot.slane %v9629_v17, 1  ;;  %v7905_v34 = vld [vmem:[%s10041_s3 + $0x210] sm:$0xff] }
 0x35c   : > { %5523 = vmatmul.bf16.gmra.mxu3 %v7863_v2  ;;  %v5762_v60 = vshrl.u32 %v8038_v12, 16  ;;  %6128 = vmatpush.bf16.msra.mxu1 %v7905_v34 }
 0x35d   : > { %v9691_v23 = vpop.f32.mrf.mxu1  ;;  %v4881_v24 = vor.u32 %v4879_v36, %v4877_v44  ;;  %v7864_v44 = vld [vmem:[#allocation2 + $0x30] sm:$0xff] }
 0x35e   : > { %v4172_v58 = vpop.f32.mrf.mxu2 }
 0x35f   : > { %v4173_v41 = vadd.f32 %v4172_v58, %v9620_v35  ;;  %v4363_v56 = vpop.f32.mrf.mxu3  ;;  %v5768_v35 = vrot.slane %v5766_v14, 1 }
 0x360   : > { %v4649_v9 = vpop.f32.mrf.mxu0 }
 0x361   : > { %v4406_v49 = vadd.f32 %v4363_v56, %v4173_v41  ;;  %v4886_v41 = vsel %vm345_vm0, %v4881_v24, %v4885_v19  ;;  %v5764_v56 = vor.u32 %v5762_v60, %v5760_v37 }
 0x363   : > { %v9695_v42 = vadd.f32 %v4647_v48, %v4406_v49  ;;  %v5135_v49 = vsel %vm752_vm2, %v5132_v1, %v5134_v30  ;;  %v5769_v17 = vsel %vm345_vm0, %v5764_v56, %v5768_v35 }
 0x365   : > { %v9698_v29 = vpop.f32.mrf.mxu1 }
 0x366   : > { %v4174_v3 = vpop.f32.mrf.mxu2 }
 0x367   : > { %v4175_v2 = vadd.f32 %v4174_v3, %v9631_v8  ;;  %v4365_v58 = vpop.f32.mrf.mxu3  ;;  %v9710_v8 = vld [vmem:[#allocation2 + $0x50] sm:$0xff] }
 0x368   : > { %v4652_v43 = vpop.f32.mrf.mxu0  ;;  %5040 = vmatmul.bf16.gmra.mxu1 %v4886_v41  ;;  %v4891_v1 = vshll.u32 %v9710_v8, 16 }
 0x369   : > { %v4407_v48 = vadd.f32 %v4365_v58, %v4175_v2  ;;  %v8040_v2 = vld [vmem:[#allocation2 + $0x40] sm:$0xff] }
 0x36a   : > { %v5774_v58 = vshll.u32 %v8040_v2, 16  ;;  %v4893_v56 = vrot.slane %v4891_v1, 1 }
 0x36b   : > { %5244 = vmatmul.bf16.gmra.mxu2 %v5135_v49  ;;  %5932 = vmatmul.bf16.gmra.mxu0 %v5769_v17  ;;  %v9708_v12 = vadd.f32 %v4649_v9, %v4407_v48  ;;  %v4887_v9 = vshrl.u32 %v9689_v28, 16  ;;  %v5770_v17 = vshrl.u32 %v8039_v0, 16 }
 0x36c   : > { %5528 = vmatmul.bf16.gmra.mxu3 %v7864_v44  ;;  %v5136_v44 = vrot.slane %v9650_v27, 1  ;;  %v5776_v47 = vrot.slane %v5774_v58, 1 }
 0x36d   : > { %v9712_v14 = vpop.f32.mrf.mxu1  ;;  %v4889_v34 = vor.u32 %v4887_v9, %v4885_v19 }
 0x36e   : > { %v4177_v37 = vpop.f32.mrf.mxu2  ;;  %v5137_v1 = vsel %vm752_vm2, %v5134_v30, %v5136_v44 }
 0x36f   : > { %v4178_v36 = vadd.f32 %v4177_v37, %v9641_v7  ;;  %v4368_v3 = vpop.f32.mrf.mxu3 }
 0x370   : > { %v4654_v24 = vpop.f32.mrf.mxu0 }
 0x371   : > { %v4408_v60 = vadd.f32 %v4368_v3, %v4178_v36  ;;  %v5772_v3 = vor.u32 %v5770_v17, %v5768_v35 }
 0x373   : > { %v9716_v41 = vadd.f32 %v4652_v43, %v4408_v60  ;;  %v4894_v43 = vsel %vm345_vm0, %v4889_v34, %v4893_v56  ;;  %v5777_v19 = vsel %vm345_vm0, %v5772_v3, %v5776_v47  ;;  %v8041_v34 = vld [vmem:[#allocation2 + $0x48] sm:$0xff]  ;;  %v5138_v3 = vrot.slane %v9671_v61, 1 }
 0x375   : > { %v5006_v49 = vpop.f32.mrf.mxu1 }
 0x376   : > { %v4179_v48 = vpop.f32.mrf.mxu2  ;;  %v9722_v39 = vadd.f32 %v5006_v49, %v9416_v15 }
 0x377   : > { %v4180_v7 = vadd.f32 %v4179_v48, %v9652_v16  ;;  %v4370_v37 = vpop.f32.mrf.mxu3  ;;  %v9729_v16 = vld [vmem:[#allocation2 + $0x58] sm:$0xff] }
 0x378   : > { %v4657_v36 = vpop.f32.mrf.mxu0  ;;  %5045 = vmatmul.bf16.gmra.mxu1 %v4894_v43  ;;  %v4899_v30 = vshll.u32 %v9729_v16, 16 }
 0x379   : > { %v4409_v60 = vadd.f32 %v4370_v37, %v4180_v7  ;;  %v4895_v7 = vshrl.u32 %v9710_v8, 16 }
 0x37b   : > { %5249 = vmatmul.bf16.gmra.mxu2 %v5137_v1  ;;  %5937 = vmatmul.bf16.gmra.mxu0 %v5777_v19  ;;  %v9727_v27 = vadd.f32 %v4654_v24, %v4409_v60  ;;  %v7904_v24 = vld [vmem:[%s10041_s3 + $0x208] sm:$0xff]  ;;  %v5778_v60 = vshrl.u32 %v8040_v2, 16 }
 0x37c   : > { %5533 = vmatmul.bf16.gmra.mxu3 %v7865_v10  ;;  %v5782_v10 = vshll.u32 %v8041_v34, 16  ;;  %6129 = vmatpush.bf16.msra.mxu1 %v7904_v24  ;;  %v7866_v24 = vld [vmem:[#allocation2 + $0x40] sm:$0xff] }
 0x37d   : > { %v5008_v0 = vpop.f32.mrf.mxu1 }
 0x37e   : > { %v4182_v15 = vpop.f32.mrf.mxu2  ;;  %v9733_v35 = vadd.f32 %v5008_v0, %v9446_v32  ;;  %v4897_v32 = vor.u32 %v4895_v7, %v4893_v56  ;;  %v5784_v1 = vrot.slane %v5782_v10, 1 }
 0x37f   : > { %v4183_v58 = vadd.f32 %v4182_v15, %v9659_v5  ;;  %v4373_v9 = vpop.f32.mrf.mxu3  ;;  %v4901_v5 = vrot.slane %v4899_v30, 1  ;;  %v5139_v30 = vsel %vm752_vm2, %v5136_v44, %v5138_v3 }
 0x380   : > { %v4659_v48 = vpop.f32.mrf.mxu0 }
 0x381   : > { %v4410_v49 = vadd.f32 %v4373_v9, %v4183_v58  ;;  %v5780_v9 = vor.u32 %v5778_v60, %v5776_v47 }
 0x383   : > { %v9739_v17 = vadd.f32 %v4657_v36, %v4410_v49  ;;  %v4902_v36 = vsel %vm345_vm0, %v4897_v32, %v4901_v5  ;;  %v5785_v56 = vsel %vm345_vm0, %v5780_v9, %v5784_v1  ;;  %v8042_v32 = vld [vmem:[#allocation2 + $0x50] sm:$0xff] }
 0x384   : > { %v5790_v60 = vshll.u32 %v8042_v32, 16 }
 0x385   : > { %v5011_v43 = vpop.f32.mrf.mxu1 }
 0x386   : > { %v4184_v37 = vpop.f32.mrf.mxu2  ;;  %v9745_v0 = vadd.f32 %v5011_v43, %v9461_v18 }
 0x387   : > { %v4185_v19 = vadd.f32 %v4184_v37, %v9673_v46  ;;  %v4375_v15 = vpop.f32.mrf.mxu3  ;;  %v9752_v46 = vld [vmem:[#allocation2 + $0x60] sm:$0xff] }
 0x388   : > { %v4662_v58 = vpop.f32.mrf.mxu0  ;;  %5050 = vmatmul.bf16.gmra.mxu1 %v4902_v36  ;;  %v4907_v44 = vshll.u32 %v9752_v46, 16 }
 0x389   : > { %v4411_v49 = vadd.f32 %v4375_v15, %v4185_v19 }
 0x38a   : > { %v4909_v15 = vrot.slane %v4907_v44, 1 }
 0x38b   : > { %5254 = vmatmul.bf16.gmra.mxu2 %v5139_v30  ;;  %5942 = vmatmul.bf16.gmra.mxu0 %v5785_v56  ;;  %v9750_v61 = vadd.f32 %v4659_v48, %v4411_v49  ;;  %v4903_v48 = vshrl.u32 %v9729_v16, 16  ;;  %v5786_v30 = vshrl.u32 %v8041_v34, 16 }
 0x38c   : > { %5538 = vmatmul.bf16.gmra.mxu3 %v7866_v24  ;;  %v5792_v24 = vrot.slane %v5790_v60, 1 }
 0x38d   : > { %v5013_v2 = vpop.f32.mrf.mxu1  ;;  %v4905_v49 = vor.u32 %v4903_v48, %v4901_v5 }
 0x38e   : > { %v4187_v18 = vpop.f32.mrf.mxu2  ;;  %v9756_v47 = vadd.f32 %v5013_v2, %v9486_v11 }
 0x38f   : > { %v4188_v10 = vadd.f32 %v4187_v18, %v9680_v4  ;;  %v4378_v7 = vpop.f32.mrf.mxu3  ;;  %v5140_v4 = vrot.slane %v9689_v28, 1 }
 0x390   : > { %v4664_v37 = vpop.f32.mrf.mxu0 }
 0x391   : > { %v4412_v43 = vadd.f32 %v4378_v7, %v4188_v10  ;;  %v5788_v10 = vor.u32 %v5786_v30, %v5784_v1  ;;  %v5141_v44 = vsel %vm752_vm2, %v5138_v3, %v5140_v4 }
 0x393   : > { %v9759_v19 = vadd.f32 %v4662_v58, %v4412_v43  ;;  %v4910_v58 = vsel %vm345_vm0, %v4905_v49, %v4909_v15  ;;  %v7867_v43 = vld [vmem:[#allocation2 + $0x48] sm:$0xff]  ;;  %v5793_v5 = vsel %vm345_vm0, %v5788_v10, %v5792_v24  ;;  %v8043_v49 = vld [vmem:[#allocation2 + $0x58] sm:$0xff] }
 0x394   : > { %v5798_v30 = vshll.u32 %v8043_v49, 16 }
 0x395   : > { %v5016_v9 = vpop.f32.mrf.mxu1 }
 0x396   : > { %v4189_v36 = vpop.f32.mrf.mxu2  ;;  %v9765_v18 = vadd.f32 %v5016_v9, %v9509_v59 }
 0x397   : > { %v4190_v11 = vadd.f32 %v4189_v36, %v9691_v23  ;;  %v4380_v56 = vpop.f32.mrf.mxu3  ;;  %v9772_v23 = vld [vmem:[#allocation2 + $0x68] sm:$0xff] }
 0x398   : > { %v4667_v2 = vpop.f32.mrf.mxu0  ;;  %5055 = vmatmul.bf16.gmra.mxu1 %v4910_v58  ;;  %v4915_v3 = vshll.u32 %v9772_v23, 16 }
 0x399   : > { %v4413_v7 = vadd.f32 %v4380_v56, %v4190_v11  ;;  %v4911_v56 = vshrl.u32 %v9752_v46, 16 }
 0x39b   : > { %5259 = vmatmul.bf16.gmra.mxu2 %v5141_v44  ;;  %5947 = vmatmul.bf16.gmra.mxu0 %v5793_v5  ;;  %v9770_v28 = vadd.f32 %v4664_v37, %v4413_v7  ;;  %v7903_v37 = vld [vmem:[%s10041_s3 + $0x200] sm:$0xff]  ;;  %v5142_v7 = vrot.slane %v9710_v8, 1  ;;  %v5794_v44 = vshrl.u32 %v8042_v32, 16 }
 0x39c   : > { %5543 = vmatmul.bf16.gmra.mxu3 %v7867_v43  ;;  %6130 = vmatpush.bf16.msra.mxu1 %v7903_v37  ;;  %v5800_v43 = vrot.slane %v5798_v30, 1 }
 0x39d   : > { %v5018_v34 = vpop.f32.mrf.mxu1 }
 0x39e   : > { %v4192_v59 = vpop.f32.mrf.mxu2  ;;  %v9776_v1 = vadd.f32 %v5018_v34, %v9532_v26  ;;  %v4913_v26 = vor.u32 %v4911_v56, %v4909_v15 }
 0x39f   : > { %v4193_v60 = vadd.f32 %v4192_v59, %v9698_v29  ;;  %v4383_v48 = vpop.f32.mrf.mxu3  ;;  %v4917_v29 = vrot.slane %v4915_v3, 1  ;;  %v5143_v3 = vsel %vm752_vm2, %v5140_v4, %v5142_v7 }
 0x3a0   : > { %v4669_v9 = vpop.f32.mrf.mxu0 }
 0x3a1   : > { %v4414_v36 = vadd.f32 %v4383_v48, %v4193_v60  ;;  %v4918_v60 = vsel %vm345_vm0, %v4913_v26, %v4917_v29 }
 0x3a3   : > { %v9782_v11 = vadd.f32 %v4667_v2, %v4414_v36  ;;  %v5796_v2 = vor.u32 %v5794_v44, %v5792_v24  ;;  %v7868_v36 = vld [vmem:[#allocation2 + $0x50] sm:$0xff] }
 0x3a5   : > { %v5021_v10 = vpop.f32.mrf.mxu1  ;;  %v5801_v15 = vsel %vm345_vm0, %v5796_v2, %v5800_v43 }
 0x3a6   : > { %v4194_v58 = vpop.f32.mrf.mxu2  ;;  %v9788_v34 = vadd.f32 %v5021_v10, %v9558_v22  ;;  %v8044_v10 = vld [vmem:[#allocation2 + $0x60] sm:$0xff] }
 0x3a7   : > { %v4195_v5 = vadd.f32 %v4194_v58, %v9712_v14  ;;  %v4385_v59 = vpop.f32.mrf.mxu3  ;;  %v9795_v14 = vld [vmem:[#allocation2 + $0x70] sm:$0xff]  ;;  %v5806_v26 = vshll.u32 %v8044_v10, 16 }
 0x3a8   : > { %5060 = vmatmul.bf16.gmra.mxu1 %v4918_v60  ;;  %v5913_v37 = vpop.f32.mrf.mxu0  ;;  %v4923_v4 = vshll.u32 %v9795_v14, 16  ;;  %v4728_v60 = vld [vmem:[#allocation2 + $0x78] sm:$0x1] }
 0x3a9   : > { %v4415_v48 = vadd.f32 %v4385_v59, %v4195_v5 }
 0x3aa   : > { %v4925_v5 = vrot.slane %v4923_v4, 1 }
 0x3ab   : > { %5264 = vmatmul.bf16.gmra.mxu2 %v5143_v3  ;;  %5952 = vmatmul.bf16.gmra.mxu0 %v5801_v15  ;;  %v9793_v8 = vadd.f32 %v4669_v9, %v4415_v48  ;;  %v4919_v9 = vshrl.u32 %v9772_v23, 16 }
 0x3ac   : > { %5548 = vmatmul.bf16.gmra.mxu3 %v7868_v36  ;;  %v5802_v36 = vshrl.u32 %v8043_v49, 16 }
 0x3ad   : > { %v5023_v32 = vpop.f32.mrf.mxu1  ;;  %v4921_v3 = vor.u32 %v4919_v9, %v4917_v29 }
 0x3ae   : > { %v5225_v22 = vpop.f32.mrf.mxu2  ;;  %v9799_v56 = vadd.f32 %v5023_v32, %v9588_v20  ;;  %v5808_v20 = vrot.slane %v5806_v26, 1 }
 0x3af   : > { %v5295_v30 = vadd.f32 %v5225_v22, %v9722_v39  ;;  %v5509_v24 = vpop.f32.mrf.mxu3  ;;  %v5144_v39 = vrot.slane %v9729_v16, 1 }
 0x3b0   : > { %10066 = vst [vmem:[#allocation10_spill] sm:$0xff] %v9799_v56  ;;  %v5915_v59 = vpop.f32.mrf.mxu0  ;;  %v7869_v56 = vld [vmem:[#allocation2 + $0x58] sm:$0xff] }
 0x3b1   : > { %v5579_v58 = vadd.f32 %v5509_v24, %v5295_v30  ;;  %v5804_v30 = vor.u32 %v5802_v36, %v5800_v43  ;;  %v4803_v24 = vunpack.c.l.b16 %v4728_v60 }
 0x3b3   : > { %v9802_v44 = vadd.f32 %v5913_v37, %v5579_v58  ;;  %v4926_v37 = vsel %vm345_vm0, %v4921_v3, %v4925_v5  ;;  %v5145_v58 = vsel %vm752_vm2, %v5142_v7, %v5144_v39  ;;  %v5809_v29 = vsel %vm345_vm0, %v5804_v30, %v5808_v20  ;;  %v8045_v3 = vld [vmem:[#allocation2 + $0x68] sm:$0xff] }
 0x3b4   : > { %v5810_v30 = vshrl.u32 %v8044_v10, 16  ;;  %v7954_v10 = vld [vmem:[#allocation2 + $0x10] sm:$0xf0] }
 0x3b5   : > { %v5026_v48 = vpop.f32.mrf.mxu1 }
 0x3b6   : > { %v5227_v2 = vpop.f32.mrf.mxu2  ;;  %v9808_v32 = vadd.f32 %v5026_v48, %v9599_v52  ;;  %v4927_v48 = vshrl.u32 %v9795_v14, 16 }
 0x3b7   : > { %v5296_v15 = vadd.f32 %v5227_v2, %v9733_v35  ;;  %v5511_v22 = vpop.f32.mrf.mxu3  ;;  %v9815_v35 = vpack.c.b16 %v4803_v24, %v4803_v24 }
 0x3b8   : > { %5065 = vmatmul.bf16.gmra.mxu1 %v4926_v37  ;;  %v5918_v60 = vpop.f32.mrf.mxu0 }
 0x3b9   : > { %v5580_v4 = vadd.f32 %v5511_v22, %v5296_v15  ;;  %v4931_v7 = vshll.u32 %v9815_v35, 16 }
 0x3bb   : > { %5269 = vmatmul.bf16.gmra.mxu2 %v5145_v58  ;;  %5957 = vmatmul.bf16.gmra.mxu0 %v5809_v29  ;;  %v9813_v16 = vadd.f32 %v5915_v59, %v5580_v4  ;;  %v5814_v59 = vshll.u32 %v8045_v3, 16  ;;  %v4933_v15 = vrot.slane %v4931_v7, 1  ;;  %v7955_v7 = vld [vmem:[#allocation2 + $0x10] sm:$0xe] }
 0x3bc   : > { %5553 = vmatmul.bf16.gmra.mxu3 %v7869_v56  ;;  %v4929_v56 = vor.u32 %v4927_v48, %v4925_v5 }
 0x3bd   : > { %v5028_v49 = vpop.f32.mrf.mxu1  ;;  %v5816_v24 = vrot.slane %v5814_v59, 1 }
 0x3be   : > { %v5230_v52 = vpop.f32.mrf.mxu2  ;;  %v9819_v9 = vadd.f32 %v5028_v49, %v9609_v62  ;;  %v4934_v29 = vsel %vm345_vm0, %v4929_v56, %v4933_v15  ;;  %v5818_v15 = vshrl.u32 %v8045_v3, 16 }
 0x3bf   : > { %v5297_v26 = vadd.f32 %v5230_v52, %v9745_v0  ;;  %v5514_v43 = vpop.f32.mrf.mxu3  ;;  %v5146_v0 = vrot.slane %v9752_v46, 1  ;;  %v5812_v52 = vor.u32 %v5810_v30, %v5808_v20  ;;  %v7956_v20 = vor.u32 %v7955_v7, %v7954_v10 }
 0x3c0   : > { %v10067_v30 = vrot.slane %v9068_v51, 1 }
 0x3c1   : > { %v5581_v2 = vadd.f32 %v5514_v43, %v5297_v26  ;;  %v5920_v26 = vpop.f32.mrf.mxu0  ;;  %v5147_v5 = vsel %vm752_vm2, %v5144_v39, %v5146_v0  ;;  %v7870_v43 = vld [vmem:[#allocation2 + $0x60] sm:$0xff]  ;;  %v6032_v56 = vrot.slane %v7956_v20, 1  ;;  %v5148_v39 = vrot.slane %v9772_v23, 1 }
 0x3c3   : > { %v9823_v36 = vadd.f32 %v5918_v60, %v5581_v2  ;;  %v5817_v60 = vsel %vm345_vm0, %v5812_v52, %v5816_v24  ;;  %v8046_v2 = vld [vmem:[#allocation2 + $0x70] sm:$0xff] }
 0x3c4   : > { %v5822_v48 = vshll.u32 %v8046_v2, 16 }
 0x3c5   : > { %v5031_v37 = vpop.f32.mrf.mxu1 }
 0x3c6   : > { %v5232_v22 = vpop.f32.mrf.mxu2  ;;  %v9828_v4 = vadd.f32 %v5031_v37, %v9617_v38 }
 0x3c7   : > { %v5298_v62 = vadd.f32 %v5232_v22, %v9756_v47  ;;  %v5516_v58 = vpop.f32.mrf.mxu3  ;;  %v5824_v22 = vrot.slane %v5822_v48, 1 }
 0x3c8   : > { %5070 = vmatmul.bf16.gmra.mxu1 %v4934_v29  ;;  %v7871_v29 = vld [vmem:[#allocation2 + $0x68] sm:$0xff] }
 0x3c9   : > { %v5582_v49 = vadd.f32 %v5516_v58, %v5298_v62  ;;  %v6034_v62 = vsel %vm752_vm2, %v6032_v56, %v10067_v30  ;;  %v5149_v58 = vsel %vm752_vm2, %v5146_v0, %v5148_v39 }
 0x3cb   : > { %5274 = vmatmul.bf16.gmra.mxu2 %v5147_v5  ;;  %5962 = vmatmul.bf16.gmra.mxu0 %v5817_v60  ;;  %v9833_v46 = vadd.f32 %v5920_v26, %v5582_v49  ;;  %v8047_v49 = vld [vmem:[#allocation2 + $0x78] sm:$0xff]  ;;  %v5150_v5 = vrot.slane %v9795_v14, 1  ;;  %v5838_v14 = vshll.u32 %v9459_v13, 16 }
 0x3cc   : > { %5558 = vmatmul.bf16.gmra.mxu3 %v7870_v43  ;;  %v5830_v26 = vshll.u32 %v8047_v49, 16  ;;  %v5834_v20 = vshrl.u32 %v8047_v49, 16 }
 0x3cd   : > { %v5033_v47 = vpop.f32.mrf.mxu1  ;;  %v5151_v60 = vsel %vm752_vm2, %v5148_v39, %v5150_v5  ;;  %v7873_v39 = vld [vmem:[#allocation2 + $0x78] sm:$0xff] }
 0x3ce   : > { %v9836_v38 = vadd.f32 %v5033_v47, %v9627_v54  ;;  %v5820_v54 = vor.u32 %v5818_v15, %v5816_v24  ;;  %v5832_v0 = vrot.slane %v5830_v26, 1  ;;  %v7872_v47 = vld [vmem:[#allocation2 + $0x70] sm:$0xff] }
 0x3d0   : > { %v5825_v52 = vsel %vm345_vm0, %v5820_v54, %v5824_v22  ;;  %v5836_v48 = vor.u32 %v5834_v20, %v5832_v0 }
 0x3d5   : > { %v5036_v59 = vpop.f32.mrf.mxu1 }
 0x3d6   : > { %v9840_v37 = vadd.f32 %v5036_v59, %v9638_v55  ;;  %v5826_v55 = vshrl.u32 %v8046_v2, 16  ;;  %v5152_v2 = vrot.slane %v9815_v35, 1 }
 0x3d8   : > { %6131 = vmatmul.bf16.vlgmr.msra.gmra.mxu1 %v6034_v62  ;;  %v5828_v24 = vor.u32 %v5826_v55, %v5824_v22  ;;  %v5153_v56 = vsel %vm752_vm2, %v5150_v5, %v5152_v2 }
 0x3da   : > { %v5833_v10 = vsel %vm345_vm0, %v5828_v24, %v5832_v0 }
 0x3db   : > { %5279 = vmatmul.bf16.gmra.mxu2 %v5149_v58  ;;  %5967 = vmatmul.bf16.gmra.mxu0 %v5825_v52 }
 0x3dc   : > { %5563 = vmatmul.bf16.gmra.mxu3 %v7871_v29 }
 0x3dd   : > { %v5038_v23 = vpop.f32.mrf.mxu1 }
 0x3de   : > { %v9848_v3 = vadd.f32 %v5038_v23, %v9648_v53  ;;  %v5519_v23 = vpop.f32.mrf.mxu3 }
 0x3e5   : > { %v5041_v51 = vpop.f32.mrf.mxu1 }
 0x3e6   : > { %v9852_v43 = vadd.f32 %v5041_v51, %v9656_v50  ;;  %v5521_v26 = vpop.f32.mrf.mxu3 }
 0x3e8   : > { %6136 = vmatmul.bf16.gmra.mxu1 %v9091_v45  ;;  %v5840_v45 = vrot.slane %v5838_v14, 1 }
 0x3ea   : > { %v5841_v15 = vsel %vm345_vm0, %v5836_v48, %v5840_v45  ;;  %vm6290_vm0 = vcmask 31744  }
 0x3eb   : > { %5284 = vmatmul.bf16.gmra.mxu2 %v5151_v60  ;;  %5972 = vmatmul.bf16.gmra.mxu0 %v5833_v10  ;;  %v10069_v10 = vld [vmem:[#allocation3_spill] sm:$0xff] }
 0x3ec   : > { %5568 = vmatmul.bf16.gmra.mxu3 %v7872_v47 }
 0x3ed   : > { %v5043_v53 = vpop.f32.mrf.mxu1 }
 0x3ee   : > { %v9858_v7 = vadd.f32 %v5043_v53, %v9669_v21  ;;  %v5524_v24 = vpop.f32.mrf.mxu3 }
 0x3f5   : > { %v5046_v50 = vpop.f32.mrf.mxu1 }
 0x3f6   : > { %v9863_v59 = vadd.f32 %v5046_v50, %v9677_v40 }
 0x3f8   : > { %6141 = vmatmul.bf16.gmra.mxu1 %v9128_v57 }
 0x3fb   : > { %5289 = vmatmul.bf16.gmra.mxu2 %v5153_v56  ;;  %5977 = vmatmul.bf16.gmra.mxu0 %v5841_v15 }
 0x3fc   : > { %5573 = vmatmul.bf16.gmra.mxu3 %v7873_v39 }
 0x3fd   : > { %v5048_v13 = vpop.f32.mrf.mxu1 }
 0x3fe   : > { %v9869_v21 = vadd.f32 %v5048_v13, %v9687_v33  ;;  %v10070_v13 = vld [vmem:[#allocation4_spill] sm:$0xff] }
 0x405   : > { %v5051_v35 = vpop.f32.mrf.mxu1 }
 0x406   : > { %v9872_v22 = vadd.f32 %v5051_v35, %v9695_v42 }
 0x408   : > { %6146 = vmatmul.bf16.gmra.mxu1 %v9166_v25 }
 0x40d   : > { %v5053_v40 = vpop.f32.mrf.mxu1 }
 0x40e   : > { %v9876_v57 = vadd.f32 %v5053_v40, %v9708_v12 }
 0x415   : > { %v5056_v30 = vpop.f32.mrf.mxu1 }
 0x416   : > { %v9879_v62 = vadd.f32 %v5056_v30, %v9716_v41 }
 0x418   : > { %6151 = vmatmul.bf16.gmra.mxu1 %v9211_v63  ;;  %v5235_v63 = vpop.f32.mrf.mxu2 }
 0x41d   : > { %v5058_v54 = vpop.f32.mrf.mxu1 }
 0x41e   : > { %v9883_v33 = vadd.f32 %v5058_v54, %v9727_v27 }
 0x420   : > { %v5237_v55 = vpop.f32.mrf.mxu2 }
 0x425   : > { %v5061_v58 = vpop.f32.mrf.mxu1 }
 0x426   : > { %v9886_v42 = vadd.f32 %v5061_v58, %v9739_v17  ;;  %v5923_v17 = vpop.f32.mrf.mxu0 }
 0x428   : > { %6156 = vmatmul.bf16.gmra.mxu1 %v9246_v6  ;;  %v5240_v5 = vpop.f32.mrf.mxu2 }
 0x42d   : > { %v5063_v25 = vpop.f32.mrf.mxu1 }
 0x42e   : > { %v9890_v12 = vadd.f32 %v5063_v25, %v9750_v61  ;;  %v10068_v61 = vld [vmem:[#allocation5_spill] sm:$0xff]  ;;  %v5925_v51 = vpop.f32.mrf.mxu0 }
 0x430   : > { %v5242_v53 = vpop.f32.mrf.mxu2 }
 0x435   : > { %v5066_v29 = vpop.f32.mrf.mxu1 }
 0x436   : > { %v9893_v41 = vadd.f32 %v5066_v29, %v9759_v19 }
 0x438   : > { %6161 = vmatmul.bf16.gmra.mxu1 %v9286_v31  ;;  %v5245_v48 = vpop.f32.mrf.mxu2 }
 0x43d   : > { %v5068_v52 = vpop.f32.mrf.mxu1 }
 0x43e   : > { %v9897_v27 = vadd.f32 %v5068_v52, %v9770_v28  ;;  %v9909_v28 = vld [vmem:[%s10042_s4] ss:$0 sm:$0xff] }
 0x440   : > { %v5247_v30 = vpop.f32.mrf.mxu2 }
 0x445   : > { %v5071_v49 = vpop.f32.mrf.mxu1 }
 0x446   : > { %v9900_v6 = vadd.f32 %v5071_v49, %v9782_v11  ;;  %v5928_v11 = vpop.f32.mrf.mxu0  ;;  %v5300_v49 = vadd.f32 %v5237_v55, %v9776_v1 }
 0x448   : > { %6166 = vmatmul.bf16.gmra.mxu1 %v10068_v61 }
 0x44d   : > { %v5073_v19 = vpop.f32.mrf.mxu1 }
 0x44e   : > { %v9904_v31 = vadd.f32 %v5073_v19, %v9793_v8  ;;  %v5930_v2 = vpop.f32.mrf.mxu0 }
 0x455   : > { %v6132_v0 = vpop.f32.mrf.mxu1 }
 0x456   : > { %v6202_v60 = vadd.f32 %v6132_v0, %v9802_v44  ;;  %v5526_v44 = vpop.f32.mrf.mxu3  ;;  %v5933_v40 = vpop.f32.mrf.mxu0 }
 0x458   : > { %v6234_v47 = vadd.f32 %v9909_v28, %v6202_v60  ;;  %6171 = vmatmul.bf16.gmra.mxu1 %v10069_v10  ;;  %v10071_v10 = vld [vmem:[#allocation6_spill] sm:$0xff] }
 0x45a   : > { %7978 = vtanh.f32 %v6234_v47  ;;  %v5584_v47 = vadd.f32 %v5521_v26, %v5300_v49 }
 0x45d   : > { %v6134_v8 = vpop.f32.mrf.mxu1 }
 0x45e   : > { %v6203_v14 = vadd.f32 %v6134_v8, %v9813_v16  ;;  %v5529_v35 = vpop.f32.mrf.mxu3  ;;  %v5299_v16 = vadd.f32 %v5235_v63, %v9765_v18  ;;  %v5935_v0 = vpop.f32.mrf.mxu0  ;;  %v5988_v8 = vadd.f32 %v5925_v51, %v5584_v47 }
 0x45f   : > { %v5250_v63 = vpop.f32.mrf.mxu2 }
 0x460   : > { %v7979_v20 = vpop.eup %7978  ;;  %v6235_v50 = vadd.f32 %v9909_v28, %v6203_v14  ;;  %v5583_v29 = vadd.f32 %v5519_v23, %v5299_v16  ;;  %v5301_v23 = vadd.f32 %v5240_v5, %v9788_v34 }
 0x461   : > { %6291 = vst.msk [vmem:[%s9918_s24] sm:$0xff] %vm6290_vm0, %v7979_v20 }
 0x462   : > { %7980 = vtanh.f32 %v6235_v50  ;;  %v5987_v61 = vadd.f32 %v5923_v17, %v5583_v29  ;;  %v5585_v20 = vadd.f32 %v5524_v24, %v5301_v23  ;;  %v5303_v29 = vadd.f32 %v5245_v48, %v9808_v32 }
 0x465   : > { %v6137_v45 = vpop.f32.mrf.mxu1 }
 0x466   : > { %v6204_v56 = vadd.f32 %v6137_v45, %v9823_v36  ;;  %v5531_v52 = vpop.f32.mrf.mxu3  ;;  %v5938_v50 = vpop.f32.mrf.mxu0 }
 0x467   : > { %v5252_v26 = vpop.f32.mrf.mxu2 }
 0x468   : > { %v7981_v39 = vpop.eup %7980  ;;  %v6236_v15 = vadd.f32 %v9909_v28, %v6204_v56  ;;  %6176 = vmatmul.bf16.gmra.mxu1 %v10070_v13  ;;  %v10072_v56 = vld [vmem:[#allocation10_spill] sm:$0xff] }
 0x469   : > { %6292 = vst.msk [vmem:[%s9918_s24 + $0x8] sm:$0xff] %vm6290_vm0, %v7981_v39  ;;  %v5302_v39 = vadd.f32 %v5242_v53, %v10072_v56  ;;  %v5306_v56 = vadd.f32 %v5252_v26, %v9836_v38 }
 0x46a   : > { %7982 = vtanh.f32 %v6236_v15  ;;  %v5989_v15 = vadd.f32 %v5928_v11, %v5585_v20 }
 0x46b   : > { %v5586_v5 = vadd.f32 %v5526_v44, %v5302_v39 }
 0x46d   : > { %v6139_v54 = vpop.f32.mrf.mxu1 }
 0x46e   : > { %v6205_v58 = vadd.f32 %v6139_v54, %v9833_v46  ;;  %v5534_v14 = vpop.f32.mrf.mxu3  ;;  %v5940_v24 = vpop.f32.mrf.mxu0 }
 0x470   : > { %v7983_v25 = vpop.eup %7982  ;;  %v6237_v36 = vadd.f32 %v9909_v28, %v6205_v58  ;;  %v10073_v58 = vld [vmem:[#allocation7_spill] sm:$0xff] }
 0x471   : > { %6293 = vst.msk [vmem:[%s9918_s24 + $0x10] sm:$0xff] %vm6290_vm0, %v7983_v25  ;;  %v5255_v25 = vpop.f32.mrf.mxu2 }
 0x472   : > { %7984 = vtanh.f32 %v6237_v36  ;;  %v5990_v36 = vadd.f32 %v5930_v2, %v5586_v5  ;;  %v10075_v5 = vld [vmem:[#allocation9_spill] sm:$0xff] }
 0x475   : > { %v6142_v19 = vpop.f32.mrf.mxu1 }
 0x476   : > { %v6206_v18 = vadd.f32 %v6142_v19, %v5987_v61  ;;  %v5536_v34 = vpop.f32.mrf.mxu3  ;;  %v5587_v61 = vadd.f32 %v5529_v35, %v5303_v29 }
 0x478   : > { %v7985_v60 = vpop.eup %7984  ;;  %v6238_v46 = vadd.f32 %v9909_v28, %v6206_v18  ;;  %6181 = vmatmul.bf16.gmra.mxu1 %v10071_v10  ;;  %v5304_v18 = vadd.f32 %v5247_v30, %v9819_v9  ;;  %v5991_v47 = vadd.f32 %v5933_v40, %v5587_v61 }
 0x479   : > { %6294 = vst.msk [vmem:[%s9918_s24 + $0x18] sm:$0xff] %vm6290_vm0, %v7985_v60  ;;  %v5943_v60 = vpop.f32.mrf.mxu0 }
 0x47a   : > { %7986 = vtanh.f32 %v6238_v46  ;;  %v5257_v46 = vpop.f32.mrf.mxu2  ;;  %v5588_v2 = vadd.f32 %v5531_v52, %v5304_v18 }
 0x47d   : > { %v6144_v1 = vpop.f32.mrf.mxu1 }
 0x47e   : > { %v6207_v17 = vadd.f32 %v6144_v1, %v5988_v8  ;;  %v5539_v44 = vpop.f32.mrf.mxu3  ;;  %v10074_v8 = vld [vmem:[#allocation8_spill] sm:$0xff]  ;;  %v5305_v1 = vadd.f32 %v5250_v63, %v9828_v4 }
 0x480   : > { %v7987_v55 = vpop.eup %7986  ;;  %v6239_v45 = vadd.f32 %v9909_v28, %v6207_v17  ;;  %v5992_v17 = vadd.f32 %v5935_v0, %v5588_v2  ;;  %v5590_v0 = vadd.f32 %v5536_v34, %v5306_v56 }
 0x481   : > { %6295 = vst.msk [vmem:[%s9918_s24 + $0x20] sm:$0xff] %vm6290_vm0, %v7987_v55  ;;  %v5945_v30 = vpop.f32.mrf.mxu0 }
 0x482   : > { %7988 = vtanh.f32 %v6239_v45  ;;  %v5260_v55 = vpop.f32.mrf.mxu2  ;;  %v5589_v45 = vadd.f32 %v5534_v14, %v5305_v1 }
 0x484   : > { %v5993_v39 = vadd.f32 %v5938_v50, %v5589_v45 }
 0x485   : > { %v6147_v13 = vpop.f32.mrf.mxu1 }
 0x486   : > { %v6208_v16 = vadd.f32 %v6147_v13, %v5989_v15  ;;  %v5541_v35 = vpop.f32.mrf.mxu3 }
 0x488   : > { %v7989_v51 = vpop.eup %7988  ;;  %v6240_v54 = vadd.f32 %v9909_v28, %v6208_v16  ;;  %6186 = vmatmul.bf16.gmra.mxu1 %v10073_v58  ;;  %v5994_v58 = vadd.f32 %v5940_v24, %v5590_v0 }
 0x489   : > { %6296 = vst.msk [vmem:[%s9918_s24 + $0x28] sm:$0xff] %vm6290_vm0, %v7989_v51  ;;  %v5948_v63 = vpop.f32.mrf.mxu0 }
 0x48a   : > { %7990 = vtanh.f32 %v6240_v54  ;;  %v5262_v14 = vpop.f32.mrf.mxu2  ;;  %v5307_v54 = vadd.f32 %v5255_v25, %v9840_v37 }
 0x48d   : > { %v6149_v53 = vpop.f32.mrf.mxu1 }
 0x48e   : > { %v6209_v11 = vadd.f32 %v6149_v53, %v5990_v36  ;;  %v5544_v15 = vpop.f32.mrf.mxu3  ;;  %v5591_v36 = vadd.f32 %v5539_v44, %v5307_v54  ;;  %v5309_v44 = vadd.f32 %v5260_v55, %v9852_v43 }
 0x490   : > { %v7991_v49 = vpop.eup %7990  ;;  %v6241_v19 = vadd.f32 %v9909_v28, %v6209_v11  ;;  %v5995_v61 = vadd.f32 %v5943_v60, %v5591_v36  ;;  %v5593_v60 = vadd.f32 %v5544_v15, %v5309_v44 }
 0x491   : > { %6297 = vst.msk [vmem:[%s9918_s24 + $0x30] sm:$0xff] %vm6290_vm0, %v7991_v49  ;;  %v5950_v53 = vpop.f32.mrf.mxu0  ;;  %v5308_v49 = vadd.f32 %v5257_v46, %v9848_v3 }
 0x492   : > { %7992 = vtanh.f32 %v6241_v19  ;;  %v5265_v11 = vpop.f32.mrf.mxu2  ;;  %v5997_v1 = vadd.f32 %v5948_v63, %v5593_v60 }
 0x493   : > { %v5592_v24 = vadd.f32 %v5541_v35, %v5308_v49  ;;  %v5310_v35 = vadd.f32 %v5262_v14, %v9858_v7  ;;  %v5311_v45 = vadd.f32 %v5265_v11, %v9863_v59 }
 0x495   : > { %v6152_v10 = vpop.f32.mrf.mxu1 }
 0x496   : > { %v6210_v23 = vadd.f32 %v6152_v10, %v5991_v47  ;;  %v5546_v26 = vpop.f32.mrf.mxu3 }
 0x497   : > { %v5594_v55 = vadd.f32 %v5546_v26, %v5310_v35 }
 0x498   : > { %v7993_v32 = vpop.eup %7992  ;;  %v6242_v48 = vadd.f32 %v9909_v28, %v6210_v23  ;;  %6191 = vmatmul.bf16.gmra.mxu1 %v10074_v8  ;;  %v5996_v23 = vadd.f32 %v5945_v30, %v5592_v24 }
 0x499   : > { %6298 = vst.msk [vmem:[%s9918_s24 + $0x38] sm:$0xff] %vm6290_vm0, %v7993_v32  ;;  %v5953_v10 = vpop.f32.mrf.mxu0 }
 0x49a   : > { %7994 = vtanh.f32 %v6242_v48  ;;  %v5267_v32 = vpop.f32.mrf.mxu2 }
 0x49b   : > { %v5312_v63 = vadd.f32 %v5267_v32, %v9869_v21 }
 0x49d   : > { %v6154_v9 = vpop.f32.mrf.mxu1 }
 0x49e   : > { %v6211_v40 = vadd.f32 %v6154_v9, %v5992_v17  ;;  %v5549_v47 = vpop.f32.mrf.mxu3 }
 0x4a0   : > { %v7995_v20 = vpop.eup %7994  ;;  %v6243_v52 = vadd.f32 %v9909_v28, %v6211_v40 }
 0x4a1   : > { %6299 = vst.msk [vmem:[%s9918_s24 + $0x40] sm:$0xff] %vm6290_vm0, %v7995_v20  ;;  %v5955_v9 = vpop.f32.mrf.mxu0 }
 0x4a2   : > { %7996 = vtanh.f32 %v6243_v52  ;;  %v5270_v40 = vpop.f32.mrf.mxu2  ;;  %v5998_v52 = vadd.f32 %v5950_v53, %v5594_v55 }
 0x4a5   : > { %v6157_v13 = vpop.f32.mrf.mxu1 }
 0x4a6   : > { %v6212_v16 = vadd.f32 %v6157_v13, %v5993_v39  ;;  %v5551_v8 = vpop.f32.mrf.mxu3  ;;  %v5595_v13 = vadd.f32 %v5549_v47, %v5311_v45 }
 0x4a8   : > { %v7997_v4 = vpop.eup %7996  ;;  %v6244_v51 = vadd.f32 %v9909_v28, %v6212_v16  ;;  %6196 = vmatmul.bf16.gmra.mxu1 %v10075_v5 }
 0x4a9   : > { %6300 = vst.msk [vmem:[%s9918_s24 + $0x48] sm:$0xff] %vm6290_vm0, %v7997_v4  ;;  %v5958_v16 = vpop.f32.mrf.mxu0 }
 0x4aa   : > { %7998 = vtanh.f32 %v6244_v51  ;;  %v5272_v0 = vpop.f32.mrf.mxu2  ;;  %v5999_v51 = vadd.f32 %v5953_v10, %v5595_v13 }
 0x4ad   : > { %v6159_v38 = vpop.f32.mrf.mxu1 }
 0x4ae   : > { %v6213_v50 = vadd.f32 %v6159_v38, %v5994_v58  ;;  %v5554_v56 = vpop.f32.mrf.mxu3  ;;  %v5596_v58 = vadd.f32 %v5551_v8, %v5312_v63 }
 0x4b0   : > { %v7999_v29 = vpop.eup %7998  ;;  %v6245_v34 = vadd.f32 %v9909_v28, %v6213_v50  ;;  %v6000_v36 = vadd.f32 %v5955_v9, %v5596_v58 }
 0x4b1   : > { %6301 = vst.msk [vmem:[%s9918_s24 + $0x50] sm:$0xff] %vm6290_vm0, %v7999_v29  ;;  %v5960_v50 = vpop.f32.mrf.mxu0  ;;  %v5313_v29 = vadd.f32 %v5270_v40, %v9872_v22 }
 0x4b2   : > { %8000 = vtanh.f32 %v6245_v34  ;;  %v5275_v26 = vpop.f32.mrf.mxu2 }
 0x4b3   : > { %v5597_v11 = vadd.f32 %v5554_v56, %v5313_v29  ;;  %v5315_v32 = vadd.f32 %v5275_v26, %v9879_v62 }
 0x4b5   : > { %v6162_v19 = vpop.f32.mrf.mxu1 }
 0x4b6   : > { %v6214_v18 = vadd.f32 %v6162_v19, %v5995_v61  ;;  %v5556_v59 = vpop.f32.mrf.mxu3  ;;  %v5314_v19 = vadd.f32 %v5272_v0, %v9876_v57 }
 0x4b8   : > { %v8001_v37 = vpop.eup %8000  ;;  %v6246_v25 = vadd.f32 %v9909_v28, %v6214_v18  ;;  %v5598_v44 = vadd.f32 %v5556_v59, %v5314_v19 }
 0x4b9   : > { %6302 = vst.msk [vmem:[%s9918_s24 + $0x58] sm:$0xff] %vm6290_vm0, %v8001_v37  ;;  %v5963_v18 = vpop.f32.mrf.mxu0  ;;  %v6001_v37 = vadd.f32 %v5958_v16, %v5597_v11 }
 0x4ba   : > { %8002 = vtanh.f32 %v6246_v25  ;;  %v5277_v24 = vpop.f32.mrf.mxu2 }
 0x4bd   : > { %v6164_v2 = vpop.f32.mrf.mxu1 }
 0x4be   : > { %v6215_v48 = vadd.f32 %v6164_v2, %v5996_v23  ;;  %v5559_v61 = vpop.f32.mrf.mxu3  ;;  %v6002_v2 = vadd.f32 %v5960_v50, %v5598_v44 }
 0x4bf   : > { %v5599_v8 = vadd.f32 %v5559_v61, %v5315_v32 }
 0x4c0   : > { %v8003_v3 = vpop.eup %8002  ;;  %v6247_v46 = vadd.f32 %v9909_v28, %v6215_v48 }
 0x4c1   : > { %6303 = vst.msk [vmem:[%s9918_s24 + $0x60] sm:$0xff] %vm6290_vm0, %v8003_v3  ;;  %v5965_v3 = vpop.f32.mrf.mxu0 }
 0x4c2   : > { %8004 = vtanh.f32 %v6247_v46  ;;  %v5280_v60 = vpop.f32.mrf.mxu2 }
 0x4c5   : > { %v6167_v17 = vpop.f32.mrf.mxu1 }
 0x4c6   : > { %v6216_v43 = vadd.f32 %v6167_v17, %v5997_v1  ;;  %v5561_v23 = vpop.f32.mrf.mxu3  ;;  %v5316_v1 = vadd.f32 %v5277_v24, %v9883_v33  ;;  %v6003_v17 = vadd.f32 %v5963_v18, %v5599_v8 }
 0x4c8   : > { %v8005_v30 = vpop.eup %8004  ;;  %v6248_v20 = vadd.f32 %v9909_v28, %v6216_v43 }
 0x4c9   : > { %6304 = vst.msk [vmem:[%s9918_s24 + $0x68] sm:$0xff] %vm6290_vm0, %v8005_v30  ;;  %v5600_v30 = vadd.f32 %v5561_v23, %v5316_v1  ;;  %v5968_v55 = vpop.f32.mrf.mxu0 }
 0x4ca   : > { %8006 = vtanh.f32 %v6248_v20  ;;  %v5282_v45 = vpop.f32.mrf.mxu2 }
 0x4cb   : > { %v6004_v56 = vadd.f32 %v5965_v3, %v5600_v30  ;;  %v5318_v63 = vadd.f32 %v5282_v45, %v9890_v12 }
 0x4cd   : > { %v6169_v39 = vpop.f32.mrf.mxu1 }
 0x4ce   : > { %v6217_v15 = vadd.f32 %v6169_v39, %v5998_v52  ;;  %v5564_v9 = vpop.f32.mrf.mxu3  ;;  %v5317_v52 = vadd.f32 %v5280_v60, %v9886_v42 }
 0x4d0   : > { %v8007_v7 = vpop.eup %8006  ;;  %v6249_v4 = vadd.f32 %v9909_v28, %v6217_v15  ;;  %v5601_v13 = vadd.f32 %v5564_v9, %v5317_v52 }
 0x4d1   : > { %6305 = vst.msk [vmem:[%s9918_s24 + $0x70] sm:$0xff] %vm6290_vm0, %v8007_v7 }
 0x4d2   : > { %8008 = vtanh.f32 %v6249_v4  ;;  %v5970_v4 = vpop.f32.mrf.mxu0  ;;  %v5285_v0 = vpop.f32.mrf.mxu2 }
 0x4d3   : > { %v5319_v50 = vadd.f32 %v5285_v0, %v9893_v41 }
 0x4d5   : > { %v6172_v5 = vpop.f32.mrf.mxu1 }
 0x4d6   : > { %v6218_v14 = vadd.f32 %v6172_v5, %v5999_v51  ;;  %v5566_v33 = vpop.f32.mrf.mxu3  ;;  %v6005_v51 = vadd.f32 %v5968_v55, %v5601_v13 }
 0x4d7   : > { %v5602_v59 = vadd.f32 %v5566_v33, %v5318_v63 }
 0x4d8   : > { %v8009_v54 = vpop.eup %8008  ;;  %v6250_v38 = vadd.f32 %v9909_v28, %v6218_v14 }
 0x4d9   : > { %6306 = vst.msk [vmem:[%s9918_s24 + $0x78] sm:$0xff] %vm6290_vm0, %v8009_v54  ;;  %v6006_v26 = vadd.f32 %v5970_v4, %v5602_v59 }
 0x4da   : > { %8010 = vtanh.f32 %v6250_v38  ;;  %v5973_v38 = vpop.f32.mrf.mxu0  ;;  %v5287_v29 = vpop.f32.mrf.mxu2 }
 0x4dd   : > { %v6174_v34 = vpop.f32.mrf.mxu1 }
 0x4de   : > { %v6219_v53 = vadd.f32 %v6174_v34, %v6000_v36  ;;  %v5569_v58 = vpop.f32.mrf.mxu3 }
 0x4e0   : > { %v8011_v21 = vpop.eup %8010  ;;  %v6251_v49 = vadd.f32 %v9909_v28, %v6219_v53  ;;  %v5603_v53 = vadd.f32 %v5569_v58, %v5319_v50 }
 0x4e1   : > { %6307 = vst.msk [vmem:[%s9918_s24 + $0x80] sm:$0xff] %vm6290_vm0, %v8011_v21 }
 0x4e2   : > { %8012 = vtanh.f32 %v6251_v49  ;;  %v5320_v49 = vadd.f32 %v5287_v29, %v9897_v27  ;;  %v6007_v61 = vadd.f32 %v5973_v38, %v5603_v53  ;;  %v5290_v41 = vpop.f32.mrf.mxu2 }
 0x4e5   : > { %v6177_v25 = vpop.f32.mrf.mxu1 }
 0x4e6   : > { %v6220_v47 = vadd.f32 %v6177_v25, %v6001_v37  ;;  %v5571_v11 = vpop.f32.mrf.mxu3  ;;  %v5975_v37 = vpop.f32.mrf.mxu0 }
 0x4e7   : > { %v5604_v25 = vadd.f32 %v5571_v11, %v5320_v49 }
 0x4e8   : > { %v8013_v22 = vpop.eup %8012  ;;  %v6252_v10 = vadd.f32 %v9909_v28, %v6220_v47 }
 0x4e9   : > { %6308 = vst.msk [vmem:[%s9918_s24 + $0x88] sm:$0xff] %vm6290_vm0, %v8013_v22  ;;  %v5321_v22 = vadd.f32 %v5290_v41, %v9900_v6  ;;  %v6008_v44 = vadd.f32 %v5975_v37, %v5604_v25 }
 0x4ea   : > { %8014 = vtanh.f32 %v6252_v10 }
 0x4ed   : > { %v6179_v48 = vpop.f32.mrf.mxu1 }
 0x4ee   : > { %v6221_v57 = vadd.f32 %v6179_v48, %v6002_v2  ;;  %v5574_v10 = vpop.f32.mrf.mxu3  ;;  %v5978_v3 = vpop.f32.mrf.mxu0 }
 0x4ef   : > { %v5605_v2 = vadd.f32 %v5574_v10, %v5321_v22 }
 0x4f0   : > { %v8015_v46 = vpop.eup %8014  ;;  %v6253_v35 = vadd.f32 %v9909_v28, %v6221_v57  ;;  %v5292_v57 = vpop.f32.mrf.mxu2 }
 0x4f1   : > { %6309 = vst.msk [vmem:[%s9918_s24 + $0x90] sm:$0xff] %vm6290_vm0, %v8015_v46  ;;  %v5322_v60 = vadd.f32 %v5292_v57, %v9904_v31  ;;  %v6009_v46 = vadd.f32 %v5978_v3, %v5605_v2 }
 0x4f2   : > { %8016 = vtanh.f32 %v6253_v35 }
 0x4f5   : > { %v6182_v43 = vpop.f32.mrf.mxu1 }
 0x4f6   : > { %v6222_v40 = vadd.f32 %v6182_v43, %v6003_v17  ;;  %v5576_v35 = vpop.f32.mrf.mxu3  ;;  %v5980_v43 = vpop.f32.mrf.mxu0 }
 0x4f7   : > { %v5606_v17 = vadd.f32 %v5576_v35, %v5322_v60 }
 0x4f8   : > { %v8017_v62 = vpop.eup %8016  ;;  %v6254_v20 = vadd.f32 %v9909_v28, %v6222_v40 }
 0x4f9   : > { %6310 = vst.msk [vmem:[%s9918_s24 + $0x98] sm:$0xff] %vm6290_vm0, %v8017_v62  ;;  %v6010_v40 = vadd.f32 %v5980_v43, %v5606_v17 }
 0x4fa   : > { %8018 = vtanh.f32 %v6254_v20 }
 0x4fd   : > { %v6184_v39 = vpop.f32.mrf.mxu1 }
 0x4fe   : > { %v6223_v15 = vadd.f32 %v6184_v39, %v6004_v56 }
 0x500   : > { %v8019_v7 = vpop.eup %8018  ;;  %v6255_v16 = vadd.f32 %v9909_v28, %v6223_v15 }
 0x501   : > { %6311 = vst.msk [vmem:[%s9918_s24 + $0xa0] sm:$0xff] %vm6290_vm0, %v8019_v7 }
 0x502   : > { %8020 = vtanh.f32 %v6255_v16 }
 0x505   : > { %v6187_v5 = vpop.f32.mrf.mxu1 }
 0x506   : > { %v6224_v14 = vadd.f32 %v6187_v5, %v6005_v51 }
 0x508   : > { %v8021_v42 = vpop.eup %8020  ;;  %v6256_v54 = vadd.f32 %v9909_v28, %v6224_v14 }
 0x509   : > { %6312 = vst.msk [vmem:[%s9918_s24 + $0xa8] sm:$0xff] %vm6290_vm0, %v8021_v42 }
 0x50a   : > { %8022 = vtanh.f32 %v6256_v54 }
 0x50d   : > { %v6189_v36 = vpop.f32.mrf.mxu1 }
 0x50e   : > { %v6225_v34 = vadd.f32 %v6189_v36, %v6006_v26 }
 0x510   : > { %v8023_v12 = vpop.eup %8022  ;;  %v6257_v21 = vadd.f32 %v9909_v28, %v6225_v34 }
 0x511   : > { %6313 = vst.msk [vmem:[%s9918_s24 + $0xb0] sm:$0xff] %vm6290_vm0, %v8023_v12 }
 0x512   : > { %8024 = vtanh.f32 %v6257_v21 }
 0x515   : > { %v6192_v19 = vpop.f32.mrf.mxu1 }
 0x516   : > { %v6226_v18 = vadd.f32 %v6192_v19, %v6007_v61 }
 0x518   : > { %v8025_v24 = vpop.eup %8024  ;;  %v6258_v47 = vadd.f32 %v9909_v28, %v6226_v18 }
 0x519   : > { %6314 = vst.msk [vmem:[%s9918_s24 + $0xb8] sm:$0xff] %vm6290_vm0, %v8025_v24 }
 0x51a   : > { %8026 = vtanh.f32 %v6258_v47 }
 0x51d   : > { %v6194_v23 = vpop.f32.mrf.mxu1 }
 0x51e   : > { %v6227_v32 = vadd.f32 %v6194_v23, %v6008_v44 }
 0x520   : > { %v8027_v27 = vpop.eup %8026  ;;  %v6259_v48 = vadd.f32 %v9909_v28, %v6227_v32 }
 0x521   : > { %6315 = vst.msk [vmem:[%s9918_s24 + $0xc0] sm:$0xff] %vm6290_vm0, %v8027_v27 }
 0x522   : > { %8028 = vtanh.f32 %v6259_v48 }
 0x525   : > { %v6197_v8 = vpop.f32.mrf.mxu1 }
 0x526   : > { %v6228_v6 = vadd.f32 %v6197_v8, %v6009_v46 }
 0x528   : > { %v8029_v1 = vpop.eup %8028  ;;  %v6260_v9 = vadd.f32 %v9909_v28, %v6228_v6 }
 0x529   : > { %6316 = vst.msk [vmem:[%s9918_s24 + $0xc8] sm:$0xff] %vm6290_vm0, %v8029_v1 }
 0x52a   : > { %8030 = vtanh.f32 %v6260_v9 }
 0x52d   : > { %v6199_v62 = vpop.f32.mrf.mxu1 }
 0x52e   : > { %v6229_v30 = vadd.f32 %v6199_v62, %v6010_v40 }
 0x530   : > { %v8031_v55 = vpop.eup %8030  ;;  %v6261_v31 = vadd.f32 %v9909_v28, %v6229_v30 }
 0x531   : > { %6317 = vst.msk [vmem:[%s9918_s24 + $0xd0] sm:$0xff] %vm6290_vm0, %v8031_v55 }
 0x532   : > { %8032 = vtanh.f32 %v6261_v31 }
 0x538   : > { %v8033_v20 = vpop.eup %8032 }
 0x539   : > { %6318 = vst.msk [vmem:[%s9918_s24 + $0xd8] sm:$0xff] %vm6290_vm0, %v8033_v20 }
 0x53a PF: > { %s15_s18 = sadd.s32 1, %s8054_s18  }
 0x53b   : > { %p12_p4 = scmp.ge.s32.totalorder %s15_s18, 4  }
 0x53d   :  { %14 = sbr.rel (!%p12_p4) target bundleno = 1 (0x1), region = 86 }

</bundles_post_ra>
